<compile_context>
chip_gen: v7x
topology: tpu7x:2x2x1
jax: 0.10.0
libtpu: 0.0.40
codegen_flags: <defaults>
</compile_context>

<pallas_src>
import functools
import numpy as np
import jax
import jax.numpy as jnp
from jax.experimental import pallas as pl
from jax.experimental.pallas import tpu as pltpu

# -------------------- synthetic config (stands in for cfg.*) --------------------
POOLING_SIZE = 2                  # cfg.POOLING_SIZE
FEAT_STRIDE = 16                  # spatial_scale = 1/16
DOUT_BASE = 128                   # dout_base_model (>=128 so stores are lane-dense)
RPN_HIDDEN = 128                  # RPN conv hidden width (lane-dense / fills MXU)
ANCHOR_RATIOS = (0.5, 1.0, 2.0)
ANCHOR_SCALES = (8,)
NUM_ANCHORS = len(ANCHOR_RATIOS) * len(ANCHOR_SCALES)   # A = 3
POST_TOP_N = 8                    # proposals kept per image
CLASSES = ("__background__", "c1", "c2", "c3")          # n_classes (unused in eval fwd)

HEAD_PAD = 128                    # fused cls+box head output, padded to a full lane width
VMEM_LIMIT = 32 * 1024 * 1024     # explicit scoped-VMEM budget (safe on v5e/v6e/v7x)
BBOX_XFORM_CLIP = float(np.log(1000.0 / 16.0))   # standard Faster R-CNN dw/dh clamp


# ============================== Pallas kernels ==============================

def _matmul_bias_relu_kernel(x_ref, w_ref, b_ref, o_ref):
    # backbone "conv" as patchified matmul + bias + ReLU (bf16 in, f32 accumulate)
    y = jnp.dot(x_ref[...], w_ref[...], preferred_element_type=jnp.float32) + b_ref[...]
    o_ref[...] = jnp.maximum(y, 0.0)


def _rpn_fused_kernel(x_ref, col_ref, wr_ref, br_ref, wh_ref, bh_ref, out_ref,
                      *, hf, wf, c, hidden):
    # 3x3 "same" conv + ReLU, then fused (cls|box) 1x1 head — all from ONE copy of
    # base_feat per image.  The 3x3 conv is 9 statically-shifted masked matmuls:
    #   out[p] += mask(p, oy, ox) * x[p + oy*wf + ox] @ W[oy, ox]
    # Shifts are built from static slices + zero concat (no reshape / roll needed).
    m = hf * wf
    x2d = x_ref[0]                                    # (M, C) bf16
    col = col_ref[...]                                # (M, 1) int32  (column of each position)
    k = jax.lax.broadcasted_iota(jnp.int32, (m, 1), 0)
    acc = jnp.zeros((m, hidden), jnp.float32)
    for oy in (-1, 0, 1):
        for ox in (-1, 0, 1):
            idx = (oy + 1) * 3 + (ox + 1)
            s = oy * wf + ox                          # static flat shift
            if s > 0:
                shifted = jnp.concatenate(
                    [x2d[s:, :], jnp.zeros((s, c), x2d.dtype)], axis=0)
            elif s < 0:
                shifted = jnp.concatenate(
                    [jnp.zeros((-s, c), x2d.dtype), x2d[: m + s, :]], axis=0)
            else:
                shifted = x2d
            valid = ((k + oy * wf >= 0) & (k + oy * wf < m)
                     & (col + ox >= 0) & (col + ox < wf))
            contrib = jnp.where(valid, shifted, jnp.zeros_like(shifted))
            acc += jnp.dot(contrib, wr_ref[idx * c:(idx + 1) * c, :],
                           preferred_element_type=jnp.float32)
    h = jnp.maximum(acc + br_ref[...], 0.0).astype(wh_ref.dtype)
    # single fused head matmul, lane-padded to 128 -> one unmasked lane-dense store
    out_ref[0] = jnp.dot(h, wh_ref[...], preferred_element_type=jnp.float32) + bh_ref[...]


def _proposal_kernel(anchors_ref, deltas_ref, cls_ref, im_ref, boxes_ref, scores_ref):
    # Coordinate-major layout: KA rides the lane axis -> lane-dense VPU work & stores.
    b = pl.program_id(0)
    anc = anchors_ref[...]                            # (4, KA)
    dlt = deltas_ref[0]                               # (4, KA)

    ax1, ay1, ax2, ay2 = anc[0:1], anc[1:2], anc[2:3], anc[3:4]
    wa = ax2 - ax1 + 1.0
    ha = ay2 - ay1 + 1.0
    cxa = ax1 + 0.5 * wa
    cya = ay1 + 0.5 * ha

    dx, dy = dlt[0:1], dlt[1:2]
    dw = jnp.minimum(dlt[2:3], BBOX_XFORM_CLIP)       # clamp like the reference impl
    dh = jnp.minimum(dlt[3:4], BBOX_XFORM_CLIP)

    cx = dx * wa + cxa
    cy = dy * ha + cya
    w = jnp.exp(dw) * wa
    h = jnp.exp(dh) * ha

    x1 = cx - 0.5 * w
    y1 = cy - 0.5 * h
    x2 = cx + 0.5 * w
    y2 = cy + 0.5 * h

    h_img = im_ref[b, 0]
    w_img = im_ref[b, 1]
    x1 = jnp.clip(x1, 0.0, w_img - 1.0)
    x2 = jnp.clip(x2, 0.0, w_img - 1.0)
    y1 = jnp.clip(y1, 0.0, h_img - 1.0)
    y2 = jnp.clip(y2, 0.0, h_img - 1.0)

    boxes_ref[0] = jnp.concatenate([x1, y1, x2, y2], axis=0)    # (4, KA)

    bg = cls_ref[0, 0:1, :]
    fg = cls_ref[0, 1:2, :]
    # fg softmax prob = 1 / (1 + exp(bg - fg)); reciprocal goes to the EUP slot
    scores_ref[0] = pl.reciprocal(1.0 + jnp.exp(bg - fg), approx=True)


def _roi_pool_kernel(hs_ref, he_ref, ws_ref, we_ref, feat_ref, out_ref,
                     *, hf, wf, c, n_rois, pool, mbh):
    # Per-image grid step: one feature-map DMA, loop over this image's ROIs.
    # Per bin: bounded-height band feat[hs_clamped : hs_clamped+mbh] (dynamic slice on a
    # major axis) + in-band masking; the w axis is kept full-width and masked for
    # lowering robustness (could also be bounded-sliced on the sublane axis).
    b = pl.program_id(0)
    row_in_win = jax.lax.broadcasted_iota(jnp.int32, (mbh, wf, 1), 0)
    col_ids = jax.lax.broadcasted_iota(jnp.int32, (mbh, wf, 1), 1)

    def body(n, carry):
        bins = []
        for ph in range(pool):
            hs = hs_ref[b, n * pool + ph]
            he = he_ref[b, n * pool + ph]
            hs_c = jnp.minimum(hs, hf - mbh)                      # clamp window start
            band = feat_ref[0, pl.ds(hs_c, mbh), :, :]            # (mbh, wf, C)
            rows = row_in_win + hs_c
            for pw in range(pool):
                ws = ws_ref[b, n * pool + pw]
                we = we_ref[b, n * pool + pw]
                mask = (rows >= hs) & (rows < he) & (col_ids >= ws) & (col_ids < we)
                mx = jnp.max(jnp.where(mask, band, -jnp.inf),
                             axis=(0, 1), keepdims=True)          # (1, 1, C)
                empty = jnp.logical_or(he <= hs, we <= ws)
                bins.append(jnp.where(empty, jnp.float32(0.0), mx))
        # one lane-dense row store per ROI: (1, 1, P*P*C)
        out_ref[0, pl.ds(n, 1)] = jnp.concatenate(bins, axis=-1)
        return carry

    jax.lax.fori_loop(0, n_rois, body, 0, unroll=True)


# ============================== JAX glue / wrappers ==============================

def _round_up(x, m):
    return (x + m - 1) // m * m


def matmul_bias_relu(x_bf16, w_bf16, b_f32, *, tm=512):
    """M-tiled, software-pipelined matmul + bias + ReLU (weights resident)."""
    M, K = x_bf16.shape
    N = w_bf16.shape[1]
    tm = min(tm, _round_up(M, 16))
    Mp = _round_up(M, tm)
    if Mp != M:
        x_bf16 = jnp.pad(x_bf16, ((0, Mp - M), (0, 0)))
    out = pl.pallas_call(
        _matmul_bias_relu_kernel,
        grid=(Mp // tm,),
        in_specs=[
            pl.BlockSpec((tm, K), lambda i: (i, 0)),
            pl.BlockSpec((K, N), lambda i: (0, 0)),
            pl.BlockSpec((1, N), lambda i: (0, 0)),
        ],
        out_specs=pl.BlockSpec((tm, N), lambda i: (i, 0)),
        out_shape=jax.ShapeDtypeStruct((Mp, N), jnp.float32),
        compiler_params=pltpu.CompilerParams(
            dimension_semantics=("parallel",),
            vmem_limit_bytes=VMEM_LIMIT),
    )(x_bf16, w_bf16, b_f32)
    return out[:M]


def backbone_conv(im_nchw, w, b):
    """Synthetic stride-16 backbone (patchify conv + ReLU). Returns NHWC base_feat (f32)."""
    B, cin, H, W = im_nchw.shape
    hf, wf = H // FEAT_STRIDE, W // FEAT_STRIDE
    x = jnp.transpose(im_nchw, (0, 2, 3, 1))                      # NHWC
    x = x.reshape(B, hf, FEAT_STRIDE, wf, FEAT_STRIDE, cin)
    x = jnp.transpose(x, (0, 1, 3, 2, 4, 5)).reshape(
        B * hf * wf, FEAT_STRIDE * FEAT_STRIDE * cin)
    out = matmul_bias_relu(x.astype(jnp.bfloat16), w.astype(jnp.bfloat16), b)
    return out.reshape(B, hf, wf, DOUT_BASE)


def _fused_head_params(params):
    """Fuse cls + box head weights; fold the [bg..,fg..] -> per-anchor (bg,fg) reorder
    into a weight-column permutation; lane-pad to HEAD_PAD."""
    A = NUM_ANCHORS
    perm = np.stack([np.arange(A), np.arange(A) + A], axis=1).reshape(-1)   # bg_a, fg_a, ...
    w_cls_p = params["w_cls"][:, perm]
    b_cls_p = params["b_cls"][:, perm]
    w = jnp.concatenate([w_cls_p, params["w_box"]], axis=1)                 # (H, 6A)
    b = jnp.concatenate([b_cls_p, params["b_box"]], axis=1)
    padn = HEAD_PAD - w.shape[1]
    w = jnp.pad(w, ((0, 0), (0, padn)))
    b = jnp.pad(b, ((0, 0), (0, padn)))
    return w.astype(jnp.bfloat16), b


def rpn_head(base_feat_nhwc, params):
    """RPN 3x3 conv + fused cls/box heads, one Pallas call, one copy of base_feat."""
    B, hf, wf, C = base_feat_nhwc.shape
    A = NUM_ANCHORS
    K = hf * wf
    x_flat = base_feat_nhwc.reshape(B, K, C).astype(jnp.bfloat16)
    colmap = jnp.asarray(np.tile(np.arange(wf, dtype=np.int32), hf).reshape(K, 1))
    w_rpn = params["w_rpn"].astype(jnp.bfloat16)
    w_heads, b_heads = _fused_head_params(params)

    kernel = functools.partial(_rpn_fused_kernel, hf=hf, wf=wf, c=C, hidden=RPN_HIDDEN)
    out = pl.pallas_call(
        kernel,
        grid=(B,),
        in_specs=[
            pl.BlockSpec((1, K, C), lambda b: (b, 0, 0)),
            pl.BlockSpec((K, 1), lambda b: (0, 0)),
            pl.BlockSpec((9 * C, RPN_HIDDEN), lambda b: (0, 0)),
            pl.BlockSpec((1, RPN_HIDDEN), lambda b: (0, 0)),
            pl.BlockSpec((RPN_HIDDEN, HEAD_PAD), lambda b: (0, 0)),
            pl.BlockSpec((1, HEAD_PAD), lambda b: (0, 0)),
        ],
        out_specs=pl.BlockSpec((1, K, HEAD_PAD), lambda b: (b, 0, 0)),
        out_shape=jax.ShapeDtypeStruct((B, K, HEAD_PAD), jnp.float32),
        compiler_params=pltpu.CompilerParams(
            dimension_semantics=("parallel",),
            vmem_limit_bytes=VMEM_LIMIT),
    )(x_flat, colmap, w_rpn, params["b_rpn"], w_heads, b_heads)

    # weight columns are already permuted -> direct reshape (no transpose pass on cls)
    cls = out[..., : 2 * A].reshape(B, K * A, 2)       # per (k, anchor): (bg, fg)
    box = out[..., 2 * A: 6 * A].reshape(B, K * A, 4)  # per (k, anchor): (dx, dy, dw, dh)
    # coordinate-major for the proposal kernel (layout plumbing only)
    cls_t = jnp.transpose(cls, (0, 2, 1))              # (B, 2, K*A)
    deltas_t = jnp.transpose(box, (0, 2, 1))           # (B, 4, K*A)
    return cls_t, deltas_t


def proposal_layer(cls_t, deltas_t, anchors_cm, im_info):
    B, _, KA = deltas_t.shape
    boxes, scores = pl.pallas_call(
        _proposal_kernel,
        grid=(B,),
        in_specs=[
            pl.BlockSpec((4, KA), lambda b: (0, 0)),
            pl.BlockSpec((1, 4, KA), lambda b: (b, 0, 0)),
            pl.BlockSpec((1, 2, KA), lambda b: (b, 0, 0)),
            pl.BlockSpec(memory_space=pltpu.MemorySpace.SMEM),
        ],
        out_specs=(
            pl.BlockSpec((1, 4, KA), lambda b: (b, 0, 0)),
            pl.BlockSpec((1, 1, KA), lambda b: (b, 0, 0)),
        ),
        out_shape=(jax.ShapeDtypeStruct((B, 4, KA), jnp.float32),
                   jax.ShapeDtypeStruct((B, 1, KA), jnp.float32)),
        compiler_params=pltpu.CompilerParams(dimension_semantics=("parallel",)),
    )(anchors_cm, deltas_t, cls_t, im_info)

    scores2 = scores[:, 0, :]                                     # (B, KA)
    # TODO(synk): NMS has no clean Pallas equivalent; keep top-N proposals by fg score instead.
    _, idx = jax.lax.top_k(scores2, POST_TOP_N)
    top_boxes = jnp.take_along_axis(boxes, idx[:, None, :], axis=2)   # (B, 4, N)
    top_boxes = jnp.transpose(top_boxes, (0, 2, 1))                    # (B, N, 4)
    batch_col = jnp.broadcast_to(
        jnp.arange(B, dtype=jnp.float32)[:, None, None], (B, POST_TOP_N, 1))
    return jnp.concatenate([batch_col, top_boxes], axis=-1)            # (B, N, 5)


def roi_pool(base_feat_nhwc, rois):
    """Caffe-style ROI max pooling. rois: (B, N, 5); per-image grid, lane-dense output."""
    B, hf, wf, C = base_feat_nhwc.shape
    N = rois.shape[1]
    P = POOLING_SIZE
    scale = 1.0 / FEAT_STRIDE

    rsw = jnp.floor(rois[..., 1] * scale + 0.5).astype(jnp.int32)       # (B, N)
    rsh = jnp.floor(rois[..., 2] * scale + 0.5).astype(jnp.int32)
    rew = jnp.floor(rois[..., 3] * scale + 0.5).astype(jnp.int32)
    reh = jnp.floor(rois[..., 4] * scale + 0.5).astype(jnp.int32)
    roi_w = jnp.maximum(rew - rsw + 1, 1).astype(jnp.float32)
    roi_h = jnp.maximum(reh - rsh + 1, 1).astype(jnp.float32)
    bin_w = roi_w / P
    bin_h = roi_h / P
    pidx = jnp.arange(P, dtype=jnp.float32)
    hstart = jnp.clip(jnp.floor(pidx * bin_h[..., None]).astype(jnp.int32) + rsh[..., None], 0, hf)
    hend = jnp.clip(jnp.ceil((pidx + 1.0) * bin_h[..., None]).astype(jnp.int32) + rsh[..., None], 0, hf)
    wstart = jnp.clip(jnp.floor(pidx * bin_w[..., None]).astype(jnp.int32) + rsw[..., None], 0, wf)
    wend = jnp.clip(jnp.ceil((pidx + 1.0) * bin_w[..., None]).astype(jnp.int32) + rsw[..., None], 0, wf)
    # flatten to 2D SMEM-friendly tables (B, N*P)
    hstart, hend = hstart.reshape(B, N * P), hend.reshape(B, N * P)
    wstart, wend = wstart.reshape(B, N * P), wend.reshape(B, N * P)

    # max bin height (bounded band per bin); he-hs <= ceil((hf+1)/P)+1 and <= hf
    mbh = min(hf, -(-(hf + 1) // P) + 1)

    kernel = functools.partial(_roi_pool_kernel, hf=hf, wf=wf, c=C,
                               n_rois=N, pool=P, mbh=mbh)
    pooled = pl.pallas_call(
        kernel,
        grid_spec=pltpu.PrefetchScalarGridSpec(
            num_scalar_prefetch=4,
            grid=(B,),
            in_specs=[pl.BlockSpec(
                (1, hf, wf, C),
                lambda b, hs, he, ws, we: (b, 0, 0, 0))],
            out_specs=pl.BlockSpec(
                (1, N, 1, P * P * C),
                lambda b, hs, he, ws, we: (b, 0, 0, 0)),
        ),
        out_shape=jax.ShapeDtypeStruct((B, N, 1, P * P * C), jnp.float32),
        compiler_params=pltpu.CompilerParams(
            dimension_semantics=("parallel",),
            vmem_limit_bytes=VMEM_LIMIT),
    )(hstart, hend, wstart, wend, base_feat_nhwc)

    pooled = pooled.reshape(B * N, P, P, C)
    return jnp.transpose(pooled, (0, 3, 1, 2))        # (B*N, C, P, P) -> PyTorch NCHW output


# ------------------------------ anchors & params ------------------------------

def generate_anchors(base_size, ratios, scales):
    base = np.array([1, 1, base_size, base_size], dtype=np.float32) - 1.0
    w = base[2] - base[0] + 1.0
    h = base[3] - base[1] + 1.0
    x_ctr = base[0] + 0.5 * (w - 1.0)
    y_ctr = base[1] + 0.5 * (h - 1.0)
    size = w * h
    anchors = []
    for r in ratios:
        size_r = size / r
        ws = np.round(np.sqrt(size_r))
        hs = np.round(ws * r)
        for s in scales:
            wss = ws * s
            hss = hs * s
            anchors.append([x_ctr - 0.5 * (wss - 1.0), y_ctr - 0.5 * (hss - 1.0),
                            x_ctr + 0.5 * (wss - 1.0), y_ctr + 0.5 * (hss - 1.0)])
    return np.array(anchors, dtype=np.float32)


@functools.lru_cache(maxsize=None)
def shift_anchors(hf, wf):
    """Coordinate-major anchors (4, K*A); cached so they're built once per feature size."""
    base = generate_anchors(16, ANCHOR_RATIOS, ANCHOR_SCALES)      # (A, 4)
    sx = np.arange(wf) * FEAT_STRIDE
    sy = np.arange(hf) * FEAT_STRIDE
    sx, sy = np.meshgrid(sx, sy)
    shifts = np.stack([sx.ravel(), sy.ravel(), sx.ravel(), sy.ravel()], axis=1).astype(np.float32)
    all_anchors = (base[None, :, :] + shifts[:, None, :]).reshape(-1, 4)   # (K*A, 4)
    return jnp.asarray(np.ascontiguousarray(all_anchors.T))                # (4, K*A)


def init_params(key, cin=3):
    ks = jax.random.split(key, 4)

    def nrm(k, shape, std=0.01):
        return jax.random.normal(k, shape, dtype=jnp.float32) * std

    kdim = FEAT_STRIDE * FEAT_STRIDE * cin
    return {
        "w_base": nrm(ks[0], (kdim, DOUT_BASE), 0.02),
        "b_base": jnp.zeros((1, DOUT_BASE), jnp.float32),
        "w_rpn": nrm(ks[1], (9 * DOUT_BASE, RPN_HIDDEN)),
        "b_rpn": jnp.zeros((1, RPN_HIDDEN), jnp.float32),
        "w_cls": nrm(ks[2], (RPN_HIDDEN, 2 * NUM_ANCHORS)),
        "b_cls": jnp.zeros((1, 2 * NUM_ANCHORS), jnp.float32),
        "w_box": nrm(ks[3], (RPN_HIDDEN, 4 * NUM_ANCHORS)),
        "b_box": jnp.zeros((1, 4 * NUM_ANCHORS), jnp.float32),
    }


# ------------------------------ forward (eval mode) ------------------------------

def rcnn_base_forward(params, im_data, im_info, gt_boxes, num_boxes):
    # self.training == False path of _RCNN_base.forward
    del gt_boxes, num_boxes  # unused at inference (no _ProposalTargetLayer)  # TODO(synk)
    base_feat = backbone_conv(im_data, params["w_base"], params["b_base"])   # NHWC f32
    cls_t, deltas_t = rpn_head(base_feat, params)
    B, hf, wf, _ = base_feat.shape
    anchors_cm = shift_anchors(hf, wf)
    rois = proposal_layer(cls_t, deltas_t, anchors_cm, im_info)              # (B, N, 5)
    rpn_loss_cls = 0.0
    rpn_loss_bbox = 0.0
    pooled_feat = roi_pool(base_feat, rois)                                  # (B*N, C, P, P)
    return (rois, pooled_feat, None, None, None, None, rpn_loss_cls, rpn_loss_bbox)


if __name__ == "__main__":
    key = jax.random.PRNGKey(0)
    k_im, k_gt, k_par = jax.random.split(key, 3)
    B, Cin, H, W = 2, 3, 64, 64
    im_data = jax.random.normal(k_im, (B, Cin, H, W), dtype=jnp.float32)
    im_info = jnp.tile(jnp.array([[float(H), float(W), 1.0]], dtype=jnp.float32), (B, 1))
    gt_boxes = jax.random.uniform(k_gt, (B, 5, 5), dtype=jnp.float32) * 32.0
    num_boxes = jnp.array([5, 5], dtype=jnp.int32)
    params = init_params(k_par, Cin)

    fwd = jax.jit(rcnn_base_forward)
    out = fwd(params, im_data, im_info, gt_boxes, num_boxes)
    rois, pooled_feat = out[0], out[1]
    jax.block_until_ready((rois, pooled_feat))

    assert rois.shape == (B, POST_TOP_N, 5)
    assert pooled_feat.shape == (B * POST_TOP_N, DOUT_BASE, POOLING_SIZE, POOLING_SIZE)
    assert bool(jnp.all(jnp.isfinite(rois))) and bool(jnp.all(jnp.isfinite(pooled_feat)))
    print("KERNEL_OK")
</pallas_src>

<mosaic_0001>
module attributes {stable_mosaic.version = 11 : i64} {
  func.func @_matmul_bias_relu_kernel(%arg0: i32, %arg1: memref<32x768xbf16, #tpu.memory_space<vmem>>, %arg2: memref<768x128xbf16, #tpu.memory_space<vmem>>, %arg3: memref<1x128xf32, #tpu.memory_space<vmem>>, %arg4: memref<32x128xf32, #tpu.memory_space<vmem>>) attributes {dimension_semantics = [#tpu.dimension_semantics<parallel>], iteration_bounds = array<i64: 1>, scalar_prefetch = 0 : i64, scratch_operands = 0 : i64, tpu.core_type = #tpu.core_type<tc>, window_params = [{transform_indices = @transform_0, window_bounds = array<i64: 32, 768>}, {pipeline_mode = #tpu.pipeline_mode<synchronous>, transform_indices = @transform_1, window_bounds = array<i64: 768, 128>}, {pipeline_mode = #tpu.pipeline_mode<synchronous>, transform_indices = @transform_2, window_bounds = array<i64: 1, 128>}, {transform_indices = @transform_3, window_bounds = array<i64: 32, 128>}]} {
    %c0 = arith.constant 0 : index
    %c0_0 = arith.constant 0 : index
    %0 = vector.load %arg1[%c0, %c0_0] : memref<32x768xbf16, #tpu.memory_space<vmem>>, vector<32x768xbf16>
    %c0_1 = arith.constant 0 : index
    %c0_2 = arith.constant 0 : index
    %1 = vector.load %arg2[%c0_1, %c0_2] : memref<768x128xbf16, #tpu.memory_space<vmem>>, vector<768x128xbf16>
    %cst = arith.constant dense<0.000000e+00> : vector<32x128xf32>
    %2 = tpu.matmul %0, %1, %cst {dimension_numbers = #tpu.dot_dimension_numbers<[1], [0], [0], [1], [0, 0, 1, 1], [], []>} : vector<32x768xbf16>, vector<768x128xbf16>, vector<32x128xf32> -> vector<32x128xf32>
    %c0_3 = arith.constant 0 : index
    %c0_4 = arith.constant 0 : index
    %3 = vector.load %arg3[%c0_3, %c0_4] : memref<1x128xf32, #tpu.memory_space<vmem>>, vector<1x128xf32>
    %4 = vector.broadcast %3 : vector<1x128xf32> to vector<32x128xf32>
    %5 = arith.addf %2, %4 : vector<32x128xf32>
    %cst_5 = arith.constant 0.000000e+00 : f32
    %6 = vector.broadcast %cst_5 : f32 to vector<32x128xf32>
    %7 = arith.maximumf %5, %6 : vector<32x128xf32>
    %c0_6 = arith.constant 0 : index
    %c0_7 = arith.constant 0 : index
    %8 = vector.load %arg4[%c0_6, %c0_7] : memref<32x128xf32, #tpu.memory_space<vmem>>, vector<32x128xf32>
    tpu.vector_store %arg4[%c0_6, %c0_7], %7 {strides = array<i32>} : memref<32x128xf32, #tpu.memory_space<vmem>>, vector<32x128xf32>,
    return
  }
  func.func @transform_0(%arg0: i32) -> (i32, i32) {
    %c0_i32 = arith.constant 0 : i32
    %c0_i32_0 = arith.constant 0 : i32
    return %arg0, %c0_i32 : i32, i32
  }
  func.func @transform_1(%arg0: i32) -> (i32, i32) {
    %c0_i32 = arith.constant 0 : i32
    %c0_i32_0 = arith.constant 0 : i32
    %c0_i32_1 = arith.constant 0 : i32
    return %c0_i32, %c0_i32_0 : i32, i32
  }
  func.func @transform_2(%arg0: i32) -> (i32, i32) {
    %c0_i32 = arith.constant 0 : i32
    %c0_i32_0 = arith.constant 0 : i32
    %c0_i32_1 = arith.constant 0 : i32
    return %c0_i32, %c0_i32_0 : i32, i32
  }
  func.func @transform_3(%arg0: i32) -> (i32, i32) {
    %c0_i32 = arith.constant 0 : i32
    %c0_i32_0 = arith.constant 0 : i32
    return %arg0, %c0_i32 : i32, i32
  }
}

module attributes {stable_mosaic.version = 11 : i64} {
  func.func @_rpn_fused_kernel(%arg0: i32, %arg1: memref<1x16x128xbf16, #tpu.memory_space<vmem>>, %arg2: memref<16x1xi32, #tpu.memory_space<vmem>>, %arg3: memref<1152x128xbf16, #tpu.memory_space<vmem>>, %arg4: memref<1x128xf32, #tpu.memory_space<vmem>>, %arg5: memref<128x128xbf16, #tpu.memory_space<vmem>>, %arg6: memref<1x128xf32, #tpu.memory_space<vmem>>, %arg7: memref<1x16x128xf32, #tpu.memory_space<vmem>>) attributes {dimension_semantics = [#tpu.dimension_semantics<parallel>], iteration_bounds = array<i64: 2>, scalar_prefetch = 0 : i64, scratch_operands = 0 : i64, tpu.core_type = #tpu.core_type<tc>, window_params = [{transform_indices = @transform_0, window_bounds = array<i64: 1, 16, 128>}, {pipeline_mode = #tpu.pipeline_mode<synchronous>, transform_indices = @transform_1, window_bounds = array<i64: 16, 1>}, {pipeline_mode = #tpu.pipeline_mode<synchronous>, transform_indices = @transform_2, window_bounds = array<i64: 1152, 128>}, {pipeline_mode = #tpu.pipeline_mode<synchronous>, transform_indices = @transform_3, window_bounds = array<i64: 1, 128>}, {pipeline_mode = #tpu.pipeline_mode<synchronous>, transform_indices = @transform_4, window_bounds = array<i64: 128, 128>}, {pipeline_mode = #tpu.pipeline_mode<synchronous>, transform_indices = @transform_5, window_bounds = array<i64: 1, 128>}, {transform_indices = @transform_6, window_bounds = array<i64: 1, 16, 128>}]} {
    %c0 = arith.constant 0 : index
    %c0_0 = arith.constant 0 : index
    %c0_1 = arith.constant 0 : index
    %0 = vector.load %arg1[%c0, %c0_0, %c0_1] : memref<1x16x128xbf16, #tpu.memory_space<vmem>>, vector<1x16x128xbf16>
    %1 = vector.shape_cast %0 : vector<1x16x128xbf16> to vector<16x128xbf16>
    %c0_2 = arith.constant 0 : index
    %c0_3 = arith.constant 0 : index
    %2 = vector.load %arg2[%c0_2, %c0_3] : memref<16x1xi32, #tpu.memory_space<vmem>>, vector<16x1xi32>
    %3 = tpu.iota {dimensions = array<i32: 0>} : vector<16x1xi32>
    %cst = arith.constant 0.000000e+00 : f32
    %4 = vector.broadcast %cst : f32 to vector<16x128xf32>
    %cst_4 = arith.constant 0.000000e+00 : bf16
    %5 = vector.broadcast %cst_4 : bf16 to vector<5x128xbf16>
    %6 = vector.extract_strided_slice %1 {offsets = [0, 0], sizes = [11, 128], strides = [1, 1]} : vector<16x128xbf16> to vector<11x128xbf16>
    %7 = tpu.concatenate %5, %6 in 0 : vector<5x128xbf16>, vector<11x128xbf16> -> vector<16x128xbf16>
    %c-4_i32 = arith.constant -4 : i32
    %8 = vector.broadcast %c-4_i32 : i32 to vector<16x1xi32>
    %9 = arith.addi %3, %8 : vector<16x1xi32>
    %c0_i32 = arith.constant 0 : i32
    %10 = vector.broadcast %c0_i32 : i32 to vector<16x1xi32>
    %11 = arith.cmpi sge, %9, %10 : vector<16x1xi32>
    %c-4_i32_5 = arith.constant -4 : i32
    %12 = vector.broadcast %c-4_i32_5 : i32 to vector<16x1xi32>
    %13 = arith.addi %3, %12 : vector<16x1xi32>
    %c16_i32 = arith.constant 16 : i32
    %14 = vector.broadcast %c16_i32 : i32 to vector<16x1xi32>
    %15 = arith.cmpi slt, %13, %14 : vector<16x1xi32>
    %16 = arith.andi %11, %15 : vector<16x1xi1>
    %c-1_i32 = arith.constant -1 : i32
    %17 = vector.broadcast %c-1_i32 : i32 to vector<16x1xi32>
    %18 = arith.addi %2, %17 : vector<16x1xi32>
    %c0_i32_6 = arith.constant 0 : i32
    %19 = vector.broadcast %c0_i32_6 : i32 to vector<16x1xi32>
    %20 = arith.cmpi sge, %18, %19 : vector<16x1xi32>
    %21 = arith.andi %16, %20 : vector<16x1xi1>
    %c-1_i32_7 = arith.constant -1 : i32
    %22 = vector.broadcast %c-1_i32_7 : i32 to vector<16x1xi32>
    %23 = arith.addi %2, %22 : vector<16x1xi32>
    %c4_i32 = arith.constant 4 : i32
    %24 = vector.broadcast %c4_i32 : i32 to vector<16x1xi32>
    %25 = arith.cmpi slt, %23, %24 : vector<16x1xi32>
    %26 = arith.andi %21, %25 : vector<16x1xi1>
    %cst_8 = arith.constant 0.000000e+00 : bf16
    %27 = vector.broadcast %cst_8 : bf16 to vector<16x128xbf16>
    %28 = vector.shape_cast %26 : vector<16x1xi1> to vector<16x1xi1>
    %29 = vector.broadcast %28 : vector<16x1xi1> to vector<16x128xi1>
    %30 = arith.select %29, %7, %27 : vector<16x128xi1>, vector<16x128xbf16>
    %c0_9 = arith.constant 0 : index
    %c0_10 = arith.constant 0 : index
    %31 = vector.load %arg3[%c0_9, %c0_10] : memref<1152x128xbf16, #tpu.memory_space<vmem>>, vector<128x128xbf16>
    %cst_11 = arith.constant dense<0.000000e+00> : vector<16x128xf32>
    %32 = tpu.matmul %30, %31, %cst_11 {dimension_numbers = #tpu.dot_dimension_numbers<[1], [0], [0], [1], [0, 0, 1, 1], [], []>} : vector<16x128xbf16>, vector<128x128xbf16>, vector<16x128xf32> -> vector<16x128xf32>
    %33 = arith.addf %4, %32 : vector<16x128xf32>
    %cst_12 = arith.constant 0.000000e+00 : bf16
    %34 = vector.broadcast %cst_12 : bf16 to vector<4x128xbf16>
    %35 = vector.extract_strided_slice %1 {offsets = [0, 0], sizes = [12, 128], strides = [1, 1]} : vector<16x128xbf16> to vector<12x128xbf16>
    %36 = tpu.concatenate %34, %35 in 0 : vector<4x128xbf16>, vector<12x128xbf16> -> vector<16x128xbf16>
    %c-4_i32_13 = arith.constant -4 : i32
    %37 = vector.broadcast %c-4_i32_13 : i32 to vector<16x1xi32>
    %38 = arith.addi %3, %37 : vector<16x1xi32>
    %c0_i32_14 = arith.constant 0 : i32
    %39 = vector.broadcast %c0_i32_14 : i32 to vector<16x1xi32>
    %40 = arith.cmpi sge, %38, %39 : vector<16x1xi32>
    %c-4_i32_15 = arith.constant -4 : i32
    %41 = vector.broadcast %c-4_i32_15 : i32 to vector<16x1xi32>
    %42 = arith.addi %3, %41 : vector<16x1xi32>
    %c16_i32_16 = arith.constant 16 : i32
    %43 = vector.broadcast %c16_i32_16 : i32 to vector<16x1xi32>
    %44 = arith.cmpi slt, %42, %43 : vector<16x1xi32>
    %45 = arith.andi %40, %44 : vector<16x1xi1>
    %c0_i32_17 = arith.constant 0 : i32
    %46 = vector.broadcast %c0_i32_17 : i32 to vector<16x1xi32>
    %47 = arith.addi %2, %46 : vector<16x1xi32>
    %c0_i32_18 = arith.constant 0 : i32
    %48 = vector.broadcast %c0_i32_18 : i32 to vector<16x1xi32>
    %49 = arith.cmpi sge, %47, %48 : vector<16x1xi32>
    %50 = arith.andi %45, %49 : vector<16x1xi1>
    %c0_i32_19 = arith.constant 0 : i32
    %51 = vector.broadcast %c0_i32_19 : i32 to vector<16x1xi32>
    %52 = arith.addi %2, %51 : vector<16x1xi32>
    %c4_i32_20 = arith.constant 4 : i32
    %53 = vector.broadcast %c4_i32_20 : i32 to vector<16x1xi32>
    %54 = arith.cmpi slt, %52, %53 : vector<16x1xi32>
    %55 = arith.andi %50, %54 : vector<16x1xi1>
    %cst_21 = arith.constant 0.000000e+00 : bf16
    %56 = vector.broadcast %cst_21 : bf16 to vector<16x128xbf16>
    %57 = vector.shape_cast %55 : vector<16x1xi1> to vector<16x1xi1>
    %58 = vector.broadcast %57 : vector<16x1xi1> to vector<16x128xi1>
    %59 = arith.select %58, %36, %56 : vector<16x128xi1>, vector<16x128xbf16>
    %c128 = arith.constant 128 : index
    %c0_22 = arith.constant 0 : index
    %60 = vector.load %arg3[%c128, %c0_22] : memref<1152x128xbf16, #tpu.memory_space<vmem>>, vector<128x128xbf16>
    %cst_23 = arith.constant dense<0.000000e+00> : vector<16x128xf32>
    %61 = tpu.matmul %59, %60, %cst_23 {dimension_numbers = #tpu.dot_dimension_numbers<[1], [0], [0], [1], [0, 0, 1, 1], [], []>} : vector<16x128xbf16>, vector<128x128xbf16>, vector<16x128xf32> -> vector<16x128xf32>
    %62 = arith.addf %33, %61 : vector<16x128xf32>
    %cst_24 = arith.constant 0.000000e+00 : bf16
    %63 = vector.broadcast %cst_24 : bf16 to vector<3x128xbf16>
    %64 = vector.extract_strided_slice %1 {offsets = [0, 0], sizes = [13, 128], strides = [1, 1]} : vector<16x128xbf16> to vector<13x128xbf16>
    %65 = tpu.concatenate %63, %64 in 0 : vector<3x128xbf16>, vector<13x128xbf16> -> vector<16x128xbf16>
    %c-4_i32_25 = arith.constant -4 : i32
    %66 = vector.broadcast %c-4_i32_25 : i32 to vector<16x1xi32>
    %67 = arith.addi %3, %66 : vector<16x1xi32>
    %c0_i32_26 = arith.constant 0 : i32
    %68 = vector.broadcast %c0_i32_26 : i32 to vector<16x1xi32>
    %69 = arith.cmpi sge, %67, %68 : vector<16x1xi32>
    %c-4_i32_27 = arith.constant -4 : i32
    %70 = vector.broadcast %c-4_i32_27 : i32 to vector<16x1xi32>
    %71 = arith.addi %3, %70 : vector<16x1xi32>
    %c16_i32_28 = arith.constant 16 : i32
    %72 = vector.broadcast %c16_i32_28 : i32 to vector<16x1xi32>
    %73 = arith.cmpi slt, %71, %72 : vector<16x1xi32>
    %74 = arith.andi %69, %73 : vector<16x1xi1>
    %c1_i32 = arith.constant 1 : i32
    %75 = vector.broadcast %c1_i32 : i32 to vector<16x1xi32>
    %76 = arith.addi %2, %75 : vector<16x1xi32>
    %c0_i32_29 = arith.constant 0 : i32
    %77 = vector.broadcast %c0_i32_29 : i32 to vector<16x1xi32>
    %78 = arith.cmpi sge, %76, %77 : vector<16x1xi32>
    %79 = arith.andi %74, %78 : vector<16x1xi1>
    %c1_i32_30 = arith.constant 1 : i32
    %80 = vector.broadcast %c1_i32_30 : i32 to vector<16x1xi32>
    %81 = arith.addi %2, %80 : vector<16x1xi32>
    %c4_i32_31 = arith.constant 4 : i32
    %82 = vector.broadcast %c4_i32_31 : i32 to vector<16x1xi32>
    %83 = arith.cmpi slt, %81, %82 : vector<16x1xi32>
    %84 = arith.andi %79, %83 : vector<16x1xi1>
    %cst_32 = arith.constant 0.000000e+00 : bf16
    %85 = vector.broadcast %cst_32 : bf16 to vector<16x128xbf16>
    %86 = vector.shape_cast %84 : vector<16x1xi1> to vector<16x1xi1>
    %87 = vector.broadcast %86 : vector<16x1xi1> to vector<16x128xi1>
    %88 = arith.select %87, %65, %85 : vector<16x128xi1>, vector<16x128xbf16>
    %c256 = arith.constant 256 : index
    %c0_33 = arith.constant 0 : index
    %89 = vector.load %arg3[%c256, %c0_33] : memref<1152x128xbf16, #tpu.memory_space<vmem>>, vector<128x128xbf16>
    %cst_34 = arith.constant dense<0.000000e+00> : vector<16x128xf32>
    %90 = tpu.matmul %88, %89, %cst_34 {dimension_numbers = #tpu.dot_dimension_numbers<[1], [0], [0], [1], [0, 0, 1, 1], [], []>} : vector<16x128xbf16>, vector<128x128xbf16>, vector<16x128xf32> -> vector<16x128xf32>
    %91 = arith.addf %62, %90 : vector<16x128xf32>
    %cst_35 = arith.constant 0.000000e+00 : bf16
    %92 = vector.broadcast %cst_35 : bf16 to vector<1x128xbf16>
    %93 = vector.extract_strided_slice %1 {offsets = [0, 0], sizes = [15, 128], strides = [1, 1]} : vector<16x128xbf16> to vector<15x128xbf16>
    %94 = tpu.concatenate %92, %93 in 0 : vector<1x128xbf16>, vector<15x128xbf16> -> vector<16x128xbf16>
    %c0_i32_36 = arith.constant 0 : i32
    %95 = vector.broadcast %c0_i32_36 : i32 to vector<16x1xi32>
    %96 = arith.addi %3, %95 : vector<16x1xi32>
    %c0_i32_37 = arith.constant 0 : i32
    %97 = vector.broadcast %c0_i32_37 : i32 to vector<16x1xi32>
    %98 = arith.cmpi sge, %96, %97 : vector<16x1xi32>
    %c0_i32_38 = arith.constant 0 : i32
    %99 = vector.broadcast %c0_i32_38 : i32 to vector<16x1xi32>
    %100 = arith.addi %3, %99 : vector<16x1xi32>
    %c16_i32_39 = arith.constant 16 : i32
    %101 = vector.broadcast %c16_i32_39 : i32 to vector<16x1xi32>
    %102 = arith.cmpi slt, %100, %101 : vector<16x1xi32>
    %103 = arith.andi %98, %102 : vector<16x1xi1>
    %c-1_i32_40 = arith.constant -1 : i32
    %104 = vector.broadcast %c-1_i32_40 : i32 to vector<16x1xi32>
    %105 = arith.addi %2, %104 : vector<16x1xi32>
    %c0_i32_41 = arith.constant 0 : i32
    %106 = vector.broadcast %c0_i32_41 : i32 to vector<16x1xi32>
    %107 = arith.cmpi sge, %105, %106 : vector<16x1xi32>
    %108 = arith.andi %103, %107 : vector<16x1xi1>
    %c-1_i32_42 = arith.constant -1 : i32
    %109 = vector.broadcast %c-1_i32_42 : i32 to vector<16x1xi32>
    %110 = arith.addi %2, %109 : vector<16x1xi32>
    %c4_i32_43 = arith.constant 4 : i32
    %111 = vector.broadcast %c4_i32_43 : i32 to vector<16x1xi32>
    %112 = arith.cmpi slt, %110, %111 : vector<16x1xi32>
    %113 = arith.andi %108, %112 : vector<16x1xi1>
    %cst_44 = arith.constant 0.000000e+00 : bf16
    %114 = vector.broadcast %cst_44 : bf16 to vector<16x128xbf16>
    %115 = vector.shape_cast %113 : vector<16x1xi1> to vector<16x1xi1>
    %116 = vector.broadcast %115 : vector<16x1xi1> to vector<16x128xi1>
    %117 = arith.select %116, %94, %114 : vector<16x128xi1>, vector<16x128xbf16>
    %c384 = arith.constant 384 : index
    %c0_45 = arith.constant 0 : index
    %118 = vector.load %arg3[%c384, %c0_45] : memref<1152x128xbf16, #tpu.memory_space<vmem>>, vector<128x128xbf16>
    %cst_46 = arith.constant dense<0.000000e+00> : vector<16x128xf32>
    %119 = tpu.matmul %117, %118, %cst_46 {dimension_numbers = #tpu.dot_dimension_numbers<[1], [0], [0], [1], [0, 0, 1, 1], [], []>} : vector<16x128xbf16>, vector<128x128xbf16>, vector<16x128xf32> -> vector<16x128xf32>
    %120 = arith.addf %91, %119 : vector<16x128xf32>
    %c0_i32_47 = arith.constant 0 : i32
    %121 = vector.broadcast %c0_i32_47 : i32 to vector<16x1xi32>
    %122 = arith.addi %3, %121 : vector<16x1xi32>
    %c0_i32_48 = arith.constant 0 : i32
    %123 = vector.broadcast %c0_i32_48 : i32 to vector<16x1xi32>
    %124 = arith.cmpi sge, %122, %123 : vector<16x1xi32>
    %c0_i32_49 = arith.constant 0 : i32
    %125 = vector.broadcast %c0_i32_49 : i32 to vector<16x1xi32>
    %126 = arith.addi %3, %125 : vector<16x1xi32>
    %c16_i32_50 = arith.constant 16 : i32
    %127 = vector.broadcast %c16_i32_50 : i32 to vector<16x1xi32>
    %128 = arith.cmpi slt, %126, %127 : vector<16x1xi32>
    %129 = arith.andi %124, %128 : vector<16x1xi1>
    %c0_i32_51 = arith.constant 0 : i32
    %130 = vector.broadcast %c0_i32_51 : i32 to vector<16x1xi32>
    %131 = arith.addi %2, %130 : vector<16x1xi32>
    %c0_i32_52 = arith.constant 0 : i32
    %132 = vector.broadcast %c0_i32_52 : i32 to vector<16x1xi32>
    %133 = arith.cmpi sge, %131, %132 : vector<16x1xi32>
    %134 = arith.andi %129, %133 : vector<16x1xi1>
    %c0_i32_53 = arith.constant 0 : i32
    %135 = vector.broadcast %c0_i32_53 : i32 to vector<16x1xi32>
    %136 = arith.addi %2, %135 : vector<16x1xi32>
    %c4_i32_54 = arith.constant 4 : i32
    %137 = vector.broadcast %c4_i32_54 : i32 to vector<16x1xi32>
    %138 = arith.cmpi slt, %136, %137 : vector<16x1xi32>
    %139 = arith.andi %134, %138 : vector<16x1xi1>
    %cst_55 = arith.constant 0.000000e+00 : bf16
    %140 = vector.broadcast %cst_55 : bf16 to vector<16x128xbf16>
    %141 = vector.shape_cast %139 : vector<16x1xi1> to vector<16x1xi1>
    %142 = vector.broadcast %141 : vector<16x1xi1> to vector<16x128xi1>
    %143 = arith.select %142, %1, %140 : vector<16x128xi1>, vector<16x128xbf16>
    %c512 = arith.constant 512 : index
    %c0_56 = arith.constant 0 : index
    %144 = vector.load %arg3[%c512, %c0_56] : memref<1152x128xbf16, #tpu.memory_space<vmem>>, vector<128x128xbf16>
    %cst_57 = arith.constant dense<0.000000e+00> : vector<16x128xf32>
    %145 = tpu.matmul %143, %144, %cst_57 {dimension_numbers = #tpu.dot_dimension_numbers<[1], [0], [0], [1], [0, 0, 1, 1], [], []>} : vector<16x128xbf16>, vector<128x128xbf16>, vector<16x128xf32> -> vector<16x128xf32>
    %146 = arith.addf %120, %145 : vector<16x128xf32>
    %147 = vector.extract_strided_slice %1 {offsets = [1, 0], sizes = [15, 128], strides = [1, 1]} : vector<16x128xbf16> to vector<15x128xbf16>
    %cst_58 = arith.constant 0.000000e+00 : bf16
    %148 = vector.broadcast %cst_58 : bf16 to vector<1x128xbf16>
    %149 = tpu.concatenate %147, %148 in 0 : vector<15x128xbf16>, vector<1x128xbf16> -> vector<16x128xbf16>
    %c0_i32_59 = arith.constant 0 : i32
    %150 = vector.broadcast %c0_i32_59 : i32 to vector<16x1xi32>
    %151 = arith.addi %3, %150 : vector<16x1xi32>
    %c0_i32_60 = arith.constant 0 : i32
    %152 = vector.broadcast %c0_i32_60 : i32 to vector<16x1xi32>
    %153 = arith.cmpi sge, %151, %152 : vector<16x1xi32>
    %c0_i32_61 = arith.constant 0 : i32
    %154 = vector.broadcast %c0_i32_61 : i32 to vector<16x1xi32>
    %155 = arith.addi %3, %154 : vector<16x1xi32>
    %c16_i32_62 = arith.constant 16 : i32
    %156 = vector.broadcast %c16_i32_62 : i32 to vector<16x1xi32>
    %157 = arith.cmpi slt, %155, %156 : vector<16x1xi32>
    %158 = arith.andi %153, %157 : vector<16x1xi1>
    %c1_i32_63 = arith.constant 1 : i32
    %159 = vector.broadcast %c1_i32_63 : i32 to vector<16x1xi32>
    %160 = arith.addi %2, %159 : vector<16x1xi32>
    %c0_i32_64 = arith.constant 0 : i32
    %161 = vector.broadcast %c0_i32_64 : i32 to vector<16x1xi32>
    %162 = arith.cmpi sge, %160, %161 : vector<16x1xi32>
    %163 = arith.andi %158, %162 : vector<16x1xi1>
    %c1_i32_65 = arith.constant 1 : i32
    %164 = vector.broadcast %c1_i32_65 : i32 to vector<16x1xi32>
    %165 = arith.addi %2, %164 : vector<16x1xi32>
    %c4_i32_66 = arith.constant 4 : i32
    %166 = vector.broadcast %c4_i32_66 : i32 to vector<16x1xi32>
    %167 = arith.cmpi slt, %165, %166 : vector<16x1xi32>
    %168 = arith.andi %163, %167 : vector<16x1xi1>
    %cst_67 = arith.constant 0.000000e+00 : bf16
    %169 = vector.broadcast %cst_67 : bf16 to vector<16x128xbf16>
    %170 = vector.shape_cast %168 : vector<16x1xi1> to vector<16x1xi1>
    %171 = vector.broadcast %170 : vector<16x1xi1> to vector<16x128xi1>
    %172 = arith.select %171, %149, %169 : vector<16x128xi1>, vector<16x128xbf16>
    %c640 = arith.constant 640 : index
    %c0_68 = arith.constant 0 : index
    %173 = vector.load %arg3[%c640, %c0_68] : memref<1152x128xbf16, #tpu.memory_space<vmem>>, vector<128x128xbf16>
    %cst_69 = arith.constant dense<0.000000e+00> : vector<16x128xf32>
    %174 = tpu.matmul %172, %173, %cst_69 {dimension_numbers = #tpu.dot_dimension_numbers<[1], [0], [0], [1], [0, 0, 1, 1], [], []>} : vector<16x128xbf16>, vector<128x128xbf16>, vector<16x128xf32> -> vector<16x128xf32>
    %175 = arith.addf %146, %174 : vector<16x128xf32>
    %176 = vector.extract_strided_slice %1 {offsets = [3, 0], sizes = [13, 128], strides = [1, 1]} : vector<16x128xbf16> to vector<13x128xbf16>
    %cst_70 = arith.constant 0.000000e+00 : bf16
    %177 = vector.broadcast %cst_70 : bf16 to vector<3x128xbf16>
    %178 = tpu.concatenate %176, %177 in 0 : vector<13x128xbf16>, vector<3x128xbf16> -> vector<16x128xbf16>
    %c4_i32_71 = arith.constant 4 : i32
    %179 = vector.broadcast %c4_i32_71 : i32 to vector<16x1xi32>
    %180 = arith.addi %3, %179 : vector<16x1xi32>
    %c0_i32_72 = arith.constant 0 : i32
    %181 = vector.broadcast %c0_i32_72 : i32 to vector<16x1xi32>
    %182 = arith.cmpi sge, %180, %181 : vector<16x1xi32>
    %c4_i32_73 = arith.constant 4 : i32
    %183 = vector.broadcast %c4_i32_73 : i32 to vector<16x1xi32>
    %184 = arith.addi %3, %183 : vector<16x1xi32>
    %c16_i32_74 = arith.constant 16 : i32
    %185 = vector.broadcast %c16_i32_74 : i32 to vector<16x1xi32>
    %186 = arith.cmpi slt, %184, %185 : vector<16x1xi32>
    %187 = arith.andi %182, %186 : vector<16x1xi1>
    %c-1_i32_75 = arith.constant -1 : i32
    %188 = vector.broadcast %c-1_i32_75 : i32 to vector<16x1xi32>
    %189 = arith.addi %2, %188 : vector<16x1xi32>
    %c0_i32_76 = arith.constant 0 : i32
    %190 = vector.broadcast %c0_i32_76 : i32 to vector<16x1xi32>
    %191 = arith.cmpi sge, %189, %190 : vector<16x1xi32>
    %192 = arith.andi %187, %191 : vector<16x1xi1>
    %c-1_i32_77 = arith.constant -1 : i32
    %193 = vector.broadcast %c-1_i32_77 : i32 to vector<16x1xi32>
    %194 = arith.addi %2, %193 : vector<16x1xi32>
    %c4_i32_78 = arith.constant 4 : i32
    %195 = vector.broadcast %c4_i32_78 : i32 to vector<16x1xi32>
    %196 = arith.cmpi slt, %194, %195 : vector<16x1xi32>
    %197 = arith.andi %192, %196 : vector<16x1xi1>
    %cst_79 = arith.constant 0.000000e+00 : bf16
    %198 = vector.broadcast %cst_79 : bf16 to vector<16x128xbf16>
    %199 = vector.shape_cast %197 : vector<16x1xi1> to vector<16x1xi1>
    %200 = vector.broadcast %199 : vector<16x1xi1> to vector<16x128xi1>
    %201 = arith.select %200, %178, %198 : vector<16x128xi1>, vector<16x128xbf16>
    %c768 = arith.constant 768 : index
    %c0_80 = arith.constant 0 : index
    %202 = vector.load %arg3[%c768, %c0_80] : memref<1152x128xbf16, #tpu.memory_space<vmem>>, vector<128x128xbf16>
    %cst_81 = arith.constant dense<0.000000e+00> : vector<16x128xf32>
    %203 = tpu.matmul %201, %202, %cst_81 {dimension_numbers = #tpu.dot_dimension_numbers<[1], [0], [0], [1], [0, 0, 1, 1], [], []>} : vector<16x128xbf16>, vector<128x128xbf16>, vector<16x128xf32> -> vector<16x128xf32>
    %204 = arith.addf %175, %203 : vector<16x128xf32>
    %205 = vector.extract_strided_slice %1 {offsets = [4, 0], sizes = [12, 128], strides = [1, 1]} : vector<16x128xbf16> to vector<12x128xbf16>
    %cst_82 = arith.constant 0.000000e+00 : bf16
    %206 = vector.broadcast %cst_82 : bf16 to vector<4x128xbf16>
    %207 = tpu.concatenate %205, %206 in 0 : vector<12x128xbf16>, vector<4x128xbf16> -> vector<16x128xbf16>
    %c4_i32_83 = arith.constant 4 : i32
    %208 = vector.broadcast %c4_i32_83 : i32 to vector<16x1xi32>
    %209 = arith.addi %3, %208 : vector<16x1xi32>
    %c0_i32_84 = arith.constant 0 : i32
    %210 = vector.broadcast %c0_i32_84 : i32 to vector<16x1xi32>
    %211 = arith.cmpi sge, %209, %210 : vector<16x1xi32>
    %c4_i32_85 = arith.constant 4 : i32
    %212 = vector.broadcast %c4_i32_85 : i32 to vector<16x1xi32>
    %213 = arith.addi %3, %212 : vector<16x1xi32>
    %c16_i32_86 = arith.constant 16 : i32
    %214 = vector.broadcast %c16_i32_86 : i32 to vector<16x1xi32>
    %215 = arith.cmpi slt, %213, %214 : vector<16x1xi32>
    %216 = arith.andi %211, %215 : vector<16x1xi1>
    %c0_i32_87 = arith.constant 0 : i32
    %217 = vector.broadcast %c0_i32_87 : i32 to vector<16x1xi32>
    %218 = arith.addi %2, %217 : vector<16x1xi32>
    %c0_i32_88 = arith.constant 0 : i32
    %219 = vector.broadcast %c0_i32_88 : i32 to vector<16x1xi32>
    %220 = arith.cmpi sge, %218, %219 : vector<16x1xi32>
    %221 = arith.andi %216, %220 : vector<16x1xi1>
    %c0_i32_89 = arith.constant 0 : i32
    %222 = vector.broadcast %c0_i32_89 : i32 to vector<16x1xi32>
    %223 = arith.addi %2, %222 : vector<16x1xi32>
    %c4_i32_90 = arith.constant 4 : i32
    %224 = vector.broadcast %c4_i32_90 : i32 to vector<16x1xi32>
    %225 = arith.cmpi slt, %223, %224 : vector<16x1xi32>
    %226 = arith.andi %221, %225 : vector<16x1xi1>
    %cst_91 = arith.constant 0.000000e+00 : bf16
    %227 = vector.broadcast %cst_91 : bf16 to vector<16x128xbf16>
    %228 = vector.shape_cast %226 : vector<16x1xi1> to vector<16x1xi1>
    %229 = vector.broadcast %228 : vector<16x1xi1> to vector<16x128xi1>
    %230 = arith.select %229, %207, %227 : vector<16x128xi1>, vector<16x128xbf16>
    %c896 = arith.constant 896 : index
    %c0_92 = arith.constant 0 : index
    %231 = vector.load %arg3[%c896, %c0_92] : memref<1152x128xbf16, #tpu.memory_space<vmem>>, vector<128x128xbf16>
    %cst_93 = arith.constant dense<0.000000e+00> : vector<16x128xf32>
    %232 = tpu.matmul %230, %231, %cst_93 {dimension_numbers = #tpu.dot_dimension_numbers<[1], [0], [0], [1], [0, 0, 1, 1], [], []>} : vector<16x128xbf16>, vector<128x128xbf16>, vector<16x128xf32> -> vector<16x128xf32>
    %233 = arith.addf %204, %232 : vector<16x128xf32>
    %234 = vector.extract_strided_slice %1 {offsets = [5, 0], sizes = [11, 128], strides = [1, 1]} : vector<16x128xbf16> to vector<11x128xbf16>
    %cst_94 = arith.constant 0.000000e+00 : bf16
    %235 = vector.broadcast %cst_94 : bf16 to vector<5x128xbf16>
    %236 = tpu.concatenate %234, %235 in 0 : vector<11x128xbf16>, vector<5x128xbf16> -> vector<16x128xbf16>
    %c4_i32_95 = arith.constant 4 : i32
    %237 = vector.broadcast %c4_i32_95 : i32 to vector<16x1xi32>
    %238 = arith.addi %3, %237 : vector<16x1xi32>
    %c0_i32_96 = arith.constant 0 : i32
    %239 = vector.broadcast %c0_i32_96 : i32 to vector<16x1xi32>
    %240 = arith.cmpi sge, %238, %239 : vector<16x1xi32>
    %c4_i32_97 = arith.constant 4 : i32
    %241 = vector.broadcast %c4_i32_97 : i32 to vector<16x1xi32>
    %242 = arith.addi %3, %241 : vector<16x1xi32>
    %c16_i32_98 = arith.constant 16 : i32
    %243 = vector.broadcast %c16_i32_98 : i32 to vector<16x1xi32>
    %244 = arith.cmpi slt, %242, %243 : vector<16x1xi32>
    %245 = arith.andi %240, %244 : vector<16x1xi1>
    %c1_i32_99 = arith.constant 1 : i32
    %246 = vector.broadcast %c1_i32_99 : i32 to vector<16x1xi32>
    %247 = arith.addi %2, %246 : vector<16x1xi32>
    %c0_i32_100 = arith.constant 0 : i32
    %248 = vector.broadcast %c0_i32_100 : i32 to vector<16x1xi32>
    %249 = arith.cmpi sge, %247, %248 : vector<16x1xi32>
    %250 = arith.andi %245, %249 : vector<16x1xi1>
    %c1_i32_101 = arith.constant 1 : i32
    %251 = vector.broadcast %c1_i32_101 : i32 to vector<16x1xi32>
    %252 = arith.addi %2, %251 : vector<16x1xi32>
    %c4_i32_102 = arith.constant 4 : i32
    %253 = vector.broadcast %c4_i32_102 : i32 to vector<16x1xi32>
    %254 = arith.cmpi slt, %252, %253 : vector<16x1xi32>
    %255 = arith.andi %250, %254 : vector<16x1xi1>
    %cst_103 = arith.constant 0.000000e+00 : bf16
    %256 = vector.broadcast %cst_103 : bf16 to vector<16x128xbf16>
    %257 = vector.shape_cast %255 : vector<16x1xi1> to vector<16x1xi1>
    %258 = vector.broadcast %257 : vector<16x1xi1> to vector<16x128xi1>
    %259 = arith.select %258, %236, %256 : vector<16x128xi1>, vector<16x128xbf16>
    %c1024 = arith.constant 1024 : index
    %c0_104 = arith.constant 0 : index
    %260 = vector.load %arg3[%c1024, %c0_104] : memref<1152x128xbf16, #tpu.memory_space<vmem>>, vector<128x128xbf16>
    %cst_105 = arith.constant dense<0.000000e+00> : vector<16x128xf32>
    %261 = tpu.matmul %259, %260, %cst_105 {dimension_numbers = #tpu.dot_dimension_numbers<[1], [0], [0], [1], [0, 0, 1, 1], [], []>} : vector<16x128xbf16>, vector<128x128xbf16>, vector<16x128xf32> -> vector<16x128xf32>
    %262 = arith.addf %233, %261 : vector<16x128xf32>
    %c0_106 = arith.constant 0 : index
    %c0_107 = arith.constant 0 : index
    %263 = vector.load %arg4[%c0_106, %c0_107] : memref<1x128xf32, #tpu.memory_space<vmem>>, vector<1x128xf32>
    %264 = vector.broadcast %263 : vector<1x128xf32> to vector<16x128xf32>
    %265 = arith.addf %262, %264 : vector<16x128xf32>
    %cst_108 = arith.constant 0.000000e+00 : f32
    %266 = vector.broadcast %cst_108 : f32 to vector<16x128xf32>
    %267 = arith.maximumf %265, %266 : vector<16x128xf32>
    %268 = arith.truncf %267 : vector<16x128xf32> to vector<16x128xbf16>
    %c0_109 = arith.constant 0 : index
    %c0_110 = arith.constant 0 : index
    %269 = vector.load %arg5[%c0_109, %c0_110] : memref<128x128xbf16, #tpu.memory_space<vmem>>, vector<128x128xbf16>
    %cst_111 = arith.constant dense<0.000000e+00> : vector<16x128xf32>
    %270 = tpu.matmul %268, %269, %cst_111 {dimension_numbers = #tpu.dot_dimension_numbers<[1], [0], [0], [1], [0, 0, 1, 1], [], []>} : vector<16x128xbf16>, vector<128x128xbf16>, vector<16x128xf32> -> vector<16x128xf32>
    %c0_112 = arith.constant 0 : index
    %c0_113 = arith.constant 0 : index
    %271 = vector.load %arg6[%c0_112, %c0_113] : memref<1x128xf32, #tpu.memory_space<vmem>>, vector<1x128xf32>
    %272 = vector.broadcast %271 : vector<1x128xf32> to vector<16x128xf32>
    %273 = arith.addf %270, %272 : vector<16x128xf32>
    %c0_114 = arith.constant 0 : index
    %c0_115 = arith.constant 0 : index
    %c0_116 = arith.constant 0 : index
    %274 = vector.load %arg7[%c0_114, %c0_115, %c0_116] : memref<1x16x128xf32, #tpu.memory_space<vmem>>, vector<1x16x128xf32>
    %275 = vector.shape_cast %274 : vector<1x16x128xf32> to vector<16x128xf32>
    %276 = vector.shape_cast %273 : vector<16x128xf32> to vector<1x16x128xf32>
    tpu.vector_store %arg7[%c0_114, %c0_115, %c0_116], %276 {strides = array<i32>} : memref<1x16x128xf32, #tpu.memory_space<vmem>>, vector<1x16x128xf32>,
    return
  }
  func.func @transform_0(%arg0: i32) -> (i32, i32, i32) {
    %c0_i32 = arith.constant 0 : i32
    %c0_i32_0 = arith.constant 0 : i32
    %c0_i32_1 = arith.constant 0 : i32
    return %arg0, %c0_i32, %c0_i32_0 : i32, i32, i32
  }
  func.func @transform_1(%arg0: i32) -> (i32, i32) {
    %c0_i32 = arith.constant 0 : i32
    %c0_i32_0 = arith.constant 0 : i32
    %c0_i32_1 = arith.constant 0 : i32
    return %c0_i32, %c0_i32_0 : i32, i32
  }
  func.func @transform_2(%arg0: i32) -> (i32, i32) {
    %c0_i32 = arith.constant 0 : i32
    %c0_i32_0 = arith.constant 0 : i32
    %c0_i32_1 = arith.constant 0 : i32
    return %c0_i32, %c0_i32_0 : i32, i32
  }
  func.func @transform_3(%arg0: i32) -> (i32, i32) {
    %c0_i32 = arith.constant 0 : i32
    %c0_i32_0 = arith.constant 0 : i32
    %c0_i32_1 = arith.constant 0 : i32
    return %c0_i32, %c0_i32_0 : i32, i32
  }
  func.func @transform_4(%arg0: i32) -> (i32, i32) {
    %c0_i32 = arith.constant 0 : i32
    %c0_i32_0 = arith.constant 0 : i32
    %c0_i32_1 = arith.constant 0 : i32
    return %c0_i32, %c0_i32_0 : i32, i32
  }
  func.func @transform_5(%arg0: i32) -> (i32, i32) {
    %c0_i32 = arith.constant 0 : i32
    %c0_i32_0 = arith.constant 0 : i32
    %c0_i32_1 = arith.constant 0 : i32
    return %c0_i32, %c0_i32_0 : i32, i32
  }
  func.func @transform_6(%arg0: i32) -> (i32, i32, i32) {
    %c0_i32 = arith.constant 0 : i32
    %c0_i32_0 = arith.constant 0 : i32
    %c0_i32_1 = arith.constant 0 : i32
    return %arg0, %c0_i32, %c0_i32_0 : i32, i32, i32
  }
}

module attributes {stable_mosaic.version = 11 : i64} {
  func.func @_proposal_kernel(%arg0: i32, %arg1: memref<4x48xf32, #tpu.memory_space<vmem>>, %arg2: memref<1x4x48xf32, #tpu.memory_space<vmem>>, %arg3: memref<1x2x48xf32, #tpu.memory_space<vmem>>, %arg4: memref<2x3xf32, #tpu.memory_space<smem>>, %arg5: memref<1x4x48xf32, #tpu.memory_space<vmem>>, %arg6: memref<1x1x48xf32, #tpu.memory_space<vmem>>) attributes {dimension_semantics = [#tpu.dimension_semantics<parallel>], iteration_bounds = array<i64: 2>, scalar_prefetch = 0 : i64, scratch_operands = 0 : i64, tpu.core_type = #tpu.core_type<tc>, window_params = [{pipeline_mode = #tpu.pipeline_mode<synchronous>, transform_indices = @transform_0, window_bounds = array<i64: 4, 48>}, {transform_indices = @transform_1, window_bounds = array<i64: 1, 4, 48>}, {transform_indices = @transform_2, window_bounds = array<i64: 1, 2, 48>}, {transform_indices = @transform_3, window_bounds = array<i64: 2, 3>}, {transform_indices = @transform_4, window_bounds = array<i64: 1, 4, 48>}, {transform_indices = @transform_5, window_bounds = array<i64: 1, 1, 48>}]} {
    %c0 = arith.constant 0 : index
    %c0_0 = arith.constant 0 : index
    %0 = vector.load %arg1[%c0, %c0_0] : memref<4x48xf32, #tpu.memory_space<vmem>>, vector<4x48xf32>
    %c0_1 = arith.constant 0 : index
    %c0_2 = arith.constant 0 : index
    %c0_3 = arith.constant 0 : index
    %1 = vector.load %arg2[%c0_1, %c0_2, %c0_3] : memref<1x4x48xf32, #tpu.memory_space<vmem>>, vector<1x4x48xf32>
    %2 = vector.shape_cast %1 : vector<1x4x48xf32> to vector<4x48xf32>
    %3 = vector.extract_strided_slice %0 {offsets = [0, 0], sizes = [1, 48], strides = [1, 1]} : vector<4x48xf32> to vector<1x48xf32>
    %4 = vector.extract_strided_slice %0 {offsets = [1, 0], sizes = [1, 48], strides = [1, 1]} : vector<4x48xf32> to vector<1x48xf32>
    %5 = vector.extract_strided_slice %0 {offsets = [2, 0], sizes = [1, 48], strides = [1, 1]} : vector<4x48xf32> to vector<1x48xf32>
    %6 = vector.extract_strided_slice %0 {offsets = [3, 0], sizes = [1, 48], strides = [1, 1]} : vector<4x48xf32> to vector<1x48xf32>
    %7 = arith.subf %5, %3 : vector<1x48xf32>
    %cst = arith.constant 1.000000e+00 : f32
    %8 = vector.broadcast %cst : f32 to vector<1x48xf32>
    %9 = arith.addf %7, %8 : vector<1x48xf32>
    %10 = arith.subf %6, %4 : vector<1x48xf32>
    %cst_4 = arith.constant 1.000000e+00 : f32
    %11 = vector.broadcast %cst_4 : f32 to vector<1x48xf32>
    %12 = arith.addf %10, %11 : vector<1x48xf32>
    %cst_5 = arith.constant 5.000000e-01 : f32
    %13 = vector.broadcast %cst_5 : f32 to vector<1x48xf32>
    %14 = arith.mulf %13, %9 : vector<1x48xf32>
    %15 = arith.addf %3, %14 : vector<1x48xf32>
    %cst_6 = arith.constant 5.000000e-01 : f32
    %16 = vector.broadcast %cst_6 : f32 to vector<1x48xf32>
    %17 = arith.mulf %16, %12 : vector<1x48xf32>
    %18 = arith.addf %4, %17 : vector<1x48xf32>
    %19 = vector.extract_strided_slice %2 {offsets = [0, 0], sizes = [1, 48], strides = [1, 1]} : vector<4x48xf32> to vector<1x48xf32>
    %20 = vector.extract_strided_slice %2 {offsets = [1, 0], sizes = [1, 48], strides = [1, 1]} : vector<4x48xf32> to vector<1x48xf32>
    %21 = vector.extract_strided_slice %2 {offsets = [2, 0], sizes = [1, 48], strides = [1, 1]} : vector<4x48xf32> to vector<1x48xf32>
    %cst_7 = arith.constant 4.13516665 : f32
    %22 = vector.broadcast %cst_7 : f32 to vector<1x48xf32>
    %23 = arith.minimumf %21, %22 : vector<1x48xf32>
    %24 = vector.extract_strided_slice %2 {offsets = [3, 0], sizes = [1, 48], strides = [1, 1]} : vector<4x48xf32> to vector<1x48xf32>
    %cst_8 = arith.constant 4.13516665 : f32
    %25 = vector.broadcast %cst_8 : f32 to vector<1x48xf32>
    %26 = arith.minimumf %24, %25 : vector<1x48xf32>
    %27 = arith.mulf %19, %9 : vector<1x48xf32>
    %28 = arith.addf %27, %15 : vector<1x48xf32>
    %29 = arith.mulf %20, %12 : vector<1x48xf32>
    %30 = arith.addf %29, %18 : vector<1x48xf32>
    %31 = math.exp %23 : vector<1x48xf32>
    %32 = arith.mulf %31, %9 : vector<1x48xf32>
    %33 = math.exp %26 : vector<1x48xf32>
    %34 = arith.mulf %33, %12 : vector<1x48xf32>
    %cst_9 = arith.constant 5.000000e-01 : f32
    %35 = vector.broadcast %cst_9 : f32 to vector<1x48xf32>
    %36 = arith.mulf %35, %32 : vector<1x48xf32>
    %37 = arith.subf %28, %36 : vector<1x48xf32>
    %cst_10 = arith.constant 5.000000e-01 : f32
    %38 = vector.broadcast %cst_10 : f32 to vector<1x48xf32>
    %39 = arith.mulf %38, %34 : vector<1x48xf32>
    %40 = arith.subf %30, %39 : vector<1x48xf32>
    %cst_11 = arith.constant 5.000000e-01 : f32
    %41 = vector.broadcast %cst_11 : f32 to vector<1x48xf32>
    %42 = arith.mulf %41, %32 : vector<1x48xf32>
    %43 = arith.addf %28, %42 : vector<1x48xf32>
    %cst_12 = arith.constant 5.000000e-01 : f32
    %44 = vector.broadcast %cst_12 : f32 to vector<1x48xf32>
    %45 = arith.mulf %44, %34 : vector<1x48xf32>
    %46 = arith.addf %30, %45 : vector<1x48xf32>
    %47 = arith.index_cast %arg0 : i32 to index
    %c0_13 = arith.constant 0 : index
    %48 = memref.load %arg4[%47, %c0_13] : memref<2x3xf32, #tpu.memory_space<smem>>
    %49 = arith.index_cast %arg0 : i32 to index
    %c1 = arith.constant 1 : index
    %50 = memref.load %arg4[%49, %c1] : memref<2x3xf32, #tpu.memory_space<smem>>
    %cst_14 = arith.constant 1.000000e+00 : f32
    %51 = arith.subf %50, %cst_14 : f32
    %cst_15 = arith.constant 0.000000e+00 : f32
    %52 = vector.broadcast %cst_15 : f32 to vector<1x48xf32>
    %53 = arith.maximumf %52, %37 : vector<1x48xf32>
    %54 = vector.broadcast %51 : f32 to vector<1x48xf32>
    %55 = arith.minimumf %54, %53 : vector<1x48xf32>
    %cst_16 = arith.constant 1.000000e+00 : f32
    %56 = arith.subf %50, %cst_16 : f32
    %cst_17 = arith.constant 0.000000e+00 : f32
    %57 = vector.broadcast %cst_17 : f32 to vector<1x48xf32>
    %58 = arith.maximumf %57, %43 : vector<1x48xf32>
    %59 = vector.broadcast %56 : f32 to vector<1x48xf32>
    %60 = arith.minimumf %59, %58 : vector<1x48xf32>
    %cst_18 = arith.constant 1.000000e+00 : f32
    %61 = arith.subf %48, %cst_18 : f32
    %cst_19 = arith.constant 0.000000e+00 : f32
    %62 = vector.broadcast %cst_19 : f32 to vector<1x48xf32>
    %63 = arith.maximumf %62, %40 : vector<1x48xf32>
    %64 = vector.broadcast %61 : f32 to vector<1x48xf32>
    %65 = arith.minimumf %64, %63 : vector<1x48xf32>
    %cst_20 = arith.constant 1.000000e+00 : f32
    %66 = arith.subf %48, %cst_20 : f32
    %cst_21 = arith.constant 0.000000e+00 : f32
    %67 = vector.broadcast %cst_21 : f32 to vector<1x48xf32>
    %68 = arith.maximumf %67, %46 : vector<1x48xf32>
    %69 = vector.broadcast %66 : f32 to vector<1x48xf32>
    %70 = arith.minimumf %69, %68 : vector<1x48xf32>
    %71 = tpu.concatenate %55, %65, %60, %70 in 0 : vector<1x48xf32>, vector<1x48xf32>, vector<1x48xf32>, vector<1x48xf32> -> vector<4x48xf32>
    %c0_22 = arith.constant 0 : index
    %c0_23 = arith.constant 0 : index
    %c0_24 = arith.constant 0 : index
    %72 = vector.load %arg5[%c0_22, %c0_23, %c0_24] : memref<1x4x48xf32, #tpu.memory_space<vmem>>, vector<1x4x48xf32>
    %73 = vector.shape_cast %72 : vector<1x4x48xf32> to vector<4x48xf32>
    %74 = vector.shape_cast %71 : vector<4x48xf32> to vector<1x4x48xf32>
    tpu.vector_store %arg5[%c0_22, %c0_23, %c0_24], %74 {strides = array<i32>} : memref<1x4x48xf32, #tpu.memory_space<vmem>>, vector<1x4x48xf32>,
    %c0_25 = arith.constant 0 : index
    %c0_26 = arith.constant 0 : index
    %c0_27 = arith.constant 0 : index
    %75 = vector.load %arg3[%c0_25, %c0_26, %c0_27] : memref<1x2x48xf32, #tpu.memory_space<vmem>>, vector<1x1x48xf32>
    %76 = vector.shape_cast %75 : vector<1x1x48xf32> to vector<1x48xf32>
    %c0_28 = arith.constant 0 : index
    %c1_29 = arith.constant 1 : index
    %c0_30 = arith.constant 0 : index
    %77 = vector.load %arg3[%c0_28, %c1_29, %c0_30] : memref<1x2x48xf32, #tpu.memory_space<vmem>>, vector<1x1x48xf32>
    %78 = vector.shape_cast %77 : vector<1x1x48xf32> to vector<1x48xf32>
    %79 = arith.subf %76, %78 : vector<1x48xf32>
    %80 = math.exp %79 : vector<1x48xf32>
    %cst_31 = arith.constant 1.000000e+00 : f32
    %81 = vector.broadcast %cst_31 : f32 to vector<1x48xf32>
    %82 = arith.addf %81, %80 : vector<1x48xf32>
    %83 = tpu.reciprocal %82 {approx = true} : vector<1x48xf32> -> vector<1x48xf32>
    %c0_32 = arith.constant 0 : index
    %c0_33 = arith.constant 0 : index
    %c0_34 = arith.constant 0 : index
    %84 = vector.load %arg6[%c0_32, %c0_33, %c0_34] : memref<1x1x48xf32, #tpu.memory_space<vmem>>, vector<1x1x48xf32>
    %85 = vector.shape_cast %84 : vector<1x1x48xf32> to vector<1x48xf32>
    %86 = vector.shape_cast %83 : vector<1x48xf32> to vector<1x1x48xf32>
    tpu.vector_store %arg6[%c0_32, %c0_33, %c0_34], %86 {strides = array<i32>} : memref<1x1x48xf32, #tpu.memory_space<vmem>>, vector<1x1x48xf32>,
    return
  }
  func.func @transform_0(%arg0: i32) -> (i32, i32) {
    %c0_i32 = arith.constant 0 : i32
    %c0_i32_0 = arith.constant 0 : i32
    %c0_i32_1 = arith.constant 0 : i32
    return %c0_i32, %c0_i32_0 : i32, i32
  }
  func.func @transform_1(%arg0: i32) -> (i32, i32, i32) {
    %c0_i32 = arith.constant 0 : i32
    %c0_i32_0 = arith.constant 0 : i32
    %c0_i32_1 = arith.constant 0 : i32
    return %arg0, %c0_i32, %c0_i32_0 : i32, i32, i32
  }
  func.func @transform_2(%arg0: i32) -> (i32, i32, i32) {
    %c0_i32 = arith.constant 0 : i32
    %c0_i32_0 = arith.constant 0 : i32
    %c0_i32_1 = arith.constant 0 : i32
    return %arg0, %c0_i32, %c0_i32_0 : i32, i32, i32
  }
  func.func @transform_3(%arg0: i32) -> (i32, i32) {
    %c0_i32 = arith.constant 0 : i32
    %c0_i32_0 = arith.constant 0 : i32
    %c0_i32_1 = arith.constant 0 : i32
    return %c0_i32, %c0_i32_0 : i32, i32
  }
  func.func @transform_4(%arg0: i32) -> (i32, i32, i32) {
    %c0_i32 = arith.constant 0 : i32
    %c0_i32_0 = arith.constant 0 : i32
    %c0_i32_1 = arith.constant 0 : i32
    return %arg0, %c0_i32, %c0_i32_0 : i32, i32, i32
  }
  func.func @transform_5(%arg0: i32) -> (i32, i32, i32) {
    %c0_i32 = arith.constant 0 : i32
    %c0_i32_0 = arith.constant 0 : i32
    %c0_i32_1 = arith.constant 0 : i32
    return %arg0, %c0_i32, %c0_i32_0 : i32, i32, i32
  }
}

module attributes {stable_mosaic.version = 11 : i64} {
  func.func @_roi_pool_kernel(%arg0: i32, %arg1: memref<2x16xi32, #tpu.memory_space<smem>>, %arg2: memref<2x16xi32, #tpu.memory_space<smem>>, %arg3: memref<2x16xi32, #tpu.memory_space<smem>>, %arg4: memref<2x16xi32, #tpu.memory_space<smem>>, %arg5: memref<1x4x4x128xf32, #tpu.memory_space<vmem>>, %arg6: memref<1x8x1x512xf32, #tpu.memory_space<vmem>>) attributes {dimension_semantics = [#tpu.dimension_semantics<parallel>], iteration_bounds = array<i64: 2>, scalar_prefetch = 4 : i64, scratch_operands = 0 : i64, tpu.core_type = #tpu.core_type<tc>, window_params = [{transform_indices = @transform_0, window_bounds = array<i64: 1, 4, 4, 128>}, {transform_indices = @transform_1, window_bounds = array<i64: 1, 8, 1, 512>}]} {
    %0 = tpu.iota {dimensions = array<i32: 0>} : vector<4x4x1xi32>
    %1 = tpu.iota {dimensions = array<i32: 1>} : vector<4x4x1xi32>
    %c0_i32 = arith.constant 0 : i32
    %c2_i32 = arith.constant 2 : i32
    %2 = arith.muli %c0_i32, %c2_i32 : i32
    %c0_i32_0 = arith.constant 0 : i32
    %3 = arith.addi %2, %c0_i32_0 : i32
    %4 = arith.index_cast %arg0 : i32 to index
    %5 = arith.index_cast %3 : i32 to index
    %6 = memref.load %arg1[%4, %5] : memref<2x16xi32, #tpu.memory_space<smem>>
    %c2_i32_1 = arith.constant 2 : i32
    %7 = arith.muli %c0_i32, %c2_i32_1 : i32
    %c0_i32_2 = arith.constant 0 : i32
    %8 = arith.addi %7, %c0_i32_2 : i32
    %9 = arith.index_cast %arg0 : i32 to index
    %10 = arith.index_cast %8 : i32 to index
    %11 = memref.load %arg2[%9, %10] : memref<2x16xi32, #tpu.memory_space<smem>>
    %c0_i32_3 = arith.constant 0 : i32
    %12 = arith.minsi %6, %c0_i32_3 : i32
    %c0 = arith.constant 0 : index
    %13 = arith.index_cast %12 : i32 to index
    %c0_4 = arith.constant 0 : index
    %c0_5 = arith.constant 0 : index
    %14 = vector.load %arg5[%c0, %13, %c0_4, %c0_5] : memref<1x4x4x128xf32, #tpu.memory_space<vmem>>, vector<1x4x4x128xf32>
    %15 = vector.shape_cast %14 : vector<1x4x4x128xf32> to vector<4x4x128xf32>
    %16 = vector.broadcast %12 : i32 to vector<4x4x1xi32>
    %17 = arith.addi %0, %16 : vector<4x4x1xi32>
    %c2_i32_6 = arith.constant 2 : i32
    %18 = arith.muli %c0_i32, %c2_i32_6 : i32
    %c0_i32_7 = arith.constant 0 : i32
    %19 = arith.addi %18, %c0_i32_7 : i32
    %20 = arith.index_cast %arg0 : i32 to index
    %21 = arith.index_cast %19 : i32 to index
    %22 = memref.load %arg3[%20, %21] : memref<2x16xi32, #tpu.memory_space<smem>>
    %c2_i32_8 = arith.constant 2 : i32
    %23 = arith.muli %c0_i32, %c2_i32_8 : i32
    %c0_i32_9 = arith.constant 0 : i32
    %24 = arith.addi %23, %c0_i32_9 : i32
    %25 = arith.index_cast %arg0 : i32 to index
    %26 = arith.index_cast %24 : i32 to index
    %27 = memref.load %arg4[%25, %26] : memref<2x16xi32, #tpu.memory_space<smem>>
    %28 = vector.broadcast %6 : i32 to vector<4x4x1xi32>
    %29 = arith.cmpi sge, %17, %28 : vector<4x4x1xi32>
    %30 = vector.broadcast %11 : i32 to vector<4x4x1xi32>
    %31 = arith.cmpi slt, %17, %30 : vector<4x4x1xi32>
    %32 = arith.andi %29, %31 : vector<4x4x1xi1>
    %33 = vector.broadcast %22 : i32 to vector<4x4x1xi32>
    %34 = arith.cmpi sge, %1, %33 : vector<4x4x1xi32>
    %35 = arith.andi %32, %34 : vector<4x4x1xi1>
    %36 = vector.broadcast %27 : i32 to vector<4x4x1xi32>
    %37 = arith.cmpi slt, %1, %36 : vector<4x4x1xi32>
    %38 = arith.andi %35, %37 : vector<4x4x1xi1>
    %cst = arith.constant 0xFF800000 : f32
    %39 = vector.shape_cast %38 : vector<4x4x1xi1> to vector<4x4x1xi1>
    %40 = vector.broadcast %39 : vector<4x4x1xi1> to vector<4x4x128xi1>
    %41 = vector.broadcast %cst : f32 to vector<4x4x128xf32>
    %42 = arith.select %40, %15, %41 : vector<4x4x128xi1>, vector<4x4x128xf32>
    %cst_10 = arith.constant dense<0xFF800000> : vector<128xf32>
    %43 = vector.multi_reduction <maximumf>, %42, %cst_10 [0, 1] : vector<4x4x128xf32> to vector<128xf32>
    %44 = vector.shape_cast %43 : vector<128xf32> to vector<1x1x128xf32>
    %45 = arith.cmpi sle, %11, %6 : i32
    %46 = arith.cmpi sle, %27, %22 : i32
    %47 = arith.ori %45, %46 : i1
    %cst_11 = arith.constant 0.000000e+00 : f32
    %48 = vector.broadcast %cst_11 : f32 to vector<1x1x128xf32>
    %49 = arith.select %47, %48, %44 : vector<1x1x128xf32>
    %c2_i32_12 = arith.constant 2 : i32
    %50 = arith.muli %c0_i32, %c2_i32_12 : i32
    %c1_i32 = arith.constant 1 : i32
    %51 = arith.addi %50, %c1_i32 : i32
    %52 = arith.index_cast %arg0 : i32 to index
    %53 = arith.index_cast %51 : i32 to index
    %54 = memref.load %arg3[%52, %53] : memref<2x16xi32, #tpu.memory_space<smem>>
    %c2_i32_13 = arith.constant 2 : i32
    %55 = arith.muli %c0_i32, %c2_i32_13 : i32
    %c1_i32_14 = arith.constant 1 : i32
    %56 = arith.addi %55, %c1_i32_14 : i32
    %57 = arith.index_cast %arg0 : i32 to index
    %58 = arith.index_cast %56 : i32 to index
    %59 = memref.load %arg4[%57, %58] : memref<2x16xi32, #tpu.memory_space<smem>>
    %60 = vector.broadcast %6 : i32 to vector<4x4x1xi32>
    %61 = arith.cmpi sge, %17, %60 : vector<4x4x1xi32>
    %62 = vector.broadcast %11 : i32 to vector<4x4x1xi32>
    %63 = arith.cmpi slt, %17, %62 : vector<4x4x1xi32>
    %64 = arith.andi %61, %63 : vector<4x4x1xi1>
    %65 = vector.broadcast %54 : i32 to vector<4x4x1xi32>
    %66 = arith.cmpi sge, %1, %65 : vector<4x4x1xi32>
    %67 = arith.andi %64, %66 : vector<4x4x1xi1>
    %68 = vector.broadcast %59 : i32 to vector<4x4x1xi32>
    %69 = arith.cmpi slt, %1, %68 : vector<4x4x1xi32>
    %70 = arith.andi %67, %69 : vector<4x4x1xi1>
    %cst_15 = arith.constant 0xFF800000 : f32
    %71 = vector.shape_cast %70 : vector<4x4x1xi1> to vector<4x4x1xi1>
    %72 = vector.broadcast %71 : vector<4x4x1xi1> to vector<4x4x128xi1>
    %73 = vector.broadcast %cst_15 : f32 to vector<4x4x128xf32>
    %74 = arith.select %72, %15, %73 : vector<4x4x128xi1>, vector<4x4x128xf32>
    %cst_16 = arith.constant dense<0xFF800000> : vector<128xf32>
    %75 = vector.multi_reduction <maximumf>, %74, %cst_16 [0, 1] : vector<4x4x128xf32> to vector<128xf32>
    %76 = vector.shape_cast %75 : vector<128xf32> to vector<1x1x128xf32>
    %77 = arith.cmpi sle, %11, %6 : i32
    %78 = arith.cmpi sle, %59, %54 : i32
    %79 = arith.ori %77, %78 : i1
    %cst_17 = arith.constant 0.000000e+00 : f32
    %80 = vector.broadcast %cst_17 : f32 to vector<1x1x128xf32>
    %81 = arith.select %79, %80, %76 : vector<1x1x128xf32>
    %c2_i32_18 = arith.constant 2 : i32
    %82 = arith.muli %c0_i32, %c2_i32_18 : i32
    %c1_i32_19 = arith.constant 1 : i32
    %83 = arith.addi %82, %c1_i32_19 : i32
    %84 = arith.index_cast %arg0 : i32 to index
    %85 = arith.index_cast %83 : i32 to index
    %86 = memref.load %arg1[%84, %85] : memref<2x16xi32, #tpu.memory_space<smem>>
    %c2_i32_20 = arith.constant 2 : i32
    %87 = arith.muli %c0_i32, %c2_i32_20 : i32
    %c1_i32_21 = arith.constant 1 : i32
    %88 = arith.addi %87, %c1_i32_21 : i32
    %89 = arith.index_cast %arg0 : i32 to index
    %90 = arith.index_cast %88 : i32 to index
    %91 = memref.load %arg2[%89, %90] : memref<2x16xi32, #tpu.memory_space<smem>>
    %c0_i32_22 = arith.constant 0 : i32
    %92 = arith.minsi %86, %c0_i32_22 : i32
    %c0_23 = arith.constant 0 : index
    %93 = arith.index_cast %92 : i32 to index
    %c0_24 = arith.constant 0 : index
    %c0_25 = arith.constant 0 : index
    %94 = vector.load %arg5[%c0_23, %93, %c0_24, %c0_25] : memref<1x4x4x128xf32, #tpu.memory_space<vmem>>, vector<1x4x4x128xf32>
    %95 = vector.shape_cast %94 : vector<1x4x4x128xf32> to vector<4x4x128xf32>
    %96 = vector.broadcast %92 : i32 to vector<4x4x1xi32>
    %97 = arith.addi %0, %96 : vector<4x4x1xi32>
    %c2_i32_26 = arith.constant 2 : i32
    %98 = arith.muli %c0_i32, %c2_i32_26 : i32
    %c0_i32_27 = arith.constant 0 : i32
    %99 = arith.addi %98, %c0_i32_27 : i32
    %100 = arith.index_cast %arg0 : i32 to index
    %101 = arith.index_cast %99 : i32 to index
    %102 = memref.load %arg3[%100, %101] : memref<2x16xi32, #tpu.memory_space<smem>>
    %c2_i32_28 = arith.constant 2 : i32
    %103 = arith.muli %c0_i32, %c2_i32_28 : i32
    %c0_i32_29 = arith.constant 0 : i32
    %104 = arith.addi %103, %c0_i32_29 : i32
    %105 = arith.index_cast %arg0 : i32 to index
    %106 = arith.index_cast %104 : i32 to index
    %107 = memref.load %arg4[%105, %106] : memref<2x16xi32, #tpu.memory_space<smem>>
    %108 = vector.broadcast %86 : i32 to vector<4x4x1xi32>
    %109 = arith.cmpi sge, %97, %108 : vector<4x4x1xi32>
    %110 = vector.broadcast %91 : i32 to vector<4x4x1xi32>
    %111 = arith.cmpi slt, %97, %110 : vector<4x4x1xi32>
    %112 = arith.andi %109, %111 : vector<4x4x1xi1>
    %113 = vector.broadcast %102 : i32 to vector<4x4x1xi32>
    %114 = arith.cmpi sge, %1, %113 : vector<4x4x1xi32>
    %115 = arith.andi %112, %114 : vector<4x4x1xi1>
    %116 = vector.broadcast %107 : i32 to vector<4x4x1xi32>
    %117 = arith.cmpi slt, %1, %116 : vector<4x4x1xi32>
    %118 = arith.andi %115, %117 : vector<4x4x1xi1>
    %cst_30 = arith.constant 0xFF800000 : f32
    %119 = vector.shape_cast %118 : vector<4x4x1xi1> to vector<4x4x1xi1>
    %120 = vector.broadcast %119 : vector<4x4x1xi1> to vector<4x4x128xi1>
    %121 = vector.broadcast %cst_30 : f32 to vector<4x4x128xf32>
    %122 = arith.select %120, %95, %121 : vector<4x4x128xi1>, vector<4x4x128xf32>
    %cst_31 = arith.constant dense<0xFF800000> : vector<128xf32>
    %123 = vector.multi_reduction <maximumf>, %122, %cst_31 [0, 1] : vector<4x4x128xf32> to vector<128xf32>
    %124 = vector.shape_cast %123 : vector<128xf32> to vector<1x1x128xf32>
    %125 = arith.cmpi sle, %91, %86 : i32
    %126 = arith.cmpi sle, %107, %102 : i32
    %127 = arith.ori %125, %126 : i1
    %cst_32 = arith.constant 0.000000e+00 : f32
    %128 = vector.broadcast %cst_32 : f32 to vector<1x1x128xf32>
    %129 = arith.select %127, %128, %124 : vector<1x1x128xf32>
    %c2_i32_33 = arith.constant 2 : i32
    %130 = arith.muli %c0_i32, %c2_i32_33 : i32
    %c1_i32_34 = arith.constant 1 : i32
    %131 = arith.addi %130, %c1_i32_34 : i32
    %132 = arith.index_cast %arg0 : i32 to index
    %133 = arith.index_cast %131 : i32 to index
    %134 = memref.load %arg3[%132, %133] : memref<2x16xi32, #tpu.memory_space<smem>>
    %c2_i32_35 = arith.constant 2 : i32
    %135 = arith.muli %c0_i32, %c2_i32_35 : i32
    %c1_i32_36 = arith.constant 1 : i32
    %136 = arith.addi %135, %c1_i32_36 : i32
    %137 = arith.index_cast %arg0 : i32 to index
    %138 = arith.index_cast %136 : i32 to index
    %139 = memref.load %arg4[%137, %138] : memref<2x16xi32, #tpu.memory_space<smem>>
    %140 = vector.broadcast %86 : i32 to vector<4x4x1xi32>
    %141 = arith.cmpi sge, %97, %140 : vector<4x4x1xi32>
    %142 = vector.broadcast %91 : i32 to vector<4x4x1xi32>
    %143 = arith.cmpi slt, %97, %142 : vector<4x4x1xi32>
    %144 = arith.andi %141, %143 : vector<4x4x1xi1>
    %145 = vector.broadcast %134 : i32 to vector<4x4x1xi32>
    %146 = arith.cmpi sge, %1, %145 : vector<4x4x1xi32>
    %147 = arith.andi %144, %146 : vector<4x4x1xi1>
    %148 = vector.broadcast %139 : i32 to vector<4x4x1xi32>
    %149 = arith.cmpi slt, %1, %148 : vector<4x4x1xi32>
    %150 = arith.andi %147, %149 : vector<4x4x1xi1>
    %cst_37 = arith.constant 0xFF800000 : f32
    %151 = vector.shape_cast %150 : vector<4x4x1xi1> to vector<4x4x1xi1>
    %152 = vector.broadcast %151 : vector<4x4x1xi1> to vector<4x4x128xi1>
    %153 = vector.broadcast %cst_37 : f32 to vector<4x4x128xf32>
    %154 = arith.select %152, %95, %153 : vector<4x4x128xi1>, vector<4x4x128xf32>
    %cst_38 = arith.constant dense<0xFF800000> : vector<128xf32>
    %155 = vector.multi_reduction <maximumf>, %154, %cst_38 [0, 1] : vector<4x4x128xf32> to vector<128xf32>
    %156 = vector.shape_cast %155 : vector<128xf32> to vector<1x1x128xf32>
    %157 = arith.cmpi sle, %91, %86 : i32
    %158 = arith.cmpi sle, %139, %134 : i32
    %159 = arith.ori %157, %158 : i1
    %cst_39 = arith.constant 0.000000e+00 : f32
    %160 = vector.broadcast %cst_39 : f32 to vector<1x1x128xf32>
    %161 = arith.select %159, %160, %156 : vector<1x1x128xf32>
    %162 = tpu.concatenate %49, %81, %129, %161 in 2 : vector<1x1x128xf32>, vector<1x1x128xf32>, vector<1x1x128xf32>, vector<1x1x128xf32> -> vector<1x1x512xf32>
    %c0_40 = arith.constant 0 : index
    %163 = arith.index_cast %c0_i32 : i32 to index
    %c0_41 = arith.constant 0 : index
    %c0_42 = arith.constant 0 : index
    %164 = vector.load %arg6[%c0_40, %163, %c0_41, %c0_42] : memref<1x8x1x512xf32, #tpu.memory_space<vmem>>, vector<1x1x1x512xf32>
    %165 = vector.shape_cast %164 : vector<1x1x1x512xf32> to vector<1x1x512xf32>
    %166 = vector.shape_cast %162 : vector<1x1x512xf32> to vector<1x1x1x512xf32>
    tpu.vector_store %arg6[%c0_40, %163, %c0_41, %c0_42], %166 {strides = array<i32>} : memref<1x8x1x512xf32, #tpu.memory_space<vmem>>, vector<1x1x1x512xf32>,
    %c1_i32_43 = arith.constant 1 : i32
    %c2_i32_44 = arith.constant 2 : i32
    %167 = arith.muli %c1_i32_43, %c2_i32_44 : i32
    %c0_i32_45 = arith.constant 0 : i32
    %168 = arith.addi %167, %c0_i32_45 : i32
    %169 = arith.index_cast %arg0 : i32 to index
    %170 = arith.index_cast %168 : i32 to index
    %171 = memref.load %arg1[%169, %170] : memref<2x16xi32, #tpu.memory_space<smem>>
    %c2_i32_46 = arith.constant 2 : i32
    %172 = arith.muli %c1_i32_43, %c2_i32_46 : i32
    %c0_i32_47 = arith.constant 0 : i32
    %173 = arith.addi %172, %c0_i32_47 : i32
    %174 = arith.index_cast %arg0 : i32 to index
    %175 = arith.index_cast %173 : i32 to index
    %176 = memref.load %arg2[%174, %175] : memref<2x16xi32, #tpu.memory_space<smem>>
    %c0_i32_48 = arith.constant 0 : i32
    %177 = arith.minsi %171, %c0_i32_48 : i32
    %c0_49 = arith.constant 0 : index
    %178 = arith.index_cast %177 : i32 to index
    %c0_50 = arith.constant 0 : index
    %c0_51 = arith.constant 0 : index
    %179 = vector.load %arg5[%c0_49, %178, %c0_50, %c0_51] : memref<1x4x4x128xf32, #tpu.memory_space<vmem>>, vector<1x4x4x128xf32>
    %180 = vector.shape_cast %179 : vector<1x4x4x128xf32> to vector<4x4x128xf32>
    %181 = vector.broadcast %177 : i32 to vector<4x4x1xi32>
    %182 = arith.addi %0, %181 : vector<4x4x1xi32>
    %c2_i32_52 = arith.constant 2 : i32
    %183 = arith.muli %c1_i32_43, %c2_i32_52 : i32
    %c0_i32_53 = arith.constant 0 : i32
    %184 = arith.addi %183, %c0_i32_53 : i32
    %185 = arith.index_cast %arg0 : i32 to index
    %186 = arith.index_cast %184 : i32 to index
    %187 = memref.load %arg3[%185, %186] : memref<2x16xi32, #tpu.memory_space<smem>>
    %c2_i32_54 = arith.constant 2 : i32
    %188 = arith.muli %c1_i32_43, %c2_i32_54 : i32
    %c0_i32_55 = arith.constant 0 : i32
    %189 = arith.addi %188, %c0_i32_55 : i32
    %190 = arith.index_cast %arg0 : i32 to index
    %191 = arith.index_cast %189 : i32 to index
    %192 = memref.load %arg4[%190, %191] : memref<2x16xi32, #tpu.memory_space<smem>>
    %193 = vector.broadcast %171 : i32 to vector<4x4x1xi32>
    %194 = arith.cmpi sge, %182, %193 : vector<4x4x1xi32>
    %195 = vector.broadcast %176 : i32 to vector<4x4x1xi32>
    %196 = arith.cmpi slt, %182, %195 : vector<4x4x1xi32>
    %197 = arith.andi %194, %196 : vector<4x4x1xi1>
    %198 = vector.broadcast %187 : i32 to vector<4x4x1xi32>
    %199 = arith.cmpi sge, %1, %198 : vector<4x4x1xi32>
    %200 = arith.andi %197, %199 : vector<4x4x1xi1>
    %201 = vector.broadcast %192 : i32 to vector<4x4x1xi32>
    %202 = arith.cmpi slt, %1, %201 : vector<4x4x1xi32>
    %203 = arith.andi %200, %202 : vector<4x4x1xi1>
    %cst_56 = arith.constant 0xFF800000 : f32
    %204 = vector.shape_cast %203 : vector<4x4x1xi1> to vector<4x4x1xi1>
    %205 = vector.broadcast %204 : vector<4x4x1xi1> to vector<4x4x128xi1>
    %206 = vector.broadcast %cst_56 : f32 to vector<4x4x128xf32>
    %207 = arith.select %205, %180, %206 : vector<4x4x128xi1>, vector<4x4x128xf32>
    %cst_57 = arith.constant dense<0xFF800000> : vector<128xf32>
    %208 = vector.multi_reduction <maximumf>, %207, %cst_57 [0, 1] : vector<4x4x128xf32> to vector<128xf32>
    %209 = vector.shape_cast %208 : vector<128xf32> to vector<1x1x128xf32>
    %210 = arith.cmpi sle, %176, %171 : i32
    %211 = arith.cmpi sle, %192, %187 : i32
    %212 = arith.ori %210, %211 : i1
    %cst_58 = arith.constant 0.000000e+00 : f32
    %213 = vector.broadcast %cst_58 : f32 to vector<1x1x128xf32>
    %214 = arith.select %212, %213, %209 : vector<1x1x128xf32>
    %c2_i32_59 = arith.constant 2 : i32
    %215 = arith.muli %c1_i32_43, %c2_i32_59 : i32
    %c1_i32_60 = arith.constant 1 : i32
    %216 = arith.addi %215, %c1_i32_60 : i32
    %217 = arith.index_cast %arg0 : i32 to index
    %218 = arith.index_cast %216 : i32 to index
    %219 = memref.load %arg3[%217, %218] : memref<2x16xi32, #tpu.memory_space<smem>>
    %c2_i32_61 = arith.constant 2 : i32
    %220 = arith.muli %c1_i32_43, %c2_i32_61 : i32
    %c1_i32_62 = arith.constant 1 : i32
    %221 = arith.addi %220, %c1_i32_62 : i32
    %222 = arith.index_cast %arg0 : i32 to index
    %223 = arith.index_cast %221 : i32 to index
    %224 = memref.load %arg4[%222, %223] : memref<2x16xi32, #tpu.memory_space<smem>>
    %225 = vector.broadcast %171 : i32 to vector<4x4x1xi32>
    %226 = arith.cmpi sge, %182, %225 : vector<4x4x1xi32>
    %227 = vector.broadcast %176 : i32 to vector<4x4x1xi32>
    %228 = arith.cmpi slt, %182, %227 : vector<4x4x1xi32>
    %229 = arith.andi %226, %228 : vector<4x4x1xi1>
    %230 = vector.broadcast %219 : i32 to vector<4x4x1xi32>
    %231 = arith.cmpi sge, %1, %230 : vector<4x4x1xi32>
    %232 = arith.andi %229, %231 : vector<4x4x1xi1>
    %233 = vector.broadcast %224 : i32 to vector<4x4x1xi32>
    %234 = arith.cmpi slt, %1, %233 : vector<4x4x1xi32>
    %235 = arith.andi %232, %234 : vector<4x4x1xi1>
    %cst_63 = arith.constant 0xFF800000 : f32
    %236 = vector.shape_cast %235 : vector<4x4x1xi1> to vector<4x4x1xi1>
    %237 = vector.broadcast %236 : vector<4x4x1xi1> to vector<4x4x128xi1>
    %238 = vector.broadcast %cst_63 : f32 to vector<4x4x128xf32>
    %239 = arith.select %237, %180, %238 : vector<4x4x128xi1>, vector<4x4x128xf32>
    %cst_64 = arith.constant dense<0xFF800000> : vector<128xf32>
    %240 = vector.multi_reduction <maximumf>, %239, %cst_64 [0, 1] : vector<4x4x128xf32> to vector<128xf32>
    %241 = vector.shape_cast %240 : vector<128xf32> to vector<1x1x128xf32>
    %242 = arith.cmpi sle, %176, %171 : i32
    %243 = arith.cmpi sle, %224, %219 : i32
    %244 = arith.ori %242, %243 : i1
    %cst_65 = arith.constant 0.000000e+00 : f32
    %245 = vector.broadcast %cst_65 : f32 to vector<1x1x128xf32>
    %246 = arith.select %244, %245, %241 : vector<1x1x128xf32>
    %c2_i32_66 = arith.constant 2 : i32
    %247 = arith.muli %c1_i32_43, %c2_i32_66 : i32
    %c1_i32_67 = arith.constant 1 : i32
    %248 = arith.addi %247, %c1_i32_67 : i32
    %249 = arith.index_cast %arg0 : i32 to index
    %250 = arith.index_cast %248 : i32 to index
    %251 = memref.load %arg1[%249, %250] : memref<2x16xi32, #tpu.memory_space<smem>>
    %c2_i32_68 = arith.constant 2 : i32
    %252 = arith.muli %c1_i32_43, %c2_i32_68 : i32
    %c1_i32_69 = arith.constant 1 : i32
    %253 = arith.addi %252, %c1_i32_69 : i32
    %254 = arith.index_cast %arg0 : i32 to index
    %255 = arith.index_cast %253 : i32 to index
    %256 = memref.load %arg2[%254, %255] : memref<2x16xi32, #tpu.memory_space<smem>>
    %c0_i32_70 = arith.constant 0 : i32
    %257 = arith.minsi %251, %c0_i32_70 : i32
    %c0_71 = arith.constant 0 : index
    %258 = arith.index_cast %257 : i32 to index
    %c0_72 = arith.constant 0 : index
    %c0_73 = arith.constant 0 : index
    %259 = vector.load %arg5[%c0_71, %258, %c0_72, %c0_73] : memref<1x4x4x128xf32, #tpu.memory_space<vmem>>, vector<1x4x4x128xf32>
    %260 = vector.shape_cast %259 : vector<1x4x4x128xf32> to vector<4x4x128xf32>
    %261 = vector.broadcast %257 : i32 to vector<4x4x1xi32>
    %262 = arith.addi %0, %261 : vector<4x4x1xi32>
    %c2_i32_74 = arith.constant 2 : i32
    %263 = arith.muli %c1_i32_43, %c2_i32_74 : i32
    %c0_i32_75 = arith.constant 0 : i32
    %264 = arith.addi %263, %c0_i32_75 : i32
    %265 = arith.index_cast %arg0 : i32 to index
    %266 = arith.index_cast %264 : i32 to index
    %267 = memref.load %arg3[%265, %266] : memref<2x16xi32, #tpu.memory_space<smem>>
    %c2_i32_76 = arith.constant 2 : i32
    %268 = arith.muli %c1_i32_43, %c2_i32_76 : i32
    %c0_i32_77 = arith.constant 0 : i32
    %269 = arith.addi %268, %c0_i32_77 : i32
    %270 = arith.index_cast %arg0 : i32 to index
    %271 = arith.index_cast %269 : i32 to index
    %272 = memref.load %arg4[%270, %271] : memref<2x16xi32, #tpu.memory_space<smem>>
    %273 = vector.broadcast %251 : i32 to vector<4x4x1xi32>
    %274 = arith.cmpi sge, %262, %273 : vector<4x4x1xi32>
    %275 = vector.broadcast %256 : i32 to vector<4x4x1xi32>
    %276 = arith.cmpi slt, %262, %275 : vector<4x4x1xi32>
    %277 = arith.andi %274, %276 : vector<4x4x1xi1>
    %278 = vector.broadcast %267 : i32 to vector<4x4x1xi32>
    %279 = arith.cmpi sge, %1, %278 : vector<4x4x1xi32>
    %280 = arith.andi %277, %279 : vector<4x4x1xi1>
    %281 = vector.broadcast %272 : i32 to vector<4x4x1xi32>
    %282 = arith.cmpi slt, %1, %281 : vector<4x4x1xi32>
    %283 = arith.andi %280, %282 : vector<4x4x1xi1>
    %cst_78 = arith.constant 0xFF800000 : f32
    %284 = vector.shape_cast %283 : vector<4x4x1xi1> to vector<4x4x1xi1>
    %285 = vector.broadcast %284 : vector<4x4x1xi1> to vector<4x4x128xi1>
    %286 = vector.broadcast %cst_78 : f32 to vector<4x4x128xf32>
    %287 = arith.select %285, %260, %286 : vector<4x4x128xi1>, vector<4x4x128xf32>
    %cst_79 = arith.constant dense<0xFF800000> : vector<128xf32>
    %288 = vector.multi_reduction <maximumf>, %287, %cst_79 [0, 1] : vector<4x4x128xf32> to vector<128xf32>
    %289 = vector.shape_cast %288 : vector<128xf32> to vector<1x1x128xf32>
    %290 = arith.cmpi sle, %256, %251 : i32
    %291 = arith.cmpi sle, %272, %267 : i32
    %292 = arith.ori %290, %291 : i1
    %cst_80 = arith.constant 0.000000e+00 : f32
    %293 = vector.broadcast %cst_80 : f32 to vector<1x1x128xf32>
    %294 = arith.select %292, %293, %289 : vector<1x1x128xf32>
    %c2_i32_81 = arith.constant 2 : i32
    %295 = arith.muli %c1_i32_43, %c2_i32_81 : i32
    %c1_i32_82 = arith.constant 1 : i32
    %296 = arith.addi %295, %c1_i32_82 : i32
    %297 = arith.index_cast %arg0 : i32 to index
    %298 = arith.index_cast %296 : i32 to index
    %299 = memref.load %arg3[%297, %298] : memref<2x16xi32, #tpu.memory_space<smem>>
    %c2_i32_83 = arith.constant 2 : i32
    %300 = arith.muli %c1_i32_43, %c2_i32_83 : i32
    %c1_i32_84 = arith.constant 1 : i32
    %301 = arith.addi %300, %c1_i32_84 : i32
    %302 = arith.index_cast %arg0 : i32 to index
    %303 = arith.index_cast %301 : i32 to index
    %304 = memref.load %arg4[%302, %303] : memref<2x16xi32, #tpu.memory_space<smem>>
    %305 = vector.broadcast %251 : i32 to vector<4x4x1xi32>
    %306 = arith.cmpi sge, %262, %305 : vector<4x4x1xi32>
    %307 = vector.broadcast %256 : i32 to vector<4x4x1xi32>
    %308 = arith.cmpi slt, %262, %307 : vector<4x4x1xi32>
    %309 = arith.andi %306, %308 : vector<4x4x1xi1>
    %310 = vector.broadcast %299 : i32 to vector<4x4x1xi32>
    %311 = arith.cmpi sge, %1, %310 : vector<4x4x1xi32>
    %312 = arith.andi %309, %311 : vector<4x4x1xi1>
    %313 = vector.broadcast %304 : i32 to vector<4x4x1xi32>
    %314 = arith.cmpi slt, %1, %313 : vector<4x4x1xi32>
    %315 = arith.andi %312, %314 : vector<4x4x1xi1>
    %cst_85 = arith.constant 0xFF800000 : f32
    %316 = vector.shape_cast %315 : vector<4x4x1xi1> to vector<4x4x1xi1>
    %317 = vector.broadcast %316 : vector<4x4x1xi1> to vector<4x4x128xi1>
    %318 = vector.broadcast %cst_85 : f32 to vector<4x4x128xf32>
    %319 = arith.select %317, %260, %318 : vector<4x4x128xi1>, vector<4x4x128xf32>
    %cst_86 = arith.constant dense<0xFF800000> : vector<128xf32>
    %320 = vector.multi_reduction <maximumf>, %319, %cst_86 [0, 1] : vector<4x4x128xf32> to vector<128xf32>
    %321 = vector.shape_cast %320 : vector<128xf32> to vector<1x1x128xf32>
    %322 = arith.cmpi sle, %256, %251 : i32
    %323 = arith.cmpi sle, %304, %299 : i32
    %324 = arith.ori %322, %323 : i1
    %cst_87 = arith.constant 0.000000e+00 : f32
    %325 = vector.broadcast %cst_87 : f32 to vector<1x1x128xf32>
    %326 = arith.select %324, %325, %321 : vector<1x1x128xf32>
    %327 = tpu.concatenate %214, %246, %294, %326 in 2 : vector<1x1x128xf32>, vector<1x1x128xf32>, vector<1x1x128xf32>, vector<1x1x128xf32> -> vector<1x1x512xf32>
    %c0_88 = arith.constant 0 : index
    %328 = arith.index_cast %c1_i32_43 : i32 to index
    %c0_89 = arith.constant 0 : index
    %c0_90 = arith.constant 0 : index
    %329 = vector.load %arg6[%c0_88, %328, %c0_89, %c0_90] : memref<1x8x1x512xf32, #tpu.memory_space<vmem>>, vector<1x1x1x512xf32>
    %330 = vector.shape_cast %329 : vector<1x1x1x512xf32> to vector<1x1x512xf32>
    %331 = vector.shape_cast %327 : vector<1x1x512xf32> to vector<1x1x1x512xf32>
    tpu.vector_store %arg6[%c0_88, %328, %c0_89, %c0_90], %331 {strides = array<i32>} : memref<1x8x1x512xf32, #tpu.memory_space<vmem>>, vector<1x1x1x512xf32>,
    %c2_i32_91 = arith.constant 2 : i32
    %c2_i32_92 = arith.constant 2 : i32
    %332 = arith.muli %c2_i32_91, %c2_i32_92 : i32
    %c0_i32_93 = arith.constant 0 : i32
    %333 = arith.addi %332, %c0_i32_93 : i32
    %334 = arith.index_cast %arg0 : i32 to index
    %335 = arith.index_cast %333 : i32 to index
    %336 = memref.load %arg1[%334, %335] : memref<2x16xi32, #tpu.memory_space<smem>>
    %c2_i32_94 = arith.constant 2 : i32
    %337 = arith.muli %c2_i32_91, %c2_i32_94 : i32
    %c0_i32_95 = arith.constant 0 : i32
    %338 = arith.addi %337, %c0_i32_95 : i32
    %339 = arith.index_cast %arg0 : i32 to index
    %340 = arith.index_cast %338 : i32 to index
    %341 = memref.load %arg2[%339, %340] : memref<2x16xi32, #tpu.memory_space<smem>>
    %c0_i32_96 = arith.constant 0 : i32
    %342 = arith.minsi %336, %c0_i32_96 : i32
    %c0_97 = arith.constant 0 : index
    %343 = arith.index_cast %342 : i32 to index
    %c0_98 = arith.constant 0 : index
    %c0_99 = arith.constant 0 : index
    %344 = vector.load %arg5[%c0_97, %343, %c0_98, %c0_99] : memref<1x4x4x128xf32, #tpu.memory_space<vmem>>, vector<1x4x4x128xf32>
    %345 = vector.shape_cast %344 : vector<1x4x4x128xf32> to vector<4x4x128xf32>
    %346 = vector.broadcast %342 : i32 to vector<4x4x1xi32>
    %347 = arith.addi %0, %346 : vector<4x4x1xi32>
    %c2_i32_100 = arith.constant 2 : i32
    %348 = arith.muli %c2_i32_91, %c2_i32_100 : i32
    %c0_i32_101 = arith.constant 0 : i32
    %349 = arith.addi %348, %c0_i32_101 : i32
    %350 = arith.index_cast %arg0 : i32 to index
    %351 = arith.index_cast %349 : i32 to index
    %352 = memref.load %arg3[%350, %351] : memref<2x16xi32, #tpu.memory_space<smem>>
    %c2_i32_102 = arith.constant 2 : i32
    %353 = arith.muli %c2_i32_91, %c2_i32_102 : i32
    %c0_i32_103 = arith.constant 0 : i32
    %354 = arith.addi %353, %c0_i32_103 : i32
    %355 = arith.index_cast %arg0 : i32 to index
    %356 = arith.index_cast %354 : i32 to index
    %357 = memref.load %arg4[%355, %356] : memref<2x16xi32, #tpu.memory_space<smem>>
    %358 = vector.broadcast %336 : i32 to vector<4x4x1xi32>
    %359 = arith.cmpi sge, %347, %358 : vector<4x4x1xi32>
    %360 = vector.broadcast %341 : i32 to vector<4x4x1xi32>
    %361 = arith.cmpi slt, %347, %360 : vector<4x4x1xi32>
    %362 = arith.andi %359, %361 : vector<4x4x1xi1>
    %363 = vector.broadcast %352 : i32 to vector<4x4x1xi32>
    %364 = arith.cmpi sge, %1, %363 : vector<4x4x1xi32>
    %365 = arith.andi %362, %364 : vector<4x4x1xi1>
    %366 = vector.broadcast %357 : i32 to vector<4x4x1xi32>
    %367 = arith.cmpi slt, %1, %366 : vector<4x4x1xi32>
    %368 = arith.andi %365, %367 : vector<4x4x1xi1>
    %cst_104 = arith.constant 0xFF800000 : f32
    %369 = vector.shape_cast %368 : vector<4x4x1xi1> to vector<4x4x1xi1>
    %370 = vector.broadcast %369 : vector<4x4x1xi1> to vector<4x4x128xi1>
    %371 = vector.broadcast %cst_104 : f32 to vector<4x4x128xf32>
    %372 = arith.select %370, %345, %371 : vector<4x4x128xi1>, vector<4x4x128xf32>
    %cst_105 = arith.constant dense<0xFF800000> : vector<128xf32>
    %373 = vector.multi_reduction <maximumf>, %372, %cst_105 [0, 1] : vector<4x4x128xf32> to vector<128xf32>
    %374 = vector.shape_cast %373 : vector<128xf32> to vector<1x1x128xf32>
    %375 = arith.cmpi sle, %341, %336 : i32
    %376 = arith.cmpi sle, %357, %352 : i32
    %377 = arith.ori %375, %376 : i1
    %cst_106 = arith.constant 0.000000e+00 : f32
    %378 = vector.broadcast %cst_106 : f32 to vector<1x1x128xf32>
    %379 = arith.select %377, %378, %374 : vector<1x1x128xf32>
    %c2_i32_107 = arith.constant 2 : i32
    %380 = arith.muli %c2_i32_91, %c2_i32_107 : i32
    %c1_i32_108 = arith.constant 1 : i32
    %381 = arith.addi %380, %c1_i32_108 : i32
    %382 = arith.index_cast %arg0 : i32 to index
    %383 = arith.index_cast %381 : i32 to index
    %384 = memref.load %arg3[%382, %383] : memref<2x16xi32, #tpu.memory_space<smem>>
    %c2_i32_109 = arith.constant 2 : i32
    %385 = arith.muli %c2_i32_91, %c2_i32_109 : i32
    %c1_i32_110 = arith.constant 1 : i32
    %386 = arith.addi %385, %c1_i32_110 : i32
    %387 = arith.index_cast %arg0 : i32 to index
    %388 = arith.index_cast %386 : i32 to index
    %389 = memref.load %arg4[%387, %388] : memref<2x16xi32, #tpu.memory_space<smem>>
    %390 = vector.broadcast %336 : i32 to vector<4x4x1xi32>
    %391 = arith.cmpi sge, %347, %390 : vector<4x4x1xi32>
    %392 = vector.broadcast %341 : i32 to vector<4x4x1xi32>
    %393 = arith.cmpi slt, %347, %392 : vector<4x4x1xi32>
    %394 = arith.andi %391, %393 : vector<4x4x1xi1>
    %395 = vector.broadcast %384 : i32 to vector<4x4x1xi32>
    %396 = arith.cmpi sge, %1, %395 : vector<4x4x1xi32>
    %397 = arith.andi %394, %396 : vector<4x4x1xi1>
    %398 = vector.broadcast %389 : i32 to vector<4x4x1xi32>
    %399 = arith.cmpi slt, %1, %398 : vector<4x4x1xi32>
    %400 = arith.andi %397, %399 : vector<4x4x1xi1>
    %cst_111 = arith.constant 0xFF800000 : f32
    %401 = vector.shape_cast %400 : vector<4x4x1xi1> to vector<4x4x1xi1>
    %402 = vector.broadcast %401 : vector<4x4x1xi1> to vector<4x4x128xi1>
    %403 = vector.broadcast %cst_111 : f32 to vector<4x4x128xf32>
    %404 = arith.select %402, %345, %403 : vector<4x4x128xi1>, vector<4x4x128xf32>
    %cst_112 = arith.constant dense<0xFF800000> : vector<128xf32>
    %405 = vector.multi_reduction <maximumf>, %404, %cst_112 [0, 1] : vector<4x4x128xf32> to vector<128xf32>
    %406 = vector.shape_cast %405 : vector<128xf32> to vector<1x1x128xf32>
    %407 = arith.cmpi sle, %341, %336 : i32
    %408 = arith.cmpi sle, %389, %384 : i32
    %409 = arith.ori %407, %408 : i1
    %cst_113 = arith.constant 0.000000e+00 : f32
    %410 = vector.broadcast %cst_113 : f32 to vector<1x1x128xf32>
    %411 = arith.select %409, %410, %406 : vector<1x1x128xf32>
    %c2_i32_114 = arith.constant 2 : i32
    %412 = arith.muli %c2_i32_91, %c2_i32_114 : i32
    %c1_i32_115 = arith.constant 1 : i32
    %413 = arith.addi %412, %c1_i32_115 : i32
    %414 = arith.index_cast %arg0 : i32 to index
    %415 = arith.index_cast %413 : i32 to index
    %416 = memref.load %arg1[%414, %415] : memref<2x16xi32, #tpu.memory_space<smem>>
    %c2_i32_116 = arith.constant 2 : i32
    %417 = arith.muli %c2_i32_91, %c2_i32_116 : i32
    %c1_i32_117 = arith.constant 1 : i32
    %418 = arith.addi %417, %c1_i32_117 : i32
    %419 = arith.index_cast %arg0 : i32 to index
    %420 = arith.index_cast %418 : i32 to index
    %421 = memref.load %arg2[%419, %420] : memref<2x16xi32, #tpu.memory_space<smem>>
    %c0_i32_118 = arith.constant 0 : i32
    %422 = arith.minsi %416, %c0_i32_118 : i32
    %c0_119 = arith.constant 0 : index
    %423 = arith.index_cast %422 : i32 to index
    %c0_120 = arith.constant 0 : index
    %c0_121 = arith.constant 0 : index
    %424 = vector.load %arg5[%c0_119, %423, %c0_120, %c0_121] : memref<1x4x4x128xf32, #tpu.memory_space<vmem>>, vector<1x4x4x128xf32>
    %425 = vector.shape_cast %424 : vector<1x4x4x128xf32> to vector<4x4x128xf32>
    %426 = vector.broadcast %422 : i32 to vector<4x4x1xi32>
    %427 = arith.addi %0, %426 : vector<4x4x1xi32>
    %c2_i32_122 = arith.constant 2 : i32
    %428 = arith.muli %c2_i32_91, %c2_i32_122 : i32
    %c0_i32_123 = arith.constant 0 : i32
    %429 = arith.addi %428, %c0_i32_123 : i32
    %430 = arith.index_cast %arg0 : i32 to index
    %431 = arith.index_cast %429 : i32 to index
    %432 = memref.load %arg3[%430, %431] : memref<2x16xi32, #tpu.memory_space<smem>>
    %c2_i32_124 = arith.constant 2 : i32
    %433 = arith.muli %c2_i32_91, %c2_i32_124 : i32
    %c0_i32_125 = arith.constant 0 : i32
    %434 = arith.addi %433, %c0_i32_125 : i32
    %435 = arith.index_cast %arg0 : i32 to index
    %436 = arith.index_cast %434 : i32 to index
    %437 = memref.load %arg4[%435, %436] : memref<2x16xi32, #tpu.memory_space<smem>>
    %438 = vector.broadcast %416 : i32 to vector<4x4x1xi32>
    %439 = arith.cmpi sge, %427, %438 : vector<4x4x1xi32>
    %440 = vector.broadcast %421 : i32 to vector<4x4x1xi32>
    %441 = arith.cmpi slt, %427, %440 : vector<4x4x1xi32>
    %442 = arith.andi %439, %441 : vector<4x4x1xi1>
    %443 = vector.broadcast %432 : i32 to vector<4x4x1xi32>
    %444 = arith.cmpi sge, %1, %443 : vector<4x4x1xi32>
    %445 = arith.andi %442, %444 : vector<4x4x1xi1>
    %446 = vector.broadcast %437 : i32 to vector<4x4x1xi32>
    %447 = arith.cmpi slt, %1, %446 : vector<4x4x1xi32>
    %448 = arith.andi %445, %447 : vector<4x4x1xi1>
    %cst_126 = arith.constant 0xFF800000 : f32
    %449 = vector.shape_cast %448 : vector<4x4x1xi1> to vector<4x4x1xi1>
    %450 = vector.broadcast %449 : vector<4x4x1xi1> to vector<4x4x128xi1>
    %451 = vector.broadcast %cst_126 : f32 to vector<4x4x128xf32>
    %452 = arith.select %450, %425, %451 : vector<4x4x128xi1>, vector<4x4x128xf32>
    %cst_127 = arith.constant dense<0xFF800000> : vector<128xf32>
    %453 = vector.multi_reduction <maximumf>, %452, %cst_127 [0, 1] : vector<4x4x128xf32> to vector<128xf32>
    %454 = vector.shape_cast %453 : vector<128xf32> to vector<1x1x128xf32>
    %455 = arith.cmpi sle, %421, %416 : i32
    %456 = arith.cmpi sle, %437, %432 : i32
    %457 = arith.ori %455, %456 : i1
    %cst_128 = arith.constant 0.000000e+00 : f32
    %458 = vector.broadcast %cst_128 : f32 to vector<1x1x128xf32>
    %459 = arith.select %457, %458, %454 : vector<1x1x128xf32>
    %c2_i32_129 = arith.constant 2 : i32
    %460 = arith.muli %c2_i32_91, %c2_i32_129 : i32
    %c1_i32_130 = arith.constant 1 : i32
    %461 = arith.addi %460, %c1_i32_130 : i32
    %462 = arith.index_cast %arg0 : i32 to index
    %463 = arith.index_cast %461 : i32 to index
    %464 = memref.load %arg3[%462, %463] : memref<2x16xi32, #tpu.memory_space<smem>>
    %c2_i32_131 = arith.constant 2 : i32
    %465 = arith.muli %c2_i32_91, %c2_i32_131 : i32
    %c1_i32_132 = arith.constant 1 : i32
    %466 = arith.addi %465, %c1_i32_132 : i32
    %467 = arith.index_cast %arg0 : i32 to index
    %468 = arith.index_cast %466 : i32 to index
    %469 = memref.load %arg4[%467, %468] : memref<2x16xi32, #tpu.memory_space<smem>>
    %470 = vector.broadcast %416 : i32 to vector<4x4x1xi32>
    %471 = arith.cmpi sge, %427, %470 : vector<4x4x1xi32>
    %472 = vector.broadcast %421 : i32 to vector<4x4x1xi32>
    %473 = arith.cmpi slt, %427, %472 : vector<4x4x1xi32>
    %474 = arith.andi %471, %473 : vector<4x4x1xi1>
    %475 = vector.broadcast %464 : i32 to vector<4x4x1xi32>
    %476 = arith.cmpi sge, %1, %475 : vector<4x4x1xi32>
    %477 = arith.andi %474, %476 : vector<4x4x1xi1>
    %478 = vector.broadcast %469 : i32 to vector<4x4x1xi32>
    %479 = arith.cmpi slt, %1, %478 : vector<4x4x1xi32>
    %480 = arith.andi %477, %479 : vector<4x4x1xi1>
    %cst_133 = arith.constant 0xFF800000 : f32
    %481 = vector.shape_cast %480 : vector<4x4x1xi1> to vector<4x4x1xi1>
    %482 = vector.broadcast %481 : vector<4x4x1xi1> to vector<4x4x128xi1>
    %483 = vector.broadcast %cst_133 : f32 to vector<4x4x128xf32>
    %484 = arith.select %482, %425, %483 : vector<4x4x128xi1>, vector<4x4x128xf32>
    %cst_134 = arith.constant dense<0xFF800000> : vector<128xf32>
    %485 = vector.multi_reduction <maximumf>, %484, %cst_134 [0, 1] : vector<4x4x128xf32> to vector<128xf32>
    %486 = vector.shape_cast %485 : vector<128xf32> to vector<1x1x128xf32>
    %487 = arith.cmpi sle, %421, %416 : i32
    %488 = arith.cmpi sle, %469, %464 : i32
    %489 = arith.ori %487, %488 : i1
    %cst_135 = arith.constant 0.000000e+00 : f32
    %490 = vector.broadcast %cst_135 : f32 to vector<1x1x128xf32>
    %491 = arith.select %489, %490, %486 : vector<1x1x128xf32>
    %492 = tpu.concatenate %379, %411, %459, %491 in 2 : vector<1x1x128xf32>, vector<1x1x128xf32>, vector<1x1x128xf32>, vector<1x1x128xf32> -> vector<1x1x512xf32>
    %c0_136 = arith.constant 0 : index
    %493 = arith.index_cast %c2_i32_91 : i32 to index
    %c0_137 = arith.constant 0 : index
    %c0_138 = arith.constant 0 : index
    %494 = vector.load %arg6[%c0_136, %493, %c0_137, %c0_138] : memref<1x8x1x512xf32, #tpu.memory_space<vmem>>, vector<1x1x1x512xf32>
    %495 = vector.shape_cast %494 : vector<1x1x1x512xf32> to vector<1x1x512xf32>
    %496 = vector.shape_cast %492 : vector<1x1x512xf32> to vector<1x1x1x512xf32>
    tpu.vector_store %arg6[%c0_136, %493, %c0_137, %c0_138], %496 {strides = array<i32>} : memref<1x8x1x512xf32, #tpu.memory_space<vmem>>, vector<1x1x1x512xf32>,
    %c3_i32 = arith.constant 3 : i32
    %c2_i32_139 = arith.constant 2 : i32
    %497 = arith.muli %c3_i32, %c2_i32_139 : i32
    %c0_i32_140 = arith.constant 0 : i32
    %498 = arith.addi %497, %c0_i32_140 : i32
    %499 = arith.index_cast %arg0 : i32 to index
    %500 = arith.index_cast %498 : i32 to index
    %501 = memref.load %arg1[%499, %500] : memref<2x16xi32, #tpu.memory_space<smem>>
    %c2_i32_141 = arith.constant 2 : i32
    %502 = arith.muli %c3_i32, %c2_i32_141 : i32
    %c0_i32_142 = arith.constant 0 : i32
    %503 = arith.addi %502, %c0_i32_142 : i32
    %504 = arith.index_cast %arg0 : i32 to index
    %505 = arith.index_cast %503 : i32 to index
    %506 = memref.load %arg2[%504, %505] : memref<2x16xi32, #tpu.memory_space<smem>>
    %c0_i32_143 = arith.constant 0 : i32
    %507 = arith.minsi %501, %c0_i32_143 : i32
    %c0_144 = arith.constant 0 : index
    %508 = arith.index_cast %507 : i32 to index
    %c0_145 = arith.constant 0 : index
    %c0_146 = arith.constant 0 : index
    %509 = vector.load %arg5[%c0_144, %508, %c0_145, %c0_146] : memref<1x4x4x128xf32, #tpu.memory_space<vmem>>, vector<1x4x4x128xf32>
    %510 = vector.shape_cast %509 : vector<1x4x4x128xf32> to vector<4x4x128xf32>
    %511 = vector.broadcast %507 : i32 to vector<4x4x1xi32>
    %512 = arith.addi %0, %511 : vector<4x4x1xi32>
    %c2_i32_147 = arith.constant 2 : i32
    %513 = arith.muli %c3_i32, %c2_i32_147 : i32
    %c0_i32_148 = arith.constant 0 : i32
    %514 = arith.addi %513, %c0_i32_148 : i32
    %515 = arith.index_cast %arg0 : i32 to index
    %516 = arith.index_cast %514 : i32 to index
    %517 = memref.load %arg3[%515, %516] : memref<2x16xi32, #tpu.memory_space<smem>>
    %c2_i32_149 = arith.constant 2 : i32
    %518 = arith.muli %c3_i32, %c2_i32_149 : i32
    %c0_i32_150 = arith.constant 0 : i32
    %519 = arith.addi %518, %c0_i32_150 : i32
    %520 = arith.index_cast %arg0 : i32 to index
    %521 = arith.index_cast %519 : i32 to index
    %522 = memref.load %arg4[%520, %521] : memref<2x16xi32, #tpu.memory_space<smem>>
    %523 = vector.broadcast %501 : i32 to vector<4x4x1xi32>
    %524 = arith.cmpi sge, %512, %523 : vector<4x4x1xi32>
    %525 = vector.broadcast %506 : i32 to vector<4x4x1xi32>
    %526 = arith.cmpi slt, %512, %525 : vector<4x4x1xi32>
    %527 = arith.andi %524, %526 : vector<4x4x1xi1>
    %528 = vector.broadcast %517 : i32 to vector<4x4x1xi32>
    %529 = arith.cmpi sge, %1, %528 : vector<4x4x1xi32>
    %530 = arith.andi %527, %529 : vector<4x4x1xi1>
    %531 = vector.broadcast %522 : i32 to vector<4x4x1xi32>
    %532 = arith.cmpi slt, %1, %531 : vector<4x4x1xi32>
    %533 = arith.andi %530, %532 : vector<4x4x1xi1>
    %cst_151 = arith.constant 0xFF800000 : f32
    %534 = vector.shape_cast %533 : vector<4x4x1xi1> to vector<4x4x1xi1>
    %535 = vector.broadcast %534 : vector<4x4x1xi1> to vector<4x4x128xi1>
    %536 = vector.broadcast %cst_151 : f32 to vector<4x4x128xf32>
    %537 = arith.select %535, %510, %536 : vector<4x4x128xi1>, vector<4x4x128xf32>
    %cst_152 = arith.constant dense<0xFF800000> : vector<128xf32>
    %538 = vector.multi_reduction <maximumf>, %537, %cst_152 [0, 1] : vector<4x4x128xf32> to vector<128xf32>
    %539 = vector.shape_cast %538 : vector<128xf32> to vector<1x1x128xf32>
    %540 = arith.cmpi sle, %506, %501 : i32
    %541 = arith.cmpi sle, %522, %517 : i32
    %542 = arith.ori %540, %541 : i1
    %cst_153 = arith.constant 0.000000e+00 : f32
    %543 = vector.broadcast %cst_153 : f32 to vector<1x1x128xf32>
    %544 = arith.select %542, %543, %539 : vector<1x1x128xf32>
    %c2_i32_154 = arith.constant 2 : i32
    %545 = arith.muli %c3_i32, %c2_i32_154 : i32
    %c1_i32_155 = arith.constant 1 : i32
    %546 = arith.addi %545, %c1_i32_155 : i32
    %547 = arith.index_cast %arg0 : i32 to index
    %548 = arith.index_cast %546 : i32 to index
    %549 = memref.load %arg3[%547, %548] : memref<2x16xi32, #tpu.memory_space<smem>>
    %c2_i32_156 = arith.constant 2 : i32
    %550 = arith.muli %c3_i32, %c2_i32_156 : i32
    %c1_i32_157 = arith.constant 1 : i32
    %551 = arith.addi %550, %c1_i32_157 : i32
    %552 = arith.index_cast %arg0 : i32 to index
    %553 = arith.index_cast %551 : i32 to index
    %554 = memref.load %arg4[%552, %553] : memref<2x16xi32, #tpu.memory_space<smem>>
    %555 = vector.broadcast %501 : i32 to vector<4x4x1xi32>
    %556 = arith.cmpi sge, %512, %555 : vector<4x4x1xi32>
    %557 = vector.broadcast %506 : i32 to vector<4x4x1xi32>
    %558 = arith.cmpi slt, %512, %557 : vector<4x4x1xi32>
    %559 = arith.andi %556, %558 : vector<4x4x1xi1>
    %560 = vector.broadcast %549 : i32 to vector<4x4x1xi32>
    %561 = arith.cmpi sge, %1, %560 : vector<4x4x1xi32>
    %562 = arith.andi %559, %561 : vector<4x4x1xi1>
    %563 = vector.broadcast %554 : i32 to vector<4x4x1xi32>
    %564 = arith.cmpi slt, %1, %563 : vector<4x4x1xi32>
    %565 = arith.andi %562, %564 : vector<4x4x1xi1>
    %cst_158 = arith.constant 0xFF800000 : f32
    %566 = vector.shape_cast %565 : vector<4x4x1xi1> to vector<4x4x1xi1>
    %567 = vector.broadcast %566 : vector<4x4x1xi1> to vector<4x4x128xi1>
    %568 = vector.broadcast %cst_158 : f32 to vector<4x4x128xf32>
    %569 = arith.select %567, %510, %568 : vector<4x4x128xi1>, vector<4x4x128xf32>
    %cst_159 = arith.constant dense<0xFF800000> : vector<128xf32>
    %570 = vector.multi_reduction <maximumf>, %569, %cst_159 [0, 1] : vector<4x4x128xf32> to vector<128xf32>
    %571 = vector.shape_cast %570 : vector<128xf32> to vector<1x1x128xf32>
    %572 = arith.cmpi sle, %506, %501 : i32
    %573 = arith.cmpi sle, %554, %549 : i32
    %574 = arith.ori %572, %573 : i1
    %cst_160 = arith.constant 0.000000e+00 : f32
    %575 = vector.broadcast %cst_160 : f32 to vector<1x1x128xf32>
    %576 = arith.select %574, %575, %571 : vector<1x1x128xf32>
    %c2_i32_161 = arith.constant 2 : i32
    %577 = arith.muli %c3_i32, %c2_i32_161 : i32
    %c1_i32_162 = arith.constant 1 : i32
    %578 = arith.addi %577, %c1_i32_162 : i32
    %579 = arith.index_cast %arg0 : i32 to index
    %580 = arith.index_cast %578 : i32 to index
    %581 = memref.load %arg1[%579, %580] : memref<2x16xi32, #tpu.memory_space<smem>>
    %c2_i32_163 = arith.constant 2 : i32
    %582 = arith.muli %c3_i32, %c2_i32_163 : i32
    %c1_i32_164 = arith.constant 1 : i32
    %583 = arith.addi %582, %c1_i32_164 : i32
    %584 = arith.index_cast %arg0 : i32 to index
    %585 = arith.index_cast %583 : i32 to index
    %586 = memref.load %arg2[%584, %585] : memref<2x16xi32, #tpu.memory_space<smem>>
    %c0_i32_165 = arith.constant 0 : i32
    %587 = arith.minsi %581, %c0_i32_165 : i32
    %c0_166 = arith.constant 0 : index
    %588 = arith.index_cast %587 : i32 to index
    %c0_167 = arith.constant 0 : index
    %c0_168 = arith.constant 0 : index
    %589 = vector.load %arg5[%c0_166, %588, %c0_167, %c0_168] : memref<1x4x4x128xf32, #tpu.memory_space<vmem>>, vector<1x4x4x128xf32>
    %590 = vector.shape_cast %589 : vector<1x4x4x128xf32> to vector<4x4x128xf32>
    %591 = vector.broadcast %587 : i32 to vector<4x4x1xi32>
    %592 = arith.addi %0, %591 : vector<4x4x1xi32>
    %c2_i32_169 = arith.constant 2 : i32
    %593 = arith.muli %c3_i32, %c2_i32_169 : i32
    %c0_i32_170 = arith.constant 0 : i32
    %594 = arith.addi %593, %c0_i32_170 : i32
    %595 = arith.index_cast %arg0 : i32 to index
    %596 = arith.index_cast %594 : i32 to index
    %597 = memref.load %arg3[%595, %596] : memref<2x16xi32, #tpu.memory_space<smem>>
    %c2_i32_171 = arith.constant 2 : i32
    %598 = arith.muli %c3_i32, %c2_i32_171 : i32
    %c0_i32_172 = arith.constant 0 : i32
    %599 = arith.addi %598, %c0_i32_172 : i32
    %600 = arith.index_cast %arg0 : i32 to index
    %601 = arith.index_cast %599 : i32 to index
    %602 = memref.load %arg4[%600, %601] : memref<2x16xi32, #tpu.memory_space<smem>>
    %603 = vector.broadcast %581 : i32 to vector<4x4x1xi32>
    %604 = arith.cmpi sge, %592, %603 : vector<4x4x1xi32>
    %605 = vector.broadcast %586 : i32 to vector<4x4x1xi32>
    %606 = arith.cmpi slt, %592, %605 : vector<4x4x1xi32>
    %607 = arith.andi %604, %606 : vector<4x4x1xi1>
    %608 = vector.broadcast %597 : i32 to vector<4x4x1xi32>
    %609 = arith.cmpi sge, %1, %608 : vector<4x4x1xi32>
    %610 = arith.andi %607, %609 : vector<4x4x1xi1>
    %611 = vector.broadcast %602 : i32 to vector<4x4x1xi32>
    %612 = arith.cmpi slt, %1, %611 : vector<4x4x1xi32>
    %613 = arith.andi %610, %612 : vector<4x4x1xi1>
    %cst_173 = arith.constant 0xFF800000 : f32
    %614 = vector.shape_cast %613 : vector<4x4x1xi1> to vector<4x4x1xi1>
    %615 = vector.broadcast %614 : vector<4x4x1xi1> to vector<4x4x128xi1>
    %616 = vector.broadcast %cst_173 : f32 to vector<4x4x128xf32>
    %617 = arith.select %615, %590, %616 : vector<4x4x128xi1>, vector<4x4x128xf32>
    %cst_174 = arith.constant dense<0xFF800000> : vector<128xf32>
    %618 = vector.multi_reduction <maximumf>, %617, %cst_174 [0, 1] : vector<4x4x128xf32> to vector<128xf32>
    %619 = vector.shape_cast %618 : vector<128xf32> to vector<1x1x128xf32>
    %620 = arith.cmpi sle, %586, %581 : i32
    %621 = arith.cmpi sle, %602, %597 : i32
    %622 = arith.ori %620, %621 : i1
    %cst_175 = arith.constant 0.000000e+00 : f32
    %623 = vector.broadcast %cst_175 : f32 to vector<1x1x128xf32>
    %624 = arith.select %622, %623, %619 : vector<1x1x128xf32>
    %c2_i32_176 = arith.constant 2 : i32
    %625 = arith.muli %c3_i32, %c2_i32_176 : i32
    %c1_i32_177 = arith.constant 1 : i32
    %626 = arith.addi %625, %c1_i32_177 : i32
    %627 = arith.index_cast %arg0 : i32 to index
    %628 = arith.index_cast %626 : i32 to index
    %629 = memref.load %arg3[%627, %628] : memref<2x16xi32, #tpu.memory_space<smem>>
    %c2_i32_178 = arith.constant 2 : i32
    %630 = arith.muli %c3_i32, %c2_i32_178 : i32
    %c1_i32_179 = arith.constant 1 : i32
    %631 = arith.addi %630, %c1_i32_179 : i32
    %632 = arith.index_cast %arg0 : i32 to index
    %633 = arith.index_cast %631 : i32 to index
    %634 = memref.load %arg4[%632, %633] : memref<2x16xi32, #tpu.memory_space<smem>>
    %635 = vector.broadcast %581 : i32 to vector<4x4x1xi32>
    %636 = arith.cmpi sge, %592, %635 : vector<4x4x1xi32>
    %637 = vector.broadcast %586 : i32 to vector<4x4x1xi32>
    %638 = arith.cmpi slt, %592, %637 : vector<4x4x1xi32>
    %639 = arith.andi %636, %638 : vector<4x4x1xi1>
    %640 = vector.broadcast %629 : i32 to vector<4x4x1xi32>
    %641 = arith.cmpi sge, %1, %640 : vector<4x4x1xi32>
    %642 = arith.andi %639, %641 : vector<4x4x1xi1>
    %643 = vector.broadcast %634 : i32 to vector<4x4x1xi32>
    %644 = arith.cmpi slt, %1, %643 : vector<4x4x1xi32>
    %645 = arith.andi %642, %644 : vector<4x4x1xi1>
    %cst_180 = arith.constant 0xFF800000 : f32
    %646 = vector.shape_cast %645 : vector<4x4x1xi1> to vector<4x4x1xi1>
    %647 = vector.broadcast %646 : vector<4x4x1xi1> to vector<4x4x128xi1>
    %648 = vector.broadcast %cst_180 : f32 to vector<4x4x128xf32>
    %649 = arith.select %647, %590, %648 : vector<4x4x128xi1>, vector<4x4x128xf32>
    %cst_181 = arith.constant dense<0xFF800000> : vector<128xf32>
    %650 = vector.multi_reduction <maximumf>, %649, %cst_181 [0, 1] : vector<4x4x128xf32> to vector<128xf32>
    %651 = vector.shape_cast %650 : vector<128xf32> to vector<1x1x128xf32>
    %652 = arith.cmpi sle, %586, %581 : i32
    %653 = arith.cmpi sle, %634, %629 : i32
    %654 = arith.ori %652, %653 : i1
    %cst_182 = arith.constant 0.000000e+00 : f32
    %655 = vector.broadcast %cst_182 : f32 to vector<1x1x128xf32>
    %656 = arith.select %654, %655, %651 : vector<1x1x128xf32>
    %657 = tpu.concatenate %544, %576, %624, %656 in 2 : vector<1x1x128xf32>, vector<1x1x128xf32>, vector<1x1x128xf32>, vector<1x1x128xf32> -> vector<1x1x512xf32>
    %c0_183 = arith.constant 0 : index
    %658 = arith.index_cast %c3_i32 : i32 to index
    %c0_184 = arith.constant 0 : index
    %c0_185 = arith.constant 0 : index
    %659 = vector.load %arg6[%c0_183, %658, %c0_184, %c0_185] : memref<1x8x1x512xf32, #tpu.memory_space<vmem>>, vector<1x1x1x512xf32>
    %660 = vector.shape_cast %659 : vector<1x1x1x512xf32> to vector<1x1x512xf32>
    %661 = vector.shape_cast %657 : vector<1x1x512xf32> to vector<1x1x1x512xf32>
    tpu.vector_store %arg6[%c0_183, %658, %c0_184, %c0_185], %661 {strides = array<i32>} : memref<1x8x1x512xf32, #tpu.memory_space<vmem>>, vector<1x1x1x512xf32>,
    %c4_i32 = arith.constant 4 : i32
    %c2_i32_186 = arith.constant 2 : i32
    %662 = arith.muli %c4_i32, %c2_i32_186 : i32
    %c0_i32_187 = arith.constant 0 : i32
    %663 = arith.addi %662, %c0_i32_187 : i32
    %664 = arith.index_cast %arg0 : i32 to index
    %665 = arith.index_cast %663 : i32 to index
    %666 = memref.load %arg1[%664, %665] : memref<2x16xi32, #tpu.memory_space<smem>>
    %c2_i32_188 = arith.constant 2 : i32
    %667 = arith.muli %c4_i32, %c2_i32_188 : i32
    %c0_i32_189 = arith.constant 0 : i32
    %668 = arith.addi %667, %c0_i32_189 : i32
    %669 = arith.index_cast %arg0 : i32 to index
    %670 = arith.index_cast %668 : i32 to index
    %671 = memref.load %arg2[%669, %670] : memref<2x16xi32, #tpu.memory_space<smem>>
    %c0_i32_190 = arith.constant 0 : i32
    %672 = arith.minsi %666, %c0_i32_190 : i32
    %c0_191 = arith.constant 0 : index
    %673 = arith.index_cast %672 : i32 to index
    %c0_192 = arith.constant 0 : index
    %c0_193 = arith.constant 0 : index
    %674 = vector.load %arg5[%c0_191, %673, %c0_192, %c0_193] : memref<1x4x4x128xf32, #tpu.memory_space<vmem>>, vector<1x4x4x128xf32>
    %675 = vector.shape_cast %674 : vector<1x4x4x128xf32> to vector<4x4x128xf32>
    %676 = vector.broadcast %672 : i32 to vector<4x4x1xi32>
    %677 = arith.addi %0, %676 : vector<4x4x1xi32>
    %c2_i32_194 = arith.constant 2 : i32
    %678 = arith.muli %c4_i32, %c2_i32_194 : i32
    %c0_i32_195 = arith.constant 0 : i32
    %679 = arith.addi %678, %c0_i32_195 : i32
    %680 = arith.index_cast %arg0 : i32 to index
    %681 = arith.index_cast %679 : i32 to index
    %682 = memref.load %arg3[%680, %681] : memref<2x16xi32, #tpu.memory_space<smem>>
    %c2_i32_196 = arith.constant 2 : i32
    %683 = arith.muli %c4_i32, %c2_i32_196 : i32
    %c0_i32_197 = arith.constant 0 : i32
    %684 = arith.addi %683, %c0_i32_197 : i32
    %685 = arith.index_cast %arg0 : i32 to index
    %686 = arith.index_cast %684 : i32 to index
    %687 = memref.load %arg4[%685, %686] : memref<2x16xi32, #tpu.memory_space<smem>>
    %688 = vector.broadcast %666 : i32 to vector<4x4x1xi32>
    %689 = arith.cmpi sge, %677, %688 : vector<4x4x1xi32>
    %690 = vector.broadcast %671 : i32 to vector<4x4x1xi32>
    %691 = arith.cmpi slt, %677, %690 : vector<4x4x1xi32>
    %692 = arith.andi %689, %691 : vector<4x4x1xi1>
    %693 = vector.broadcast %682 : i32 to vector<4x4x1xi32>
    %694 = arith.cmpi sge, %1, %693 : vector<4x4x1xi32>
    %695 = arith.andi %692, %694 : vector<4x4x1xi1>
    %696 = vector.broadcast %687 : i32 to vector<4x4x1xi32>
    %697 = arith.cmpi slt, %1, %696 : vector<4x4x1xi32>
    %698 = arith.andi %695, %697 : vector<4x4x1xi1>
    %cst_198 = arith.constant 0xFF800000 : f32
    %699 = vector.shape_cast %698 : vector<4x4x1xi1> to vector<4x4x1xi1>
    %700 = vector.broadcast %699 : vector<4x4x1xi1> to vector<4x4x128xi1>
    %701 = vector.broadcast %cst_198 : f32 to vector<4x4x128xf32>
    %702 = arith.select %700, %675, %701 : vector<4x4x128xi1>, vector<4x4x128xf32>
    %cst_199 = arith.constant dense<0xFF800000> : vector<128xf32>
    %703 = vector.multi_reduction <maximumf>, %702, %cst_199 [0, 1] : vector<4x4x128xf32> to vector<128xf32>
    %704 = vector.shape_cast %703 : vector<128xf32> to vector<1x1x128xf32>
    %705 = arith.cmpi sle, %671, %666 : i32
    %706 = arith.cmpi sle, %687, %682 : i32
    %707 = arith.ori %705, %706 : i1
    %cst_200 = arith.constant 0.000000e+00 : f32
    %708 = vector.broadcast %cst_200 : f32 to vector<1x1x128xf32>
    %709 = arith.select %707, %708, %704 : vector<1x1x128xf32>
    %c2_i32_201 = arith.constant 2 : i32
    %710 = arith.muli %c4_i32, %c2_i32_201 : i32
    %c1_i32_202 = arith.constant 1 : i32
    %711 = arith.addi %710, %c1_i32_202 : i32
    %712 = arith.index_cast %arg0 : i32 to index
    %713 = arith.index_cast %711 : i32 to index
    %714 = memref.load %arg3[%712, %713] : memref<2x16xi32, #tpu.memory_space<smem>>
    %c2_i32_203 = arith.constant 2 : i32
    %715 = arith.muli %c4_i32, %c2_i32_203 : i32
    %c1_i32_204 = arith.constant 1 : i32
    %716 = arith.addi %715, %c1_i32_204 : i32
    %717 = arith.index_cast %arg0 : i32 to index
    %718 = arith.index_cast %716 : i32 to index
    %719 = memref.load %arg4[%717, %718] : memref<2x16xi32, #tpu.memory_space<smem>>
    %720 = vector.broadcast %666 : i32 to vector<4x4x1xi32>
    %721 = arith.cmpi sge, %677, %720 : vector<4x4x1xi32>
    %722 = vector.broadcast %671 : i32 to vector<4x4x1xi32>
    %723 = arith.cmpi slt, %677, %722 : vector<4x4x1xi32>
    %724 = arith.andi %721, %723 : vector<4x4x1xi1>
    %725 = vector.broadcast %714 : i32 to vector<4x4x1xi32>
    %726 = arith.cmpi sge, %1, %725 : vector<4x4x1xi32>
    %727 = arith.andi %724, %726 : vector<4x4x1xi1>
    %728 = vector.broadcast %719 : i32 to vector<4x4x1xi32>
    %729 = arith.cmpi slt, %1, %728 : vector<4x4x1xi32>
    %730 = arith.andi %727, %729 : vector<4x4x1xi1>
    %cst_205 = arith.constant 0xFF800000 : f32
    %731 = vector.shape_cast %730 : vector<4x4x1xi1> to vector<4x4x1xi1>
    %732 = vector.broadcast %731 : vector<4x4x1xi1> to vector<4x4x128xi1>
    %733 = vector.broadcast %cst_205 : f32 to vector<4x4x128xf32>
    %734 = arith.select %732, %675, %733 : vector<4x4x128xi1>, vector<4x4x128xf32>
    %cst_206 = arith.constant dense<0xFF800000> : vector<128xf32>
    %735 = vector.multi_reduction <maximumf>, %734, %cst_206 [0, 1] : vector<4x4x128xf32> to vector<128xf32>
    %736 = vector.shape_cast %735 : vector<128xf32> to vector<1x1x128xf32>
    %737 = arith.cmpi sle, %671, %666 : i32
    %738 = arith.cmpi sle, %719, %714 : i32
    %739 = arith.ori %737, %738 : i1
    %cst_207 = arith.constant 0.000000e+00 : f32
    %740 = vector.broadcast %cst_207 : f32 to vector<1x1x128xf32>
    %741 = arith.select %739, %740, %736 : vector<1x1x128xf32>
    %c2_i32_208 = arith.constant 2 : i32
    %742 = arith.muli %c4_i32, %c2_i32_208 : i32
    %c1_i32_209 = arith.constant 1 : i32
    %743 = arith.addi %742, %c1_i32_209 : i32
    %744 = arith.index_cast %arg0 : i32 to index
    %745 = arith.index_cast %743 : i32 to index
    %746 = memref.load %arg1[%744, %745] : memref<2x16xi32, #tpu.memory_space<smem>>
    %c2_i32_210 = arith.constant 2 : i32
    %747 = arith.muli %c4_i32, %c2_i32_210 : i32
    %c1_i32_211 = arith.constant 1 : i32
    %748 = arith.addi %747, %c1_i32_211 : i32
    %749 = arith.index_cast %arg0 : i32 to index
    %750 = arith.index_cast %748 : i32 to index
    %751 = memref.load %arg2[%749, %750] : memref<2x16xi32, #tpu.memory_space<smem>>
    %c0_i32_212 = arith.constant 0 : i32
    %752 = arith.minsi %746, %c0_i32_212 : i32
    %c0_213 = arith.constant 0 : index
    %753 = arith.index_cast %752 : i32 to index
    %c0_214 = arith.constant 0 : index
    %c0_215 = arith.constant 0 : index
    %754 = vector.load %arg5[%c0_213, %753, %c0_214, %c0_215] : memref<1x4x4x128xf32, #tpu.memory_space<vmem>>, vector<1x4x4x128xf32>
    %755 = vector.shape_cast %754 : vector<1x4x4x128xf32> to vector<4x4x128xf32>
    %756 = vector.broadcast %752 : i32 to vector<4x4x1xi32>
    %757 = arith.addi %0, %756 : vector<4x4x1xi32>
    %c2_i32_216 = arith.constant 2 : i32
    %758 = arith.muli %c4_i32, %c2_i32_216 : i32
    %c0_i32_217 = arith.constant 0 : i32
    %759 = arith.addi %758, %c0_i32_217 : i32
    %760 = arith.index_cast %arg0 : i32 to index
    %761 = arith.index_cast %759 : i32 to index
    %762 = memref.load %arg3[%760, %761] : memref<2x16xi32, #tpu.memory_space<smem>>
    %c2_i32_218 = arith.constant 2 : i32
    %763 = arith.muli %c4_i32, %c2_i32_218 : i32
    %c0_i32_219 = arith.constant 0 : i32
    %764 = arith.addi %763, %c0_i32_219 : i32
    %765 = arith.index_cast %arg0 : i32 to index
    %766 = arith.index_cast %764 : i32 to index
    %767 = memref.load %arg4[%765, %766] : memref<2x16xi32, #tpu.memory_space<smem>>
    %768 = vector.broadcast %746 : i32 to vector<4x4x1xi32>
    %769 = arith.cmpi sge, %757, %768 : vector<4x4x1xi32>
    %770 = vector.broadcast %751 : i32 to vector<4x4x1xi32>
    %771 = arith.cmpi slt, %757, %770 : vector<4x4x1xi32>
    %772 = arith.andi %769, %771 : vector<4x4x1xi1>
    %773 = vector.broadcast %762 : i32 to vector<4x4x1xi32>
    %774 = arith.cmpi sge, %1, %773 : vector<4x4x1xi32>
    %775 = arith.andi %772, %774 : vector<4x4x1xi1>
    %776 = vector.broadcast %767 : i32 to vector<4x4x1xi32>
    %777 = arith.cmpi slt, %1, %776 : vector<4x4x1xi32>
    %778 = arith.andi %775, %777 : vector<4x4x1xi1>
    %cst_220 = arith.constant 0xFF800000 : f32
    %779 = vector.shape_cast %778 : vector<4x4x1xi1> to vector<4x4x1xi1>
    %780 = vector.broadcast %779 : vector<4x4x1xi1> to vector<4x4x128xi1>
    %781 = vector.broadcast %cst_220 : f32 to vector<4x4x128xf32>
    %782 = arith.select %780, %755, %781 : vector<4x4x128xi1>, vector<4x4x128xf32>
    %cst_221 = arith.constant dense<0xFF800000> : vector<128xf32>
    %783 = vector.multi_reduction <maximumf>, %782, %cst_221 [0, 1] : vector<4x4x128xf32> to vector<128xf32>
    %784 = vector.shape_cast %783 : vector<128xf32> to vector<1x1x128xf32>
    %785 = arith.cmpi sle, %751, %746 : i32
    %786 = arith.cmpi sle, %767, %762 : i32
    %787 = arith.ori %785, %786 : i1
    %cst_222 = arith.constant 0.000000e+00 : f32
    %788 = vector.broadcast %cst_222 : f32 to vector<1x1x128xf32>
    %789 = arith.select %787, %788, %784 : vector<1x1x128xf32>
    %c2_i32_223 = arith.constant 2 : i32
    %790 = arith.muli %c4_i32, %c2_i32_223 : i32
    %c1_i32_224 = arith.constant 1 : i32
    %791 = arith.addi %790, %c1_i32_224 : i32
    %792 = arith.index_cast %arg0 : i32 to index
    %793 = arith.index_cast %791 : i32 to index
    %794 = memref.load %arg3[%792, %793] : memref<2x16xi32, #tpu.memory_space<smem>>
    %c2_i32_225 = arith.constant 2 : i32
    %795 = arith.muli %c4_i32, %c2_i32_225 : i32
    %c1_i32_226 = arith.constant 1 : i32
    %796 = arith.addi %795, %c1_i32_226 : i32
    %797 = arith.index_cast %arg0 : i32 to index
    %798 = arith.index_cast %796 : i32 to index
    %799 = memref.load %arg4[%797, %798] : memref<2x16xi32, #tpu.memory_space<smem>>
    %800 = vector.broadcast %746 : i32 to vector<4x4x1xi32>
    %801 = arith.cmpi sge, %757, %800 : vector<4x4x1xi32>
    %802 = vector.broadcast %751 : i32 to vector<4x4x1xi32>
    %803 = arith.cmpi slt, %757, %802 : vector<4x4x1xi32>
    %804 = arith.andi %801, %803 : vector<4x4x1xi1>
    %805 = vector.broadcast %794 : i32 to vector<4x4x1xi32>
    %806 = arith.cmpi sge, %1, %805 : vector<4x4x1xi32>
    %807 = arith.andi %804, %806 : vector<4x4x1xi1>
    %808 = vector.broadcast %799 : i32 to vector<4x4x1xi32>
    %809 = arith.cmpi slt, %1, %808 : vector<4x4x1xi32>
    %810 = arith.andi %807, %809 : vector<4x4x1xi1>
    %cst_227 = arith.constant 0xFF800000 : f32
    %811 = vector.shape_cast %810 : vector<4x4x1xi1> to vector<4x4x1xi1>
    %812 = vector.broadcast %811 : vector<4x4x1xi1> to vector<4x4x128xi1>
    %813 = vector.broadcast %cst_227 : f32 to vector<4x4x128xf32>
    %814 = arith.select %812, %755, %813 : vector<4x4x128xi1>, vector<4x4x128xf32>
    %cst_228 = arith.constant dense<0xFF800000> : vector<128xf32>
    %815 = vector.multi_reduction <maximumf>, %814, %cst_228 [0, 1] : vector<4x4x128xf32> to vector<128xf32>
    %816 = vector.shape_cast %815 : vector<128xf32> to vector<1x1x128xf32>
    %817 = arith.cmpi sle, %751, %746 : i32
    %818 = arith.cmpi sle, %799, %794 : i32
    %819 = arith.ori %817, %818 : i1
    %cst_229 = arith.constant 0.000000e+00 : f32
    %820 = vector.broadcast %cst_229 : f32 to vector<1x1x128xf32>
    %821 = arith.select %819, %820, %816 : vector<1x1x128xf32>
    %822 = tpu.concatenate %709, %741, %789, %821 in 2 : vector<1x1x128xf32>, vector<1x1x128xf32>, vector<1x1x128xf32>, vector<1x1x128xf32> -> vector<1x1x512xf32>
    %c0_230 = arith.constant 0 : index
    %823 = arith.index_cast %c4_i32 : i32 to index
    %c0_231 = arith.constant 0 : index
    %c0_232 = arith.constant 0 : index
    %824 = vector.load %arg6[%c0_230, %823, %c0_231, %c0_232] : memref<1x8x1x512xf32, #tpu.memory_space<vmem>>, vector<1x1x1x512xf32>
    %825 = vector.shape_cast %824 : vector<1x1x1x512xf32> to vector<1x1x512xf32>
    %826 = vector.shape_cast %822 : vector<1x1x512xf32> to vector<1x1x1x512xf32>
    tpu.vector_store %arg6[%c0_230, %823, %c0_231, %c0_232], %826 {strides = array<i32>} : memref<1x8x1x512xf32, #tpu.memory_space<vmem>>, vector<1x1x1x512xf32>,
    %c5_i32 = arith.constant 5 : i32
    %c2_i32_233 = arith.constant 2 : i32
    %827 = arith.muli %c5_i32, %c2_i32_233 : i32
    %c0_i32_234 = arith.constant 0 : i32
    %828 = arith.addi %827, %c0_i32_234 : i32
    %829 = arith.index_cast %arg0 : i32 to index
    %830 = arith.index_cast %828 : i32 to index
    %831 = memref.load %arg1[%829, %830] : memref<2x16xi32, #tpu.memory_space<smem>>
    %c2_i32_235 = arith.constant 2 : i32
    %832 = arith.muli %c5_i32, %c2_i32_235 : i32
    %c0_i32_236 = arith.constant 0 : i32
    %833 = arith.addi %832, %c0_i32_236 : i32
    %834 = arith.index_cast %arg0 : i32 to index
    %835 = arith.index_cast %833 : i32 to index
    %836 = memref.load %arg2[%834, %835] : memref<2x16xi32, #tpu.memory_space<smem>>
    %c0_i32_237 = arith.constant 0 : i32
    %837 = arith.minsi %831, %c0_i32_237 : i32
    %c0_238 = arith.constant 0 : index
    %838 = arith.index_cast %837 : i32 to index
    %c0_239 = arith.constant 0 : index
    %c0_240 = arith.constant 0 : index
    %839 = vector.load %arg5[%c0_238, %838, %c0_239, %c0_240] : memref<1x4x4x128xf32, #tpu.memory_space<vmem>>, vector<1x4x4x128xf32>
    %840 = vector.shape_cast %839 : vector<1x4x4x128xf32> to vector<4x4x128xf32>
    %841 = vector.broadcast %837 : i32 to vector<4x4x1xi32>
    %842 = arith.addi %0, %841 : vector<4x4x1xi32>
    %c2_i32_241 = arith.constant 2 : i32
    %843 = arith.muli %c5_i32, %c2_i32_241 : i32
    %c0_i32_242 = arith.constant 0 : i32
    %844 = arith.addi %843, %c0_i32_242 : i32
    %845 = arith.index_cast %arg0 : i32 to index
    %846 = arith.index_cast %844 : i32 to index
    %847 = memref.load %arg3[%845, %846] : memref<2x16xi32, #tpu.memory_space<smem>>
    %c2_i32_243 = arith.constant 2 : i32
    %848 = arith.muli %c5_i32, %c2_i32_243 : i32
    %c0_i32_244 = arith.constant 0 : i32
    %849 = arith.addi %848, %c0_i32_244 : i32
    %850 = arith.index_cast %arg0 : i32 to index
    %851 = arith.index_cast %849 : i32 to index
    %852 = memref.load %arg4[%850, %851] : memref<2x16xi32, #tpu.memory_space<smem>>
    %853 = vector.broadcast %831 : i32 to vector<4x4x1xi32>
    %854 = arith.cmpi sge, %842, %853 : vector<4x4x1xi32>
    %855 = vector.broadcast %836 : i32 to vector<4x4x1xi32>
    %856 = arith.cmpi slt, %842, %855 : vector<4x4x1xi32>
    %857 = arith.andi %854, %856 : vector<4x4x1xi1>
    %858 = vector.broadcast %847 : i32 to vector<4x4x1xi32>
    %859 = arith.cmpi sge, %1, %858 : vector<4x4x1xi32>
    %860 = arith.andi %857, %859 : vector<4x4x1xi1>
    %861 = vector.broadcast %852 : i32 to vector<4x4x1xi32>
    %862 = arith.cmpi slt, %1, %861 : vector<4x4x1xi32>
    %863 = arith.andi %860, %862 : vector<4x4x1xi1>
    %cst_245 = arith.constant 0xFF800000 : f32
    %864 = vector.shape_cast %863 : vector<4x4x1xi1> to vector<4x4x1xi1>
    %865 = vector.broadcast %864 : vector<4x4x1xi1> to vector<4x4x128xi1>
    %866 = vector.broadcast %cst_245 : f32 to vector<4x4x128xf32>
    %867 = arith.select %865, %840, %866 : vector<4x4x128xi1>, vector<4x4x128xf32>
    %cst_246 = arith.constant dense<0xFF800000> : vector<128xf32>
    %868 = vector.multi_reduction <maximumf>, %867, %cst_246 [0, 1] : vector<4x4x128xf32> to vector<128xf32>
    %869 = vector.shape_cast %868 : vector<128xf32> to vector<1x1x128xf32>
    %870 = arith.cmpi sle, %836, %831 : i32
    %871 = arith.cmpi sle, %852, %847 : i32
    %872 = arith.ori %870, %871 : i1
    %cst_247 = arith.constant 0.000000e+00 : f32
    %873 = vector.broadcast %cst_247 : f32 to vector<1x1x128xf32>
    %874 = arith.select %872, %873, %869 : vector<1x1x128xf32>
    %c2_i32_248 = arith.constant 2 : i32
    %875 = arith.muli %c5_i32, %c2_i32_248 : i32
    %c1_i32_249 = arith.constant 1 : i32
    %876 = arith.addi %875, %c1_i32_249 : i32
    %877 = arith.index_cast %arg0 : i32 to index
    %878 = arith.index_cast %876 : i32 to index
    %879 = memref.load %arg3[%877, %878] : memref<2x16xi32, #tpu.memory_space<smem>>
    %c2_i32_250 = arith.constant 2 : i32
    %880 = arith.muli %c5_i32, %c2_i32_250 : i32
    %c1_i32_251 = arith.constant 1 : i32
    %881 = arith.addi %880, %c1_i32_251 : i32
    %882 = arith.index_cast %arg0 : i32 to index
    %883 = arith.index_cast %881 : i32 to index
    %884 = memref.load %arg4[%882, %883] : memref<2x16xi32, #tpu.memory_space<smem>>
    %885 = vector.broadcast %831 : i32 to vector<4x4x1xi32>
    %886 = arith.cmpi sge, %842, %885 : vector<4x4x1xi32>
    %887 = vector.broadcast %836 : i32 to vector<4x4x1xi32>
    %888 = arith.cmpi slt, %842, %887 : vector<4x4x1xi32>
    %889 = arith.andi %886, %888 : vector<4x4x1xi1>
    %890 = vector.broadcast %879 : i32 to vector<4x4x1xi32>
    %891 = arith.cmpi sge, %1, %890 : vector<4x4x1xi32>
    %892 = arith.andi %889, %891 : vector<4x4x1xi1>
    %893 = vector.broadcast %884 : i32 to vector<4x4x1xi32>
    %894 = arith.cmpi slt, %1, %893 : vector<4x4x1xi32>
    %895 = arith.andi %892, %894 : vector<4x4x1xi1>
    %cst_252 = arith.constant 0xFF800000 : f32
    %896 = vector.shape_cast %895 : vector<4x4x1xi1> to vector<4x4x1xi1>
    %897 = vector.broadcast %896 : vector<4x4x1xi1> to vector<4x4x128xi1>
    %898 = vector.broadcast %cst_252 : f32 to vector<4x4x128xf32>
    %899 = arith.select %897, %840, %898 : vector<4x4x128xi1>, vector<4x4x128xf32>
    %cst_253 = arith.constant dense<0xFF800000> : vector<128xf32>
    %900 = vector.multi_reduction <maximumf>, %899, %cst_253 [0, 1] : vector<4x4x128xf32> to vector<128xf32>
    %901 = vector.shape_cast %900 : vector<128xf32> to vector<1x1x128xf32>
    %902 = arith.cmpi sle, %836, %831 : i32
    %903 = arith.cmpi sle, %884, %879 : i32
    %904 = arith.ori %902, %903 : i1
    %cst_254 = arith.constant 0.000000e+00 : f32
    %905 = vector.broadcast %cst_254 : f32 to vector<1x1x128xf32>
    %906 = arith.select %904, %905, %901 : vector<1x1x128xf32>
    %c2_i32_255 = arith.constant 2 : i32
    %907 = arith.muli %c5_i32, %c2_i32_255 : i32
    %c1_i32_256 = arith.constant 1 : i32
    %908 = arith.addi %907, %c1_i32_256 : i32
    %909 = arith.index_cast %arg0 : i32 to index
    %910 = arith.index_cast %908 : i32 to index
    %911 = memref.load %arg1[%909, %910] : memref<2x16xi32, #tpu.memory_space<smem>>
    %c2_i32_257 = arith.constant 2 : i32
    %912 = arith.muli %c5_i32, %c2_i32_257 : i32
    %c1_i32_258 = arith.constant 1 : i32
    %913 = arith.addi %912, %c1_i32_258 : i32
    %914 = arith.index_cast %arg0 : i32 to index
    %915 = arith.index_cast %913 : i32 to index
    %916 = memref.load %arg2[%914, %915] : memref<2x16xi32, #tpu.memory_space<smem>>
    %c0_i32_259 = arith.constant 0 : i32
    %917 = arith.minsi %911, %c0_i32_259 : i32
    %c0_260 = arith.constant 0 : index
    %918 = arith.index_cast %917 : i32 to index
    %c0_261 = arith.constant 0 : index
    %c0_262 = arith.constant 0 : index
    %919 = vector.load %arg5[%c0_260, %918, %c0_261, %c0_262] : memref<1x4x4x128xf32, #tpu.memory_space<vmem>>, vector<1x4x4x128xf32>
    %920 = vector.shape_cast %919 : vector<1x4x4x128xf32> to vector<4x4x128xf32>
    %921 = vector.broadcast %917 : i32 to vector<4x4x1xi32>
    %922 = arith.addi %0, %921 : vector<4x4x1xi32>
    %c2_i32_263 = arith.constant 2 : i32
    %923 = arith.muli %c5_i32, %c2_i32_263 : i32
    %c0_i32_264 = arith.constant 0 : i32
    %924 = arith.addi %923, %c0_i32_264 : i32
    %925 = arith.index_cast %arg0 : i32 to index
    %926 = arith.index_cast %924 : i32 to index
    %927 = memref.load %arg3[%925, %926] : memref<2x16xi32, #tpu.memory_space<smem>>
    %c2_i32_265 = arith.constant 2 : i32
    %928 = arith.muli %c5_i32, %c2_i32_265 : i32
    %c0_i32_266 = arith.constant 0 : i32
    %929 = arith.addi %928, %c0_i32_266 : i32
    %930 = arith.index_cast %arg0 : i32 to index
    %931 = arith.index_cast %929 : i32 to index
    %932 = memref.load %arg4[%930, %931] : memref<2x16xi32, #tpu.memory_space<smem>>
    %933 = vector.broadcast %911 : i32 to vector<4x4x1xi32>
    %934 = arith.cmpi sge, %922, %933 : vector<4x4x1xi32>
    %935 = vector.broadcast %916 : i32 to vector<4x4x1xi32>
    %936 = arith.cmpi slt, %922, %935 : vector<4x4x1xi32>
    %937 = arith.andi %934, %936 : vector<4x4x1xi1>
    %938 = vector.broadcast %927 : i32 to vector<4x4x1xi32>
    %939 = arith.cmpi sge, %1, %938 : vector<4x4x1xi32>
    %940 = arith.andi %937, %939 : vector<4x4x1xi1>
    %941 = vector.broadcast %932 : i32 to vector<4x4x1xi32>
    %942 = arith.cmpi slt, %1, %941 : vector<4x4x1xi32>
    %943 = arith.andi %940, %942 : vector<4x4x1xi1>
    %cst_267 = arith.constant 0xFF800000 : f32
    %944 = vector.shape_cast %943 : vector<4x4x1xi1> to vector<4x4x1xi1>
    %945 = vector.broadcast %944 : vector<4x4x1xi1> to vector<4x4x128xi1>
    %946 = vector.broadcast %cst_267 : f32 to vector<4x4x128xf32>
    %947 = arith.select %945, %920, %946 : vector<4x4x128xi1>, vector<4x4x128xf32>
    %cst_268 = arith.constant dense<0xFF800000> : vector<128xf32>
    %948 = vector.multi_reduction <maximumf>, %947, %cst_268 [0, 1] : vector<4x4x128xf32> to vector<128xf32>
    %949 = vector.shape_cast %948 : vector<128xf32> to vector<1x1x128xf32>
    %950 = arith.cmpi sle, %916, %911 : i32
    %951 = arith.cmpi sle, %932, %927 : i32
    %952 = arith.ori %950, %951 : i1
    %cst_269 = arith.constant 0.000000e+00 : f32
    %953 = vector.broadcast %cst_269 : f32 to vector<1x1x128xf32>
    %954 = arith.select %952, %953, %949 : vector<1x1x128xf32>
    %c2_i32_270 = arith.constant 2 : i32
    %955 = arith.muli %c5_i32, %c2_i32_270 : i32
    %c1_i32_271 = arith.constant 1 : i32
    %956 = arith.addi %955, %c1_i32_271 : i32
    %957 = arith.index_cast %arg0 : i32 to index
    %958 = arith.index_cast %956 : i32 to index
    %959 = memref.load %arg3[%957, %958] : memref<2x16xi32, #tpu.memory_space<smem>>
    %c2_i32_272 = arith.constant 2 : i32
    %960 = arith.muli %c5_i32, %c2_i32_272 : i32
    %c1_i32_273 = arith.constant 1 : i32
    %961 = arith.addi %960, %c1_i32_273 : i32
    %962 = arith.index_cast %arg0 : i32 to index
    %963 = arith.index_cast %961 : i32 to index
    %964 = memref.load %arg4[%962, %963] : memref<2x16xi32, #tpu.memory_space<smem>>
    %965 = vector.broadcast %911 : i32 to vector<4x4x1xi32>
    %966 = arith.cmpi sge, %922, %965 : vector<4x4x1xi32>
    %967 = vector.broadcast %916 : i32 to vector<4x4x1xi32>
    %968 = arith.cmpi slt, %922, %967 : vector<4x4x1xi32>
    %969 = arith.andi %966, %968 : vector<4x4x1xi1>
    %970 = vector.broadcast %959 : i32 to vector<4x4x1xi32>
    %971 = arith.cmpi sge, %1, %970 : vector<4x4x1xi32>
    %972 = arith.andi %969, %971 : vector<4x4x1xi1>
    %973 = vector.broadcast %964 : i32 to vector<4x4x1xi32>
    %974 = arith.cmpi slt, %1, %973 : vector<4x4x1xi32>
    %975 = arith.andi %972, %974 : vector<4x4x1xi1>
    %cst_274 = arith.constant 0xFF800000 : f32
    %976 = vector.shape_cast %975 : vector<4x4x1xi1> to vector<4x4x1xi1>
    %977 = vector.broadcast %976 : vector<4x4x1xi1> to vector<4x4x128xi1>
    %978 = vector.broadcast %cst_274 : f32 to vector<4x4x128xf32>
    %979 = arith.select %977, %920, %978 : vector<4x4x128xi1>, vector<4x4x128xf32>
    %cst_275 = arith.constant dense<0xFF800000> : vector<128xf32>
    %980 = vector.multi_reduction <maximumf>, %979, %cst_275 [0, 1] : vector<4x4x128xf32> to vector<128xf32>
    %981 = vector.shape_cast %980 : vector<128xf32> to vector<1x1x128xf32>
    %982 = arith.cmpi sle, %916, %911 : i32
    %983 = arith.cmpi sle, %964, %959 : i32
    %984 = arith.ori %982, %983 : i1
    %cst_276 = arith.constant 0.000000e+00 : f32
    %985 = vector.broadcast %cst_276 : f32 to vector<1x1x128xf32>
    %986 = arith.select %984, %985, %981 : vector<1x1x128xf32>
    %987 = tpu.concatenate %874, %906, %954, %986 in 2 : vector<1x1x128xf32>, vector<1x1x128xf32>, vector<1x1x128xf32>, vector<1x1x128xf32> -> vector<1x1x512xf32>
    %c0_277 = arith.constant 0 : index
    %988 = arith.index_cast %c5_i32 : i32 to index
    %c0_278 = arith.constant 0 : index
    %c0_279 = arith.constant 0 : index
    %989 = vector.load %arg6[%c0_277, %988, %c0_278, %c0_279] : memref<1x8x1x512xf32, #tpu.memory_space<vmem>>, vector<1x1x1x512xf32>
    %990 = vector.shape_cast %989 : vector<1x1x1x512xf32> to vector<1x1x512xf32>
    %991 = vector.shape_cast %987 : vector<1x1x512xf32> to vector<1x1x1x512xf32>
    tpu.vector_store %arg6[%c0_277, %988, %c0_278, %c0_279], %991 {strides = array<i32>} : memref<1x8x1x512xf32, #tpu.memory_space<vmem>>, vector<1x1x1x512xf32>,
    %c6_i32 = arith.constant 6 : i32
    %c2_i32_280 = arith.constant 2 : i32
    %992 = arith.muli %c6_i32, %c2_i32_280 : i32
    %c0_i32_281 = arith.constant 0 : i32
    %993 = arith.addi %992, %c0_i32_281 : i32
    %994 = arith.index_cast %arg0 : i32 to index
    %995 = arith.index_cast %993 : i32 to index
    %996 = memref.load %arg1[%994, %995] : memref<2x16xi32, #tpu.memory_space<smem>>
    %c2_i32_282 = arith.constant 2 : i32
    %997 = arith.muli %c6_i32, %c2_i32_282 : i32
    %c0_i32_283 = arith.constant 0 : i32
    %998 = arith.addi %997, %c0_i32_283 : i32
    %999 = arith.index_cast %arg0 : i32 to index
    %1000 = arith.index_cast %998 : i32 to index
    %1001 = memref.load %arg2[%999, %1000] : memref<2x16xi32, #tpu.memory_space<smem>>
    %c0_i32_284 = arith.constant 0 : i32
    %1002 = arith.minsi %996, %c0_i32_284 : i32
    %c0_285 = arith.constant 0 : index
    %1003 = arith.index_cast %1002 : i32 to index
    %c0_286 = arith.constant 0 : index
    %c0_287 = arith.constant 0 : index
    %1004 = vector.load %arg5[%c0_285, %1003, %c0_286, %c0_287] : memref<1x4x4x128xf32, #tpu.memory_space<vmem>>, vector<1x4x4x128xf32>
    %1005 = vector.shape_cast %1004 : vector<1x4x4x128xf32> to vector<4x4x128xf32>
    %1006 = vector.broadcast %1002 : i32 to vector<4x4x1xi32>
    %1007 = arith.addi %0, %1006 : vector<4x4x1xi32>
    %c2_i32_288 = arith.constant 2 : i32
    %1008 = arith.muli %c6_i32, %c2_i32_288 : i32
    %c0_i32_289 = arith.constant 0 : i32
    %1009 = arith.addi %1008, %c0_i32_289 : i32
    %1010 = arith.index_cast %arg0 : i32 to index
    %1011 = arith.index_cast %1009 : i32 to index
    %1012 = memref.load %arg3[%1010, %1011] : memref<2x16xi32, #tpu.memory_space<smem>>
    %c2_i32_290 = arith.constant 2 : i32
    %1013 = arith.muli %c6_i32, %c2_i32_290 : i32
    %c0_i32_291 = arith.constant 0 : i32
    %1014 = arith.addi %1013, %c0_i32_291 : i32
    %1015 = arith.index_cast %arg0 : i32 to index
    %1016 = arith.index_cast %1014 : i32 to index
    %1017 = memref.load %arg4[%1015, %1016] : memref<2x16xi32, #tpu.memory_space<smem>>
    %1018 = vector.broadcast %996 : i32 to vector<4x4x1xi32>
    %1019 = arith.cmpi sge, %1007, %1018 : vector<4x4x1xi32>
    %1020 = vector.broadcast %1001 : i32 to vector<4x4x1xi32>
    %1021 = arith.cmpi slt, %1007, %1020 : vector<4x4x1xi32>
    %1022 = arith.andi %1019, %1021 : vector<4x4x1xi1>
    %1023 = vector.broadcast %1012 : i32 to vector<4x4x1xi32>
    %1024 = arith.cmpi sge, %1, %1023 : vector<4x4x1xi32>
    %1025 = arith.andi %1022, %1024 : vector<4x4x1xi1>
    %1026 = vector.broadcast %1017 : i32 to vector<4x4x1xi32>
    %1027 = arith.cmpi slt, %1, %1026 : vector<4x4x1xi32>
    %1028 = arith.andi %1025, %1027 : vector<4x4x1xi1>
    %cst_292 = arith.constant 0xFF800000 : f32
    %1029 = vector.shape_cast %1028 : vector<4x4x1xi1> to vector<4x4x1xi1>
    %1030 = vector.broadcast %1029 : vector<4x4x1xi1> to vector<4x4x128xi1>
    %1031 = vector.broadcast %cst_292 : f32 to vector<4x4x128xf32>
    %1032 = arith.select %1030, %1005, %1031 : vector<4x4x128xi1>, vector<4x4x128xf32>
    %cst_293 = arith.constant dense<0xFF800000> : vector<128xf32>
    %1033 = vector.multi_reduction <maximumf>, %1032, %cst_293 [0, 1] : vector<4x4x128xf32> to vector<128xf32>
    %1034 = vector.shape_cast %1033 : vector<128xf32> to vector<1x1x128xf32>
    %1035 = arith.cmpi sle, %1001, %996 : i32
    %1036 = arith.cmpi sle, %1017, %1012 : i32
    %1037 = arith.ori %1035, %1036 : i1
    %cst_294 = arith.constant 0.000000e+00 : f32
    %1038 = vector.broadcast %cst_294 : f32 to vector<1x1x128xf32>
    %1039 = arith.select %1037, %1038, %1034 : vector<1x1x128xf32>
    %c2_i32_295 = arith.constant 2 : i32
    %1040 = arith.muli %c6_i32, %c2_i32_295 : i32
    %c1_i32_296 = arith.constant 1 : i32
    %1041 = arith.addi %1040, %c1_i32_296 : i32
    %1042 = arith.index_cast %arg0 : i32 to index
    %1043 = arith.index_cast %1041 : i32 to index
    %1044 = memref.load %arg3[%1042, %1043] : memref<2x16xi32, #tpu.memory_space<smem>>
    %c2_i32_297 = arith.constant 2 : i32
    %1045 = arith.muli %c6_i32, %c2_i32_297 : i32
    %c1_i32_298 = arith.constant 1 : i32
    %1046 = arith.addi %1045, %c1_i32_298 : i32
    %1047 = arith.index_cast %arg0 : i32 to index
    %1048 = arith.index_cast %1046 : i32 to index
    %1049 = memref.load %arg4[%1047, %1048] : memref<2x16xi32, #tpu.memory_space<smem>>
    %1050 = vector.broadcast %996 : i32 to vector<4x4x1xi32>
    %1051 = arith.cmpi sge, %1007, %1050 : vector<4x4x1xi32>
    %1052 = vector.broadcast %1001 : i32 to vector<4x4x1xi32>
    %1053 = arith.cmpi slt, %1007, %1052 : vector<4x4x1xi32>
    %1054 = arith.andi %1051, %1053 : vector<4x4x1xi1>
    %1055 = vector.broadcast %1044 : i32 to vector<4x4x1xi32>
    %1056 = arith.cmpi sge, %1, %1055 : vector<4x4x1xi32>
    %1057 = arith.andi %1054, %1056 : vector<4x4x1xi1>
    %1058 = vector.broadcast %1049 : i32 to vector<4x4x1xi32>
    %1059 = arith.cmpi slt, %1, %1058 : vector<4x4x1xi32>
    %1060 = arith.andi %1057, %1059 : vector<4x4x1xi1>
    %cst_299 = arith.constant 0xFF800000 : f32
    %1061 = vector.shape_cast %1060 : vector<4x4x1xi1> to vector<4x4x1xi1>
    %1062 = vector.broadcast %1061 : vector<4x4x1xi1> to vector<4x4x128xi1>
    %1063 = vector.broadcast %cst_299 : f32 to vector<4x4x128xf32>
    %1064 = arith.select %1062, %1005, %1063 : vector<4x4x128xi1>, vector<4x4x128xf32>
    %cst_300 = arith.constant dense<0xFF800000> : vector<128xf32>
    %1065 = vector.multi_reduction <maximumf>, %1064, %cst_300 [0, 1] : vector<4x4x128xf32> to vector<128xf32>
    %1066 = vector.shape_cast %1065 : vector<128xf32> to vector<1x1x128xf32>
    %1067 = arith.cmpi sle, %1001, %996 : i32
    %1068 = arith.cmpi sle, %1049, %1044 : i32
    %1069 = arith.ori %1067, %1068 : i1
    %cst_301 = arith.constant 0.000000e+00 : f32
    %1070 = vector.broadcast %cst_301 : f32 to vector<1x1x128xf32>
    %1071 = arith.select %1069, %1070, %1066 : vector<1x1x128xf32>
    %c2_i32_302 = arith.constant 2 : i32
    %1072 = arith.muli %c6_i32, %c2_i32_302 : i32
    %c1_i32_303 = arith.constant 1 : i32
    %1073 = arith.addi %1072, %c1_i32_303 : i32
    %1074 = arith.index_cast %arg0 : i32 to index
    %1075 = arith.index_cast %1073 : i32 to index
    %1076 = memref.load %arg1[%1074, %1075] : memref<2x16xi32, #tpu.memory_space<smem>>
    %c2_i32_304 = arith.constant 2 : i32
    %1077 = arith.muli %c6_i32, %c2_i32_304 : i32
    %c1_i32_305 = arith.constant 1 : i32
    %1078 = arith.addi %1077, %c1_i32_305 : i32
    %1079 = arith.index_cast %arg0 : i32 to index
    %1080 = arith.index_cast %1078 : i32 to index
    %1081 = memref.load %arg2[%1079, %1080] : memref<2x16xi32, #tpu.memory_space<smem>>
    %c0_i32_306 = arith.constant 0 : i32
    %1082 = arith.minsi %1076, %c0_i32_306 : i32
    %c0_307 = arith.constant 0 : index
    %1083 = arith.index_cast %1082 : i32 to index
    %c0_308 = arith.constant 0 : index
    %c0_309 = arith.constant 0 : index
    %1084 = vector.load %arg5[%c0_307, %1083, %c0_308, %c0_309] : memref<1x4x4x128xf32, #tpu.memory_space<vmem>>, vector<1x4x4x128xf32>
    %1085 = vector.shape_cast %1084 : vector<1x4x4x128xf32> to vector<4x4x128xf32>
    %1086 = vector.broadcast %1082 : i32 to vector<4x4x1xi32>
    %1087 = arith.addi %0, %1086 : vector<4x4x1xi32>
    %c2_i32_310 = arith.constant 2 : i32
    %1088 = arith.muli %c6_i32, %c2_i32_310 : i32
    %c0_i32_311 = arith.constant 0 : i32
    %1089 = arith.addi %1088, %c0_i32_311 : i32
    %1090 = arith.index_cast %arg0 : i32 to index
    %1091 = arith.index_cast %1089 : i32 to index
    %1092 = memref.load %arg3[%1090, %1091] : memref<2x16xi32, #tpu.memory_space<smem>>
    %c2_i32_312 = arith.constant 2 : i32
    %1093 = arith.muli %c6_i32, %c2_i32_312 : i32
    %c0_i32_313 = arith.constant 0 : i32
    %1094 = arith.addi %1093, %c0_i32_313 : i32
    %1095 = arith.index_cast %arg0 : i32 to index
    %1096 = arith.index_cast %1094 : i32 to index
    %1097 = memref.load %arg4[%1095, %1096] : memref<2x16xi32, #tpu.memory_space<smem>>
    %1098 = vector.broadcast %1076 : i32 to vector<4x4x1xi32>
    %1099 = arith.cmpi sge, %1087, %1098 : vector<4x4x1xi32>
    %1100 = vector.broadcast %1081 : i32 to vector<4x4x1xi32>
    %1101 = arith.cmpi slt, %1087, %1100 : vector<4x4x1xi32>
    %1102 = arith.andi %1099, %1101 : vector<4x4x1xi1>
    %1103 = vector.broadcast %1092 : i32 to vector<4x4x1xi32>
    %1104 = arith.cmpi sge, %1, %1103 : vector<4x4x1xi32>
    %1105 = arith.andi %1102, %1104 : vector<4x4x1xi1>
    %1106 = vector.broadcast %1097 : i32 to vector<4x4x1xi32>
    %1107 = arith.cmpi slt, %1, %1106 : vector<4x4x1xi32>
    %1108 = arith.andi %1105, %1107 : vector<4x4x1xi1>
    %cst_314 = arith.constant 0xFF800000 : f32
    %1109 = vector.shape_cast %1108 : vector<4x4x1xi1> to vector<4x4x1xi1>
    %1110 = vector.broadcast %1109 : vector<4x4x1xi1> to vector<4x4x128xi1>
    %1111 = vector.broadcast %cst_314 : f32 to vector<4x4x128xf32>
    %1112 = arith.select %1110, %1085, %1111 : vector<4x4x128xi1>, vector<4x4x128xf32>
    %cst_315 = arith.constant dense<0xFF800000> : vector<128xf32>
    %1113 = vector.multi_reduction <maximumf>, %1112, %cst_315 [0, 1] : vector<4x4x128xf32> to vector<128xf32>
    %1114 = vector.shape_cast %1113 : vector<128xf32> to vector<1x1x128xf32>
    %1115 = arith.cmpi sle, %1081, %1076 : i32
    %1116 = arith.cmpi sle, %1097, %1092 : i32
    %1117 = arith.ori %1115, %1116 : i1
    %cst_316 = arith.constant 0.000000e+00 : f32
    %1118 = vector.broadcast %cst_316 : f32 to vector<1x1x128xf32>
    %1119 = arith.select %1117, %1118, %1114 : vector<1x1x128xf32>
    %c2_i32_317 = arith.constant 2 : i32
    %1120 = arith.muli %c6_i32, %c2_i32_317 : i32
    %c1_i32_318 = arith.constant 1 : i32
    %1121 = arith.addi %1120, %c1_i32_318 : i32
    %1122 = arith.index_cast %arg0 : i32 to index
    %1123 = arith.index_cast %1121 : i32 to index
    %1124 = memref.load %arg3[%1122, %1123] : memref<2x16xi32, #tpu.memory_space<smem>>
    %c2_i32_319 = arith.constant 2 : i32
    %1125 = arith.muli %c6_i32, %c2_i32_319 : i32
    %c1_i32_320 = arith.constant 1 : i32
    %1126 = arith.addi %1125, %c1_i32_320 : i32
    %1127 = arith.index_cast %arg0 : i32 to index
    %1128 = arith.index_cast %1126 : i32 to index
    %1129 = memref.load %arg4[%1127, %1128] : memref<2x16xi32, #tpu.memory_space<smem>>
    %1130 = vector.broadcast %1076 : i32 to vector<4x4x1xi32>
    %1131 = arith.cmpi sge, %1087, %1130 : vector<4x4x1xi32>
    %1132 = vector.broadcast %1081 : i32 to vector<4x4x1xi32>
    %1133 = arith.cmpi slt, %1087, %1132 : vector<4x4x1xi32>
    %1134 = arith.andi %1131, %1133 : vector<4x4x1xi1>
    %1135 = vector.broadcast %1124 : i32 to vector<4x4x1xi32>
    %1136 = arith.cmpi sge, %1, %1135 : vector<4x4x1xi32>
    %1137 = arith.andi %1134, %1136 : vector<4x4x1xi1>
    %1138 = vector.broadcast %1129 : i32 to vector<4x4x1xi32>
    %1139 = arith.cmpi slt, %1, %1138 : vector<4x4x1xi32>
    %1140 = arith.andi %1137, %1139 : vector<4x4x1xi1>
    %cst_321 = arith.constant 0xFF800000 : f32
    %1141 = vector.shape_cast %1140 : vector<4x4x1xi1> to vector<4x4x1xi1>
    %1142 = vector.broadcast %1141 : vector<4x4x1xi1> to vector<4x4x128xi1>
    %1143 = vector.broadcast %cst_321 : f32 to vector<4x4x128xf32>
    %1144 = arith.select %1142, %1085, %1143 : vector<4x4x128xi1>, vector<4x4x128xf32>
    %cst_322 = arith.constant dense<0xFF800000> : vector<128xf32>
    %1145 = vector.multi_reduction <maximumf>, %1144, %cst_322 [0, 1] : vector<4x4x128xf32> to vector<128xf32>
    %1146 = vector.shape_cast %1145 : vector<128xf32> to vector<1x1x128xf32>
    %1147 = arith.cmpi sle, %1081, %1076 : i32
    %1148 = arith.cmpi sle, %1129, %1124 : i32
    %1149 = arith.ori %1147, %1148 : i1
    %cst_323 = arith.constant 0.000000e+00 : f32
    %1150 = vector.broadcast %cst_323 : f32 to vector<1x1x128xf32>
    %1151 = arith.select %1149, %1150, %1146 : vector<1x1x128xf32>
    %1152 = tpu.concatenate %1039, %1071, %1119, %1151 in 2 : vector<1x1x128xf32>, vector<1x1x128xf32>, vector<1x1x128xf32>, vector<1x1x128xf32> -> vector<1x1x512xf32>
    %c0_324 = arith.constant 0 : index
    %1153 = arith.index_cast %c6_i32 : i32 to index
    %c0_325 = arith.constant 0 : index
    %c0_326 = arith.constant 0 : index
    %1154 = vector.load %arg6[%c0_324, %1153, %c0_325, %c0_326] : memref<1x8x1x512xf32, #tpu.memory_space<vmem>>, vector<1x1x1x512xf32>
    %1155 = vector.shape_cast %1154 : vector<1x1x1x512xf32> to vector<1x1x512xf32>
    %1156 = vector.shape_cast %1152 : vector<1x1x512xf32> to vector<1x1x1x512xf32>
    tpu.vector_store %arg6[%c0_324, %1153, %c0_325, %c0_326], %1156 {strides = array<i32>} : memref<1x8x1x512xf32, #tpu.memory_space<vmem>>, vector<1x1x1x512xf32>,
    %c7_i32 = arith.constant 7 : i32
    %c2_i32_327 = arith.constant 2 : i32
    %1157 = arith.muli %c7_i32, %c2_i32_327 : i32
    %c0_i32_328 = arith.constant 0 : i32
    %1158 = arith.addi %1157, %c0_i32_328 : i32
    %1159 = arith.index_cast %arg0 : i32 to index
    %1160 = arith.index_cast %1158 : i32 to index
    %1161 = memref.load %arg1[%1159, %1160] : memref<2x16xi32, #tpu.memory_space<smem>>
    %c2_i32_329 = arith.constant 2 : i32
    %1162 = arith.muli %c7_i32, %c2_i32_329 : i32
    %c0_i32_330 = arith.constant 0 : i32
    %1163 = arith.addi %1162, %c0_i32_330 : i32
    %1164 = arith.index_cast %arg0 : i32 to index
    %1165 = arith.index_cast %1163 : i32 to index
    %1166 = memref.load %arg2[%1164, %1165] : memref<2x16xi32, #tpu.memory_space<smem>>
    %c0_i32_331 = arith.constant 0 : i32
    %1167 = arith.minsi %1161, %c0_i32_331 : i32
    %c0_332 = arith.constant 0 : index
    %1168 = arith.index_cast %1167 : i32 to index
    %c0_333 = arith.constant 0 : index
    %c0_334 = arith.constant 0 : index
    %1169 = vector.load %arg5[%c0_332, %1168, %c0_333, %c0_334] : memref<1x4x4x128xf32, #tpu.memory_space<vmem>>, vector<1x4x4x128xf32>
    %1170 = vector.shape_cast %1169 : vector<1x4x4x128xf32> to vector<4x4x128xf32>
    %1171 = vector.broadcast %1167 : i32 to vector<4x4x1xi32>
    %1172 = arith.addi %0, %1171 : vector<4x4x1xi32>
    %c2_i32_335 = arith.constant 2 : i32
    %1173 = arith.muli %c7_i32, %c2_i32_335 : i32
    %c0_i32_336 = arith.constant 0 : i32
    %1174 = arith.addi %1173, %c0_i32_336 : i32
    %1175 = arith.index_cast %arg0 : i32 to index
    %1176 = arith.index_cast %1174 : i32 to index
    %1177 = memref.load %arg3[%1175, %1176] : memref<2x16xi32, #tpu.memory_space<smem>>
    %c2_i32_337 = arith.constant 2 : i32
    %1178 = arith.muli %c7_i32, %c2_i32_337 : i32
    %c0_i32_338 = arith.constant 0 : i32
    %1179 = arith.addi %1178, %c0_i32_338 : i32
    %1180 = arith.index_cast %arg0 : i32 to index
    %1181 = arith.index_cast %1179 : i32 to index
    %1182 = memref.load %arg4[%1180, %1181] : memref<2x16xi32, #tpu.memory_space<smem>>
    %1183 = vector.broadcast %1161 : i32 to vector<4x4x1xi32>
    %1184 = arith.cmpi sge, %1172, %1183 : vector<4x4x1xi32>
    %1185 = vector.broadcast %1166 : i32 to vector<4x4x1xi32>
    %1186 = arith.cmpi slt, %1172, %1185 : vector<4x4x1xi32>
    %1187 = arith.andi %1184, %1186 : vector<4x4x1xi1>
    %1188 = vector.broadcast %1177 : i32 to vector<4x4x1xi32>
    %1189 = arith.cmpi sge, %1, %1188 : vector<4x4x1xi32>
    %1190 = arith.andi %1187, %1189 : vector<4x4x1xi1>
    %1191 = vector.broadcast %1182 : i32 to vector<4x4x1xi32>
    %1192 = arith.cmpi slt, %1, %1191 : vector<4x4x1xi32>
    %1193 = arith.andi %1190, %1192 : vector<4x4x1xi1>
    %cst_339 = arith.constant 0xFF800000 : f32
    %1194 = vector.shape_cast %1193 : vector<4x4x1xi1> to vector<4x4x1xi1>
    %1195 = vector.broadcast %1194 : vector<4x4x1xi1> to vector<4x4x128xi1>
    %1196 = vector.broadcast %cst_339 : f32 to vector<4x4x128xf32>
    %1197 = arith.select %1195, %1170, %1196 : vector<4x4x128xi1>, vector<4x4x128xf32>
    %cst_340 = arith.constant dense<0xFF800000> : vector<128xf32>
    %1198 = vector.multi_reduction <maximumf>, %1197, %cst_340 [0, 1] : vector<4x4x128xf32> to vector<128xf32>
    %1199 = vector.shape_cast %1198 : vector<128xf32> to vector<1x1x128xf32>
    %1200 = arith.cmpi sle, %1166, %1161 : i32
    %1201 = arith.cmpi sle, %1182, %1177 : i32
    %1202 = arith.ori %1200, %1201 : i1
    %cst_341 = arith.constant 0.000000e+00 : f32
    %1203 = vector.broadcast %cst_341 : f32 to vector<1x1x128xf32>
    %1204 = arith.select %1202, %1203, %1199 : vector<1x1x128xf32>
    %c2_i32_342 = arith.constant 2 : i32
    %1205 = arith.muli %c7_i32, %c2_i32_342 : i32
    %c1_i32_343 = arith.constant 1 : i32
    %1206 = arith.addi %1205, %c1_i32_343 : i32
    %1207 = arith.index_cast %arg0 : i32 to index
    %1208 = arith.index_cast %1206 : i32 to index
    %1209 = memref.load %arg3[%1207, %1208] : memref<2x16xi32, #tpu.memory_space<smem>>
    %c2_i32_344 = arith.constant 2 : i32
    %1210 = arith.muli %c7_i32, %c2_i32_344 : i32
    %c1_i32_345 = arith.constant 1 : i32
    %1211 = arith.addi %1210, %c1_i32_345 : i32
    %1212 = arith.index_cast %arg0 : i32 to index
    %1213 = arith.index_cast %1211 : i32 to index
    %1214 = memref.load %arg4[%1212, %1213] : memref<2x16xi32, #tpu.memory_space<smem>>
    %1215 = vector.broadcast %1161 : i32 to vector<4x4x1xi32>
    %1216 = arith.cmpi sge, %1172, %1215 : vector<4x4x1xi32>
    %1217 = vector.broadcast %1166 : i32 to vector<4x4x1xi32>
    %1218 = arith.cmpi slt, %1172, %1217 : vector<4x4x1xi32>
    %1219 = arith.andi %1216, %1218 : vector<4x4x1xi1>
    %1220 = vector.broadcast %1209 : i32 to vector<4x4x1xi32>
    %1221 = arith.cmpi sge, %1, %1220 : vector<4x4x1xi32>
    %1222 = arith.andi %1219, %1221 : vector<4x4x1xi1>
    %1223 = vector.broadcast %1214 : i32 to vector<4x4x1xi32>
    %1224 = arith.cmpi slt, %1, %1223 : vector<4x4x1xi32>
    %1225 = arith.andi %1222, %1224 : vector<4x4x1xi1>
    %cst_346 = arith.constant 0xFF800000 : f32
    %1226 = vector.shape_cast %1225 : vector<4x4x1xi1> to vector<4x4x1xi1>
    %1227 = vector.broadcast %1226 : vector<4x4x1xi1> to vector<4x4x128xi1>
    %1228 = vector.broadcast %cst_346 : f32 to vector<4x4x128xf32>
    %1229 = arith.select %1227, %1170, %1228 : vector<4x4x128xi1>, vector<4x4x128xf32>
    %cst_347 = arith.constant dense<0xFF800000> : vector<128xf32>
    %1230 = vector.multi_reduction <maximumf>, %1229, %cst_347 [0, 1] : vector<4x4x128xf32> to vector<128xf32>
    %1231 = vector.shape_cast %1230 : vector<128xf32> to vector<1x1x128xf32>
    %1232 = arith.cmpi sle, %1166, %1161 : i32
    %1233 = arith.cmpi sle, %1214, %1209 : i32
    %1234 = arith.ori %1232, %1233 : i1
    %cst_348 = arith.constant 0.000000e+00 : f32
    %1235 = vector.broadcast %cst_348 : f32 to vector<1x1x128xf32>
    %1236 = arith.select %1234, %1235, %1231 : vector<1x1x128xf32>
    %c2_i32_349 = arith.constant 2 : i32
    %1237 = arith.muli %c7_i32, %c2_i32_349 : i32
    %c1_i32_350 = arith.constant 1 : i32
    %1238 = arith.addi %1237, %c1_i32_350 : i32
    %1239 = arith.index_cast %arg0 : i32 to index
    %1240 = arith.index_cast %1238 : i32 to index
    %1241 = memref.load %arg1[%1239, %1240] : memref<2x16xi32, #tpu.memory_space<smem>>
    %c2_i32_351 = arith.constant 2 : i32
    %1242 = arith.muli %c7_i32, %c2_i32_351 : i32
    %c1_i32_352 = arith.constant 1 : i32
    %1243 = arith.addi %1242, %c1_i32_352 : i32
    %1244 = arith.index_cast %arg0 : i32 to index
    %1245 = arith.index_cast %1243 : i32 to index
    %1246 = memref.load %arg2[%1244, %1245] : memref<2x16xi32, #tpu.memory_space<smem>>
    %c0_i32_353 = arith.constant 0 : i32
    %1247 = arith.minsi %1241, %c0_i32_353 : i32
    %c0_354 = arith.constant 0 : index
    %1248 = arith.index_cast %1247 : i32 to index
    %c0_355 = arith.constant 0 : index
    %c0_356 = arith.constant 0 : index
    %1249 = vector.load %arg5[%c0_354, %1248, %c0_355, %c0_356] : memref<1x4x4x128xf32, #tpu.memory_space<vmem>>, vector<1x4x4x128xf32>
    %1250 = vector.shape_cast %1249 : vector<1x4x4x128xf32> to vector<4x4x128xf32>
    %1251 = vector.broadcast %1247 : i32 to vector<4x4x1xi32>
    %1252 = arith.addi %0, %1251 : vector<4x4x1xi32>
    %c2_i32_357 = arith.constant 2 : i32
    %1253 = arith.muli %c7_i32, %c2_i32_357 : i32
    %c0_i32_358 = arith.constant 0 : i32
    %1254 = arith.addi %1253, %c0_i32_358 : i32
    %1255 = arith.index_cast %arg0 : i32 to index
    %1256 = arith.index_cast %1254 : i32 to index
    %1257 = memref.load %arg3[%1255, %1256] : memref<2x16xi32, #tpu.memory_space<smem>>
    %c2_i32_359 = arith.constant 2 : i32
    %1258 = arith.muli %c7_i32, %c2_i32_359 : i32
    %c0_i32_360 = arith.constant 0 : i32
    %1259 = arith.addi %1258, %c0_i32_360 : i32
    %1260 = arith.index_cast %arg0 : i32 to index
    %1261 = arith.index_cast %1259 : i32 to index
    %1262 = memref.load %arg4[%1260, %1261] : memref<2x16xi32, #tpu.memory_space<smem>>
    %1263 = vector.broadcast %1241 : i32 to vector<4x4x1xi32>
    %1264 = arith.cmpi sge, %1252, %1263 : vector<4x4x1xi32>
    %1265 = vector.broadcast %1246 : i32 to vector<4x4x1xi32>
    %1266 = arith.cmpi slt, %1252, %1265 : vector<4x4x1xi32>
    %1267 = arith.andi %1264, %1266 : vector<4x4x1xi1>
    %1268 = vector.broadcast %1257 : i32 to vector<4x4x1xi32>
    %1269 = arith.cmpi sge, %1, %1268 : vector<4x4x1xi32>
    %1270 = arith.andi %1267, %1269 : vector<4x4x1xi1>
    %1271 = vector.broadcast %1262 : i32 to vector<4x4x1xi32>
    %1272 = arith.cmpi slt, %1, %1271 : vector<4x4x1xi32>
    %1273 = arith.andi %1270, %1272 : vector<4x4x1xi1>
    %cst_361 = arith.constant 0xFF800000 : f32
    %1274 = vector.shape_cast %1273 : vector<4x4x1xi1> to vector<4x4x1xi1>
    %1275 = vector.broadcast %1274 : vector<4x4x1xi1> to vector<4x4x128xi1>
    %1276 = vector.broadcast %cst_361 : f32 to vector<4x4x128xf32>
    %1277 = arith.select %1275, %1250, %1276 : vector<4x4x128xi1>, vector<4x4x128xf32>
    %cst_362 = arith.constant dense<0xFF800000> : vector<128xf32>
    %1278 = vector.multi_reduction <maximumf>, %1277, %cst_362 [0, 1] : vector<4x4x128xf32> to vector<128xf32>
    %1279 = vector.shape_cast %1278 : vector<128xf32> to vector<1x1x128xf32>
    %1280 = arith.cmpi sle, %1246, %1241 : i32
    %1281 = arith.cmpi sle, %1262, %1257 : i32
    %1282 = arith.ori %1280, %1281 : i1
    %cst_363 = arith.constant 0.000000e+00 : f32
    %1283 = vector.broadcast %cst_363 : f32 to vector<1x1x128xf32>
    %1284 = arith.select %1282, %1283, %1279 : vector<1x1x128xf32>
    %c2_i32_364 = arith.constant 2 : i32
    %1285 = arith.muli %c7_i32, %c2_i32_364 : i32
    %c1_i32_365 = arith.constant 1 : i32
    %1286 = arith.addi %1285, %c1_i32_365 : i32
    %1287 = arith.index_cast %arg0 : i32 to index
    %1288 = arith.index_cast %1286 : i32 to index
    %1289 = memref.load %arg3[%1287, %1288] : memref<2x16xi32, #tpu.memory_space<smem>>
    %c2_i32_366 = arith.constant 2 : i32
    %1290 = arith.muli %c7_i32, %c2_i32_366 : i32
    %c1_i32_367 = arith.constant 1 : i32
    %1291 = arith.addi %1290, %c1_i32_367 : i32
    %1292 = arith.index_cast %arg0 : i32 to index
    %1293 = arith.index_cast %1291 : i32 to index
    %1294 = memref.load %arg4[%1292, %1293] : memref<2x16xi32, #tpu.memory_space<smem>>
    %1295 = vector.broadcast %1241 : i32 to vector<4x4x1xi32>
    %1296 = arith.cmpi sge, %1252, %1295 : vector<4x4x1xi32>
    %1297 = vector.broadcast %1246 : i32 to vector<4x4x1xi32>
    %1298 = arith.cmpi slt, %1252, %1297 : vector<4x4x1xi32>
    %1299 = arith.andi %1296, %1298 : vector<4x4x1xi1>
    %1300 = vector.broadcast %1289 : i32 to vector<4x4x1xi32>
    %1301 = arith.cmpi sge, %1, %1300 : vector<4x4x1xi32>
    %1302 = arith.andi %1299, %1301 : vector<4x4x1xi1>
    %1303 = vector.broadcast %1294 : i32 to vector<4x4x1xi32>
    %1304 = arith.cmpi slt, %1, %1303 : vector<4x4x1xi32>
    %1305 = arith.andi %1302, %1304 : vector<4x4x1xi1>
    %cst_368 = arith.constant 0xFF800000 : f32
    %1306 = vector.shape_cast %1305 : vector<4x4x1xi1> to vector<4x4x1xi1>
    %1307 = vector.broadcast %1306 : vector<4x4x1xi1> to vector<4x4x128xi1>
    %1308 = vector.broadcast %cst_368 : f32 to vector<4x4x128xf32>
    %1309 = arith.select %1307, %1250, %1308 : vector<4x4x128xi1>, vector<4x4x128xf32>
    %cst_369 = arith.constant dense<0xFF800000> : vector<128xf32>
    %1310 = vector.multi_reduction <maximumf>, %1309, %cst_369 [0, 1] : vector<4x4x128xf32> to vector<128xf32>
    %1311 = vector.shape_cast %1310 : vector<128xf32> to vector<1x1x128xf32>
    %1312 = arith.cmpi sle, %1246, %1241 : i32
    %1313 = arith.cmpi sle, %1294, %1289 : i32
    %1314 = arith.ori %1312, %1313 : i1
    %cst_370 = arith.constant 0.000000e+00 : f32
    %1315 = vector.broadcast %cst_370 : f32 to vector<1x1x128xf32>
    %1316 = arith.select %1314, %1315, %1311 : vector<1x1x128xf32>
    %1317 = tpu.concatenate %1204, %1236, %1284, %1316 in 2 : vector<1x1x128xf32>, vector<1x1x128xf32>, vector<1x1x128xf32>, vector<1x1x128xf32> -> vector<1x1x512xf32>
    %c0_371 = arith.constant 0 : index
    %1318 = arith.index_cast %c7_i32 : i32 to index
    %c0_372 = arith.constant 0 : index
    %c0_373 = arith.constant 0 : index
    %1319 = vector.load %arg6[%c0_371, %1318, %c0_372, %c0_373] : memref<1x8x1x512xf32, #tpu.memory_space<vmem>>, vector<1x1x1x512xf32>
    %1320 = vector.shape_cast %1319 : vector<1x1x1x512xf32> to vector<1x1x512xf32>
    %1321 = vector.shape_cast %1317 : vector<1x1x512xf32> to vector<1x1x1x512xf32>
    tpu.vector_store %arg6[%c0_371, %1318, %c0_372, %c0_373], %1321 {strides = array<i32>} : memref<1x8x1x512xf32, #tpu.memory_space<vmem>>, vector<1x1x1x512xf32>,
    %c8_i32 = arith.constant 8 : i32
    return
  }
  func.func @transform_0(%arg0: i32, %arg1: memref<2x16xi32, #tpu.memory_space<smem>>, %arg2: memref<2x16xi32, #tpu.memory_space<smem>>, %arg3: memref<2x16xi32, #tpu.memory_space<smem>>, %arg4: memref<2x16xi32, #tpu.memory_space<smem>>) -> (i32, i32, i32, i32) {
    %c0_i32 = arith.constant 0 : i32
    %c0_i32_0 = arith.constant 0 : i32
    %c0_i32_1 = arith.constant 0 : i32
    %c0_i32_2 = arith.constant 0 : i32
    return %arg0, %c0_i32, %c0_i32_0, %c0_i32_1 : i32, i32, i32, i32
  }
  func.func @transform_1(%arg0: i32, %arg1: memref<2x16xi32, #tpu.memory_space<smem>>, %arg2: memref<2x16xi32, #tpu.memory_space<smem>>, %arg3: memref<2x16xi32, #tpu.memory_space<smem>>, %arg4: memref<2x16xi32, #tpu.memory_space<smem>>) -> (i32, i32, i32, i32) {
    %c0_i32 = arith.constant 0 : i32
    %c0_i32_0 = arith.constant 0 : i32
    %c0_i32_1 = arith.constant 0 : i32
    %c0_i32_2 = arith.constant 0 : i32
    return %arg0, %c0_i32, %c0_i32_0, %c0_i32_1 : i32, i32, i32, i32
  }
}

</mosaic_0001>

<bundles_post_ra>
// kernel: rcnn_base_forward.4
= control target key start
LH: loop header
LB: loop body
LE: loop exit
PB: predicated region body
PF: predicated region fallthrough
CT: control target
= control target key end

     0   :  { %s1079_s1 = inlined_call_operand.vmem [shape: bf16[768,128], index: 1, kind: input, shape index: {}]   ;;  %s1080_s0 = inlined_call_operand.vmem [shape: bf16[32,768], index: 0, kind: input, shape index: {}]   ;;  %s1081_s2 = inlined_call_operand.vmem [shape: f32[1,128], index: 2, kind: input, shape index: {}]   ;;  %s1082_s3 = inlined_call_operand.vmem [shape: f32[32,128], index: 3, kind: output, shape index: {}]  }
   0x1   :  { %v798_v0 = vld [vmem:[%s1079_s1 + $0x40] sm:$0xff]   ;;  %v802_v4 = vld [vmem:[%s1079_s1 + $0x48] sm:$0xff]   ;;  %v806_v8 = vld [vmem:[%s1079_s1 + $0x50] sm:$0xff]  }
   0x2   :  { %v799_v1 = vld [vmem:[%s1079_s1 + $0xc0] sm:$0xff]   ;;  %698 = vmatprep.subr.bf16.mxu0 %v798_v0  ;;  %v803_v5 = vld [vmem:[%s1079_s1 + $0xc8] sm:$0xff]   ;;  %v807_v9 = vld [vmem:[%s1079_s1 + $0xd0] sm:$0xff]  }
   0x3   :  { %v800_v2 = vld [vmem:[%s1079_s1] sm:$0xff]   ;;  %726 = vmatprep.subr.bf16.mxu1 %v799_v1  ;;  %v804_v6 = vld [vmem:[%s1079_s1 + $0x8] sm:$0xff]   ;;  %v808_v10 = vld [vmem:[%s1079_s1 + $0x10] sm:$0xff]  }
   0x4   :  { %v801_v3 = vld [vmem:[%s1079_s1 + $0x80] sm:$0xff]   ;;  %699 = vmatpush3.bf16.msra.mxu0 %v800_v2  ;;  %v805_v7 = vld [vmem:[%s1079_s1 + $0x88] sm:$0xff]   ;;  %v809_v11 = vld [vmem:[%s1079_s1 + $0x90] sm:$0xff]  }
   0x5   :  { %727 = vmatpush3.bf16.msra.mxu1 %v801_v3  ;;  %700 = vmatprep.subr.bf16.mxu0 %v802_v4  ;;  %v810_v12 = vld [vmem:[%s1079_s1 + $0x58] sm:$0xff]   ;;  %v814_v16 = vld [vmem:[%s1079_s1 + $0x60] sm:$0xff]   ;;  %v818_v20 = vld [vmem:[%s1079_s1 + $0x68] sm:$0xff]  }
   0x6   :  { %728 = vmatprep.subr.bf16.mxu1 %v803_v5  ;;  %v811_v13 = vld [vmem:[%s1079_s1 + $0xd8] sm:$0xff]   ;;  %v815_v17 = vld [vmem:[%s1079_s1 + $0xe0] sm:$0xff]   ;;  %v819_v21 = vld [vmem:[%s1079_s1 + $0xe8] sm:$0xff]  }
   0x7   :  { %v812_v14 = vld [vmem:[%s1079_s1 + $0x18] sm:$0xff]   ;;  %v816_v18 = vld [vmem:[%s1079_s1 + $0x20] sm:$0xff]   ;;  %v820_v22 = vld [vmem:[%s1079_s1 + $0x28] sm:$0xff]  }
   0x8   :  { %701 = vmatpush3.bf16.msra.mxu0 %v804_v6  ;;  %v813_v15 = vld [vmem:[%s1079_s1 + $0x98] sm:$0xff]   ;;  %v817_v19 = vld [vmem:[%s1079_s1 + $0xa0] sm:$0xff]   ;;  %v821_v23 = vld [vmem:[%s1079_s1 + $0xa8] sm:$0xff]  }
   0x9   :  { %729 = vmatpush3.bf16.msra.mxu1 %v805_v7  ;;  %702 = vmatprep.subr.bf16.mxu0 %v806_v8  ;;  %v822_v24 = vld [vmem:[%s1079_s1 + $0x70] sm:$0xff]   ;;  %v826_v28 = vld [vmem:[%s1079_s1 + $0x78] sm:$0xff]   ;;  %v833_v34 = vld [vmem:[%s1080_s0 + $0x8] ss:$24 sps:$4 sm:$0xff]  }
   0xa   :  { %730 = vmatprep.subr.bf16.mxu1 %v807_v9  ;;  %v823_v25 = vld [vmem:[%s1079_s1 + $0xf0] sm:$0xff]   ;;  %v827_v29 = vld [vmem:[%s1079_s1 + $0xf8] sm:$0xff]   ;;  %v835_v35 = vld [vmem:[%s1080_s0 + $0xc] ss:$24 sps:$4 sm:$0xff]  }
   0xb   :  { %v824_v26 = vld [vmem:[%s1079_s1 + $0x30] sm:$0xff]   ;;  %v828_v30 = vld [vmem:[%s1079_s1 + $0x38] sm:$0xff]   ;;  %v836_v36 = vld [vmem:[%s1079_s1 + $0x140] sm:$0xff]   ;;  %559 = vmatprep.mubr.bf16.mxu1 %v835_v35 }
   0xc   :  { %703 = vmatpush3.bf16.msra.mxu0 %v808_v10  ;;  %v825_v27 = vld [vmem:[%s1079_s1 + $0xb0] sm:$0xff]   ;;  %v829_v31 = vld [vmem:[%s1079_s1 + $0xb8] sm:$0xff]   ;;  %v837_v37 = vld [vmem:[%s1079_s1 + $0x100] sm:$0xff]  }
   0xd   :  { %731 = vmatpush3.bf16.msra.mxu1 %v809_v11  ;;  %704 = vmatprep.subr.bf16.mxu0 %v810_v12  ;;  %v830_v32 = vld [vmem:[%s1080_s0] ss:$24 sps:$4 sm:$0xff]   ;;  %v832_v33 = vld [vmem:[%s1080_s0 + $0x4] ss:$24 sps:$4 sm:$0xff]   ;;  %v838_v38 = vld [vmem:[%s1079_s1 + $0x148] sm:$0xff]  }
   0xe   :  { %732 = vmatprep.subr.bf16.mxu1 %v811_v13  ;;  %510 = vmatprep.mubr.bf16.mxu0 %v832_v33  ;;  %v839_v39 = vld [vmem:[%s1079_s1 + $0x108] sm:$0xff]   ;;  %v840_v40 = vld [vmem:[%s1079_s1 + $0x150] sm:$0xff]   ;;  %v842_v42 = vld [vmem:[%s1079_s1 + $0x158] sm:$0xff]  }
   0xf   :  { %v841_v41 = vld [vmem:[%s1079_s1 + $0x110] sm:$0xff]   ;;  %v843_v43 = vld [vmem:[%s1079_s1 + $0x118] sm:$0xff]   ;;  %v844_v47 = vld [vmem:[%s1079_s1 + $0x160] sm:$0xff]  }
  0x10   :  { %705 = vmatpush3.bf16.msra.mxu0 %v812_v14  ;;  %v846_v44 = vld [vmem:[%s1080_s0 + $0x34] ss:$24 sps:$4 sm:$0xff]   ;;  %v848_v45 = vld [vmem:[%s1080_s0 + $0x30] ss:$24 sps:$4 sm:$0xff]   ;;  %v845_v49 = vld [vmem:[%s1079_s1 + $0x120] sm:$0xff]  }
  0x11   :  { %733 = vmatpush3.bf16.msra.mxu1 %v813_v15  ;;  %706 = vmatprep.subr.bf16.mxu0 %v814_v16  ;;  %v849_v46 = vld [vmem:[%s1080_s0 + $0x3c] ss:$24 sps:$4 sm:$0xff]   ;;  %v852_v48 = vld [vmem:[%s1080_s0 + $0x38] ss:$24 sps:$4 sm:$0xff]   ;;  %v851_v50 = vld [vmem:[%s1079_s1 + $0x168] sm:$0xff]  }
  0x12   :  { %734 = vmatprep.subr.bf16.mxu1 %v815_v17  ;;  %v853_v51 = vld [vmem:[%s1079_s1 + $0x128] sm:$0xff]   ;;  %v854_v53 = vld [vmem:[%s1079_s1 + $0x170] sm:$0xff]   ;;  %v863_v54 = vld [vmem:[%s1080_s0 + $0x44] ss:$24 sps:$4 sm:$0xff]  }
  0x13   :  { %v860_v52 = vld [vmem:[%s1080_s0 + $0x14] ss:$24 sps:$4 sm:$0xff]   ;;  %v856_v56 = vld [vmem:[%s1079_s1 + $0x178] sm:$0xff]   ;;  %v858_v58 = vld [vmem:[%s1080_s0 + $0x10] ss:$24 sps:$4 sm:$0xff]  }
  0x14   :  { %707 = vmatpush3.bf16.msra.mxu0 %v816_v18  ;;  %v855_v55 = vld [vmem:[%s1079_s1 + $0x130] sm:$0xff]   ;;  %v857_v57 = vld [vmem:[%s1079_s1 + $0x138] sm:$0xff]   ;;  %v637_v62 = vld [vmem:[%s1081_s2] ss:$0 sm:$0xff] }
  0x15   :  { %735 = vmatpush3.bf16.msra.mxu1 %v817_v19  ;;  %708 = vmatprep.subr.bf16.mxu0 %v818_v20  ;;  %v861_v59 = vld [vmem:[%s1080_s0 + $0x40] ss:$24 sps:$4 sm:$0xff]  }
  0x16   :  { %736 = vmatprep.subr.bf16.mxu1 %v819_v21 }
  0x18   :  { %709 = vmatpush3.bf16.msra.mxu0 %v820_v22 }
  0x19   :  { %737 = vmatpush3.bf16.msra.mxu1 %v821_v23  ;;  %710 = vmatprep.subr.bf16.mxu0 %v822_v24 }
  0x1a   :  { %738 = vmatprep.subr.bf16.mxu1 %v823_v25 }
  0x1c   :  { %711 = vmatpush3.bf16.msra.mxu0 %v824_v26 }
  0x1d   :  { %739 = vmatpush3.bf16.msra.mxu1 %v825_v27  ;;  %712 = vmatprep.subr.bf16.mxu0 %v826_v28 }
  0x1e   :  { %740 = vmatprep.subr.bf16.mxu1 %v827_v29 }
  0x20   :  { %713 = vmatpush3.bf16.msra.mxu0 %v828_v30 }
  0x21   :  { %741 = vmatpush3.bf16.msra.mxu1 %v829_v31  ;;  %754 = vmatprep.subr.bf16.mxu0 %v836_v36 }
  0x22   :  { %782 = vmatprep.subr.bf16.mxu1 %v836_v36 }
  0x23   :  { %511 = vmatmul.mubr.bf16.vlgmr.msra.gmra.mrb[0].mxu0 %v830_v32 }
  0x24   :  { %560 = vmatmul.mubr.bf16.vlgmr.msra.gmra.mrb[0].mxu1 %v833_v34  ;;  %755 = vmatpush3.bf16.msra.mxu0 %v837_v37 }
  0x25   :  { %790 = vmatpush3.bf16.msra.mxu1 %v837_v37  ;;  %756 = vmatprep.subr.bf16.mxu0 %v838_v38 }
  0x26   :  { %783 = vmatprep.subr.bf16.mxu1 %v838_v38  ;;  %518 = vmatprep.mubr.bf16.mxu0 %v846_v44 }
  0x27   :  { %567 = vmatprep.mubr.bf16.mxu1 %v849_v46 }
  0x28   :  { %757 = vmatpush3.bf16.msra.mxu0 %v839_v39 }
  0x29   :  { %791 = vmatpush3.bf16.msra.mxu1 %v839_v39  ;;  %758 = vmatprep.subr.bf16.mxu0 %v840_v40 }
  0x2a   :  { %784 = vmatprep.subr.bf16.mxu1 %v840_v40 }
  0x2b   :  { %519 = vmatmul.mubr.bf16.gmra.mrb[4].mxu0 %v848_v45 }
  0x2c   :  { %759 = vmatpush3.bf16.msra.mxu0 %v841_v41  ;;  %568 = vmatmul.mubr.bf16.gmra.mrb[4].mxu1 %v852_v48 }
  0x2d   :  { %792 = vmatpush3.bf16.msra.mxu1 %v841_v41  ;;  %760 = vmatprep.subr.bf16.mxu0 %v842_v42 }
  0x2e   :  { %785 = vmatprep.subr.bf16.mxu1 %v842_v42  ;;  %608 = vmatprep.mubr.bf16.mxu0 %v860_v52 }
  0x2f   :  { %616 = vmatprep.mubr.bf16.mxu1 %v863_v54 }
  0x30   :  { %761 = vmatpush3.bf16.msra.mxu0 %v843_v43 }
  0x31   :  { %793 = vmatpush3.bf16.msra.mxu1 %v843_v43  ;;  %762 = vmatprep.subr.bf16.mxu0 %v844_v47 }
  0x32   :  { %786 = vmatprep.subr.bf16.mxu1 %v844_v47 }
  0x34   :  { %763 = vmatpush3.bf16.msra.mxu0 %v845_v49 }
  0x35   :  { %794 = vmatpush3.bf16.msra.mxu1 %v845_v49  ;;  %764 = vmatprep.subr.bf16.mxu0 %v851_v50 }
  0x36   :  { %787 = vmatprep.subr.bf16.mxu1 %v851_v50 }
  0x38   :  { %765 = vmatpush3.bf16.msra.mxu0 %v853_v51 }
  0x39   :  { %795 = vmatpush3.bf16.msra.mxu1 %v853_v51  ;;  %766 = vmatprep.subr.bf16.mxu0 %v854_v53 }
  0x3a   :  { %788 = vmatprep.subr.bf16.mxu1 %v854_v53 }
  0x3c   :  { %767 = vmatpush3.bf16.msra.mxu0 %v855_v55 }
  0x3d   :  { %796 = vmatpush3.bf16.msra.mxu1 %v855_v55  ;;  %768 = vmatprep.subr.bf16.mxu0 %v856_v56 }
  0x3e   :  { %789 = vmatprep.subr.bf16.mxu1 %v856_v56 }
  0x40   :  { %769 = vmatpush3.bf16.msra.mxu0 %v857_v57 }
  0x41   :  { %797 = vmatpush3.bf16.msra.mxu1 %v857_v57 }
  0x43   :  { %609 = vmatmul.mubr.bf16.vlgmr.msra.gmra.mrb[8].mxu0 %v858_v58 }
  0x44   :  { %617 = vmatmul.mubr.bf16.vlgmr.msra.gmra.mrb[8].mxu1 %v861_v59 }
  0xf6   :  { %v714_v60 = vpop.f32.mrb[0].mxu0 }
  0xf7   :  { %v742_v61 = vpop.f32.mrb[0].mxu1  ;;  %v715_v63 = vpop.f32.mrb[1].mxu0 }
  0xf8   :  { %v716_v0 = vadd.f32 %v715_v63, %v714_v60  ;;  %v743_v1 = vpop.f32.mrb[1].mxu1  ;;  %v717_v2 = vpop.f32.mrb[2].mxu0 }
  0xf9   :  { %v744_v3 = vadd.f32 %v743_v1, %v742_v61  ;;  %v745_v4 = vpop.f32.mrb[2].mxu1  ;;  %v718_v5 = vpop.f32.mrb[3].mxu0 }
  0xfa   :  { %v513_v6 = vadd.f32 %v716_v0, %v637_v62  ;;  %v719_v7 = vadd.f32 %v718_v5, %v717_v2  ;;  %v746_v8 = vpop.f32.mrb[3].mxu1 }
  0xfb   :  { %v747_v9 = vadd.f32 %v746_v8, %v745_v4 }
  0xfc   :  { %v562_v10 = vadd.f32 %v744_v3, %v513_v6  ;;  %v516_v11 = vadd.f32 %v719_v7, %v637_v62 }
  0xfe   :  { %v565_v12 = vadd.f32 %v747_v9, %v516_v11  ;;  %v720_v13 = vpop.f32.mrb[4].mxu0 }
  0xff   :  { %v721_v14 = vpop.f32.mrb[5].mxu0  ;;  %v748_v15 = vpop.f32.mrb[4].mxu1 }
 0x100   :  { %v722_v16 = vadd.f32 %v721_v14, %v720_v13  ;;  %v723_v17 = vpop.f32.mrb[6].mxu0  ;;  %v749_v18 = vpop.f32.mrb[5].mxu1 }
 0x101   :  { %v724_v19 = vpop.f32.mrb[7].mxu0  ;;  %v750_v20 = vadd.f32 %v749_v18, %v748_v15  ;;  %v751_v21 = vpop.f32.mrb[6].mxu1 }
 0x102   :  { %v521_v22 = vadd.f32 %v722_v16, %v637_v62  ;;  %v725_v23 = vadd.f32 %v724_v19, %v723_v17  ;;  %v752_v24 = vpop.f32.mrb[7].mxu1 }
 0x103   :  { %v753_v25 = vadd.f32 %v752_v24, %v751_v21 }
 0x104   :  { %v524_v26 = vadd.f32 %v725_v23, %v637_v62  ;;  %v570_v27 = vadd.f32 %v750_v20, %v521_v22 }
 0x106   :  { %v573_v28 = vadd.f32 %v753_v25, %v524_v26 }
 0x116   :  { %v770_v29 = vpop.f32.mrb[8].mxu0 }
 0x117   :  { %v776_v30 = vpop.f32.mrb[8].mxu1  ;;  %v771_v31 = vpop.f32.mrb[9].mxu0 }
 0x118   :  { %v772_v32 = vadd.f32 %v771_v31, %v770_v29  ;;  %v777_v33 = vpop.f32.mrb[9].mxu1  ;;  %v773_v34 = vpop.f32.mrb[10].mxu0 }
 0x119   :  { %v778_v35 = vadd.f32 %v777_v33, %v776_v30  ;;  %v779_v36 = vpop.f32.mrb[10].mxu1  ;;  %v774_v37 = vpop.f32.mrb[11].mxu0 }
 0x11a   :  { %v611_v38 = vadd.f32 %v772_v32, %v562_v10  ;;  %v775_v39 = vadd.f32 %v774_v37, %v773_v34  ;;  %v780_v40 = vpop.f32.mrb[11].mxu1 }
 0x11b   :  { %v619_v41 = vadd.f32 %v778_v35, %v570_v27  ;;  %v781_v42 = vadd.f32 %v780_v40, %v779_v36 }
 0x11c   :  { %v625_v43 = vmax.f32 %v611_v38, 0.0  ;;  %v614_v44 = vadd.f32 %v775_v39, %v565_v12 }
 0x11d   :  { %v627_v45 = vmax.f32 %v619_v41, 0.0  ;;  %v622_v46 = vadd.f32 %v781_v42, %v573_v28 }
 0x11e   :  { %629 = vst [vmem:[%s1082_s3] sm:$0xff] %v625_v43  ;;  %v626_v47 = vmax.f32 %v614_v44, 0.0 }
 0x11f   :  { %631 = vst [vmem:[%s1082_s3 + $0x10] sm:$0xff] %v627_v45  ;;  %v628_v48 = vmax.f32 %v622_v46, 0.0 }
 0x120   :  { %630 = vst [vmem:[%s1082_s3 + $0x8] sm:$0xff] %v626_v47 }
 0x121   :  { %632 = vst [vmem:[%s1082_s3 + $0x18] sm:$0xff] %v628_v48 }

// kernel: rcnn_base_forward.6
= control target key start
LH: loop header
LB: loop body
LE: loop exit
PB: predicated region body
PF: predicated region fallthrough
CT: control target
= control target key end

     0   :  { %11 = vsyncpa [#allocation3], 0  ;;  %s524_s18 = smov 0   ;;  %s582_s0 = inlined_call_operand.vmem [shape: f32[4,48], index: 0, kind: input, shape index: {}]   ;;  %s583_s1 = inlined_call_operand.vmem [shape: f32[2,4,48], index: 1, kind: input, shape index: {}]   ;;  %s584_s2 = inlined_call_operand.vmem [shape: f32[2,2,48], index: 2, kind: input, shape index: {}]   ;;  %s585_s3 = inlined_call_operand.vmem [shape: f32[2,3], index: 3, kind: input, shape index: {}]   ;;  %s586_s4 = inlined_call_operand.vmem [shape: f32[2,4,48], index: 4, kind: output, shape index: {0}]   ;;  %s587_s5 = inlined_call_operand.vmem [shape: f32[2,1,48], index: 5, kind: output, shape index: {1}]  }
   0x1 LB: > { %s530_s19 = sadd.s32 4294967295, %s491_s18   ;;  %p428_p0 = scmp.ge.s32.totalorder %s491_s18, 1  ;;  %s491_s18 = sphi %s524_s18, %s17_s18  }
   0x2   : > { %p168_p1 = scmp.lt.s32.totalorder %s491_s18, 3  ;;  %s184_s22 = sshll.u32 %s585_s3, 4  ;;  %s185_s22 = int_to_ptr.vmem [resolvable:$true] %s184_s22 }
   0x3   : > { %p449_p3 = scmp.eq.s32.totalorder %s530_s19, 0  ;;  %s466_s24 = scalar_lea.vmem %s185_s22, 32 }
   0x4   : > { %p537_p2 = pnand %p428_p0, %p168_p1  ;;  %p467_p6 = scmp.ne.s32.totalorder %s185_s22, %s466_s24 }
   0x5   : > { %p474_p10 = scmp.lt.s32.totalorder %s185_s22, %s185_s22  ;;  %p475_p11 = scmp.lt.s32.totalorder %s466_s24, %s466_s24 }
   0x6   : > { %p445_p4 = pneg %p537_p2 }
   0x7   : > { %p476_p12 = por %p475_p11, %p474_p10 }
   0x8   : > { %p446_p5 = pnand %p449_p3, %p445_p4 }
   0xa   : > { %p468_p7 = pneg %p446_p5 }
   0xc   : > { %p469_p8 = pnand %p468_p7, %p467_p6 }
   0xe   : > { %p470_p9 = pneg %p469_p8 }
  0x10   : > { %p477_p13 = pnand %p476_p12, %p470_p9 }
  0x12   : > { %480 = shalt.err (!%p477_p13)
}
  0x13   : > { %s493_s25 = smov [#allocation2]   ;;  %211 = sbr.rel (%p537_p2) target bundleno = 68 (0x44), region = 36 }
  0x14   : > { %448 = dma.vmem_to_smem (!%p446_p5), %s185_s22, 32, %s493_s25, [#allocation3]  }
  0x1a   : > { %486 = dma.done.wait (%p449_p3), [#allocation3], 32  }
  0x1b   : > { %488 = vsyncadd (%p449_p3), [#allocation3], 4294967264 }
  0x1c   : > { %217 = sfence }
  0x1d   : > { %p245_p0 = scmp.lt.s32.totalorder %s530_s19, 1  ;;  %v260_v0 = vld [vmem:[%s582_s0] sm:$0xf]  ;;  %s436_s12 = sshll.u32 %s530_s19, 7  ;;  %vm307_vm0 = vcmask 1040384   ;;  %vm309_vm1 = vcmask 1041408  }
  0x1e   : > { %v263_v1 = vrot.slane %v260_v0, 6  ;;  %s289_s13 = sadd.s32 1, %s436_s12  ;;  %s288_s14 = sld [smem:[#allocation2 + %s436_s12]]  ;;  %vm322_vm2 = vcmask 385024   ;;  %vm311_vm3 = vcmask 1042432   ;;  %vm313_vm4 = vcmask 388096  }
  0x1f   : > { %s557_s28 = scalar_select %p245_p0, %s530_s19, 1 }
  0x20   : > { %v265_v2 = vsub.f32 %v260_v0, %v263_v1  ;;  %s290_s15 = sld [smem:[#allocation2 + %s289_s13]] }
  0x21   : > { %s433_s29 = sshll.u32 %s557_s28, 2  ;;  %s434_s30 = sshll.u32 %s557_s28, 1 }
  0x22   : > { %s248_s8 = scalar_lea.vmem %s583_s1, %s433_s29  ;;  %s252_s11 = scalar_lea.vmem %s584_s2, %s434_s30  ;;  %v266_v8 = vadd.f32 1.0, %v265_v2 }
  0x23   : > { %v261_v3 = vld [vmem:[%s248_s8] sm:$0xf]  ;;  %s259_s21 = scalar_lea.vmem %s587_s5, %s557_s28  ;;  %s256_s24 = scalar_lea.vmem %s586_s4, %s433_s29 }
  0x24   : > { %v315_v4 = vld [vmem:[%s252_s11] sm:$0x1]  ;;  %v316_v5 = vld [vmem:[%s252_s11 + $0x1] sm:$0x1]  ;;  %v272_v6 = vmin.f32 %v261_v3, 4.1351666 }
  0x25   : > { %v317_v7 = vsub.f32 %v315_v4, %v316_v5  ;;  %v267_v11 = vmul.f32 0.5, %v266_v8  ;;  %v274_v13 = vrot.slane %v266_v8, 2  ;;  %s438_s16 = sadd.f32 -1.0, %s288_s14 }
  0x26   : > { %v278_v9 = vmul.f32 1.442695, %v272_v6  ;;  %s437_s17 = sadd.f32 -1.0, %s290_s15 }
  0x27   : > { %v318_v10 = vmul.f32 1.442695, %v317_v7  ;;  %v269_v12 = vrot.slane %v267_v11, 2  ;;  %v276_v15 = vmul.f32 %v274_v13, %v261_v3  ;;  %v298_v26 = vstv %s438_s16 }
  0x28   : > { %460 = vpow2.f32 %v278_v9  ;;  %v293_v25 = vstv %s437_s17 }
  0x29   : > { %462 = vpow2.f32 %v318_v10  ;;  %v271_v14 = vadd.f32 %v269_v12, %v260_v0 }
  0x2b   : > { %v277_v20 = vadd.f32 %v276_v15, %v271_v14 }
  0x32   : > { %v461_v16 = vpop.eup %460 }
  0x33   : > { %v463_v17 = vpop.eup %462  ;;  %v280_v18 = vmul.f32 %v461_v16, %v266_v8 }
  0x34   : > { %v320_v19 = vadd.f32 1.0, %v463_v17 }
  0x35   : > { %v281_v21 = vmul.f32 0.5, %v280_v18 }
  0x36   : > { %464 = vrcp.f32 %v320_v19 }
  0x37   : > { %v283_v22 = vrot.slane %v281_v21, 2 }
  0x39   : > { %v285_v23 = vsub.f32 %v277_v20, %v283_v22  ;;  %v286_v24 = vadd.f32 %v283_v22, %v277_v20 }
  0x3b   : > { %v292_v27 = vmax.f32 %v285_v23, 0.0  ;;  %v295_v28 = vmax.f32 %v286_v24, 0.0 }
  0x3d   : > { %v294_v29 = vmin.f32 %v293_v25, %v292_v27  ;;  %v296_v30 = vmin.f32 %v293_v25, %v295_v28  ;;  %v299_v31 = vmin.f32 %v298_v26, %v292_v27  ;;  %v300_v32 = vmin.f32 %v298_v26, %v295_v28 }
  0x3f   : > { %v302_v33 = vrot.slane %v296_v30, 6  ;;  %v305_v34 = vrot.slane %v300_v32, 6  ;;  %v308_v35 = vsel %vm307_vm0, %v294_v29, %v299_v31 }
  0x40   : > { %v465_v36 = vpop.eup %464 }
  0x41   : > { %v310_v37 = vsel %vm309_vm1, %v308_v35, %v302_v33  ;;  %323 = vst.msk [vmem:[%s259_s21] sm:$0x1] %vm322_vm2, %v465_v36 }
  0x42   : > { %v312_v38 = vsel %vm311_vm3, %v310_v37, %v305_v34 }
  0x43   : > { %314 = vst.msk [vmem:[%s256_s24] sm:$0xf] %vm313_vm4, %v312_v38 }
  0x44 PF: > { %s17_s18 = sadd.s32 1, %s491_s18  }
  0x45   : > { %p14_p1 = scmp.ge.s32.totalorder %s17_s18, 4  }
  0x47   :  { %16 = sbr.rel (!%p14_p1) target bundleno = 1 (0x1), region = 86 }
  0x4e   :  { %355 = vsyncpa [#allocation3], 1 }
  0x4f   :  { %357 = vsyncpa [#allocation3 + $0x1], 1 }

// kernel: rcnn_base_forward.5
= control target key start
LH: loop header
LB: loop body
LE: loop exit
PB: predicated region body
PF: predicated region fallthrough
CT: control target
= control target key end

     0   :  { %s2258_s21 = smov 0   ;;  %s2833_s0 = inlined_call_operand.vmem [shape: bf16[2,16,128], index: 0, kind: input, shape index: {}]   ;;  %s2834_s1 = inlined_call_operand.vmem [shape: s32[16,1], index: 1, kind: input, shape index: {}]   ;;  %s2835_s2 = inlined_call_operand.vmem [shape: bf16[1152,128], index: 2, kind: input, shape index: {}]   ;;  %s2836_s3 = inlined_call_operand.vmem [shape: f32[1,128], index: 3, kind: input, shape index: {}]   ;;  %s2837_s4 = inlined_call_operand.vmem [shape: bf16[128,128], index: 4, kind: input, shape index: {}]   ;;  %s2838_s5 = inlined_call_operand.vmem [shape: f32[1,128], index: 5, kind: input, shape index: {}]   ;;  %s2839_s6 = inlined_call_operand.vmem [shape: f32[2,16,128], index: 6, kind: output, shape index: {}]  }
   0x1 LB: > { %s1715_s22 = sadd.s32 4294967295, %s2218_s21   ;;  %p1719_p0 = scmp.ge.s32.totalorder %s2218_s21, 1  ;;  %s2218_s21 = sphi %s2258_s21, %s16_s21  }
   0x2   : > { %p212_p1 = scmp.lt.s32.totalorder %s2218_s21, 3 }
   0x4   : > { %p213_p2 = pnand %p1719_p0, %p212_p1 }
   0x5   : > { %v2269_v0 = vld [vmem:[%s2834_s1 + $0x8] sm:$0xff] (!%p213_p2)  ;;  %v259_v1 = vlaneseq (!%p213_p2)  ;;  %v2274_v2 = vld [vmem:[%s2834_s1] sm:$0xff] (!%p213_p2)  ;;  %v2220_v3 = vmov (!%p213_p2), 0   ;;  %v2221_v8 = vmov (!%p213_p2), 0.0   ;;  %v2135_v19 = vld [vmem:[%s2835_s2 + $0x10] sm:$0xff] (!%p213_p2)   ;;  %p242_p3 = scmp.lt.s32.totalorder (!%p213_p2), %s1715_s22, 1 }
   0x6   : > { %216 = sbr.rel (%p213_p2) target bundleno = 720 (0x2d0), region = 44  ;;  %2130 = vset.pattern.permute.xlu1 (!%p213_p2), %v2220_v3  ;;  %v2278_v4 = vadd.s32 (!%p213_p2), 4294967295, %v2269_v0  ;;  %2129 = vset.pattern.permute.xlu0 (!%p213_p2), %v2220_v3  ;;  %v288_v6 = vadd.s32 (!%p213_p2), 4294967295, %v2274_v2  ;;  %v2283_v7 = vadd.s32 (!%p213_p2), 1, %v2269_v0  ;;  %v2131_v9 = vld [vmem:[%s2835_s2] sm:$0xff] (!%p213_p2)   ;;  %vm340_vm2 = vcmp.ge.s32.totalorder (!%p213_p2), %v2269_v0, 0 }
   0x7   : > { %v260_v5 = vshrl.u32 (!%p213_p2), %v259_v1, 7  ;;  %1938 = vmatprep.subr.bf16.mxu1 (!%p213_p2), %v2221_v8  ;;  %1918 = vmatprep.subr.bf16.mxu0 (!%p213_p2), %v2221_v8  ;;  %v2132_v10 = vld [vmem:[%s2835_s2 + $0x40] sm:$0xff] (!%p213_p2)   ;;  %vm344_vm3 = vcmp.lt.s32.totalorder (!%p213_p2), %v2269_v0, 4  ;;  %vm339_vm5 = vcmp.ge.s32.totalorder (!%p213_p2), %v2274_v2, 0  ;;  %vm343_vm6 = vcmp.lt.s32.totalorder (!%p213_p2), %v2274_v2, 4  ;;  %v2133_v15 = vld [vmem:[%s2835_s2 + $0x8] sm:$0xff] (!%p213_p2)  }
   0x8   : > { %vm291_vm0 = vcmp.ge.s32.totalorder (!%p213_p2), %v2278_v4, 0  ;;  %vm295_vm1 = vcmp.lt.s32.totalorder (!%p213_p2), %v2278_v4, 4  ;;  %1939 = vmatpush3.bf16.msra.mxu1 (!%p213_p2), %v2131_v9  ;;  %1919 = vmatpush3.bf16.msra.mxu0 (!%p213_p2), %v2132_v10  ;;  %v2305_v13 = vadd.s32 (!%p213_p2), 1, %v2274_v2  ;;  %vm2313_vm8 = vmand (!%p213_p2), %vm340_vm2, %vm344_vm3  ;;  %vm2841_vm9 = vcmp.ge.s32.totalorder (!%p213_p2), %v2283_v7, 0  ;;  %v2134_v16 = vld [vmem:[%s2835_s2 + $0x48] sm:$0xff] (!%p213_p2)   ;;  %v2136_v21 = vld [vmem:[%s2835_s2 + $0x50] sm:$0xff] (!%p213_p2)  }
   0x9   : > { %vm297_vm4 = vmand (!%p213_p2), %vm291_vm0, %vm295_vm1  ;;  %v280_v11 = vadd.s32 (!%p213_p2), 4294967292, %v260_v5  ;;  %1940 = vmatprep.subr.bf16.mxu1 (!%p213_p2), %v2221_v8  ;;  %1920 = vmatprep.subr.bf16.mxu0 (!%p213_p2), %v2221_v8  ;;  %vm2840_vm10 = vcmp.lt.s32.totalorder (!%p213_p2), %v2283_v7, 4  ;;  %vm290_vm12 = vcmp.ge.s32.totalorder (!%p213_p2), %v288_v6, 0  ;;  %vm294_vm14 = vcmp.lt.s32.totalorder (!%p213_p2), %v288_v6, 4  ;;  %v2137_v24 = vld [vmem:[%s2835_s2 + $0x18] sm:$0xff] (!%p213_p2)   ;;  %v2139_v29 = vld [vmem:[%s2835_s2 + $0x20] sm:$0xff] (!%p213_p2)  }
   0xa   : > { %v299_v12 = vsel (!%p213_p2), %vm297_vm4, 1, %v2220_v3  ;;  %vm2335_vm15 = vmand (!%p213_p2), %vm2841_vm9, %vm2840_vm10  ;;  %vm570_vm4 = vcmp.ge.s32.totalorder (!%p213_p2), %v2305_v13, 0  ;;  %v348_v20 = vsel (!%p213_p2), %vm2313_vm8, 1, %v2220_v3  ;;  %v261_v22 = vadd.s32 (!%p213_p2), 8, %v260_v5  ;;  %v2138_v26 = vld [vmem:[%s2835_s2 + $0x58] sm:$0xff] (!%p213_p2)   ;;  %v2140_v30 = vld [vmem:[%s2835_s2 + $0x60] sm:$0xff] (!%p213_p2)  }
   0xb   : > { %304 = vperm.xlu1 (!%p213_p2), %2130, %v299_v12   ;;  %vm282_vm7 = vcmp.ge.s32.totalorder (!%p213_p2), %v280_v11, 0  ;;  %v579_v25 = vsel (!%p213_p2), %vm2335_vm15, 1, %v2220_v3  ;;  %v2141_v32 = vld [vmem:[%s2835_s2 + $0x28] sm:$0xff] (!%p213_p2)   ;;  %v2143_v35 = vld [vmem:[%s2835_s2 + $0x30] sm:$0xff] (!%p213_p2)   ;;  %v2145_v38 = vld [vmem:[%s2835_s2 + $0x38] sm:$0xff] (!%p213_p2)  }
   0xc   : > { %vm341_vm11 = vmand (!%p213_p2), %vm282_vm7, %vm339_vm5  ;;  %1941 = vmatpush3.bf16.msra.mxu1 (!%p213_p2), %v2133_v15  ;;  %1921 = vmatpush3.bf16.msra.mxu0 (!%p213_p2), %v2134_v16  ;;  %v1124_v28 = vadd.s32 (!%p213_p2), 4, %v261_v22  ;;  %v2142_v33 = vld [vmem:[%s2835_s2 + $0x68] sm:$0xff] (!%p213_p2)   ;;  %v2144_v36 = vld [vmem:[%s2835_s2 + $0x70] sm:$0xff] (!%p213_p2)  }
   0xd   : > { %vm345_vm13 = vmand %vm341_vm11, %vm343_vm6  ;;  %1942 = vmatprep.subr.bf16.mxu1 %v2221_v8  ;;  %1922 = vmatprep.subr.bf16.mxu0 %v2221_v8  ;;  %v2146_v40 = vld [vmem:[%s2835_s2 + $0x78] sm:$0xff]   ;;  %s2865_s22 = smov (!%p242_p3, %s1715_s22), 1  ;;  %v2148_v63 = vld [vmem:[%s2835_s2 + $0xc0] sm:$0xff]  }
   0xe   : > { %v347_v17 = vsel %vm345_vm13, 1, %v2220_v3  ;;  %vm292_vm11 = vmand %vm282_vm7, %vm290_vm12  ;;  %vm574_vm13 = vcmp.lt.s32.totalorder %v2305_v13, 4  ;;  %s1826_s13 = sshll.u32 %s2865_s22, 3  ;;  %v2149_v2 = vld [vmem:[%s2835_s2 + $0x80] sm:$0xff]   ;;  %v2150_v4 = vld [vmem:[%s2835_s2 + $0xc8] sm:$0xff]   ;;  %s1827_s15 = sshll.u32 %s2865_s22, 4 }
   0xf   : > { %350 = vperm.xlu0 %2129, %v347_v17   ;;  %vm296_vm10 = vmand %vm292_vm11, %vm294_vm14  ;;  %s246_s16 = scalar_lea.vmem %s2833_s0, %s1826_s13  ;;  %v2151_v5 = vld [vmem:[%s2835_s2 + $0x88] sm:$0xff]   ;;  %v2152_v6 = vld [vmem:[%s2835_s2 + $0xd0] sm:$0xff]   ;;  %s251_s20 = scalar_lea.vmem %s2839_s6, %s1827_s15 }
  0x10   : > { %v298_v23 = vsel %vm296_vm10, 1, %v2220_v3  ;;  %vm572_vm9 = vmand %vm282_vm7, %vm570_vm4  ;;  %1943 = vmatpush3.bf16.msra.mxu1 %v2135_v19  ;;  %1923 = vmatpush3.bf16.msra.mxu0 %v2136_v21  ;;  %vm2222_vm10 = vmmov 0   ;;  %v2452_v43 = vld [vmem:[%s246_s16] sm:$0xf]  ;;  %v2454_v44 = vld [vmem:[%s246_s16 + $0x4] sm:$0xf] }
  0x11   : > { %301 = vperm.xlu1 %2130, %v298_v23   ;;  %vm576_vm8 = vmand %vm572_vm9, %vm574_vm13  ;;  %1944 = vmatprep.subr.bf16.mxu1 %v2221_v8  ;;  %v2458_v45 = vcombine.low %v2452_v43, %v2454_v44  ;;  %v2154_v10 = vld [vmem:[%s2835_s2 + $0xd8] sm:$0xff]   ;;  %v2156_v13 = vld [vmem:[%s2835_s2 + $0xe0] sm:$0xff]  }
  0x12   : > { %v578_v27 = vsel %vm576_vm8, 1, %v2220_v3  ;;  %vm719_vm7 = vmand %vm290_vm12, %vm294_vm14  ;;  %1924 = vmatprep.subr.bf16.mxu0 %v2221_v8  ;;  %1954 = vmatprep.mubr.msk.bf16.mxu1 %vm2222_vm10, %v2221_v8  ;;  %vm1128_vm12 = vcmp.lt.s32.totalorder %v1124_v28, 16  ;;  %vm277_vm8 = vsmask.f32 2304  ;;  %v2157_v14 = vld [vmem:[%s2835_s2 + $0xa0] sm:$0xff]   ;;  %v2158_v17 = vld [vmem:[%s2835_s2 + $0xe8] sm:$0xff]  }
  0x13   : > { %353 = vperm.xlu0 %2129, %v348_v20   ;;  %v721_v31 = vsel %vm719_vm7, 1, %v2220_v3  ;;  %vm849_vm9 = vmand %vm339_vm5, %vm343_vm6  ;;  %1934 = vmatprep.mubr.msk.bf16.mxu0 %vm2222_vm10, %v2221_v8  ;;  %v2461_v46 = vshrl.u32 %v2458_v45, 16  ;;  %v2464_v47 = vshll.u32 %v2458_v45, 16  ;;  %v333_v57 = vrot.slane %v2458_v45, 6  ;;  %v2159_v18 = vld [vmem:[%s2835_s2 + $0xa8] sm:$0xff]   ;;  %v2161_v22 = vld [vmem:[%s2835_s2 + $0xb0] sm:$0xff]  }
  0x14   : > { %1945 = vmatpush3.bf16.msra.mxu1 %v2137_v24  ;;  %1925 = vmatpush3.bf16.msra.mxu0 %v2138_v26  ;;  %vm1132_vm5 = vmand %vm1128_vm12, %vm291_vm0  ;;  %v851_v34 = vsel %vm849_vm9, 1, %v2220_v3  ;;  %v2172_v54 = vld [vmem:[%s2835_s2 + $0x160] sm:$0xff]   ;;  %v2186_v19 = vld [vmem:[%s2835_s2 + $0x1d8] sm:$0xff]  }
  0x15   : > { %584 = vperm.xlu1 %2130, %v579_v25   ;;  %1946 = vmatprep.subr.bf16.mxu1 %v2221_v8  ;;  %vm987_vm6 = vmand %vm570_vm4, %vm574_vm13  ;;  %vm2847_vm4 = vcmp.lt.s32.totalorder %v2283_v7, 4  ;;  %v270_v49 = vrot.slane %v2461_v46, 5  ;;  %v273_v50 = vrot.slane %v2464_v47, 6  ;;  %vm276_vm13 = vcmask 1042432  }
  0x16   : > { %1926 = vmatprep.subr.bf16.mxu0 %v2221_v8  ;;  %vm1134_vm0 = vmand %vm1132_vm5, %vm295_vm1  ;;  %v989_v37 = vsel %vm987_vm6, 1, %v2220_v3  ;;  %v704_v21 = vrot.slane %v2461_v46, 7  ;;  %v560_v23 = vrot.slane %v2461_v46, 6  ;;  %v561_v24 = vrot.slane %v2464_v47, 7 }
  0x17   : > { %581 = vperm.xlu0 %2129, %v578_v27   ;;  %vm1267_vm14 = vmand %vm1128_vm12, %vm340_vm2  ;;  %v1136_v39 = vsel %vm1134_vm0, 1, %v2220_v3  ;;  %vm2846_vm2 = vcmp.ge.s32.totalorder %v2283_v7, 0  ;;  %v274_v53 = vor.u32 %v273_v50, %v270_v49  ;;  %v2153_v7 = vld [vmem:[%s2835_s2 + $0x90] sm:$0xff]  }
  0x18   : > { %1947 = vmatpush3.bf16.msra.mxu1 %v2139_v29  ;;  %1927 = vmatpush3.bf16.msra.mxu0 %v2140_v30  ;;  %vm1269_vm1 = vmand %vm1267_vm14, %vm344_vm3  ;;  %v2162_v29 = vld [vmem:[%s2835_s2 + $0xf8] sm:$0xff]   ;;  %v705_v30 = vor.u32 %v704_v21, %v2464_v47  ;;  %v2169_v49 = vld [vmem:[%s2835_s2 + $0x110] sm:$0xff]  }
  0x19   : > { %727 = vperm.xlu1 %2130, %v299_v12   ;;  %1948 = vmatprep.subr.bf16.mxu1 %v2221_v8  ;;  %vm1405_vm15 = vmand %vm1128_vm12, %vm2846_vm2  ;;  %v1271_v41 = vsel %vm1269_vm1, 1, %v2220_v3  ;;  %vm334_vm1 = vcmask 1041408   ;;  %v2155_v12 = vld [vmem:[%s2835_s2 + $0x98] sm:$0xff]  }
  0x1a   : > { %1928 = vmatprep.subr.bf16.mxu0 %v2221_v8  ;;  %vm1407_vm11 = vmand %vm1405_vm15, %vm2847_vm4  ;;  %v337_v1 = vsel %vm334_vm1, 0, %v333_v57  ;;  %v2187_v21 = vld [vmem:[%s2835_s2 + $0x198] sm:$0xff]  }
  0x1b   : > { %724 = vperm.xlu0 %2129, %v721_v31   ;;  %v1409_v42 = vsel %vm1407_vm11, 1, %v2220_v3  ;;  %vm2468_vm12 = vmand %vm276_vm13, %vm277_vm8 }
  0x1c   : > { %1949 = vmatpush3.bf16.msra.mxu1 %v2141_v32  ;;  %1929 = vmatpush3.bf16.msra.mxu0 %v2142_v33  ;;  %v279_v62 = vsel %vm2468_vm12, 0, %v274_v53  ;;  %v2163_v32 = vld [vmem:[%s2835_s2 + $0xb8] sm:$0xff]   ;;  %v562_v33 = vor.u32 %v561_v24, %v560_v23  ;;  %v2189_v23 = vld [vmem:[%s2835_s2 + $0x1a0] sm:$0xff]  }
  0x1d   : > { %857 = vperm.xlu1 %2130, %v348_v20   ;;  %1950 = vmatprep.subr.bf16.mxu1 %v2221_v8  ;;  %v2160_v20 = vld [vmem:[%s2835_s2 + $0xf0] sm:$0xff]   ;;  %v2171_v53 = vld [vmem:[%s2835_s2 + $0x118] sm:$0xff]  }
  0x1e   : > { %1930 = vmatprep.subr.bf16.mxu0 %v2221_v8 }
  0x1f   : > { %854 = vperm.xlu0 %2129, %v851_v34  }
  0x20   : > { %1951 = vmatpush3.bf16.msra.mxu1 %v2143_v35  ;;  %1931 = vmatpush3.bf16.msra.mxu0 %v2144_v36 }
  0x21   : > { %995 = vperm.xlu1 %2130, %v579_v25   ;;  %1952 = vmatprep.subr.bf16.mxu1 %v2221_v8 }
  0x22   : > { %1932 = vmatprep.subr.bf16.mxu0 %v2221_v8 }
  0x23   : > { %992 = vperm.xlu0 %2129, %v989_v37  }
  0x24   : > { %1953 = vmatpush3.bf16.msra.mxu1 %v2145_v38  ;;  %1933 = vmatpush3.bf16.msra.mxu0 %v2146_v40  ;;  %v2164_v38 = vld [vmem:[%s2835_s2 + $0x140] sm:$0xff]  }
  0x25   : > { %1141 = vperm.xlu1 %2130, %v1136_v39   ;;  %1978 = vmatprep.subr.bf16.mxu1 %v2221_v8  ;;  %v2165_v40 = vld [vmem:[%s2835_s2 + $0x100] sm:$0xff]  }
  0x26   : > { %1958 = vmatprep.subr.bf16.mxu0 %v2221_v8 }
  0x27   : > { %1138 = vperm.xlu0 %2129, %v721_v31   ;;  %v1115_v31 = vrot.slane %v2461_v46, 1 }
  0x29   : > { %1276 = vperm.xlu1 %2130, %v1271_v41   ;;  %v2166_v41 = vld [vmem:[%s2835_s2 + $0x148] sm:$0xff]  }
  0x2b   : > { %1273 = vperm.xlu0 %2129, %v851_v34  }
  0x2d   : > { %1414 = vperm.xlu1 %2130, %v1409_v42   ;;  %v2167_v42 = vld [vmem:[%s2835_s2 + $0x108] sm:$0xff]  }
  0x2f   : > { %1411 = vperm.xlu0 %2129, %v989_v37  }
  0x8a   : > { %v305_v48 = vpop.permute.xlu1 %304 }
  0x8b   : > { %vm307_vm3 = vcmp.eq.s32.totalorder %v305_v48, 1  ;;  %v2168_v48 = vld [vmem:[%s2835_s2 + $0x150] sm:$0xff]  }
  0x8c   : > { %vm309_vm7 = vmpackc.low %vm307_vm3, %vm307_vm3 }
  0x8d   : > { %v311_v55 = vsel %vm309_vm7, 65537, %v2220_v3 }
  0x8e   : > { %v351_v51 = vpop.permute.xlu0 %350 }
  0x8f   : > { %vm355_vm9 = vcmp.eq.s32.totalorder %v351_v51, 1  ;;  %v2170_v51 = vld [vmem:[%s2835_s2 + $0x158] sm:$0xff]  }
  0x90   : > { %v302_v52 = vpop.permute.xlu1 %301  ;;  %vm357_vm5 = vmpackc.low %vm355_vm9, %vm355_vm9 }
  0x91   : > { %vm306_vm6 = vcmp.eq.s32.totalorder %v302_v52, 1  ;;  %v359_v59 = vsel %vm357_vm5, 65537, %v2220_v3 }
  0x92   : > { %v354_v56 = vpop.permute.xlu0 %353  ;;  %vm308_vm0 = vmpackc.low %vm306_vm6, %vm306_vm6  ;;  %vm707_vm6 = vcmask 1040384  }
  0x93   : > { %vm356_vm14 = vcmp.eq.s32.totalorder %v354_v56, 1  ;;  %v310_v58 = vsel %vm308_vm0, 65537, %v2220_v3  ;;  %vm708_vm0 = vsmask.f32 256 }
  0x94   : > { %vm358_vm2 = vmpackc.low %vm356_vm14, %vm356_vm14  ;;  %v1725_v60 = vcombine.low %v310_v58, %v311_v55  ;;  %v585_v11 = vpop.permute.xlu1 %584  ;;  %vm565_vm14 = vsmask.f32 1280  ;;  %v2173_v55 = vld [vmem:[%s2835_s2 + $0x120] sm:$0xff]   ;;  %v2174_v58 = vld [vmem:[%s2835_s2 + $0x168] sm:$0xff]  }
  0x95   : > { %v360_v61 = vsel %vm358_vm2, 65537, %v2220_v3  ;;  %vm587_vm11 = vcmp.eq.s32.totalorder %v585_v11, 1  ;;  %vm2556_vm2 = vmand %vm707_vm6, %vm708_vm0 }
  0x96   : > { %v1726_v0 = vcombine.low %v359_v59, %v360_v61  ;;  %vm315_vm15 = vcmp.ne.s16.totalorder %v1725_v60, 0  ;;  %v582_v9 = vpop.permute.xlu0 %581  ;;  %vm2529_vm8 = vmpackc.low %vm587_vm11, %vm587_vm11  ;;  %v710_v37 = vsel %vm2556_vm2, 0, %v705_v30  ;;  %v2175_v59 = vld [vmem:[%s2835_s2 + $0x128] sm:$0xff]   ;;  %v2176_v60 = vld [vmem:[%s2835_s2 + $0x170] sm:$0xff]   ;;  %v978_v61 = vrot.slane %v2464_v47, 1 }
  0x97   : > { %1955 = vmatmul.mubr.msk.bf16.vlgmr.msra.gmra.mrb[0].mxu1 %vm315_vm15, %v279_v62  ;;  %vm586_vm7 = vcmp.eq.s32.totalorder %v582_v9, 1  ;;  %v591_v27 = vsel %vm2529_vm8, 65537, %v2220_v3  ;;  %vm2564_vm15 = vmand %vm334_vm1, %vm565_vm14  ;;  %v2177_v62 = vld [vmem:[%s2835_s2 + $0x130] sm:$0xff]  }
  0x98   : > { %vm364_vm4 = vcmp.ne.s16.totalorder %v1726_v0, 0  ;;  %1979 = vmatpush3.bf16.msra.mxu1 %v2148_v63  ;;  %1994 = vmatprep.mubr.msk.bf16.mxu1 %vm2222_vm10, %v2221_v8  ;;  %v728_v16 = vpop.permute.xlu1 %727  ;;  %vm588_vm5 = vmpackc.low %vm586_vm7, %vm586_vm7  ;;  %v567_v39 = vsel %vm2564_vm15, 0, %v562_v33  ;;  %v2193_v30 = vld [vmem:[%s2835_s2 + $0x1b0] sm:$0xff]  }
  0x99   : > { %1935 = vmatmul.mubr.msk.bf16.vlgmr.msra.gmra.mrb[0].mxu0 %vm364_vm4, %v337_v1  ;;  %1980 = vmatprep.subr.bf16.mxu1 %v2221_v8  ;;  %vm730_vm3 = vcmp.eq.s32.totalorder %v728_v16, 1  ;;  %v590_v28 = vsel %vm588_vm5, 65537, %v2220_v3  ;;  %vm982_vm5 = vsmask.f32 7424  ;;  %v2184_v16 = vld [vmem:[%s2835_s2 + $0x1d0] sm:$0xff]  }
  0x9a   : > { %1959 = vmatpush3.bf16.msra.mxu0 %v2149_v2  ;;  %1974 = vmatprep.mubr.msk.bf16.mxu0 %vm2222_vm10, %v2221_v8  ;;  %v725_v15 = vpop.permute.xlu0 %724  ;;  %vm732_vm9 = vmpackc.low %vm730_vm3, %vm730_vm3  ;;  %v1745_v36 = vcombine.low %v590_v28, %v591_v27  ;;  %v2191_v27 = vld [vmem:[%s2835_s2 + $0x1a8] sm:$0xff]   ;;  %v2207_v2 = vld [vmem:[%s2837_s4 + $0x18] sm:$0xff]  }
  0x9b   : > { %1960 = vmatprep.subr.bf16.mxu0 %v2221_v8  ;;  %vm729_vm13 = vcmp.eq.s32.totalorder %v725_v15, 1  ;;  %v734_v25 = vsel %vm732_vm9, 65537, %v2220_v3  ;;  %v2183_v15 = vld [vmem:[%s2835_s2 + $0x188] sm:$0xff]  }
  0x9c   : > { %1981 = vmatpush3.bf16.msra.mxu1 %v2150_v4  ;;  %vm731_vm12 = vmpackc.low %vm729_vm13, %vm729_vm13  ;;  %vm595_vm4 = vcmp.ne.s16.totalorder %v1745_v36, 0  ;;  %v858_v52 = vpop.permute.xlu1 %857  ;;  %v2178_v4 = vld [vmem:[%s2835_s2 + $0x178] sm:$0xff]  }
  0x9d   : > { %1982 = vmatprep.subr.bf16.mxu1 %v2221_v8  ;;  %v733_v26 = vsel %vm731_vm12, 65537, %v2220_v3  ;;  %vm860_vm8 = vcmp.eq.s32.totalorder %v858_v52, 1  ;;  %vm981_vm12 = vcmask 1047552   ;;  %v2199_v52 = vld [vmem:[%s2835_s2 + $0x218] sm:$0xff]  }
  0x9e   : > { %1961 = vmatpush3.bf16.msra.mxu0 %v2151_v5  ;;  %v1755_v35 = vcombine.low %v733_v26, %v734_v25  ;;  %v855_v50 = vpop.permute.xlu0 %854  ;;  %vm2634_vm6 = vmpackc.low %vm860_vm8, %vm860_vm8  ;;  %v979_v5 = vor.u32 %v978_v61, %v2461_v46  ;;  %v2190_v26 = vld [vmem:[%s2835_s2 + $0x1e8] sm:$0xff]   ;;  %v2203_v61 = vld [vmem:[%s2835_s2 + $0x238] sm:$0xff]  }
  0x9f   : > { %1962 = vmatprep.subr.bf16.mxu0 %v2221_v8  ;;  %vm859_vm9 = vcmp.eq.s32.totalorder %v855_v50, 1  ;;  %vm2649_vm14 = vmand %vm981_vm12, %vm982_vm5  ;;  %vm1120_vm12 = vsmask.f32 6400  ;;  %vm1262_vm5 = vcmask 1045504   ;;  %v2197_v50 = vld [vmem:[%s2835_s2 + $0x208] sm:$0xff]  }
  0xa0   : > { %1983 = vmatpush3.bf16.msra.mxu1 %v2152_v6  ;;  %vm738_vm1 = vcmp.ne.s16.totalorder %v1755_v35, 0  ;;  %v996_v57 = vpop.permute.xlu1 %995  ;;  %vm2640_vm0 = vmpackc.low %vm859_vm9, %vm859_vm9  ;;  %vm1119_vm9 = vcmask 1046528  }
  0xa1   : > { %1984 = vmatprep.subr.bf16.mxu1 %v2221_v8  ;;  %vm998_vm11 = vcmp.eq.s32.totalorder %v996_v57, 1  ;;  %v863_v11 = vsel %vm2640_vm0, %v2452_v43, 0  ;;  %v2182_v43 = vld [vmem:[%s2835_s2 + $0x1c8] sm:$0xff]   ;;  %v2202_v57 = vld [vmem:[%s2835_s2 + $0x230] sm:$0xff]  }
  0xa2   : > { %1963 = vmatpush3.bf16.msra.mxu0 %v2153_v7  ;;  %v993_v56 = vpop.permute.xlu0 %992  ;;  %vm1000_vm13 = vmpackc.low %vm998_vm11, %vm998_vm11  ;;  %v2179_v7 = vld [vmem:[%s2835_s2 + $0x138] sm:$0xff]  }
  0xa3   : > { %1964 = vmatprep.subr.bf16.mxu0 %v2221_v8  ;;  %vm997_vm3 = vcmp.eq.s32.totalorder %v993_v56, 1  ;;  %v1002_v0 = vsel %vm1000_vm13, 65537, %v2220_v3  ;;  %v2201_v56 = vld [vmem:[%s2835_s2 + $0x228] sm:$0xff]  }
  0xa4   : > { %1985 = vmatpush3.bf16.msra.mxu1 %v2154_v10  ;;  %vm999_vm7 = vmpackc.low %vm997_vm3, %vm997_vm3  ;;  %v864_v10 = vsel %vm2634_vm6, %v2454_v44, 0 }
  0xa5   : > { %1986 = vmatprep.subr.bf16.mxu1 %v2221_v8  ;;  %v1001_v1 = vsel %vm999_vm7, 65537, %v2220_v3  ;;  %v1765_v44 = vcombine.low %v863_v11, %v864_v10  ;;  %vm1121_vm6 = vmand %vm1119_vm9, %vm1120_vm12 }
  0xa6   : > { %1965 = vmatpush3.bf16.msra.mxu0 %v2155_v12  ;;  %v1774_v9 = vcombine.low %v1001_v1, %v1002_v0  ;;  %v984_v12 = vsel %vm2649_vm14, %v979_v5, 0  ;;  %v2204_v0 = vld [vmem:[%s2837_s4] sm:$0xff]   ;;  %v2205_v1 = vld [vmem:[%s2837_s4 + $0x8] sm:$0xff]  }
  0xa7   : > { %1966 = vmatprep.subr.bf16.mxu0 %v2221_v8 }
  0xa8   : > { %1987 = vmatpush3.bf16.msra.mxu1 %v2156_v13  ;;  %v2180_v13 = vld [vmem:[%s2835_s2 + $0x1c0] sm:$0xff]   ;;  %vm1006_vm2 = vcmp.ne.s16.totalorder %v1774_v9, 0 }
  0xa9   : > { %1988 = vmatprep.subr.bf16.mxu1 %v2221_v8 }
  0xaa   : > { %1967 = vmatpush3.bf16.msra.mxu0 %v2157_v14  ;;  %v2181_v14 = vld [vmem:[%s2835_s2 + $0x180] sm:$0xff]  }
  0xab   : > { %1968 = vmatprep.subr.bf16.mxu0 %v2221_v8 }
  0xac   : > { %1989 = vmatpush3.bf16.msra.mxu1 %v2158_v17  ;;  %v2185_v17 = vld [vmem:[%s2835_s2 + $0x190] sm:$0xff]  }
  0xad   : > { %1990 = vmatprep.subr.bf16.mxu1 %v2221_v8 }
  0xae   : > { %1969 = vmatpush3.bf16.msra.mxu0 %v2159_v18  ;;  %v1139_v18 = vpop.permute.xlu0 %1138 }
  0xaf   : > { %1970 = vmatprep.subr.bf16.mxu0 %v2221_v8  ;;  %vm1143_vm3 = vcmp.eq.s32.totalorder %v1139_v18, 1 }
  0xb0   : > { %1991 = vmatpush3.bf16.msra.mxu1 %v2160_v20  ;;  %v1142_v20 = vpop.permute.xlu1 %1141  ;;  %vm1145_vm7 = vmpackc.low %vm1143_vm3, %vm1143_vm3 }
  0xb1   : > { %1992 = vmatprep.subr.bf16.mxu1 %v2221_v8  ;;  %vm1144_vm15 = vcmp.eq.s32.totalorder %v1142_v20, 1  ;;  %v1147_v36 = vsel %vm1145_vm7, 65537, %v2220_v3 }
  0xb2   : > { %1971 = vmatpush3.bf16.msra.mxu0 %v2161_v22  ;;  %v2188_v22 = vld [vmem:[%s2835_s2 + $0x1e0] sm:$0xff]   ;;  %v1274_v24 = vpop.permute.xlu0 %1273  ;;  %vm2716_vm11 = vmpackc.low %vm1144_vm15, %vm1144_vm15 }
  0xb3   : > { %1972 = vmatprep.subr.bf16.mxu0 %v2221_v8  ;;  %v1148_v35 = vsel %vm2716_vm11, 65537, %v2220_v3 }
  0xb4   : > { %1993 = vmatpush3.bf16.msra.mxu1 %v2162_v29  ;;  %v1277_v25 = vpop.permute.xlu1 %1276  ;;  %v2192_v29 = vld [vmem:[%s2835_s2 + $0x1f0] sm:$0xff]  }
  0xb5   : > { %2018 = vmatprep.subr.bf16.mxu1 %v2221_v8 }
  0xb6   : > { %1973 = vmatpush3.bf16.msra.mxu0 %v2163_v32  ;;  %v1116_v32 = vrot.slane %v2464_v47, 2 }
  0xb7   : > { %1998 = vmatprep.subr.bf16.mxu0 %v2221_v8  ;;  %1995 = vmatmul.mubr.msk.bf16.vlgmr.msra.gmra.mrb[4].mxu1 %vm738_vm1, %v710_v37  ;;  %vm1279_vm1 = vcmp.eq.s32.totalorder %v1277_v25, 1  ;;  %v2194_v37 = vld [vmem:[%s2835_s2 + $0x1f8] sm:$0xff]  }
  0xb8   : > { %2019 = vmatpush3.bf16.msra.mxu1 %v2164_v38  ;;  %2034 = vmatprep.mubr.msk.bf16.mxu1 %vm2222_vm10, %v2221_v8  ;;  %vm1281_vm13 = vmpackc.low %vm1279_vm1, %vm1279_vm1  ;;  %v1261_v38 = vrot.slane %v2458_v45, 2  ;;  %v2196_v45 = vld [vmem:[%s2835_s2 + $0x200] sm:$0xff]  }
  0xb9   : > { %1975 = vmatmul.mubr.msk.bf16.vlgmr.msra.gmra.mrb[4].mxu0 %vm595_vm4, %v567_v39  ;;  %2020 = vmatprep.subr.bf16.mxu1 %v2221_v8  ;;  %vm1278_vm4 = vcmp.eq.s32.totalorder %v1274_v24, 1  ;;  %v1283_v33 = vsel %vm1281_vm13, 65537, %v2220_v3  ;;  %v2195_v39 = vld [vmem:[%s2835_s2 + $0x1b8] sm:$0xff]  }
  0xba   : > { %1999 = vmatpush3.bf16.msra.mxu0 %v2165_v40  ;;  %2014 = vmatprep.mubr.msk.bf16.mxu0 %vm2222_vm10, %v2221_v8  ;;  %vm1280_vm8 = vmpackc.low %vm1278_vm4, %vm1278_vm4  ;;  %v1117_v40 = vor.u32 %v1116_v32, %v1115_v31  ;;  %vm1401_vm4 = vsmask.f32 5376 }
  0xbb   : > { %2000 = vmatprep.subr.bf16.mxu0 %v2221_v8  ;;  %v1282_v34 = vsel %vm1280_vm8, 65537, %v2220_v3  ;;  %vm1402_vm11 = vmand %vm1262_vm5, %vm1401_vm4 }
  0xbc   : > { %2021 = vmatpush3.bf16.msra.mxu1 %v2166_v41  ;;  %v1794_v41 = vcombine.low %v1282_v34, %v1283_v33 }
  0xbd   : > { %2022 = vmatprep.subr.bf16.mxu1 %v2221_v8 }
  0xbe   : > { %2001 = vmatpush3.bf16.msra.mxu0 %v2167_v42  ;;  %v1784_v42 = vcombine.low %v1147_v36, %v1148_v35  ;;  %vm1287_vm0 = vcmp.ne.s16.totalorder %v1794_v41, 0 }
  0xbf   : > { %2002 = vmatprep.subr.bf16.mxu0 %v2221_v8 }
  0xc0   : > { %2023 = vmatpush3.bf16.msra.mxu1 %v2168_v48  ;;  %v1264_v48 = vsel %vm1262_vm5, %v1261_v38, 0  ;;  %vm1152_vm14 = vcmp.ne.s16.totalorder %v1784_v42, 0 }
  0xc1   : > { %2024 = vmatprep.subr.bf16.mxu1 %v2221_v8 }
  0xc2   : > { %2003 = vmatpush3.bf16.msra.mxu0 %v2169_v49  ;;  %v1122_v49 = vsel %vm1121_vm6, %v1117_v40, 0 }
  0xc3   : > { %2004 = vmatprep.subr.bf16.mxu0 %v2221_v8 }
  0xc4   : > { %2025 = vmatpush3.bf16.msra.mxu1 %v2170_v51  ;;  %v2198_v51 = vld [vmem:[%s2835_s2 + $0x210] sm:$0xff]  }
  0xc5   : > { %2026 = vmatprep.subr.bf16.mxu1 %v2221_v8 }
  0xc6   : > { %2005 = vmatpush3.bf16.msra.mxu0 %v2171_v53  ;;  %v2200_v53 = vld [vmem:[%s2835_s2 + $0x220] sm:$0xff]  }
  0xc7   : > { %2006 = vmatprep.subr.bf16.mxu0 %v2221_v8 }
  0xc8   : > { %2027 = vmatpush3.bf16.msra.mxu1 %v2172_v54  ;;  %v1412_v54 = vpop.permute.xlu0 %1411 }
  0xc9   : > { %2028 = vmatprep.subr.bf16.mxu1 %v2221_v8 }
  0xca   : > { %2007 = vmatpush3.bf16.msra.mxu0 %v2173_v55  ;;  %v1415_v55 = vpop.permute.xlu1 %1414 }
  0xcb   : > { %2008 = vmatprep.subr.bf16.mxu0 %v2221_v8 }
  0xcc   : > { %2029 = vmatpush3.bf16.msra.mxu1 %v2174_v58  ;;  %v1396_v58 = vrot.slane %v2461_v46, 2 }
  0xcd   : > { %2030 = vmatprep.subr.bf16.mxu1 %v2221_v8 }
  0xce   : > { %2009 = vmatpush3.bf16.msra.mxu0 %v2175_v59  ;;  %v1397_v59 = vrot.slane %v2464_v47, 3 }
  0xcf   : > { %2010 = vmatprep.subr.bf16.mxu0 %v2221_v8 }
  0xd0   : > { %2031 = vmatpush3.bf16.msra.mxu1 %v2176_v60 }
  0xd1   : > { %2032 = vmatprep.subr.bf16.mxu1 %v2221_v8 }
  0xd2   : > { %2011 = vmatpush3.bf16.msra.mxu0 %v2177_v62  ;;  %v1398_v62 = vor.u32 %v1397_v59, %v1396_v58 }
  0xd3   : > { %2012 = vmatprep.subr.bf16.mxu0 %v2221_v8 }
  0xd4   : > { %2033 = vmatpush3.bf16.msra.mxu1 %v2178_v4  ;;  %v1403_v47 = vsel %vm1402_vm11, %v1398_v62, 0  ;;  %v2208_v4 = vld [vmem:[%s2837_s4 + $0x20] sm:$0xff]  }
  0xd5   : > { %2058 = vmatprep.subr.bf16.mxu1 %v2221_v8 }
  0xd6   : > { %2013 = vmatpush3.bf16.msra.mxu0 %v2179_v7 }
  0xd7   : > { %2038 = vmatprep.subr.bf16.mxu0 %v2221_v8  ;;  %2035 = vmatmul.mubr.msk.bf16.vlgmr.msra.gmra.mrb[8].mxu1 %vm1006_vm2, %v984_v12  ;;  %vm1417_vm2 = vcmp.eq.s32.totalorder %v1415_v55, 1  ;;  %v2209_v12 = vld [vmem:[%s2837_s4 + $0x28] sm:$0xff]  }
  0xd8   : > { %2059 = vmatpush3.bf16.msra.mxu1 %v2180_v13  ;;  %2074 = vmatprep.mubr.msk.bf16.mxu1 %vm2222_vm10, %v2221_v8  ;;  %vm1419_vm1 = vmpackc.low %vm1417_vm2, %vm1417_vm2 }
  0xd9   : > { %2015 = vmatmul.mubr.bf16.vlgmr.msra.gmra.mrb[8].mxu0 %v1765_v44  ;;  %2060 = vmatprep.subr.bf16.mxu1 %v2221_v8  ;;  %v1421_v63 = vsel %vm1419_vm1, 65537, %v2220_v3 }
  0xda   : > { %2039 = vmatpush3.bf16.msra.mxu0 %v2181_v14  ;;  %2054 = vmatprep.mubr.msk.bf16.mxu0 %vm2222_vm10, %v2221_v8 }
  0xdb   : > { %2040 = vmatprep.subr.bf16.mxu0 %v2221_v8 }
  0xdc   : > { %2061 = vmatpush3.bf16.msra.mxu1 %v2182_v43 }
  0xdd   : > { %2062 = vmatprep.subr.bf16.mxu1 %v2221_v8 }
  0xde   : > { %2041 = vmatpush3.bf16.msra.mxu0 %v2183_v15  ;;  %v2210_v15 = vld [vmem:[%s2837_s4 + $0x30] sm:$0xff]  }
  0xdf   : > { %2042 = vmatprep.subr.bf16.mxu0 %v2221_v8 }
  0xe0   : > { %2063 = vmatpush3.bf16.msra.mxu1 %v2184_v16  ;;  %v2211_v16 = vld [vmem:[%s2837_s4 + $0x38] sm:$0xff]  }
  0xe1   : > { %2064 = vmatprep.subr.bf16.mxu1 %v2221_v8 }
  0xe2   : > { %2043 = vmatpush3.bf16.msra.mxu0 %v2185_v17 }
  0xe3   : > { %2044 = vmatprep.subr.bf16.mxu0 %v2221_v8 }
  0xe4   : > { %2065 = vmatpush3.bf16.msra.mxu1 %v2186_v19 }
  0xe5   : > { %2066 = vmatprep.subr.bf16.mxu1 %v2221_v8 }
  0xe6   : > { %2045 = vmatpush3.bf16.msra.mxu0 %v2187_v21 }
  0xe7   : > { %2046 = vmatprep.subr.bf16.mxu0 %v2221_v8 }
  0xe8   : > { %2067 = vmatpush3.bf16.msra.mxu1 %v2188_v22 }
  0xe9   : > { %2068 = vmatprep.subr.bf16.mxu1 %v2221_v8 }
  0xea   : > { %2047 = vmatpush3.bf16.msra.mxu0 %v2189_v23 }
  0xeb   : > { %2048 = vmatprep.subr.bf16.mxu0 %v2221_v8 }
  0xec   : > { %2069 = vmatpush3.bf16.msra.mxu1 %v2190_v26 }
  0xed   : > { %2070 = vmatprep.subr.bf16.mxu1 %v2221_v8 }
  0xee   : > { %2049 = vmatpush3.bf16.msra.mxu0 %v2191_v27 }
  0xef   : > { %2050 = vmatprep.subr.bf16.mxu0 %v2221_v8 }
  0xf0   : > { %2071 = vmatpush3.bf16.msra.mxu1 %v2192_v29 }
  0xf1   : > { %2072 = vmatprep.subr.bf16.mxu1 %v2221_v8 }
  0xf2   : > { %2051 = vmatpush3.bf16.msra.mxu0 %v2193_v30 }
  0xf3   : > { %2052 = vmatprep.subr.bf16.mxu0 %v2221_v8 }
  0xf4   : > { %2073 = vmatpush3.bf16.msra.mxu1 %v2194_v37 }
  0xf5   : > { %2098 = vmatprep.subr.bf16.mxu1 %v2221_v8 }
  0xf6   : > { %2053 = vmatpush3.bf16.msra.mxu0 %v2195_v39 }
  0xf7   : > { %2078 = vmatprep.subr.bf16.mxu0 %v2221_v8  ;;  %2075 = vmatmul.mubr.msk.bf16.vlgmr.msra.gmra.mrb[12].mxu1 %vm1287_vm0, %v1264_v48 }
  0xf8   : > { %2114 = vmatprep.mubr.msk.bf16.mxu1 %vm2222_vm10, %v2221_v8  ;;  %2099 = vmatpush3.bf16.msra.mxu1 %v2204_v0 }
  0xf9   : > { %2055 = vmatmul.mubr.msk.bf16.vlgmr.msra.gmra.mrb[12].mxu0 %vm1152_vm14, %v1122_v49  ;;  %2100 = vmatprep.subr.bf16.mxu1 %v2221_v8 }
  0xfa   : > { %2079 = vmatpush3.bf16.msra.mxu0 %v2196_v45  ;;  %2094 = vmatprep.mubr.msk.bf16.mxu0 %vm2222_vm10, %v2221_v8  ;;  %vm1416_vm10 = vcmp.eq.s32.totalorder %v1412_v54, 1 }
  0xfb   : > { %2080 = vmatprep.subr.bf16.mxu0 %v2221_v8  ;;  %vm1418_vm15 = vmpackc.low %vm1416_vm10, %vm1416_vm10 }
  0xfc   : > { %v1420_v60 = vsel %vm1418_vm15, 65537, %v2220_v3  ;;  %2101 = vmatpush3.bf16.msra.mxu1 %v2205_v1  ;;  %v2206_v3 = vld [vmem:[%s2837_s4 + $0x10] sm:$0xff]  }
  0xfd   : > { %v1804_v46 = vcombine.low %v1420_v60, %v1421_v63  ;;  %2102 = vmatprep.subr.bf16.mxu1 %v2221_v8 }
  0xfe   : > { %2081 = vmatpush3.bf16.msra.mxu0 %v2197_v50 }
  0xff   : > { %2082 = vmatprep.subr.bf16.mxu0 %v2221_v8  ;;  %vm1425_vm3 = vcmp.ne.s16.totalorder %v1804_v46, 0 }
 0x100   : > { %2103 = vmatpush3.bf16.msra.mxu1 %v2206_v3  ;;  %v1815_v3 = vld [vmem:[%s2838_s5] ss:$0 sm:$0xff] }
 0x101   : > { %2104 = vmatprep.subr.bf16.mxu1 %v2221_v8 }
 0x102   : > { %2083 = vmatpush3.bf16.msra.mxu0 %v2198_v51 }
 0x103   : > { %2084 = vmatprep.subr.bf16.mxu0 %v2221_v8 }
 0x104   : > { %2105 = vmatpush3.bf16.msra.mxu1 %v2207_v2 }
 0x105   : > { %2106 = vmatprep.subr.bf16.mxu1 %v2221_v8 }
 0x106   : > { %2085 = vmatpush3.bf16.msra.mxu0 %v2199_v52 }
 0x107   : > { %2086 = vmatprep.subr.bf16.mxu0 %v2221_v8 }
 0x108   : > { %2107 = vmatpush3.bf16.msra.mxu1 %v2208_v4 }
 0x109   : > { %2108 = vmatprep.subr.bf16.mxu1 %v2221_v8 }
 0x10a   : > { %2087 = vmatpush3.bf16.msra.mxu0 %v2200_v53 }
 0x10b   : > { %2088 = vmatprep.subr.bf16.mxu0 %v2221_v8 }
 0x10c   : > { %2109 = vmatpush3.bf16.msra.mxu1 %v2209_v12 }
 0x10d   : > { %2110 = vmatprep.subr.bf16.mxu1 %v2221_v8 }
 0x10e   : > { %2089 = vmatpush3.bf16.msra.mxu0 %v2201_v56 }
 0x10f   : > { %2090 = vmatprep.subr.bf16.mxu0 %v2221_v8 }
 0x110   : > { %2111 = vmatpush3.bf16.msra.mxu1 %v2210_v15 }
 0x111   : > { %2112 = vmatprep.subr.bf16.mxu1 %v2221_v8 }
 0x112   : > { %2091 = vmatpush3.bf16.msra.mxu0 %v2202_v57  ;;  %v1814_v57 = vld [vmem:[%s2836_s3] ss:$0 sm:$0xff] }
 0x113   : > { %2092 = vmatprep.subr.bf16.mxu0 %v2221_v8 }
 0x114   : > { %2113 = vmatpush3.bf16.msra.mxu1 %v2211_v16 }
 0x116   : > { %2093 = vmatpush3.bf16.msra.mxu0 %v2203_v61 }
 0x119   : > { %2095 = vmatmul.mubr.msk.bf16.vlgmr.msra.gmra.mrb[16].mxu0 %vm1425_vm3, %v1403_v47 }
 0x16a   : > { %v553_v5 = vpop.f32.mrb[0].mxu1 }
 0x16b   : > { %v1956_v7 = vpop.f32.mrb[1].mxu1 }
 0x16c   : > { %v464_v6 = vpop.f32.mrb[0].mxu0  ;;  %v556_v11 = vpop.f32.mrb[2].mxu1 }
 0x16d   : > { %v554_v9 = vadd.f32 %v553_v5, %v464_v6  ;;  %v1936_v10 = vpop.f32.mrb[1].mxu0  ;;  %v1957_v14 = vpop.f32.mrb[3].mxu1 }
 0x16e   : > { %v467_v13 = vpop.f32.mrb[2].mxu0 }
 0x16f   : > { %v557_v44 = vadd.f32 %v556_v11, %v467_v13  ;;  %v1937_v43 = vpop.f32.mrb[3].mxu0 }
 0x18a   : > { %v838_v17 = vpop.f32.mrb[4].mxu1 }
 0x18b   : > { %v1996_v18 = vpop.f32.mrb[5].mxu1 }
 0x18c   : > { %v695_v19 = vpop.f32.mrb[4].mxu0  ;;  %v841_v20 = vpop.f32.mrb[6].mxu1 }
 0x18d   : > { %v702_v21 = vadd.f32 %v695_v19, %v554_v9  ;;  %v1976_v22 = vpop.f32.mrb[5].mxu0  ;;  %v1997_v23 = vpop.f32.mrb[7].mxu1 }
 0x18e   : > { %v698_v24 = vpop.f32.mrb[6].mxu0 }
 0x18f   : > { %v703_v25 = vadd.f32 %v698_v24, %v557_v44  ;;  %v1977_v26 = vpop.f32.mrb[7].mxu0  ;;  %v845_v27 = vadd.f32 %v838_v17, %v702_v21 }
 0x191   : > { %v846_v28 = vadd.f32 %v841_v20, %v703_v25 }
 0x1aa   : > { %v1106_v29 = vpop.f32.mrb[8].mxu1 }
 0x1ab   : > { %v2036_v30 = vpop.f32.mrb[9].mxu1 }
 0x1ac   : > { %v969_v8 = vpop.f32.mrb[8].mxu0  ;;  %v1109_v31 = vpop.f32.mrb[10].mxu1 }
 0x1ad   : > { %v976_v32 = vadd.f32 %v969_v8, %v845_v27  ;;  %v2016_v33 = vpop.f32.mrb[9].mxu0  ;;  %v2037_v34 = vpop.f32.mrb[11].mxu1 }
 0x1ae   : > { %v972_v35 = vpop.f32.mrb[10].mxu0 }
 0x1af   : > { %v977_v36 = vadd.f32 %v972_v35, %v846_v28  ;;  %v2017_v37 = vpop.f32.mrb[11].mxu0  ;;  %v1113_v38 = vadd.f32 %v1106_v29, %v976_v32 }
 0x1b1   : > { %v1114_v39 = vadd.f32 %v1109_v31, %v977_v36 }
 0x1ca   : > { %v1387_v40 = vpop.f32.mrb[12].mxu1 }
 0x1cb   : > { %v2076_v41 = vpop.f32.mrb[13].mxu1 }
 0x1cc   : > { %v1252_v42 = vpop.f32.mrb[12].mxu0  ;;  %v1390_v48 = vpop.f32.mrb[14].mxu1 }
 0x1cd   : > { %v1259_v49 = vadd.f32 %v1252_v42, %v1113_v38  ;;  %v2056_v45 = vpop.f32.mrb[13].mxu0  ;;  %v2077_v50 = vpop.f32.mrb[15].mxu1 }
 0x1ce   : > { %v1255_v51 = vpop.f32.mrb[14].mxu0 }
 0x1cf   : > { %v1260_v52 = vadd.f32 %v1255_v51, %v1114_v39  ;;  %v2057_v53 = vpop.f32.mrb[15].mxu0  ;;  %v1394_v54 = vadd.f32 %v1387_v40, %v1259_v49 }
 0x1d1   : > { %v1395_v55 = vadd.f32 %v1390_v48, %v1260_v52 }
 0x1ec   : > { %v1525_v56 = vpop.f32.mrb[16].mxu0 }
 0x1ed   : > { %v1532_v58 = vadd.f32 %v1525_v56, %v1394_v54  ;;  %v2096_v59 = vpop.f32.mrb[17].mxu0 }
 0x1ee   : > { %v1528_v60 = vpop.f32.mrb[18].mxu0 }
 0x1ef   : > { %v1541_v61 = vadd.f32 %v1814_v57, %v1532_v58  ;;  %v1533_v62 = vadd.f32 %v1528_v60, %v1395_v55  ;;  %v2097_v63 = vpop.f32.mrb[19].mxu0 }
 0x1f1   : > { %v1542_v46 = vadd.f32 %v1814_v57, %v1533_v62  ;;  %v1543_v47 = vmax.f32 %v1541_v61, 0.0 }
 0x1f3   : > { %v1544_v0 = vmax.f32 %v1542_v46, 0.0 }
 0x1f5   : > { %v1545_v1 = vpack.c.bf16 %v1544_v0, %v1543_v47 }
 0x1f7   : > { %2115 = vmatmul.mubr.bf16.vlgmr.msra.gmra.mrb[16].mxu1 %v1545_v1 }
 0x2ca   : > { %v1651_v2 = vpop.f32.mrb[16].mxu1 }
 0x2cb   : > { %v1652_v4 = vadd.f32 %v1815_v3, %v1651_v2  ;;  %v2116_v5 = vpop.f32.mrb[17].mxu1 }
 0x2cc   : > { %v1654_v6 = vpop.f32.mrb[18].mxu1 }
 0x2cd   : > { %1658 = vst [vmem:[%s251_s20] sm:$0xff] %v1652_v4  ;;  %v1655_v7 = vadd.f32 %v1815_v3, %v1654_v6  ;;  %v2117_v9 = vpop.f32.mrb[19].mxu1 }
 0x2cf   : > { %1659 = vst [vmem:[%s251_s20 + $0x8] sm:$0xff] %v1655_v7 }
 0x2d0 PF: > { %s16_s21 = sadd.s32 1, %s2218_s21  }
 0x2d1   : > { %p13_p4 = scmp.ge.s32.totalorder %s16_s21, 4  }
 0x2d3   :  { %15 = sbr.rel (!%p13_p4) target bundleno = 1 (0x1), region = 74 }

// kernel: rcnn_base_forward.7
= control target key start
LH: loop header
LB: loop body
LE: loop exit
PB: predicated region body
PF: predicated region fallthrough
CT: control target
= control target key end

     0   :  { %s6313_s0 = inlined_call_operand.vmem [shape: s32[2,16], index: 0, kind: input, shape index: {}]   ;;  %s6314_s4 = inlined_call_operand.vmem [shape: f32[2,4,4,128], index: 4, kind: input, shape index: {}]   ;;  %s6315_s5 = inlined_call_operand.hbm [shape: f32[2,8,1,512], index: 5, kind: output, shape index: {}]   ;;  %s6316_s1 = inlined_call_operand.vmem [shape: s32[2,16], index: 1, kind: input, shape index: {}]   ;;  %s6317_s2 = inlined_call_operand.vmem [shape: s32[2,16], index: 2, kind: input, shape index: {}]   ;;  %s6318_s3 = inlined_call_operand.vmem [shape: s32[2,16], index: 3, kind: input, shape index: {}]  }
   0x1   :  { %6347 = sst [smem:[#allocation12_spill]] %s6314_s4  ;;  %s10_s20 = sshll.u32 %s6313_s0, 4  ;;  %s11_s20 = int_to_ptr.vmem [resolvable:$true] %s10_s20 }
   0x2   :  { %s14_s23 = sshll.u32 %s6316_s1, 4  ;;  %s2391_s24 = scalar_lea.vmem %s11_s20, 32  ;;  %s15_s23 = int_to_ptr.vmem [resolvable:$true] %s14_s23 }
   0x3   :  { %p2392_p0 = scmp.ne.s32.totalorder %s11_s20, %s2391_s24  ;;  %p2396_p1 = scmp.lt.s32.totalorder %s11_s20, %s11_s20 }
   0x4   :  { %p2397_p2 = scmp.lt.s32.totalorder %s2391_s24, %s2391_s24 }
   0x6   :  { %p2398_p3 = por %p2397_p2, %p2396_p1 }
   0x8   :  { %p2399_p4 = pnand %p2398_p3, %p2392_p0 }
   0xa   :  { %2402 = shalt.err (!%p2399_p4)  }
   0xb   :  { %s2505_s25 = smov [#allocation3]   ;;  %s2403_s26 = scalar_lea.vmem %s15_s23, 32 }
   0xc   :  { %13 = dma.vmem_to_smem %s11_s20, 32, %s2505_s25, [#allocation2] }
   0xd   :  { %p2404_p5 = scmp.ne.s32.totalorder %s15_s23, %s2403_s26  ;;  %p2408_p6 = scmp.lt.s32.totalorder %s15_s23, %s15_s23 }
   0xe   :  { %p2409_p7 = scmp.lt.s32.totalorder %s2403_s26, %s2403_s26 }
  0x10   :  { %p2410_p8 = por %p2409_p7, %p2408_p6 }
  0x12   :  { %p2411_p9 = pnand %p2410_p8, %p2404_p5 }
  0x14   :  { %2414 = shalt.err (!%p2411_p9)  }
  0x15   :  { %s2506_s0 = smov [#allocation4]   ;;  %s18_s28 = sshll.u32 %s6317_s2, 4  ;;  %s19_s28 = int_to_ptr.vmem [resolvable:$true] %s18_s28 }
  0x16   :  { %17 = dma.vmem_to_smem %s15_s23, 32, %s2506_s0, [#allocation2] }
  0x17   :  { %s22_s6 = sshll.u32 %s6318_s3, 4  ;;  %s2415_s7 = scalar_lea.vmem %s19_s28, 32  ;;  %s23_s6 = int_to_ptr.vmem [resolvable:$true] %s22_s6 }
  0x18   :  { %p2416_p10 = scmp.ne.s32.totalorder %s19_s28, %s2415_s7  ;;  %p2420_p11 = scmp.lt.s32.totalorder %s19_s28, %s19_s28 }
  0x19   :  { %p2421_p12 = scmp.lt.s32.totalorder %s2415_s7, %s2415_s7 }
  0x1b   :  { %p2422_p13 = por %p2421_p12, %p2420_p11 }
  0x1d   :  { %p2423_p0 = pnand %p2422_p13, %p2416_p10 }
  0x1f   :  { %2426 = shalt.err (!%p2423_p0)  }
  0x20   :  { %s2507_s8 = smov [#allocation5]   ;;  %s2427_s9 = scalar_lea.vmem %s23_s6, 32 }
  0x21   :  { %21 = dma.vmem_to_smem %s19_s28, 32, %s2507_s8, [#allocation2] }
  0x22   :  { %p2428_p1 = scmp.ne.s32.totalorder %s23_s6, %s2427_s9  ;;  %p2432_p2 = scmp.lt.s32.totalorder %s23_s6, %s23_s6 }
  0x23   :  { %p2433_p3 = scmp.lt.s32.totalorder %s2427_s9, %s2427_s9 }
  0x25   :  { %p2434_p4 = por %p2433_p3, %p2432_p2 }
  0x27   :  { %p2435_p5 = pnand %p2434_p4, %p2428_p1 }
  0x29   :  { %2438 = shalt.err (!%p2435_p5)  }
  0x2a   :  { %s2508_s2 = smov [#allocation6]  }
  0x2b   :  { %25 = dma.vmem_to_smem %s23_s6, 32, %s2508_s2, [#allocation2] }
  0x2c   :  { %2483 = dma.done.wait [#allocation2], 128 }
  0x2d   :  { %2484 = vsyncadd [#allocation2], 4294967168 }
  0x2e   :  { %27 = sfence }
  0x2f   :  { %28 = vsyncpa [#allocation8], 0 }
  0x30   :  { %30 = vsyncpa [#allocation8 + $0x1], 0  ;;  %s2555_s3 = smov 0   ;;  %s2557_s10 = smov 0  }
  0x31   :  { %s2559_s11 = smov 0   ;;  %s2561_s12 = smov 0  }
  0x32 LB: > { %s2576_s13 = sadd.s32 4294967295, %s2503_s12   ;;  %s2307_s14 = sadd.s32 4294967294, %s2503_s12   ;;  %s2503_s12 = sphi %s2561_s12, %s6882_s12   ;;  %s2499_s11 = sphi %s2559_s11, %s6881_s11   ;;  %s2495_s10 = sphi %s2557_s10, %s6880_s10   ;;  %s2491_s3 = sphi %s2555_s3, %s6879_s3  }
  0x33   : > { %s2580_s15 = sadd.s32 1, %s2503_s12   ;;  %s69_s16 = sadd.s32 1, %s2499_s11 }
  0x34   : > { %s66_s17 = ssub.s32 %s2503_s12, %s2580_s15  ;;  %p79_p6 = scmp.ne.s32.totalorder %s2499_s11, %s2495_s10 }
  0x35   : > { %p67_p7 = scmp.eq.s32.totalorder %s66_s17, 0  ;;  %p80_p8 = scmp.eq.s32.totalorder %s2576_s13, 1 }
  0x36   : > { %p85_p9 = scmp.ne.s32.totalorder %s2495_s10, %s2491_s3  ;;  %p86_p10 = scmp.eq.s32.totalorder %s2307_s14, 1 }
  0x37   : > { %s2591_s18 = scalar_select %p67_p7, %s2499_s11, %s69_s16  }
  0x38   : > { %p2593_p11 = por %p80_p8, %p79_p6  ;;  %p2597_p12 = por %p86_p10, %p85_p9 }
  0x39   : > { %6348 = sst [smem:[#allocation11_spill]] %s2591_s18  ;;  %p2310_p13 = scmp.ge.s32.totalorder %s2503_s12, 1 }
  0x3a   : > { %p112_p0 = scmp.lt.s32.totalorder %s2503_s12, 3 }
  0x3c   : > { %p113_p1 = pnand %p2310_p13, %p112_p0 }
  0x3d   : > { %s2604_s21 = sshll.u32 (!%p113_p1), %s2576_s13, 7  ;;  %p132_p2 = scmp.lt.s32.totalorder (!%p113_p1), %s2576_s13, 1  ;;  %v137_v0 = vlaneseq (!%p113_p1)  ;;  %v2509_v25 = vmov (!%p113_p1), 1966171168  }
  0x3e   : > { %116 = sbr.rel (%p113_p1) target bundleno = 527 (0x20f), region = 24  ;;  %s2607_s22 = sld [smem:[#allocation3 + %s2604_s21]] (!%p113_p1) }
  0x3f   : > { %s2611_s23 = sld [smem:[#allocation4 + %s2604_s21]] (!%p113_p1)  ;;  %s2617_s25 = sadd.s32 (!%p113_p1), 1, %s2604_s21  ;;  %v2633_v3 = vshrl.u32 (!%p113_p1), %v137_v0, 7 }
  0x40   : > { %s2614_s24 = sld [smem:[#allocation5 + %s2604_s21]] (!%p113_p1)  ;;  %s2727_s17 = sadd.s32 (!%p113_p1), 2, %s2604_s21 }
  0x41   : > { %s2622_s0 = sld [smem:[#allocation6 + %s2604_s21]] (!%p113_p1) }
  0x42   : > { %s2625_s1 = sld [smem:[#allocation3 + %s2617_s25]] (!%p113_p1) }
  0x43   : > { %s2638_s29 = sld [smem:[#allocation5 + %s2617_s25]] (!%p113_p1) }
  0x44   : > { %p142_p3 = scmp.lt.s32.totalorder (!%p113_p1), %s2607_s22, 0  ;;  %v156_v1 = vstv (!%p113_p1), %s2607_s22  ;;  %s6351_s4 = sld [smem:[#allocation12_spill]] (!%p113_p1) }
  0x45   : > { %s133_s26 = scalar_select %p132_p2, %s2576_s13, 1  ;;  %v161_v2 = vstv %s2611_s23 }
  0x46   : > { %s2628_s27 = scalar_select %p142_p3, %s2607_s22, 0  ;;  %v170_v5 = vstv %s2614_s24 }
  0x47   : > { %s2343_s28 = sshll.u32 %s133_s26, 4  ;;  %vm2655_vm10 = vcmp.ge.s32.totalorder %v2633_v3, %v170_v5  ;;  %s2660_s9 = sld [smem:[#allocation6 + %s2617_s25]]  ;;  %v176_v13 = vstv %s2622_s0 }
  0x48   : > { %v150_v4 = vstv %s2628_s27  ;;  %s2315_s8 = sshll.u32 %s2628_s27, 2  ;;  %p263_p4 = scmp.lt.s32.totalorder %s2625_s1, 0  ;;  %vm2682_vm15 = vcmp.lt.s32.totalorder %v2633_v3, %v176_v13  ;;  %v275_v35 = vstv %s2625_s1 }
  0x49   : > { %v151_v6 = vadd.s32 1, %v150_v4  ;;  %v152_v7 = vadd.s32 2, %v150_v4  ;;  %v153_v8 = vadd.s32 3, %v150_v4  ;;  %vm157_vm0 = vcmp.ge.s32.totalorder %v150_v4, %v156_v1  ;;  %s2687_s14 = sld [smem:[#allocation4 + %s2617_s25]]  ;;  %p208_p6 = scmp.le.s32.totalorder %s2611_s23, %s2607_s22 }
  0x4a   : > { %vm162_vm1 = vcmp.lt.s32.totalorder %v150_v4, %v161_v2  ;;  %s2643_s7 = scalar_lea.vmem %s6351_s4, %s2343_s28  ;;  %v218_v16 = vstv %s2638_s29  ;;  %s2759_s25 = sld [smem:[#allocation3 + %s2727_s17]] }
  0x4b   : > { %vm158_vm2 = vcmp.ge.s32.totalorder %v151_v6, %v156_v1  ;;  %vm159_vm3 = vcmp.ge.s32.totalorder %v152_v7, %v156_v1  ;;  %vm160_vm4 = vcmp.ge.s32.totalorder %v153_v8, %v156_v1  ;;  %vm163_vm5 = vcmp.lt.s32.totalorder %v151_v6, %v161_v2  ;;  %vm2645_vm6 = vmand %vm157_vm0, %vm162_vm1  ;;  %s145_s2 = scalar_lea.vmem %s2643_s7, %s2315_s8  ;;  %s2825_s28 = sld [smem:[#allocation4 + %s2727_s17]] }
  0x4c   : > { %vm164_vm7 = vcmp.lt.s32.totalorder %v152_v7, %v161_v2  ;;  %vm165_vm8 = vcmp.lt.s32.totalorder %v153_v8, %v161_v2  ;;  %vm2650_vm9 = vmand %vm158_vm2, %vm163_vm5  ;;  %s2695_s16 = scalar_select %p263_p4, %s2625_s1, 0  ;;  %v146_v17 = vld [vmem:[%s145_s2] sm:$0xf]  ;;  %v147_v18 = vld [vmem:[%s145_s2 + $0x4] sm:$0xf] }
  0x4d   : > { %vm2662_vm11 = vmand %vm159_vm3, %vm164_vm7  ;;  %v148_v19 = vld [vmem:[%s145_s2 + $0x8] sm:$0xf]  ;;  %v149_v21 = vld [vmem:[%s145_s2 + $0xc] sm:$0xf]  ;;  %v224_v24 = vstv %s2660_s9  ;;  %p209_p7 = scmp.le.s32.totalorder %s2622_s0, %s2614_s24  ;;  %p255_p8 = scmp.le.s32.totalorder %s2660_s9, %s2638_s29 }
  0x4e   : > { %vm2668_vm12 = vmand %vm160_vm4, %vm165_vm8  ;;  %vm2714_vm4 = vcmp.ge.s32.totalorder %v2633_v3, %v218_v16  ;;  %v271_v26 = vstv %s2695_s16  ;;  %vm6319_vm8 = vcmask 1043456   ;;  %s2316_s26 = sshll.u32 %s2695_s16, 2  ;;  %s2861_s6 = sld [smem:[#allocation5 + %s2727_s17]] }
  0x4f   : > { %vm172_vm13 = vmand %vm2645_vm6, %vm2655_vm10  ;;  %v272_v33 = vadd.s32 1, %v271_v26  ;;  %v273_v34 = vadd.s32 2, %v271_v26  ;;  %v280_v36 = vstv %s2687_s14  ;;  %v274_v41 = vadd.s32 3, %v271_v26  ;;  %s266_s27 = scalar_lea.vmem %s2643_s7, %s2316_s26  ;;  %s2864_s8 = sadd.s32 3, %s2604_s21 }
  0x50   : > { %vm173_vm14 = vmand %vm2650_vm9, %vm2655_vm10  ;;  %p403_p5 = scmp.lt.s32.totalorder %s2759_s25, 0  ;;  %v2842_v62 = vld [vmem:[%s266_s27] sm:$0xf]  ;;  %v2850_v63 = vld [vmem:[%s266_s27 + $0x4] sm:$0xf]  ;;  %p322_p9 = scmp.le.s32.totalorder %s2687_s14, %s2625_s1  ;;  %v2920_v13 = vstv %s2759_s25 }
  0x51   : > { %vm174_vm0 = vmand %vm2662_vm11, %vm2655_vm10  ;;  %v2856_v1 = vld [vmem:[%s266_s27 + $0x8] sm:$0xf]  ;;  %v2866_v4 = vld [vmem:[%s266_s27 + $0xc] sm:$0xf]  ;;  %p2887_p10 = por %p209_p7, %p208_p6  ;;  %p2906_p13 = por %p255_p8, %p208_p6  ;;  %v2923_v14 = vstv %s2825_s28 }
  0x52   : > { %vm175_vm1 = vmand %vm2668_vm12, %vm2655_vm10  ;;  %s2836_s30 = scalar_select %p403_p5, %s2759_s25, 0 }
  0x53   : > { %vm2703_vm2 = vmand %vm172_vm13, %vm2682_vm15  ;;  %s2926_s22 = sld [smem:[#allocation3 + %s2864_s8]]  ;;  %p2942_p0 = por %p322_p9, %p209_p7 }
  0x54   : > { %vm2709_vm3 = vmand %vm173_vm14, %vm2682_vm15  ;;  %v190_v28 = vsel %vm2703_vm2, %v146_v17, -inf  ;;  %vm2748_vm14 = vcmp.lt.s32.totalorder %v2633_v3, %v224_v24  ;;  %vm279_vm2 = vcmp.ge.s32.totalorder %v274_v41, %v275_v35  ;;  %v2879_v6 = vstv %s2836_s30  ;;  %s2953_s26 = sld [smem:[#allocation6 + %s2727_s17]]  ;;  %p2990_p1 = por %p322_p9, %p255_p8 }
  0x55   : > { %vm2721_vm5 = vmand %vm174_vm0, %vm2682_vm15  ;;  %v191_v29 = vsel %vm2709_vm3, %v147_v18, -inf  ;;  %v195_v37 = vsel %vm6319_vm8, %v190_v28, -inf  ;;  %v413_v20 = vadd.s32 2, %v2879_v6  ;;  %s211_s24 = scalar_select %p2887_p10, 1, 0 }
  0x56   : > { %vm2731_vm7 = vmand %vm175_vm1, %vm2682_vm15  ;;  %v192_v30 = vsel %vm2721_vm5, %v148_v19, -inf  ;;  %v196_v38 = vsel %vm6319_vm8, %v191_v29, -inf  ;;  %vm282_vm5 = vcmp.lt.s32.totalorder %v272_v33, %v280_v36  ;;  %s257_s0 = scalar_select %p2906_p13, 1, 0  ;;  %v431_v29 = vstv %s2861_s6 }
  0x57   : > { %v193_v31 = vsel %vm2731_vm7, %v149_v21, -inf  ;;  %vm220_vm13 = vmand %vm2645_vm6, %vm2714_vm4  ;;  %v197_v39 = vsel %vm6319_vm8, %v192_v30, -inf  ;;  %vm281_vm7 = vcmp.lt.s32.totalorder %v271_v26, %v280_v36  ;;  %v199_v42 = vmax.f32 %v195_v37, %v196_v38  ;;  %s324_s27 = scalar_select %p2942_p0, 1, 0 }
  0x58   : > { %vm221_vm0 = vmand %vm2650_vm9, %vm2714_vm4  ;;  %v198_v40 = vsel %vm6319_vm8, %v193_v31, -inf  ;;  %vm6376_vm6 = vcmask 1043456   ;;  %s3021_s1 = sld [smem:[#allocation5 + %s2864_s8]]  ;;  %s2317_s14 = sshll.u32 %s2836_s30, 2 }
  0x59   : > { %vm222_vm1 = vmand %vm2662_vm11, %vm2714_vm4  ;;  %v200_v43 = vmax.f32 %v197_v39, %v198_v40  ;;  %p523_p2 = scmp.lt.s32.totalorder %s2926_s22, 0  ;;  %s3065_s9 = sld [smem:[#allocation6 + %s2864_s8]]  ;;  %v325_v57 = vstv %s324_s27 }
  0x5a   : > { %vm226_vm3 = vmand %vm220_vm13, %vm2748_vm14  ;;  %vm6380_vm13 = vcmp.ge.s32.totalorder %v271_v26, %v275_v35  ;;  %v2967_v26 = vunpack.c.l.s4 %v2509_v25  ;;  %s362_s29 = scalar_select %p2990_p1, 1, 0 }
  0x5b   : > { %vm227_vm11 = vmand %vm221_vm0, %vm2748_vm14  ;;  %v238_v44 = vsel %vm226_vm3, %v146_v17, -inf  ;;  %v201_v53 = vmax.f32 %v199_v42, %v200_v43  ;;  %v412_v17 = vadd.s32 1, %v2879_v6  ;;  %s3077_s17 = sld [smem:[#allocation4 + %s2864_s8]]  ;;  %s406_s8 = scalar_lea.vmem %s2643_s7, %s2317_s14 }
  0x5c   : > { %vm228_vm8 = vmand %vm222_vm1, %vm2748_vm14  ;;  %v239_v45 = vsel %vm227_vm11, %v147_v18, -inf  ;;  %v242_v46 = vsel %vm6376_vm6, %v238_v44, -inf  ;;  %vm283_vm1 = vcmp.lt.s32.totalorder %v273_v34, %v280_v36  ;;  %v6409_v44 = vmov 0  ;;  %s3091_s30 = scalar_select %p523_p2, %s2926_s22, 0 }
  0x5d   : > { %vm6377_vm9 = vmand %vm2668_vm12, %vm2714_vm4  ;;  %v240_v47 = vsel %vm228_vm8, %v148_v19, -inf  ;;  %v202_v60 = vrot.slane %v201_v53, 4  ;;  %v3106_v58 = vstv %s362_s29  ;;  %s3145_s2 = sadd.s32 4, %s2604_s21  ;;  %s6324_s23 = sand.u32 1, %s2495_s10  }
  0x5e   : > { %vm229_vm0 = vmand %vm6377_vm9, %vm2748_vm14  ;;  %vm6384_vm9 = vcmp.ge.s32.totalorder %v272_v33, %v275_v35  ;;  %s3195_s16 = sld [smem:[#allocation3 + %s3145_s2]]  ;;  %p468_p4 = scmp.le.s32.totalorder %s2825_s28, %s2759_s25 }
  0x5f   : > { %vm6378_vm3 = vmmov %vm6376_vm6  ;;  %v241_v49 = vsel %vm229_vm0, %v149_v21, -inf  ;;  %vm284_vm6 = vcmp.lt.s32.totalorder %v274_v41, %v280_v36  ;;  %v203_v2 = vmax.f32 %v201_v53, %v202_v60  ;;  %v414_v21 = vadd.s32 3, %v2879_v6  ;;  %s3320_s14 = sld [smem:[#allocation4 + %s3145_s2]]  ;;  %p469_p5 = scmp.le.s32.totalorder %s2953_s26, %s2861_s6 }
  0x60   : > { %v243_v48 = vsel %vm6378_vm3, %v239_v45, -inf  ;;  %vm6379_vm11 = vmmov %vm6378_vm3  ;;  %v437_v45 = vstv %s2953_s26  ;;  %v212_v53 = vstv %s211_s24  ;;  %s2318_s24 = sshll.u32 %s3091_s30, 2  ;;  %p515_p6 = scmp.le.s32.totalorder %s3065_s9, %s3021_s1 }
  0x61   : > { %v244_v50 = vsel %vm6379_vm11, %v240_v47, -inf  ;;  %v246_v51 = vmax.f32 %v242_v46, %v243_v48  ;;  %vm2802_vm12 = vmand %vm6380_vm13, %vm281_vm7  ;;  %v204_v18 = vrot.slane %v203_v2, 2  ;;  %s526_s27 = scalar_lea.vmem %s2643_s7, %s2318_s24  ;;  %s3361_s24 = sadd.s32 5, %s2604_s21 }
  0x62   : > { %vm6383_vm8 = vmmov %vm6378_vm3  ;;  %vm6387_vm3 = vcmp.ge.s32.totalorder %v273_v34, %v275_v35  ;;  %p582_p7 = scmp.le.s32.totalorder %s3077_s17, %s2926_s22  ;;  %p3398_p8 = por %p469_p5, %p468_p4 }
  0x63   : > { %v245_v54 = vsel %vm6383_vm8, %v241_v49, -inf  ;;  %vm2808_vm0 = vmand %vm6384_vm9, %vm282_vm5  ;;  %v205_v30 = vmax.f32 %v203_v2, %v204_v18  ;;  %p3422_p9 = por %p515_p6, %p468_p4  ;;  %s3455_s28 = sld [smem:[#allocation6 + %s3145_s2]] }
  0x64   : > { %v247_v56 = vmax.f32 %v244_v50, %v245_v54  ;;  %vm2814_vm11 = vmand %vm6387_vm3, %vm283_vm1  ;;  %vm6393_vm3 = vcmask 1043456   ;;  %v258_v54 = vstv %s257_s0  ;;  %p660_p3 = scmp.lt.s32.totalorder %s3195_s16, 0  ;;  %s2311_s0 = sshll.u32 %s6324_s23, 5 }
  0x65   : > { %vm2820_vm7 = vmand %vm279_vm2, %vm284_vm6  ;;  %v206_v46 = vrot.slane %v205_v30, 1  ;;  %p3446_p10 = por %p582_p7, %p469_p5  ;;  %p3502_p13 = por %p582_p7, %p515_p6 }
  0x66   : > { %v248_v59 = vmax.f32 %v246_v51, %v247_v56  ;;  %vm289_vm5 = vmand %vm2802_vm12, %vm2655_vm10  ;;  %v374_v51 = vunpack.c.0.s8 %v2967_v26  ;;  %s3303_s29 = scalar_select %p660_p3, %s3195_s16, 0 }
  0x67   : > { %vm290_vm13 = vmand %vm2808_vm0, %vm2655_vm10  ;;  %v207_v60 = vmax.f32 %v205_v30, %v206_v46  ;;  %s471_s4 = scalar_select %p3398_p8, 1, 0 }
  0x68   : > { %v249_v61 = vrot.slane %v248_v59, 4  ;;  %vm291_vm2 = vmand %vm2814_vm11, %vm2655_vm10  ;;  %s584_s6 = scalar_select %p3446_p10, 1, 0 }
  0x69   : > { %vm292_vm1 = vmand %vm2820_vm7, %vm2655_vm10  ;;  %v694_v52 = vstv %s3455_s28  ;;  %p725_p2 = scmp.le.s32.totalorder %s3320_s14, %s3195_s16 }
  0x6a   : > { %vm293_vm6 = vmand %vm289_vm5, %vm2682_vm15  ;;  %v250_v7 = vmax.f32 %v248_v59, %v249_v61  ;;  %v6415_v59 = vmov 0 }
  0x6b   : > { %vm294_vm8 = vmand %vm290_vm13, %vm2682_vm15  ;;  %v305_v5 = vsel %vm293_vm6, %v2842_v62, -inf }
  0x6c   : > { %vm295_vm9 = vmand %vm291_vm2, %vm2682_vm15  ;;  %v306_v8 = vsel %vm294_vm8, %v2850_v63, -inf  ;;  %v309_v9 = vsel %vm6393_vm3, %v305_v5, -inf  ;;  %v251_v22 = vrot.slane %v250_v7, 2  ;;  %v3131_v5 = vsub.s32 %v374_v51, %v2633_v3 }
  0x6d   : > { %vm296_vm5 = vmand %vm292_vm1, %vm2682_vm15  ;;  %v307_v10 = vsel %vm295_vm9, %v2856_v1, -inf  ;;  %vm418_vm9 = vcmp.ge.s32.totalorder %v2879_v6, %v2920_v13 }
  0x6e   : > { %vm6395_vm13 = vmmov %vm6393_vm3  ;;  %v308_v15 = vsel %vm296_vm5, %v2866_v4, -inf  ;;  %v252_v33 = vmax.f32 %v250_v7, %v251_v22  ;;  %v535_v22 = vstv %s2926_s22  ;;  %v3337_v7 = vld [vmem:[%s526_s27 + $0x4] sm:$0xf]  ;;  %s2320_s22 = sshll.u32 %s3303_s29, 2 }
  0x6f   : > { %v310_v12 = vsel %vm6395_vm13, %v306_v8, -inf  ;;  %vm6396_vm2 = vmmov %vm6393_vm3  ;;  %vm423_vm3 = vcmp.lt.s32.totalorder %v2879_v6, %v2923_v14  ;;  %vm419_vm13 = vcmp.ge.s32.totalorder %v412_v17, %v2920_v13  ;;  %v407_v6 = vld [vmem:[%s406_s8] sm:$0xf]  ;;  %v408_v8 = vld [vmem:[%s406_s8 + $0x4] sm:$0xf] }
  0x70   : > { %v311_v16 = vsel %vm6396_vm2, %v307_v10, -inf  ;;  %v313_v11 = vmax.f32 %v309_v9, %v310_v12  ;;  %vm328_vm10 = vmand %vm2802_vm12, %vm2714_vm4  ;;  %v253_v47 = vrot.slane %v252_v33, 1  ;;  %v409_v9 = vld [vmem:[%s406_s8 + $0x8] sm:$0xf]  ;;  %v3363_v10 = vld [vmem:[%s526_s27 + $0xc] sm:$0xf] }
  0x71   : > { %vm6397_vm15 = vmmov %vm6396_vm2  ;;  %vm424_vm2 = vcmp.lt.s32.totalorder %v412_v17, %v2923_v14  ;;  %v3390_v17 = vstv %s3195_s16 }
  0x72   : > { %v312_v19 = vsel %vm6397_vm15, %v308_v15, -inf  ;;  %vm329_vm1 = vmand %vm2808_vm0, %vm2714_vm4  ;;  %vm421_vm15 = vcmp.ge.s32.totalorder %v414_v21, %v2920_v13  ;;  %v254_v61 = vmax.f32 %v252_v33, %v253_v47 }
  0x73   : > { %v314_v24 = vmax.f32 %v311_v16, %v312_v19  ;;  %vm330_vm6 = vmand %vm2814_vm11, %vm2714_vm4 }
  0x74   : > { %vm331_vm8 = vmand %vm2820_vm7, %vm2714_vm4 }
  0x75   : > { %v315_v27 = vmax.f32 %v313_v11, %v314_v24  ;;  %vm2980_vm5 = vmand %vm328_vm10, %vm2748_vm14  ;;  %vm420_vm10 = vcmp.ge.s32.totalorder %v413_v20, %v2920_v13  ;;  %v484_v13 = vstv %s3065_s9  ;;  %v410_v11 = vld [vmem:[%s406_s8 + $0xc] sm:$0xf]  ;;  %v540_v24 = vstv %s3077_s17  ;;  %s3347_s8 = sld [smem:[#allocation5 + %s3145_s2]] }
  0x76   : > { %vm333_vm12 = vmand %vm329_vm1, %vm2748_vm14  ;;  %v344_v31 = vsel %vm2980_vm5, %v2842_v62, -inf  ;;  %vm6402_vm1 = vcmask 1043456   ;;  %s3508_s2 = sld [smem:[#allocation5 + %s3361_s24]] }
  0x77   : > { %v316_v34 = vrot.slane %v315_v27, 4  ;;  %vm334_vm0 = vmand %vm330_vm6, %vm2748_vm14  ;;  %v345_v35 = vsel %vm333_vm12, %v2850_v63, -inf  ;;  %v348_v36 = vsel %vm6402_vm1, %v344_v31, -inf  ;;  %vm425_vm6 = vcmp.lt.s32.totalorder %v413_v20, %v2923_v14  ;;  %s3562_s9 = sld [smem:[#allocation4 + %s3361_s24]] }
  0x78   : > { %vm335_vm5 = vmand %vm331_vm8, %vm2748_vm14  ;;  %v346_v37 = vsel %vm334_vm0, %v2856_v1, -inf  ;;  %vm426_vm12 = vcmp.lt.s32.totalorder %v414_v21, %v2923_v14  ;;  %vm3059_vm8 = vcmp.ge.s32.totalorder %v2633_v3, %v431_v29  ;;  %v478_v63 = vstv %s3021_s1  ;;  %s3559_s1 = sld [smem:[#allocation6 + %s3361_s24]] }
  0x79   : > { %vm6403_vm11 = vmmov %vm6402_vm1  ;;  %v317_v39 = vmax.f32 %v315_v27, %v316_v34  ;;  %v347_v32 = vsel %vm335_vm5, %v2866_v4, -inf  ;;  %v350_v23 = vsel %vm6402_vm1, %v346_v37, -inf  ;;  %v6410_v44 = vsel %vm3059_vm8, 4294967295, %v6409_v44  ;;  %s622_s17 = scalar_select %p3502_p13, 1, 0 }
  0x7a   : > { %v349_v38 = vsel %vm6403_vm11, %v345_v35, -inf  ;;  %vm3045_vm4 = vmand %vm418_vm9, %vm423_vm3  ;;  %vm213_vm0 = vcmp.eq.s32.totalorder %v212_v53, 1  ;;  %vm259_vm5 = vcmp.eq.s32.totalorder %v258_v54, 1  ;;  %v3128_v1 = vstv %s3091_s30  ;;  %s3330_s30 = scalar_lea.vmem [#allocation7], %s2311_s0  ;;  %s663_s0 = scalar_lea.vmem %s2643_s7, %s2320_s22 }
  0x7b   : > { %v352_v40 = vmax.f32 %v348_v36, %v349_v38  ;;  %vm6406_vm14 = vmmov %vm6402_vm1  ;;  %v318_v48 = vrot.slane %v317_v39, 2  ;;  %v214_v14 = vsel %vm213_vm0, 0.0, %v207_v60  ;;  %v260_v15 = vsel %vm259_vm5, 0.0, %v254_v61  ;;  %p726_p3 = scmp.le.s32.totalorder %s3455_s28, %s3347_s8 }
  0x7c   : > { %v351_v42 = vsel %vm6406_vm14, %v347_v32, -inf  ;;  %vm3054_vm7 = vmand %vm419_vm13, %vm424_vm2  ;;  %v532_v18 = vadd.s32 1, %v3128_v1  ;;  %v533_v20 = vadd.s32 2, %v3128_v1  ;;  %v534_v21 = vadd.s32 3, %v3128_v1 }
  0x7d   : > { %v353_v49 = vmax.f32 %v350_v23, %v351_v42  ;;  %vm3072_vm9 = vmand %vm420_vm10, %vm425_vm6  ;;  %v319_v55 = vmax.f32 %v317_v39, %v318_v48  ;;  %vm3114_vm10 = vcmp.lt.s32.totalorder %v2633_v3, %v437_v45  ;;  %v370_v29 = vcombine.low %v214_v14, %v260_v15  ;;  %v665_v14 = vld [vmem:[%s663_s0 + $0x4] sm:$0xf]  ;;  %p3875_p5 = por %p726_p3, %p725_p2 }
  0x7e   : > { %vm3084_vm3 = vmand %vm421_vm15, %vm426_vm12  ;;  %v6416_v59 = vsel %vm3114_vm10, 4294967295, %v6415_v59  ;;  %vm6435_vm12 = vcmp.eq.s32.totalorder %v3106_v58, 1  ;;  %p772_p4 = scmp.le.s32.totalorder %s3559_s1, %s3508_s2 }
  0x7f   : > { %v354_v56 = vmax.f32 %v352_v40, %v353_v49  ;;  %vm433_vm13 = vmand %vm3045_vm4, %vm3059_vm8  ;;  %v320_v2 = vrot.slane %v319_v55, 1  ;;  %v378_v23 = vrot.slane %v370_v29, %v3131_v5 }
  0x80   : > { %vm434_vm2 = vmand %vm3054_vm7, %vm3059_vm8  ;;  %p3912_p7 = por %p772_p4, %p725_p2 }
  0x81   : > { %v355_v62 = vrot.slane %v354_v56, 4  ;;  %vm435_vm15 = vmand %vm3072_vm9, %vm3059_vm8  ;;  %v321_v25 = vmax.f32 %v319_v55, %v320_v2 }
  0x82   : > { %vm436_vm11 = vmand %vm3084_vm3, %vm3059_vm8  ;;  %vm6430_vm8 = vcmp.eq.s32.totalorder %v325_v57, 1 }
  0x83   : > { %v356_v4 = vmax.f32 %v354_v56, %v355_v62  ;;  %vm3140_vm6 = vmand %vm433_vm13, %vm3114_vm10  ;;  %vm3160_vm13 = vcmp.ge.s32.totalorder %v2633_v3, %v478_v63  ;;  %v327_v37 = vsel %vm6430_vm8, 0.0, %v321_v25  ;;  %v6452_v63 = vmov 0 }
  0x84   : > { %vm3155_vm14 = vmand %vm434_vm2, %vm3114_vm10  ;;  %v451_v27 = vsel %vm3140_vm6, %v407_v6, -inf  ;;  %v6487_v62 = vmov 0 }
  0x85   : > { %v357_v16 = vrot.slane %v356_v4, 2  ;;  %vm3174_vm2 = vmand %vm435_vm15, %vm3114_vm10  ;;  %v452_v28 = vsel %vm3155_vm14, %v408_v8, -inf  ;;  %vm536_vm14 = vcmp.ge.s32.totalorder %v3128_v1, %v535_v22  ;;  %v455_v35 = vsel %vm6402_vm1, %v451_v27, -inf }
  0x86   : > { %vm3186_vm0 = vmand %vm436_vm11, %vm3114_vm10  ;;  %v453_v30 = vsel %vm3174_vm2, %v409_v9, -inf  ;;  %vm3214_vm11 = vcmp.lt.s32.totalorder %v2633_v3, %v484_v13  ;;  %vm543_vm10 = vcmp.lt.s32.totalorder %v533_v20, %v540_v24  ;;  %v679_v27 = vstv %s3320_s14  ;;  %s728_s14 = scalar_select %p3875_p5, 1, 0 }
  0x87   : > { %v358_v26 = vmax.f32 %v356_v4, %v357_v16  ;;  %v454_v31 = vsel %vm3186_vm0, %v410_v11, -inf  ;;  %vm541_vm0 = vcmp.lt.s32.totalorder %v3128_v1, %v540_v24  ;;  %vm6429_vm5 = vmmov %vm6402_vm1 }
  0x88   : > { %v456_v36 = vsel %vm6429_vm5, %v452_v28, -inf  ;;  %vm483_vm15 = vmand %vm3084_vm3, %vm3160_vm13 }
  0x89   : > { %v359_v34 = vrot.slane %v358_v26, 1  ;;  %vm6431_vm6 = vmmov %vm6402_vm1  ;;  %v459_v42 = vmax.f32 %v455_v35, %v456_v36 }
  0x8a   : > { %v457_v39 = vsel %vm6431_vm6, %v453_v30, -inf  ;;  %vm6432_vm2 = vmmov %vm6402_vm1 }
  0x8b   : > { %v360_v38 = vmax.f32 %v358_v26, %v359_v34  ;;  %v458_v32 = vsel %vm6432_vm2, %v454_v31, -inf  ;;  %vm6433_vm1 = vmand %vm3045_vm4, %vm3160_vm13  ;;  %vm542_vm2 = vcmp.lt.s32.totalorder %v532_v18, %v540_v24  ;;  %v688_v31 = vstv %s3347_s8 }
  0x8c   : > { %vm486_vm5 = vmand %vm6433_vm1, %vm3214_vm11  ;;  %vm6437_vm1 = vcmask 1043456   ;;  %v460_v47 = vmax.f32 %v457_v39, %v458_v32 }
  0x8d   : > { %vm6434_vm8 = vmand %vm3054_vm7, %vm3160_vm13  ;;  %v498_v40 = vsel %vm486_vm5, %v407_v6, -inf  ;;  %v365_v41 = vsel %vm6435_vm12, 0.0, %v360_v38 }
  0x8e   : > { %vm487_vm6 = vmand %vm6434_vm8, %vm3214_vm11  ;;  %v502_v45 = vsel %vm6437_vm1, %v498_v40, -inf  ;;  %v371_v46 = vcombine.low %v327_v37, %v365_v41  ;;  %vm544_vm8 = vcmp.lt.s32.totalorder %v534_v21, %v540_v24  ;;  %v461_v61 = vmax.f32 %v459_v42, %v460_v47 }
  0x8f   : > { %vm6436_vm4 = vmand %vm3072_vm9, %vm3160_vm13  ;;  %v499_v43 = vsel %vm487_vm6, %v408_v8, -inf  ;;  %v3344_v8 = vstv %s3303_s29 }
  0x90   : > { %vm488_vm7 = vmand %vm6436_vm4, %vm3214_vm11  ;;  %v385_v54 = vrot.slane %v371_v46, %v3131_v5  ;;  %v462_v4 = vrot.slane %v461_v61, 4  ;;  %v670_v24 = vadd.s32 2, %v3344_v8  ;;  %v671_v26 = vadd.s32 3, %v3344_v8 }
  0x91   : > { %vm489_vm12 = vmand %vm483_vm15, %vm3214_vm11  ;;  %v500_v48 = vsel %vm488_vm7, %v409_v9, -inf  ;;  %vm6443_vm15 = vcmp.ge.s32.totalorder %v532_v18, %v535_v22  ;;  %vm6449_vm7 = vcmp.ge.s32.totalorder %v534_v21, %v535_v22  ;;  %v3351_v9 = vld [vmem:[%s526_s27 + $0x8] sm:$0xf] }
  0x92   : > { %vm6438_vm5 = vmmov %vm6437_vm1  ;;  %v501_v50 = vsel %vm489_vm12, %v410_v11, -inf  ;;  %v386_v60 = vcombine.low %v378_v23, %v385_v54  ;;  %v669_v11 = vadd.s32 1, %v3344_v8  ;;  %v463_v18 = vmax.f32 %v461_v61, %v462_v4 }
  0x93   : > { %v503_v49 = vsel %vm6438_vm5, %v499_v43, -inf  ;;  %vm6439_vm9 = vmmov %vm6437_vm1  ;;  %v585_v4 = vstv %s584_s6 }
  0x94   : > { %v504_v51 = vsel %vm6439_vm9, %v500_v48, -inf  ;;  %v506_v53 = vmax.f32 %v502_v45, %v503_v49  ;;  %vm3274_vm6 = vmand %vm536_vm14, %vm541_vm0  ;;  %vm6446_vm14 = vcmp.ge.s32.totalorder %v533_v20, %v535_v22  ;;  %v393_v2 = vrot.slane %v386_v60, %v3131_v5 }
  0x95   : > { %vm6442_vm3 = vmmov %vm6437_vm1  ;;  %v464_v29 = vrot.slane %v463_v18, 2 }
  0x96   : > { %v505_v55 = vsel %vm6442_vm3, %v501_v50, -inf  ;;  %vm3284_vm4 = vmand %vm6443_vm15, %vm542_vm2  ;;  %vm3306_vm2 = vcmp.lt.s32.totalorder %v137_v0, 512  ;;  %v3324_v0 = vld [vmem:[%s526_s27] sm:$0xf]  ;;  %vm6455_vm3 = vnez %v6416_v59  ;;  %s3414_s27 = sld [smem:[#allocation3 + %s3361_s24]] }
  0x97   : > { %v507_v57 = vmax.f32 %v504_v51, %v505_v55  ;;  %vm3291_vm0 = vmand %vm6446_vm14, %vm543_vm10  ;;  %v6453_v63 = vsel %vm3306_vm2, 4294967295, %v6452_v63  ;;  %vm6454_vm10 = vnez %v6410_v44  ;;  %399 = vst.msk [vmem:[%s3330_s30] sm:$0xf] %vm3306_vm2, %v393_v2  ;;  %v465_v23 = vmax.f32 %v463_v18, %v464_v29  ;;  %s6486_s24 = scalar_select %p3422_p9, 1, 0 }
  0x98   : > { %vm3296_vm1 = vmand %vm6449_vm7, %vm544_vm8  ;;  %v472_v55 = vstv %s471_s4  ;;  %v735_v2 = vstv %s3508_s2  ;;  %s3658_s4 = sadd.s32 6, %s2604_s21 }
  0x99   : > { %v508_v1 = vmax.f32 %v506_v53, %v507_v57  ;;  %vm549_vm12 = vmand %vm3274_vm6, %vm6454_vm10  ;;  %v466_v54 = vrot.slane %v465_v23, 1  ;;  %v518_v58 = vstv %s6486_s24  ;;  %s3701_s23 = sld [smem:[#allocation3 + %s3658_s4]] }
  0x9a   : > { %vm550_vm5 = vmand %vm3284_vm4, %vm6454_vm10  ;;  %s3818_s22 = sld [smem:[#allocation4 + %s3658_s4]] }
  0x9b   : > { %vm551_vm9 = vmand %vm3291_vm0, %vm6454_vm10  ;;  %v509_v6 = vrot.slane %v508_v1, 4  ;;  %s3930_s16 = sld [smem:[#allocation6 + %s3658_s4]] }
  0x9c   : > { %vm552_vm8 = vmand %vm3296_vm1, %vm6454_vm10  ;;  %p780_p0 = scmp.lt.s32.totalorder %s3414_s27, 0  ;;  %p839_p6 = scmp.le.s32.totalorder %s3562_s9, %s3414_s27 }
  0x9d   : > { %vm553_vm15 = vmand %vm549_vm12, %vm6455_vm3  ;;  %vm6458_vm12 = vcmask 1043456   ;;  %v510_v19 = vmax.f32 %v508_v1, %v509_v6  ;;  %v664_v6 = vld [vmem:[%s663_s0] sm:$0xf] }
  0x9e   : > { %vm554_vm14 = vmand %vm550_vm5, %vm6455_vm3  ;;  %v565_v13 = vsel %vm553_vm15, %v3324_v0, -inf  ;;  %s3587_s29 = scalar_select %p780_p0, %s3414_s27, 0 }
  0x9f   : > { %vm3380_vm7 = vmand %vm551_vm9, %vm6455_vm3  ;;  %v566_v15 = vsel %vm554_vm14, %v3337_v7, -inf  ;;  %v569_v16 = vsel %vm6458_vm12, %v565_v13, -inf  ;;  %v511_v30 = vrot.slane %v510_v19, 2  ;;  %v623_v13 = vstv %s622_s17  ;;  %p917_p1 = scmp.lt.s32.totalorder %s3701_s23, 0  ;;  %s3840_s17 = sld [smem:[#allocation5 + %s3658_s4]] }
  0xa0   : > { %vm556_vm5 = vmand %vm552_vm8, %vm6455_vm3  ;;  %v567_v20 = vsel %vm3380_vm7, %v3351_v9, -inf  ;;  %s2321_s25 = sshll.u32 %s3587_s29, 2  ;;  %p3945_p8 = por %p839_p6, %p726_p3 }
  0xa1   : > { %vm6460_vm9 = vmmov %vm6458_vm12  ;;  %v568_v44 = vsel %vm556_vm5, %v3363_v10, -inf  ;;  %v512_v40 = vmax.f32 %v510_v19, %v511_v30  ;;  %v741_v19 = vstv %s3559_s1  ;;  %s783_s6 = scalar_lea.vmem %s2643_s7, %s2321_s25  ;;  %p4009_p10 = por %p839_p6, %p772_p4 }
  0xa2   : > { %v570_v21 = vsel %vm6460_vm9, %v566_v15, -inf  ;;  %vm6462_vm10 = vmmov %vm6460_vm9  ;;  %v666_v15 = vld [vmem:[%s663_s0 + $0x8] sm:$0xf]  ;;  %s3810_s26 = scalar_select %p917_p1, %s3701_s23, 0 }
  0xa3   : > { %v571_v59 = vsel %vm6462_vm10, %v567_v20, -inf  ;;  %v573_v22 = vmax.f32 %v569_v16, %v570_v21  ;;  %vm588_vm8 = vmand %vm3274_vm6, %vm3160_vm13  ;;  %vm678_vm6 = vcmp.ge.s32.totalorder %v671_v26, %v3390_v17  ;;  %vm682_vm10 = vcmp.lt.s32.totalorder %v670_v24, %v679_v27  ;;  %s6551_s18 = scalar_select %p3945_p8, 1, 0 }
  0xa4   : > { %vm6463_vm3 = vmmov %vm6460_vm9  ;;  %vm676_vm9 = vcmp.ge.s32.totalorder %v669_v11, %v3390_v17  ;;  %v513_v57 = vrot.slane %v512_v40, 1  ;;  %v3652_v20 = vstv %s3414_s27  ;;  %v3655_v21 = vstv %s3562_s9  ;;  %s2323_s27 = sshll.u32 %s3810_s26, 2  ;;  %p982_p0 = scmp.le.s32.totalorder %s3818_s22, %s3701_s23 }
  0xa5   : > { %v572_v25 = vsel %vm6463_vm3, %v568_v44, -inf  ;;  %vm589_vm15 = vmand %vm3284_vm4, %vm3160_vm13  ;;  %vm680_vm3 = vcmp.lt.s32.totalorder %v3344_v8, %v679_v27  ;;  %v3857_v16 = vstv %s3810_s26  ;;  %s6550_s9 = scalar_select %p3912_p7, 1, 0 }
  0xa6   : > { %v574_v28 = vmax.f32 %v571_v59, %v572_v25  ;;  %vm590_vm14 = vmand %vm3291_vm0, %vm3160_vm13  ;;  %s879_s26 = scalar_select %p4009_p10, 1, 0 }
  0xa7   : > { %vm591_vm7 = vmand %vm3296_vm1, %vm3160_vm13  ;;  %vm6473_vm13 = vcmp.ge.s32.totalorder %v3344_v8, %v3390_v17  ;;  %v514_v8 = vmax.f32 %v512_v40, %v513_v57  ;;  %p983_p1 = scmp.le.s32.totalorder %s3930_s16, %s3840_s17 }
  0xa8   : > { %v575_v34 = vmax.f32 %v573_v22, %v574_v28  ;;  %vm3475_vm5 = vmand %vm588_vm8, %vm3214_vm11  ;;  %vm681_vm8 = vcmp.lt.s32.totalorder %v669_v11, %v679_v27  ;;  %v3632_v11 = vld [vmem:[%s663_s0 + $0xc] sm:$0xf] }
  0xa9   : > { %vm3489_vm12 = vmand %vm589_vm15, %vm3214_vm11  ;;  %v604_v37 = vsel %vm3475_vm5, %v3324_v0, -inf  ;;  %vm6470_vm15 = vcmask 1043456   ;;  %vm683_vm5 = vcmp.lt.s32.totalorder %v671_v26, %v679_v27  ;;  %v467_v0 = vmax.f32 %v465_v23, %v466_v54  ;;  %p4348_p3 = por %p983_p1, %p982_p0 }
  0xaa   : > { %v576_v38 = vrot.slane %v575_v34, 4  ;;  %vm594_vm4 = vmand %vm590_vm14, %vm3214_vm11  ;;  %v605_v39 = vsel %vm3489_vm12, %v3337_v7, -inf  ;;  %v608_v32 = vsel %vm6470_vm15, %v604_v37, -inf  ;;  %v3619_v7 = vstv %s3587_s29  ;;  %s3843_s29 = sadd.s32 7, %s2604_s21 }
  0xab   : > { %vm595_vm0 = vmand %vm591_vm7, %vm3214_vm11  ;;  %v606_v41 = vsel %vm594_vm4, %v3351_v9, -inf  ;;  %vm3554_vm4 = vcmp.ge.s32.totalorder %v2633_v3, %v688_v31  ;;  %v790_v25 = vadd.s32 2, %v3619_v7  ;;  %v791_v30 = vadd.s32 3, %v3619_v7  ;;  %s3889_s0 = sld [smem:[#allocation3 + %s3843_s29]] }
  0xac   : > { %vm6471_vm14 = vmmov %vm6470_vm15  ;;  %v577_v43 = vmax.f32 %v575_v34, %v576_v38  ;;  %v607_v45 = vsel %vm595_vm0, %v3363_v10, -inf  ;;  %vm3602_vm15 = vcmp.lt.s32.totalorder %v2633_v3, %v694_v52  ;;  %v927_v27 = vadd.s32 2, %v3857_v16  ;;  %s3978_s8 = sld [smem:[#allocation5 + %s3843_s29]] }
  0xad   : > { %v609_v42 = vsel %vm6471_vm14, %v605_v39, -inf  ;;  %vm6472_vm12 = vmmov %vm6471_vm14  ;;  %v6488_v62 = vsel %vm3602_vm15, 4294967295, %v6487_v62  ;;  %vm519_vm14 = vcmp.eq.s32.totalorder %v518_v58, 1  ;;  %s4023_s4 = sld [smem:[#allocation6 + %s3843_s29]] }
  0xae   : > { %v610_v46 = vsel %vm6472_vm12, %v606_v41, -inf  ;;  %v612_v33 = vmax.f32 %v608_v32, %v609_v42  ;;  %vm3541_vm11 = vmand %vm6473_vm13, %vm680_vm3  ;;  %v578_v50 = vrot.slane %v577_v43, 2  ;;  %v520_v31 = vsel %vm519_vm14, 0.0, %v514_v8  ;;  %s4060_s1 = sld [smem:[#allocation4 + %s3843_s29]]  ;;  %s920_s29 = scalar_lea.vmem %s2643_s7, %s2323_s27 }
  0xaf   : > { %vm6476_vm1 = vmmov %vm6472_vm12  ;;  %s4310_s27 = sadd.s32 9, %s2604_s21 }
  0xb0   : > { %v611_v47 = vsel %vm6476_vm1, %v607_v45, -inf  ;;  %vm3549_vm7 = vmand %vm676_vm9, %vm681_vm8  ;;  %vm6481_vm9 = vcmp.ge.s32.totalorder %v670_v24, %v3390_v17  ;;  %v579_v60 = vmax.f32 %v577_v43, %v578_v50  ;;  %v789_v24 = vadd.s32 1, %v3619_v7  ;;  %v3859_v17 = vld [vmem:[%s783_s6 + $0xc] sm:$0xf] }
  0xb1   : > { %v613_v51 = vmax.f32 %v610_v46, %v611_v47  ;;  %vm3569_vm3 = vmand %vm6481_vm9, %vm682_vm10  ;;  %vm3646_vm9 = vcmp.ge.s32.totalorder %v2633_v3, %v735_v2  ;;  %p1037_p9 = scmp.lt.s32.totalorder %s3889_s0, 0 }
  0xb2   : > { %vm3580_vm8 = vmand %vm678_vm6, %vm683_vm5  ;;  %vm473_vm5 = vcmp.eq.s32.totalorder %v472_v55, 1  ;;  %v580_v9 = vrot.slane %v579_v60, 1  ;;  %vm799_vm14 = vcmp.lt.s32.totalorder %v789_v24, %v3655_v21 }
  0xb3   : > { %v614_v61 = vmax.f32 %v612_v33, %v613_v51  ;;  %vm690_vm10 = vmand %vm3541_vm11, %vm3554_vm4  ;;  %v474_v26 = vsel %vm473_vm5, 0.0, %v467_v0  ;;  %s4050_s2 = scalar_select %p1037_p9, %s3889_s0, 0  ;;  %v6552_v0 = vmov 0 }
  0xb4   : > { %vm691_vm6 = vmand %vm3549_vm7, %vm3554_vm4  ;;  %v581_v34 = vmax.f32 %v579_v60, %v580_v9  ;;  %v630_v41 = vcombine.low %v474_v26, %v520_v31  ;;  %v936_v31 = vstv %s3818_s22  ;;  %p1029_p2 = scmp.le.s32.totalorder %s4023_s4, %s3978_s8  ;;  %p1096_p4 = scmp.le.s32.totalorder %s4060_s1, %s3889_s0 }
  0xb5   : > { %v615_v1 = vrot.slane %v614_v61, 4  ;;  %vm692_vm0 = vmand %vm3569_vm3, %vm3554_vm4  ;;  %s2324_s25 = sshll.u32 %s4050_s2, 2 }
  0xb6   : > { %vm693_vm12 = vmand %vm3580_vm8, %vm3554_vm4  ;;  %v638_v51 = vrot.slane %v630_v41, %v3131_v5  ;;  %p4379_p5 = por %p1029_p2, %p982_p0  ;;  %p4413_p6 = por %p1096_p4, %p983_p1 }
  0xb7   : > { %v616_v10 = vmax.f32 %v614_v61, %v615_v1  ;;  %vm3628_vm13 = vmand %vm690_vm10, %vm3602_vm15  ;;  %s985_s22 = scalar_select %p4348_p3, 1, 0 }
  0xb8   : > { %vm3641_vm1 = vmand %vm691_vm6, %vm3602_vm15  ;;  %v708_v22 = vsel %vm3628_vm13, %v664_v6, -inf  ;;  %vm6499_vm13 = vcmask 1043456   ;;  %p4478_p7 = por %p1096_p4, %p1029_p2 }
  0xb9   : > { %v617_v44 = vrot.slane %v616_v10, 2  ;;  %vm3667_vm10 = vmand %vm692_vm0, %vm3602_vm15  ;;  %v709_v28 = vsel %vm3641_vm1, %v665_v14, -inf  ;;  %vm586_vm0 = vcmp.eq.s32.totalorder %v585_v4, 1  ;;  %v712_v37 = vsel %vm6499_vm13, %v708_v22, -inf }
  0xba   : > { %vm3683_vm6 = vmand %vm693_vm12, %vm3602_vm15  ;;  %v710_v29 = vsel %vm3667_vm10, %v666_v15, -inf  ;;  %vm3709_vm1 = vcmp.lt.s32.totalorder %v2633_v3, %v741_v19  ;;  %v587_v42 = vsel %vm586_vm0, 0.0, %v581_v34  ;;  %vm6509_vm12 = vcmask 1043456  }
  0xbb   : > { %v618_v35 = vmax.f32 %v616_v10, %v617_v44  ;;  %v711_v36 = vsel %vm3683_vm6, %v3632_v11, -inf  ;;  %vm6502_vm10 = vmmov %vm6499_vm13 }
  0xbc   : > { %v713_v32 = vsel %vm6502_vm10, %v709_v28, -inf  ;;  %vm6503_vm6 = vmmov %vm6502_vm10 }
  0xbd   : > { %v619_v39 = vrot.slane %v618_v35, 1  ;;  %v714_v23 = vsel %vm6503_vm6, %v710_v29, -inf  ;;  %vm6504_vm5 = vmmov %vm6503_vm6  ;;  %vm798_vm6 = vcmp.lt.s32.totalorder %v3619_v7, %v3655_v21  ;;  %v716_v45 = vmax.f32 %v712_v37, %v713_v32 }
  0xbe   : > { %v715_v40 = vsel %vm6504_vm5, %v711_v36, -inf  ;;  %vm6505_vm5 = vmand %vm3541_vm11, %vm3646_vm9  ;;  %vm6507_vm11 = vcmp.eq.s32.totalorder %v623_v13, 1  ;;  %v3824_v13 = vld [vmem:[%s783_s6] sm:$0xf]  ;;  %v945_v36 = vstv %s3840_s17  ;;  %s1031_s17 = scalar_select %p4379_p5, 1, 0 }
  0xbf   : > { %v620_v43 = vmax.f32 %v618_v35, %v619_v39  ;;  %vm743_vm13 = vmand %vm6505_vm5, %vm3709_vm1  ;;  %v717_v46 = vmax.f32 %v714_v23, %v715_v40 }
  0xc0   : > { %vm6506_vm0 = vmand %vm3549_vm7, %vm3646_vm9  ;;  %v755_v33 = vsel %vm743_vm13, %v664_v6, -inf  ;;  %vm800_vm7 = vcmp.lt.s32.totalorder %v790_v25, %v3655_v21 }
  0xc1   : > { %vm744_vm10 = vmand %vm6506_vm0, %vm3709_vm1  ;;  %v625_v12 = vsel %vm6507_vm11, 0.0, %v620_v43  ;;  %v759_v48 = vsel %vm6509_vm12, %v755_v33, -inf  ;;  %v718_v60 = vmax.f32 %v716_v45, %v717_v46 }
  0xc2   : > { %vm6508_vm5 = vmand %vm3569_vm3, %vm3646_vm9  ;;  %v756_v47 = vsel %vm744_vm10, %v665_v14, -inf  ;;  %v631_v50 = vcombine.low %v587_v42, %v625_v12  ;;  %vm801_vm10 = vcmp.lt.s32.totalorder %v791_v30, %v3655_v21  ;;  %v3833_v14 = vld [vmem:[%s783_s6 + $0x4] sm:$0xf] }
  0xc3   : > { %vm745_vm15 = vmand %vm6508_vm5, %vm3709_vm1  ;;  %vm6517_vm5 = vcmp.ge.s32.totalorder %v789_v24, %v3652_v20  ;;  %v719_v9 = vrot.slane %v718_v60, 4  ;;  %v926_v24 = vadd.s32 1, %v3857_v16 }
  0xc4   : > { %vm6510_vm13 = vmand %vm3580_vm8, %vm3646_vm9  ;;  %v757_v53 = vsel %vm745_vm15, %v666_v15, -inf  ;;  %vm6513_vm8 = vcmp.ge.s32.totalorder %v3619_v7, %v3652_v20  ;;  %v645_v58 = vrot.slane %v631_v50, %v3131_v5  ;;  %v3847_v15 = vld [vmem:[%s783_s6 + $0x8] sm:$0xf]  ;;  %v6544_v50 = vmov 0 }
  0xc5   : > { %vm746_vm0 = vmand %vm6510_vm13, %vm3709_vm1 }
  0xc6   : > { %vm6511_vm3 = vmmov %vm6509_vm12  ;;  %v758_v54 = vsel %vm746_vm0, %v3632_v11, -inf  ;;  %v646_v4 = vcombine.low %v638_v51, %v645_v58  ;;  %v720_v11 = vmax.f32 %v718_v60, %v719_v9  ;;  %v951_v51 = vstv %s3930_s16  ;;  %s4459_s16 = sld [smem:[#allocation5 + %s4310_s27]] }
  0xc7   : > { %v760_v52 = vsel %vm6511_vm3, %v756_v47, -inf  ;;  %vm6512_vm12 = vmmov %vm6511_vm3  ;;  %v729_v58 = vstv %s728_s14  ;;  %v775_v60 = vstv %s6550_s9  ;;  %v4093_v9 = vstv %s4050_s2  ;;  %s1040_s14 = scalar_lea.vmem %s2643_s7, %s2324_s25  ;;  %s4606_s9 = sadd.s32 10, %s2604_s21 }
  0xc8   : > { %v761_v55 = vsel %vm6512_vm12, %v757_v53, -inf  ;;  %v763_v57 = vmax.f32 %v759_v48, %v760_v52  ;;  %vm3775_vm11 = vmand %vm6513_vm8, %vm798_vm6  ;;  %vm6520_vm6 = vcmp.ge.s32.totalorder %v790_v25, %v3652_v20  ;;  %v653_v8 = vrot.slane %v646_v4, %v3131_v5  ;;  %s4763_s25 = sld [smem:[#allocation4 + %s4606_s9]] }
  0xc9   : > { %vm6516_vm15 = vmmov %vm6511_vm3  ;;  %vm6523_vm3 = vcmp.ge.s32.totalorder %v791_v30, %v3652_v20  ;;  %v3904_v25 = vstv %s3701_s23  ;;  %v721_v28 = vrot.slane %v720_v11, 2  ;;  %v928_v30 = vadd.s32 3, %v3857_v16 }
  0xca   : > { %v762_v61 = vsel %vm6516_vm15, %v758_v54, -inf  ;;  %vm3786_vm13 = vmand %vm6517_vm5, %vm799_vm14  ;;  %2319 = vst.msk [vmem:[%s3330_s30 + $0x4] sm:$0xf] %vm3306_vm2, %v653_v8  ;;  %vm6526_vm15 = vnez %v6488_v62  ;;  %v992_v4 = vstv %s3978_s8  ;;  %vm6575_vm2 = vcmask 1043456   ;;  %s4524_s8 = sld [smem:[#allocation4 + %s4310_s27]] }
  0xcb   : > { %v764_v2 = vmax.f32 %v761_v55, %v762_v61  ;;  %vm3794_vm0 = vmand %vm6520_vm6, %vm800_vm7  ;;  %v722_v39 = vmax.f32 %v720_v11, %v721_v28  ;;  %v998_v11 = vstv %s4023_s4  ;;  %v1049_v28 = vstv %s3889_s0  ;;  %s4513_s4 = sld [smem:[#allocation6 + %s4310_s27]] }
  0xcc   : > { %vm3801_vm12 = vmand %vm6523_vm3, %vm801_vm10 }
  0xcd   : > { %v765_v7 = vmax.f32 %v763_v57, %v764_v2  ;;  %vm806_vm14 = vmand %vm3775_vm11, %vm3554_vm4  ;;  %v723_v53 = vrot.slane %v722_v39, 1  ;;  %v842_v2 = vstv %s6551_s18  ;;  %s4112_s18 = sadd.s32 8, %s2604_s21 }
  0xce   : > { %vm807_vm7 = vmand %vm3786_vm13, %vm3554_vm4  ;;  %s4164_s24 = sld [smem:[#allocation3 + %s4112_s18]] }
  0xcf   : > { %v766_v10 = vrot.slane %v765_v7, 4  ;;  %vm808_vm10 = vmand %vm3794_vm0, %vm3554_vm4  ;;  %v724_v6 = vmax.f32 %v722_v39, %v723_v53  ;;  %s4276_s28 = sld [smem:[#allocation4 + %s4112_s18]] }
  0xd0   : > { %vm809_vm8 = vmand %vm3801_vm12, %vm3554_vm4  ;;  %s4337_s2 = sld [smem:[#allocation5 + %s4112_s18]] }
  0xd1   : > { %vm810_vm5 = vmand %vm806_vm14, %vm6526_vm15  ;;  %v767_v20 = vmax.f32 %v765_v7, %v766_v10  ;;  %vm6528_vm14 = vcmask 1043456   ;;  %s4395_s23 = sld [smem:[#allocation6 + %s4112_s18]]  ;;  %p1286_p0 = scmp.le.s32.totalorder %s4513_s4, %s4459_s16 }
  0xd2   : > { %vm811_vm6 = vmand %vm807_vm7, %vm6526_vm15  ;;  %v822_v19 = vsel %vm810_vm5, %v3824_v13, -inf }
  0xd3   : > { %vm812_vm3 = vmand %vm808_vm10, %vm6526_vm15  ;;  %v823_v21 = vsel %vm811_vm6, %v3833_v14, -inf  ;;  %v826_v44 = vsel %vm6528_vm14, %v822_v19, -inf  ;;  %v768_v34 = vrot.slane %v767_v20, 2  ;;  %v923_v19 = vld [vmem:[%s920_s29 + $0x8] sm:$0xf] }
  0xd4   : > { %vm813_vm7 = vmand %vm809_vm8, %vm6526_vm15  ;;  %v824_v59 = vsel %vm812_vm3, %v3847_v15, -inf  ;;  %p1174_p13 = scmp.lt.s32.totalorder %s4164_s24, 0 }
  0xd5   : > { %vm6529_vm5 = vmmov %vm6528_vm14  ;;  %v825_v49 = vsel %vm813_vm7, %v3859_v17, -inf  ;;  %v769_v23 = vmax.f32 %v767_v20, %v768_v34  ;;  %p1239_p10 = scmp.le.s32.totalorder %s4276_s28, %s4164_s24 }
  0xd6   : > { %v827_v22 = vsel %vm6529_vm5, %v823_v21, -inf  ;;  %vm6531_vm4 = vmmov %vm6529_vm5  ;;  %vm933_vm5 = vcmp.ge.s32.totalorder %v926_v24, %v3904_v25  ;;  %s4264_s6 = scalar_select %p1174_p13, %s4164_s24, 0 }
  0xd7   : > { %v828_v62 = vsel %vm6531_vm4, %v824_v59, -inf  ;;  %v830_v26 = vmax.f32 %v826_v44, %v827_v22  ;;  %vm845_vm10 = vmand %vm3775_vm11, %vm3646_vm9  ;;  %vm935_vm11 = vcmp.ge.s32.totalorder %v928_v30, %v3904_v25  ;;  %v770_v52 = vrot.slane %v769_v23, 1  ;;  %p1240_p13 = scmp.le.s32.totalorder %s4395_s23, %s4337_s2  ;;  %p4840_p2 = por %p1286_p0, %p1239_p10 }
  0xd8   : > { %vm6532_vm8 = vmmov %vm6531_vm4  ;;  %vm934_vm4 = vcmp.ge.s32.totalorder %v927_v27, %v3904_v25  ;;  %v1046_v44 = vadd.s32 1, %v4093_v9  ;;  %s2326_s0 = sshll.u32 %s4264_s6, 2 }
  0xd9   : > { %v829_v29 = vsel %vm6532_vm8, %v825_v49, -inf  ;;  %vm846_vm15 = vmand %vm3786_vm13, %vm3646_vm9  ;;  %vm937_vm8 = vcmp.lt.s32.totalorder %v3857_v16, %v936_v31  ;;  %v771_v7 = vmax.f32 %v769_v23, %v770_v52  ;;  %p4818_p1 = por %p1240_p13, %p1239_p10 }
  0xda   : > { %v831_v35 = vmax.f32 %v828_v62, %v829_v29  ;;  %vm847_vm6 = vmand %vm3794_vm0, %vm3646_vm9  ;;  %v1047_v62 = vadd.s32 2, %v4093_v9  ;;  %v1054_v29 = vstv %s4060_s1 }
  0xdb   : > { %vm848_vm3 = vmand %vm3801_vm12, %vm3646_vm9  ;;  %vm6538_vm9 = vcmp.ge.s32.totalorder %v3857_v16, %v3904_v25  ;;  %v924_v25 = vld [vmem:[%s920_s29 + $0xc] sm:$0xf]  ;;  %v4291_v16 = vld [vmem:[%s1040_s14 + $0x4] sm:$0xf] }
  0xdc   : > { %v832_v37 = vmax.f32 %v830_v26, %v831_v35  ;;  %vm849_vm7 = vmand %vm845_vm10, %vm3709_vm1  ;;  %vm938_vm10 = vcmp.lt.s32.totalorder %v926_v24, %v936_v31 }
  0xdd   : > { %vm850_vm14 = vmand %vm846_vm15, %vm3709_vm1  ;;  %v861_v32 = vsel %vm849_vm7, %v3824_v13, -inf  ;;  %vm6534_vm15 = vcmask 1043456  }
  0xde   : > { %v833_v40 = vrot.slane %v832_v37, 4  ;;  %vm851_vm13 = vmand %vm847_vm6, %vm3709_vm1  ;;  %v862_v41 = vsel %vm850_vm14, %v3833_v14, -inf  ;;  %v865_v42 = vsel %vm6534_vm15, %v861_v32, -inf  ;;  %vm939_vm6 = vcmp.lt.s32.totalorder %v927_v27, %v936_v31 }
  0xdf   : > { %vm852_vm7 = vmand %vm848_vm3, %vm3709_vm1  ;;  %v863_v43 = vsel %vm851_vm13, %v3847_v15, -inf  ;;  %vm940_vm14 = vcmp.lt.s32.totalorder %v928_v30, %v936_v31  ;;  %vm4035_vm13 = vcmp.ge.s32.totalorder %v2633_v3, %v945_v36  ;;  %v880_v14 = vstv %s879_s26  ;;  %v921_v15 = vld [vmem:[%s920_s29] sm:$0xf]  ;;  %s4362_s26 = sld [smem:[#allocation3 + %s4310_s27]] }
  0xe0   : > { %vm6535_vm0 = vmmov %vm6534_vm15  ;;  %v834_v46 = vmax.f32 %v832_v37, %v833_v40  ;;  %v864_v33 = vsel %vm852_vm7, %v3859_v17, -inf  ;;  %v6545_v50 = vsel %vm4035_vm13, 4294967295, %v6544_v50  ;;  %v922_v17 = vld [vmem:[%s920_s29 + $0x4] sm:$0xf]  ;;  %v1048_v32 = vadd.s32 3, %v4093_v9  ;;  %s4649_s29 = sld [smem:[#allocation3 + %s4606_s9]] }
  0xe1   : > { %v866_v45 = vsel %vm6535_vm0, %v862_v41, -inf  ;;  %vm6536_vm15 = vmmov %vm6535_vm0  ;;  %s1136_s27 = scalar_select %p4478_p7, 1, 0 }
  0xe2   : > { %v867_v38 = vsel %vm6536_vm15, %v863_v43, -inf  ;;  %v869_v12 = vmax.f32 %v865_v42, %v866_v45  ;;  %vm4018_vm1 = vmand %vm6538_vm9, %vm937_vm8  ;;  %v835_v54 = vrot.slane %v834_v46, 2  ;;  %vm6573_vm9 = vcmp.eq.s32.totalorder %v880_v14, 1 }
  0xe3   : > { %vm6541_vm12 = vmmov %vm6535_vm0  ;;  %vm730_vm0 = vcmp.eq.s32.totalorder %v729_v58, 1 }
  0xe4   : > { %v868_v47 = vsel %vm6541_vm12, %v864_v33, -inf  ;;  %vm4030_vm3 = vmand %vm933_vm5, %vm938_vm10  ;;  %v836_v61 = vmax.f32 %v834_v46, %v835_v54  ;;  %vm4083_vm10 = vcmp.lt.s32.totalorder %v2633_v3, %v951_v51  ;;  %v731_v59 = vsel %vm730_vm0, 0.0, %v724_v6 }
  0xe5   : > { %v870_v55 = vmax.f32 %v867_v38, %v868_v47  ;;  %vm4043_vm5 = vmand %vm934_vm4, %vm939_vm6  ;;  %v6553_v0 = vsel %vm4083_vm10, 4294967295, %v6552_v0  ;;  %vm776_vm6 = vcmp.eq.s32.totalorder %v775_v60, 1  ;;  %p1294_p8 = scmp.lt.s32.totalorder %s4362_s26, 0  ;;  %p1353_p3 = scmp.le.s32.totalorder %s4524_s8, %s4362_s26 }
  0xe6   : > { %vm4055_vm8 = vmand %vm935_vm11, %vm940_vm14  ;;  %v837_v10 = vrot.slane %v836_v61, 1  ;;  %v777_v22 = vsel %vm776_vm6, 0.0, %v771_v7  ;;  %vm4157_vm6 = vcmp.lt.s32.totalorder %v2633_v3, %v998_v11  ;;  %v4298_v11 = vstv %s4264_s6  ;;  %s1177_s6 = scalar_lea.vmem %s2643_s7, %s2326_s0  ;;  %p1431_p9 = scmp.lt.s32.totalorder %s4649_s29, 0 }
  0xe7   : > { %v871_v1 = vmax.f32 %v869_v12, %v870_v55  ;;  %vm947_vm4 = vmand %vm4018_vm1, %vm4035_vm13  ;;  %v887_v36 = vcombine.low %v731_v59, %v777_v22  ;;  %v4334_v22 = vadd.s32 1, %v4298_v11  ;;  %s4539_s1 = scalar_select %p1294_p8, %s4362_s26, 0 }
  0xe8   : > { %vm948_vm11 = vmand %vm4030_vm3, %vm4035_vm13  ;;  %v838_v30 = vmax.f32 %v836_v61, %v837_v10  ;;  %s4788_s0 = sadd.s32 11, %s2604_s21  ;;  %p4897_p4 = por %p1353_p3, %p1240_p13 }
  0xe9   : > { %v872_v8 = vrot.slane %v871_v1, 4  ;;  %vm949_vm7 = vmand %vm4043_vm5, %vm4035_vm13  ;;  %v895_v33 = vrot.slane %v887_v36, %v3131_v5  ;;  %p1496_p8 = scmp.le.s32.totalorder %s4763_s25, %s4649_s29 }
  0xea   : > { %vm950_vm14 = vmand %vm4055_vm8, %vm4035_vm13  ;;  %vm6568_vm13 = vcmp.eq.s32.totalorder %v842_v2, 1 }
  0xeb   : > { %v873_v13 = vmax.f32 %v871_v1, %v872_v8  ;;  %vm4106_vm15 = vmand %vm947_vm4, %vm4083_vm10  ;;  %vm4126_vm4 = vcmp.ge.s32.totalorder %v2633_v3, %v992_v4  ;;  %v844_v42 = vsel %vm6568_vm13, 0.0, %v838_v30  ;;  %v6622_v8 = vmov 0 }
  0xec   : > { %vm4121_vm12 = vmand %vm948_vm11, %vm4083_vm10  ;;  %v965_v34 = vsel %vm4106_vm15, %v921_v15, -inf }
  0xed   : > { %v874_v24 = vrot.slane %v873_v13, 2  ;;  %vm4140_vm11 = vmand %vm949_vm7, %vm4083_vm10  ;;  %v966_v35 = vsel %vm4121_vm12, %v922_v17, -inf  ;;  %vm6566_vm7 = vcmask 1043456  }
  0xee   : > { %vm4152_vm0 = vmand %vm950_vm14, %vm4083_vm10  ;;  %v967_v37 = vsel %vm4140_vm11, %v923_v19, -inf  ;;  %v969_v40 = vsel %vm6566_vm7, %v965_v34, -inf  ;;  %vm1055_vm10 = vcmp.lt.s32.totalorder %v4093_v9, %v1054_v29  ;;  %vm1057_vm11 = vcmp.lt.s32.totalorder %v1047_v62, %v1054_v29 }
  0xef   : > { %v875_v31 = vmax.f32 %v873_v13, %v874_v24  ;;  %v968_v39 = vsel %vm4152_vm0, %v924_v25, -inf  ;;  %vm6567_vm0 = vmmov %vm6566_vm7  ;;  %v4278_v13 = vld [vmem:[%s1040_s14] sm:$0xf]  ;;  %v4340_v24 = vstv %s4164_s24  ;;  %v1193_v34 = vstv %s4276_s28  ;;  %s4873_s24 = sld [smem:[#allocation6 + %s4606_s9]] }
  0xf0   : > { %v970_v41 = vsel %vm6567_vm0, %v966_v35, -inf  ;;  %vm997_vm14 = vmand %vm4055_vm8, %vm4126_vm4  ;;  %s1242_s28 = scalar_select %p4818_p1, 1, 0 }
  0xf1   : > { %v876_v23 = vrot.slane %v875_v31, 1  ;;  %vm6569_vm15 = vmmov %vm6567_vm0  ;;  %v973_v18 = vmax.f32 %v969_v40, %v970_v41 }
  0xf2   : > { %v971_v45 = vsel %vm6569_vm15, %v967_v37, -inf  ;;  %vm6570_vm12 = vmmov %vm6567_vm0 }
  0xf3   : > { %v877_v43 = vmax.f32 %v875_v31, %v876_v23  ;;  %v972_v46 = vsel %vm6570_vm12, %v968_v39, -inf  ;;  %vm6571_vm7 = vmand %vm4018_vm1, %vm4126_vm4  ;;  %vm1053_vm12 = vcmp.ge.s32.totalorder %v1048_v32, %v1049_v28  ;;  %v1185_v31 = vadd.s32 3, %v4298_v11 }
  0xf4   : > { %vm1000_vm0 = vmand %vm6571_vm7, %vm4157_vm6  ;;  %v974_v53 = vmax.f32 %v971_v45, %v972_v46  ;;  %v1202_v45 = vstv %s4337_s2  ;;  %s4921_s2 = sld [smem:[#allocation5 + %s4788_s0]] }
  0xf5   : > { %vm6572_vm13 = vmand %vm4030_vm3, %vm4126_vm4  ;;  %v1012_v38 = vsel %vm1000_vm0, %v921_v15, -inf  ;;  %v882_v12 = vsel %vm6573_vm9, 0.0, %v877_v43  ;;  %vm6577_vm0 = vcmp.ge.s32.totalorder %v4093_v9, %v1049_v28 }
  0xf6   : > { %vm1001_vm15 = vmand %vm6572_vm13, %vm4157_vm6  ;;  %v1016_v48 = vsel %vm6575_vm2, %v1012_v38, -inf  ;;  %v888_v51 = vcombine.low %v844_v42, %v882_v12  ;;  %v975_v7 = vmax.f32 %v973_v18, %v974_v53 }
  0xf7   : > { %vm6574_vm1 = vmand %vm4043_vm5, %vm4126_vm4  ;;  %v1013_v47 = vsel %vm1001_vm15, %v922_v17, -inf  ;;  %vm1058_vm5 = vcmp.lt.s32.totalorder %v1048_v32, %v1054_v29  ;;  %vm6582_vm15 = vcmp.ge.s32.totalorder %v1046_v44, %v1049_v28  ;;  %v4300_v17 = vld [vmem:[%s1040_s14 + $0x8] sm:$0xf] }
  0xf8   : > { %vm1002_vm7 = vmand %vm6574_vm1, %vm4157_vm6  ;;  %v902_v60 = vrot.slane %v888_v51, %v3131_v5  ;;  %v976_v14 = vrot.slane %v975_v7, 4 }
  0xf9   : > { %vm1003_vm3 = vmand %vm997_vm14, %vm4157_vm6  ;;  %v1014_v52 = vsel %vm1002_vm7, %v923_v19, -inf  ;;  %vm6581_vm14 = vcmp.lt.s32.totalorder %v1046_v44, %v1054_v29  ;;  %v4314_v19 = vld [vmem:[%s1040_s14 + $0xc] sm:$0xf]  ;;  %s1098_s14 = scalar_select %p4413_p6, 1, 0 }
  0xfa   : > { %vm6576_vm9 = vmmov %vm6575_vm2  ;;  %v1015_v55 = vsel %vm1003_vm3, %v924_v25, -inf  ;;  %v1018_v57 = vsel %vm6575_vm2, %v1014_v52, -inf  ;;  %v903_v6 = vcombine.low %v895_v33, %v902_v60  ;;  %v977_v25 = vmax.f32 %v975_v7, %v976_v14  ;;  %v1178_v14 = vld [vmem:[%s1177_s6] sm:$0xf]  ;;  %p4948_p6 = por %p1353_p3, %p1286_p0 }
  0xfb   : > { %v1017_v54 = vsel %vm6576_vm9, %v1013_v47, -inf  ;;  %vm4237_vm13 = vmand %vm6577_vm0, %vm1055_vm10  ;;  %vm6585_vm10 = vcmp.ge.s32.totalorder %v1047_v62, %v1049_v28  ;;  %vm6590_vm9 = vnez %v6545_v50  ;;  %v1184_v50 = vadd.s32 2, %v4298_v11 }
  0xfc   : > { %v1020_v58 = vmax.f32 %v1016_v48, %v1017_v54  ;;  %vm6580_vm8 = vmmov %vm6575_vm2  ;;  %v910_v10 = vrot.slane %v903_v6, %v3131_v5  ;;  %v978_v36 = vrot.slane %v977_v25, 2  ;;  %v986_v60 = vstv %s985_s22  ;;  %s2327_s22 = sshll.u32 %s4539_s1, 2 }
  0xfd   : > { %v1019_v61 = vsel %vm6580_vm8, %v1015_v55, -inf  ;;  %vm4245_vm1 = vmand %vm6582_vm15, %vm6581_vm14  ;;  %vm6592_vm8 = vnez %v6553_v0  ;;  %v1099_v7 = vstv %s1098_s14  ;;  %s1297_s18 = scalar_lea.vmem %s2643_s7, %s2327_s22  ;;  %s4785_s14 = sld [smem:[#allocation5 + %s4606_s9]] }
  0xfe   : > { %v1021_v2 = vmax.f32 %v1018_v57, %v1019_v61  ;;  %vm4252_vm7 = vmand %vm6585_vm10, %vm1057_vm11  ;;  %v979_v46 = vmax.f32 %v977_v25, %v978_v36  ;;  %s1288_s22 = scalar_select %p4840_p2, 1, 0 }
  0xff   : > { %vm4257_vm3 = vmand %vm1053_vm12, %vm1058_vm5  ;;  %vm6591_vm5 = vnez %v6453_v63 }
 0x100   : > { %v1022_v9 = vmax.f32 %v1020_v58, %v1021_v2  ;;  %vm1063_vm11 = vmand %vm4237_vm13, %vm6590_vm9  ;;  %2322 = vst.msk [vmem:[%s3330_s30 + $0x8] sm:$0xf] %vm6591_vm5, %v910_v10  ;;  %v1208_v58 = vstv %s4395_s23  ;;  %v980_v56 = vrot.slane %v979_v46, 1  ;;  %v1032_v2 = vstv %s1031_s17  ;;  %s4753_s17 = scalar_select %p1431_p9, %s4649_s29, 0 }
 0x101   : > { %vm1064_vm12 = vmand %vm4245_vm1, %vm6590_vm9  ;;  %v1249_v10 = vstv %s4459_s16  ;;  %s4981_s16 = sld [smem:[#allocation6 + %s4788_s0]] }
 0x102   : > { %vm1065_vm2 = vmand %vm4252_vm7, %vm6590_vm9  ;;  %v1023_v15 = vrot.slane %v1022_v9, 4 }
 0x103   : > { %vm1066_vm0 = vmand %vm4257_vm3, %vm6590_vm9  ;;  %p1497_p9 = scmp.le.s32.totalorder %s4873_s24, %s4785_s14 }
 0x104   : > { %vm1067_vm14 = vmand %vm1063_vm11, %vm6592_vm8  ;;  %vm6593_vm11 = vcmask 1043456   ;;  %v1024_v49 = vmax.f32 %v1022_v9, %v1023_v15  ;;  %v4570_v15 = vstv %s4539_s1  ;;  %s5036_s1 = sadd.s32 12, %s2604_s21 }
 0x105   : > { %vm1068_vm15 = vmand %vm1064_vm12, %vm6592_vm8  ;;  %v1079_v20 = vsel %vm1067_vm14, %v4278_v13, -inf  ;;  %v1304_v36 = vadd.s32 2, %v4570_v15  ;;  %s5224_s23 = sld [smem:[#allocation4 + %s5036_s1]]  ;;  %p5291_p13 = por %p1497_p9, %p1496_p8 }
 0x106   : > { %vm1069_vm10 = vmand %vm1065_vm2, %vm6592_vm8  ;;  %v1080_v44 = vsel %vm1068_vm15, %v4291_v16, -inf  ;;  %v1083_v59 = vsel %vm6593_vm11, %v1079_v20, -inf  ;;  %v1025_v37 = vrot.slane %v1024_v49, 2  ;;  %v1180_v20 = vld [vmem:[%s1177_s6 + $0x8] sm:$0xf] }
 0x107   : > { %vm1070_vm12 = vmand %vm1066_vm0, %vm6592_vm8  ;;  %v1081_v62 = vsel %vm1069_vm10, %v4300_v17, -inf  ;;  %p1543_p10 = scmp.le.s32.totalorder %s4981_s16, %s4921_s2 }
 0x108   : > { %vm6595_vm2 = vmmov %vm6593_vm11  ;;  %v1082_v28 = vsel %vm1070_vm12, %v4314_v19, -inf  ;;  %vm1195_vm12 = vcmp.lt.s32.totalorder %v4334_v22, %v1193_v34  ;;  %v1026_v33 = vmax.f32 %v1024_v49, %v1025_v37  ;;  %v1255_v49 = vstv %s4513_s4 }
 0x109   : > { %v1084_v26 = vsel %vm6595_vm2, %v1080_v44, -inf  ;;  %vm6596_vm14 = vmmov %vm6595_vm2  ;;  %v4790_v44 = vld [vmem:[%s1297_s18 + $0x8] sm:$0xf]  ;;  %p5322_p1 = por %p1543_p10, %p1496_p8 }
 0x10a   : > { %v1085_v29 = vsel %vm6596_vm14, %v1081_v62, -inf  ;;  %v1087_v30 = vmax.f32 %v1083_v59, %v1084_v26  ;;  %vm1102_vm9 = vmand %vm4237_vm13, %vm4126_vm4  ;;  %vm1192_vm13 = vcmp.ge.s32.totalorder %v1185_v31, %v4340_v24  ;;  %vm1197_vm14 = vcmp.lt.s32.totalorder %v1185_v31, %v1193_v34 }
 0x10b   : > { %vm6598_vm0 = vmmov %vm6595_vm2  ;;  %v1027_v1 = vrot.slane %v1026_v33, 1  ;;  %v1137_v59 = vstv %s1136_s27  ;;  %v4603_v62 = vstv %s4362_s26  ;;  %s2329_s26 = sshll.u32 %s4753_s17, 2  ;;  %s5072_s27 = sld [smem:[#allocation3 + %s5036_s1]] }
 0x10c   : > { %v1086_v0 = vsel %vm6598_vm0, %v1082_v28, -inf  ;;  %vm1103_vm8 = vmand %vm4245_vm1, %vm4126_vm4  ;;  %vm1194_vm0 = vcmp.lt.s32.totalorder %v4298_v11, %v1193_v34 }
 0x10d   : > { %v1088_v35 = vmax.f32 %v1085_v29, %v1086_v0  ;;  %vm1104_vm15 = vmand %vm4252_vm7, %vm4126_vm4 }
 0x10e   : > { %vm1105_vm10 = vmand %vm4257_vm3, %vm4126_vm4 }
 0x10f   : > { %v1089_v39 = vmax.f32 %v1087_v30, %v1088_v35  ;;  %vm1106_vm2 = vmand %vm1102_vm9, %vm4157_vm6  ;;  %vm1196_vm9 = vcmp.lt.s32.totalorder %v1184_v50, %v1193_v34  ;;  %v1303_v30 = vadd.s32 1, %v4570_v15 }
 0x110   : > { %vm4436_vm11 = vmand %vm1103_vm8, %vm4157_vm6  ;;  %v1118_v23 = vsel %vm1106_vm2, %v4278_v13, -inf  ;;  %vm6604_vm8 = vcmask 1043456   ;;  %v981_v13 = vmax.f32 %v979_v46, %v980_v56 }
 0x111   : > { %v1090_v40 = vrot.slane %v1089_v39, 4  ;;  %vm4449_vm1 = vmand %vm1104_vm15, %vm4157_vm6  ;;  %v1119_v42 = vsel %vm4436_vm11, %v4291_v16, -inf  ;;  %v1122_v43 = vsel %vm6604_vm8, %v1118_v23, -inf  ;;  %vm6612_vm11 = vcmp.ge.s32.totalorder %v4334_v22, %v4340_v24  ;;  %v4583_v22 = vld [vmem:[%s1177_s6 + $0xc] sm:$0xf]  ;;  %p1688_p7 = scmp.lt.s32.totalorder %s5072_s27, 0 }
 0x112   : > { %vm1109_vm7 = vmand %vm1105_vm10, %vm4157_vm6  ;;  %v1120_v38 = vsel %vm4449_vm1, %v4300_v17, -inf  ;;  %vm6608_vm6 = vcmp.ge.s32.totalorder %v4298_v11, %v4340_v24  ;;  %vm4508_vm1 = vcmp.ge.s32.totalorder %v2633_v3, %v1202_v45  ;;  %v1028_v16 = vmax.f32 %v1026_v33, %v1027_v1 }
 0x113   : > { %vm6605_vm15 = vmmov %vm6604_vm8  ;;  %v1091_v27 = vmax.f32 %v1089_v39, %v1090_v40  ;;  %v1121_v21 = vsel %vm1109_vm7, %v4314_v19, -inf  ;;  %v1179_v19 = vld [vmem:[%s1177_s6 + $0x4] sm:$0xf]  ;;  %s4832_s6 = sld [smem:[#allocation3 + %s4788_s0]] }
 0x114   : > { %v1123_v12 = vsel %vm6605_vm15, %v1119_v42, -inf  ;;  %vm6607_vm4 = vmmov %vm6604_vm8  ;;  %vm987_vm15 = vcmp.eq.s32.totalorder %v986_v60, 1  ;;  %v1305_v42 = vadd.s32 3, %v4570_v15 }
 0x115   : > { %v1124_v18 = vsel %vm6607_vm4, %v1120_v38, -inf  ;;  %v1126_v47 = vmax.f32 %v1122_v43, %v1123_v12  ;;  %vm4492_vm3 = vmand %vm6608_vm6, %vm1194_vm0  ;;  %v1092_v54 = vrot.slane %v1091_v27, 2  ;;  %vm6617_vm0 = vcmp.ge.s32.totalorder %v1184_v50, %v4340_v24  ;;  %v4802_v24 = vld [vmem:[%s1297_s18 + $0xc] sm:$0xf] }
 0x116   : > { %vm6611_vm10 = vmmov %vm6607_vm4  ;;  %vm1033_vm4 = vcmp.eq.s32.totalorder %v1032_v2, 1  ;;  %v1311_v50 = vstv %s4524_s8  ;;  %v988_v0 = vsel %vm987_vm15, 0.0, %v981_v13  ;;  %vm6645_vm15 = vcmask 1043456   ;;  %s5003_s8 = sld [smem:[#allocation4 + %s4788_s0]]  ;;  %s1434_s0 = scalar_lea.vmem %s2643_s7, %s2329_s26 }
 0x117   : > { %v1125_v51 = vsel %vm6611_vm10, %v1121_v21, -inf  ;;  %vm4503_vm2 = vmand %vm6612_vm11, %vm1195_vm12  ;;  %v1093_v4 = vmax.f32 %v1091_v27, %v1092_v54  ;;  %vm4597_vm10 = vcmp.ge.s32.totalorder %v2633_v3, %v1249_v10  ;;  %v1034_v37 = vsel %vm1033_vm4, 0.0, %v1028_v16  ;;  %s5253_s26 = sadd.s32 13, %s2604_s21 }
 0x118   : > { %v1127_v55 = vmax.f32 %v1124_v18, %v1125_v51  ;;  %vm4518_vm8 = vmand %vm6617_vm0, %vm1196_vm9  ;;  %v1144_v38 = vcombine.low %v988_v0, %v1034_v37  ;;  %v4855_v0 = vstv %s4649_s29  ;;  %v6688_v10 = vmov 0  ;;  %s5336_s29 = sld [smem:[#allocation6 + %s5036_s1]] }
 0x119   : > { %vm4532_vm12 = vmand %vm1192_vm13, %vm1197_vm14  ;;  %vm4556_vm13 = vcmp.lt.s32.totalorder %v2633_v3, %v1208_v58  ;;  %v1094_v11 = vrot.slane %v1093_v4, 1  ;;  %p1551_p5 = scmp.lt.s32.totalorder %s4832_s6, 0 }
 0x11a   : > { %v1128_v6 = vmax.f32 %v1126_v47, %v1127_v55  ;;  %vm1204_vm9 = vmand %vm4492_vm3, %vm4508_vm1  ;;  %v6623_v8 = vsel %vm4556_vm13, 4294967295, %v6622_v8  ;;  %v1152_v55 = vrot.slane %v1144_v38, %v3131_v5 }
 0x11b   : > { %vm1205_vm14 = vmand %vm4503_vm2, %vm4508_vm1  ;;  %v1095_v39 = vmax.f32 %v1093_v4, %v1094_v11  ;;  %s4993_s4 = scalar_select %p1551_p5, %s4832_s6, 0 }
 0x11c   : > { %v1129_v9 = vrot.slane %v1128_v6, 4  ;;  %vm1206_vm7 = vmand %vm4518_vm8, %vm4508_vm1  ;;  %p1610_p0 = scmp.le.s32.totalorder %s5003_s8, %s4832_s6 }
 0x11d   : > { %vm1207_vm6 = vmand %vm4532_vm12, %vm4508_vm1 }
 0x11e   : > { %v1130_v17 = vmax.f32 %v1128_v6, %v1129_v9  ;;  %vm4579_vm11 = vmand %vm1204_vm9, %vm4556_vm13  ;;  %p5353_p2 = por %p1610_p0, %p1497_p9 }
 0x11f   : > { %vm4592_vm0 = vmand %vm1205_vm14, %vm4556_vm13  ;;  %v1222_v29 = vsel %vm4579_vm11, %v1178_v14, -inf  ;;  %vm4657_vm11 = vcmp.lt.s32.totalorder %v2633_v3, %v1255_v49 }
 0x120   : > { %v1131_v26 = vrot.slane %v1130_v17, 2  ;;  %vm4615_vm9 = vmand %vm1206_vm7, %vm4556_vm13  ;;  %v1223_v34 = vsel %vm4592_vm0, %v1179_v19, -inf  ;;  %vm6640_vm7 = vcmp.eq.s32.totalorder %v1099_v7, 1 }
 0x121   : > { %vm4631_vm14 = vmand %vm1207_vm6, %vm4556_vm13  ;;  %v1224_v35 = vsel %vm4615_vm9, %v1180_v20, -inf  ;;  %vm6634_vm6 = vcmask 1043456   ;;  %v1101_v12 = vsel %vm6640_vm7, 0.0, %v1095_v39  ;;  %vm1313_vm13 = vcmp.lt.s32.totalorder %v1303_v30, %v1311_v50 }
 0x122   : > { %v1132_v32 = vmax.f32 %v1130_v17, %v1131_v26  ;;  %v1225_v23 = vsel %vm4631_vm14, %v4583_v22, -inf  ;;  %v1226_v40 = vsel %vm6634_vm6, %v1222_v29, -inf  ;;  %vm6637_vm0 = vmmov %vm6634_vm6  ;;  %v1450_v39 = vstv %s4763_s25  ;;  %s1499_s25 = scalar_select %p5291_p13, 1, 0 }
 0x123   : > { %v1227_v45 = vsel %vm6637_vm0, %v1223_v34, -inf  ;;  %vm6638_vm9 = vmmov %vm6637_vm0 }
 0x124   : > { %v1133_v43 = vrot.slane %v1132_v32, 1  ;;  %v1228_v46 = vsel %vm6638_vm9, %v1224_v35, -inf  ;;  %vm6639_vm14 = vmmov %vm6637_vm0  ;;  %v1230_v21 = vmax.f32 %v1226_v40, %v1227_v45  ;;  %vm6643_vm9 = vcmp.eq.s32.totalorder %v1137_v59, 1 }
 0x125   : > { %v1229_v33 = vsel %vm6639_vm14, %v1225_v23, -inf  ;;  %vm6641_vm14 = vmand %vm4492_vm3, %vm4597_vm10  ;;  %v4800_v59 = vstv %s4753_s17  ;;  %v1459_v40 = vstv %s4785_s14  ;;  %s1393_s17 = scalar_select %p4948_p6, 1, 0 }
 0x126   : > { %v1134_v27 = vmax.f32 %v1132_v32, %v1133_v43  ;;  %vm1257_vm6 = vmand %vm6641_vm14, %vm4657_vm11  ;;  %v1231_v18 = vmax.f32 %v1228_v46, %v1229_v33  ;;  %v1441_v52 = vadd.s32 2, %v4800_v59  ;;  %v1442_v37 = vadd.s32 3, %v4800_v59  ;;  %s1545_s14 = scalar_select %p5322_p1, 1, 0 }
 0x127   : > { %vm6642_vm7 = vmand %vm4503_vm2, %vm4597_vm10  ;;  %v1269_v47 = vsel %vm1257_vm6, %v1178_v14, -inf  ;;  %vm1314_vm2 = vcmp.lt.s32.totalorder %v1304_v36, %v1311_v50  ;;  %p1753_p6 = scmp.le.s32.totalorder %s5224_s23, %s5072_s27 }
 0x128   : > { %vm1258_vm0 = vmand %vm6642_vm7, %vm4657_vm11  ;;  %v1139_v48 = vsel %vm6643_vm9, 0.0, %v1134_v27  ;;  %v1273_v53 = vsel %vm6645_vm15, %v1269_v47, -inf  ;;  %v1232_v4 = vmax.f32 %v1230_v21, %v1231_v18 }
 0x129   : > { %vm6644_vm3 = vmand %vm4518_vm8, %vm4597_vm10  ;;  %v1270_v51 = vsel %vm1258_vm0, %v1179_v19, -inf  ;;  %v1145_v54 = vcombine.low %v1101_v12, %v1139_v48  ;;  %vm6649_vm0 = vcmp.lt.s32.totalorder %v4570_v15, %v1311_v50  ;;  %v4769_v19 = vld [vmem:[%s1297_s18] sm:$0xf] }
 0x12a   : > { %vm1259_vm14 = vmand %vm6644_vm3, %vm4657_vm11  ;;  %vm6650_vm3 = vcmp.ge.s32.totalorder %v4570_v15, %v4603_v62  ;;  %v1233_v11 = vrot.slane %v1232_v4, 4 }
 0x12b   : > { %vm6646_vm6 = vmand %vm4532_vm12, %vm4597_vm10  ;;  %v1271_v57 = vsel %vm1259_vm14, %v1180_v20, -inf  ;;  %v1159_v2 = vrot.slane %v1145_v54, %v3131_v5  ;;  %vm6654_vm14 = vcmp.ge.s32.totalorder %v1303_v30, %v4603_v62  ;;  %v4778_v20 = vld [vmem:[%s1297_s18 + $0x4] sm:$0xf]  ;;  %s1355_s18 = scalar_select %p4897_p4, 1, 0  ;;  %v6681_v54 = vmov 0 }
 0x12c   : > { %vm1260_vm9 = vmand %vm6646_vm6, %vm4657_vm11  ;;  %p5435_p4 = por %p1610_p0, %p1543_p10 }
 0x12d   : > { %vm6647_vm7 = vmmov %vm6645_vm15  ;;  %v1272_v56 = vsel %vm1260_vm9, %v4583_v22, -inf  ;;  %vm1315_vm15 = vcmp.lt.s32.totalorder %v1305_v42, %v1311_v50  ;;  %vm6657_vm9 = vcmp.ge.s32.totalorder %v1304_v36, %v4603_v62  ;;  %v1160_v13 = vcombine.low %v1152_v55, %v1159_v2 }
 0x12e   : > { %v1274_v58 = vsel %vm6647_vm7, %v1270_v51, -inf  ;;  %vm6648_vm8 = vmmov %vm6647_vm7  ;;  %v1234_v22 = vmax.f32 %v1232_v4, %v1233_v11  ;;  %v1440_v50 = vadd.s32 1, %v4800_v59  ;;  %v1465_v55 = vstv %s4873_s24  ;;  %s5401_s24 = sld [smem:[#allocation5 + %s5253_s26]] }
 0x12f   : > { %v1275_v60 = vsel %vm6648_vm8, %v1271_v57, -inf  ;;  %v1277_v1 = vmax.f32 %v1273_v53, %v1274_v58  ;;  %vm4720_vm4 = vmand %vm6650_vm3, %vm6649_vm0  ;;  %vm6660_vm8 = vcmp.ge.s32.totalorder %v1305_v42, %v4603_v62  ;;  %v1167_v16 = vrot.slane %v1160_v13, %v3131_v5 }
 0x130   : > { %vm6653_vm12 = vmmov %vm6647_vm7  ;;  %v1235_v35 = vrot.slane %v1234_v22, 2  ;;  %v1243_v2 = vstv %s1242_s28  ;;  %v1289_v4 = vstv %s1288_s22  ;;  %v1506_v13 = vstv %s4921_s2  ;;  %s2330_s28 = sshll.u32 %s4993_s4, 2 }
 0x131   : > { %v1276_v6 = vsel %vm6653_vm12, %v1272_v56, -inf  ;;  %vm4730_vm6 = vmand %vm6654_vm14, %vm1313_vm13  ;;  %2325 = vst.msk [vmem:[%s3330_s30 + $0xc] sm:$0xf] %vm6591_vm5, %v1167_v16  ;;  %vm6663_vm12 = vnez %v6623_v8  ;;  %v5033_v11 = vstv %s4993_s4  ;;  %s5198_s22 = scalar_select %p1688_p7, %s5072_s27, 0 }
 0x132   : > { %v1278_v9 = vmax.f32 %v1275_v60, %v1276_v6  ;;  %vm4737_vm7 = vmand %vm6657_vm9, %vm1314_vm2  ;;  %v1236_v43 = vmax.f32 %v1234_v22, %v1235_v35  ;;  %v1563_v35 = vstv %s4832_s6  ;;  %s1554_s9 = scalar_lea.vmem %s2643_s7, %s2330_s28  ;;  %s5453_s6 = sld [smem:[#allocation6 + %s5253_s26]] }
 0x133   : > { %vm4744_vm0 = vmand %vm6660_vm8, %vm1315_vm15  ;;  %v5234_v22 = vld [vmem:[%s1554_s9 + $0x4] sm:$0xf]  ;;  %s1650_s4 = scalar_select %p5435_p4, 1, 0 }
 0x134   : > { %v1279_v15 = vmax.f32 %v1277_v1, %v1278_v9  ;;  %vm1320_vm13 = vmand %vm4720_vm4, %vm4508_vm1  ;;  %v1237_v57 = vrot.slane %v1236_v43, 1  ;;  %v1356_v9 = vstv %s1355_s18  ;;  %s5241_s18 = sld [smem:[#allocation5 + %s5036_s1]]  ;;  %s2332_s1 = sshll.u32 %s5198_s22, 2 }
 0x135   : > { %vm1321_vm2 = vmand %vm4730_vm6, %vm4508_vm1 }
 0x136   : > { %v1280_v17 = vrot.slane %v1279_v15, 4  ;;  %vm1322_vm15 = vmand %vm4737_vm7, %vm4508_vm1  ;;  %v1238_v14 = vmax.f32 %v1236_v43, %v1237_v57 }
 0x137   : > { %vm1323_vm3 = vmand %vm4744_vm0, %vm4508_vm1 }
 0x138   : > { %vm1324_vm14 = vmand %vm1320_vm13, %vm6663_vm12  ;;  %v1281_v62 = vmax.f32 %v1279_v15, %v1280_v17  ;;  %vm6665_vm13 = vcmask 1043456   ;;  %p1800_p8 = scmp.le.s32.totalorder %s5453_s6, %s5401_s24 }
 0x139   : > { %vm1325_vm9 = vmand %vm1321_vm2, %vm6663_vm12  ;;  %v1336_v49 = vsel %vm1324_vm14, %v4769_v19, -inf }
 0x13a   : > { %vm1326_vm8 = vmand %vm1322_vm15, %vm6663_vm12  ;;  %v1337_v26 = vsel %vm1325_vm9, %v4778_v20, -inf  ;;  %v1340_v28 = vsel %vm6665_vm13, %v1336_v49, -inf  ;;  %v1282_v32 = vrot.slane %v1281_v62, 2  ;;  %v5257_v49 = vld [vmem:[%s1554_s9 + $0xc] sm:$0xf]  ;;  %p1754_p7 = scmp.le.s32.totalorder %s5336_s29, %s5241_s18  ;;  %p5818_p13 = por %p1800_p8, %p1753_p6 }
 0x13b   : > { %vm1327_vm2 = vmand %vm1323_vm3, %vm6663_vm12  ;;  %v1338_v29 = vsel %vm1326_vm8, %v4790_v44, -inf }
 0x13c   : > { %vm6667_vm15 = vmmov %vm6665_vm13  ;;  %v1339_v31 = vsel %vm1327_vm2, %v4802_v24, -inf  ;;  %v1283_v46 = vmax.f32 %v1281_v62, %v1282_v32  ;;  %p5786_p9 = por %p1754_p7, %p1753_p6 }
 0x13d   : > { %v1341_v30 = vsel %vm6667_vm15, %v1337_v26, -inf  ;;  %vm6668_vm14 = vmmov %vm6665_vm13  ;;  %v1512_v26 = vstv %s4981_s16  ;;  %s1691_s16 = scalar_lea.vmem %s2643_s7, %s2332_s1 }
 0x13e   : > { %v1342_v8 = vsel %vm6668_vm14, %v1338_v29, -inf  ;;  %v1344_v34 = vmax.f32 %v1340_v28, %v1341_v30  ;;  %vm1359_vm1 = vmand %vm4720_vm4, %vm4597_vm10  ;;  %vm1452_vm14 = vcmp.lt.s32.totalorder %v1440_v50, %v1450_v39  ;;  %v1284_v58 = vrot.slane %v1283_v46, 1 }
 0x13f   : > { %vm6669_vm3 = vmmov %vm6665_vm13  ;;  %vm1446_vm13 = vcmp.ge.s32.totalorder %v4800_v59, %v4855_v0  ;;  %v1560_v28 = vadd.s32 1, %v5033_v11 }
 0x140   : > { %v1343_v36 = vsel %vm6669_vm3, %v1339_v31, -inf  ;;  %vm1360_vm12 = vmand %vm4730_vm6, %vm4597_vm10  ;;  %vm1451_vm3 = vcmp.lt.s32.totalorder %v4800_v59, %v1450_v39  ;;  %vm6671_vm6 = vcmask 1043456   ;;  %v1285_v15 = vmax.f32 %v1283_v46, %v1284_v58  ;;  %v1436_v59 = vld [vmem:[%s1434_s0 + $0x4] sm:$0xf] }
 0x141   : > { %v1345_v23 = vmax.f32 %v1342_v8, %v1343_v36  ;;  %vm1361_vm9 = vmand %vm4737_vm7, %vm4597_vm10  ;;  %vm1453_vm7 = vcmp.lt.s32.totalorder %v1441_v52, %v1450_v39  ;;  %v1561_v8 = vadd.s32 2, %v5033_v11  ;;  %v1568_v36 = vstv %s5003_s8  ;;  %s5489_s8 = sld [smem:[#allocation4 + %s5253_s26]] }
 0x142   : > { %vm1362_vm8 = vmand %vm4744_vm0, %vm4597_vm10  ;;  %vm1569_vm5 = vcmp.lt.s32.totalorder %v5033_v11, %v1568_v36 }
 0x143   : > { %v1346_v42 = vmax.f32 %v1344_v34, %v1345_v23  ;;  %vm1363_vm2 = vmand %vm1359_vm1, %vm4657_vm11  ;;  %vm1449_vm1 = vcmp.ge.s32.totalorder %v1442_v37, %v4855_v0 }
 0x144   : > { %vm1364_vm4 = vmand %vm1360_vm12, %vm4657_vm11  ;;  %v1375_v45 = vsel %vm1363_vm2, %v4769_v19, -inf }
 0x145   : > { %v1347_v33 = vrot.slane %v1346_v42, 4  ;;  %vm1365_vm15 = vmand %vm1361_vm9, %vm4657_vm11  ;;  %v1376_v38 = vsel %vm1364_vm4, %v4778_v20, -inf  ;;  %v1379_v12 = vsel %vm6671_vm6, %v1375_v45, -inf  ;;  %vm1454_vm9 = vcmp.lt.s32.totalorder %v1442_v37, %v1450_v39 }
 0x146   : > { %vm1366_vm12 = vmand %vm1362_vm8, %vm4657_vm11  ;;  %v1377_v27 = vsel %vm1365_vm15, %v4790_v44, -inf  ;;  %vm6678_vm8 = vcmp.ge.s32.totalorder %v1440_v50, %v4855_v0  ;;  %vm4975_vm4 = vcmp.ge.s32.totalorder %v2633_v3, %v1459_v40  ;;  %v1394_v20 = vstv %s1393_s17  ;;  %v1435_v44 = vld [vmem:[%s1434_s0] sm:$0xf]  ;;  %s5305_s17 = sld [smem:[#allocation3 + %s5253_s26]]  ;;  %s5548_s26 = sadd.s32 14, %s2604_s21 }
 0x147   : > { %vm6672_vm2 = vmmov %vm6671_vm6  ;;  %v1348_v41 = vmax.f32 %v1346_v42, %v1347_v33  ;;  %v1378_v25 = vsel %vm1366_vm12, %v4802_v24, -inf  ;;  %v6682_v54 = vsel %vm4975_vm4, 4294967295, %v6681_v54  ;;  %vm5023_vm12 = vcmp.lt.s32.totalorder %v2633_v3, %v1465_v55  ;;  %v1437_v24 = vld [vmem:[%s1434_s0 + $0x8] sm:$0xf]  ;;  %s5703_s1 = sld [smem:[#allocation4 + %s5548_s26]] }
 0x148   : > { %v1380_v21 = vsel %vm6672_vm2, %v1376_v38, -inf  ;;  %vm6674_vm10 = vmmov %vm6672_vm2  ;;  %v6689_v10 = vsel %vm5023_vm12, 4294967295, %v6688_v10 }
 0x149   : > { %v1381_v18 = vsel %vm6674_vm10, %v1377_v27, -inf  ;;  %v1383_v47 = vmax.f32 %v1379_v12, %v1380_v21  ;;  %vm4961_vm11 = vmand %vm1446_vm13, %vm1451_vm3  ;;  %v1349_v56 = vrot.slane %v1348_v41, 2  ;;  %vm6683_vm13 = vcmp.ge.s32.totalorder %v1441_v52, %v4855_v0  ;;  %v1438_v0 = vld [vmem:[%s1434_s0 + $0xc] sm:$0xf]  ;;  %s5591_s0 = sld [smem:[#allocation3 + %s5548_s26]] }
 0x14a   : > { %vm6677_vm0 = vmmov %vm6672_vm2  ;;  %v1562_v52 = vadd.s32 3, %v5033_v11 }
 0x14b   : > { %v1382_v51 = vsel %vm6677_vm0, %v1378_v25, -inf  ;;  %vm4970_vm15 = vmand %vm6678_vm8, %vm1452_vm14  ;;  %v1350_v6 = vmax.f32 %v1348_v41, %v1349_v56  ;;  %vm6702_vm8 = vcmask 1043456  }
 0x14c   : > { %v1384_v60 = vmax.f32 %v1381_v18, %v1382_v51  ;;  %vm4986_vm14 = vmand %vm6683_vm13, %vm1453_vm7  ;;  %vm1244_vm7 = vcmp.eq.s32.totalorder %v1243_v2, 1  ;;  %p1808_p3 = scmp.lt.s32.totalorder %s5305_s17, 0  ;;  %p1867_p10 = scmp.le.s32.totalorder %s5489_s8, %s5305_s17 }
 0x14d   : > { %vm4998_vm3 = vmand %vm1449_vm1, %vm1454_vm9  ;;  %vm1290_vm9 = vcmp.eq.s32.totalorder %v1289_v4, 1  ;;  %v1351_v17 = vrot.slane %v1350_v6, 1  ;;  %v1245_v29 = vsel %vm1244_vm7, 0.0, %v1238_v14 }
 0x14e   : > { %v1385_v7 = vmax.f32 %v1383_v47, %v1384_v60  ;;  %vm1461_vm1 = vmand %vm4961_vm11, %vm4975_vm4  ;;  %v1291_v30 = vsel %vm1290_vm9, 0.0, %v1285_v15  ;;  %s5478_s2 = scalar_select %p1808_p3, %s5305_s17, 0 }
 0x14f   : > { %vm1462_vm6 = vmand %vm4970_vm15, %vm4975_vm4  ;;  %v1352_v37 = vmax.f32 %v1350_v6, %v1351_v17  ;;  %v1401_v40 = vcombine.low %v1245_v29, %v1291_v30  ;;  %p1945_p5 = scmp.lt.s32.totalorder %s5591_s0, 0  ;;  %p5851_p0 = por %p1867_p10, %p1754_p7 }
 0x150   : > { %v1386_v16 = vrot.slane %v1385_v7, 4  ;;  %vm1463_vm2 = vmand %vm4986_vm14, %vm4975_vm4  ;;  %p2010_p3 = scmp.le.s32.totalorder %s5703_s1, %s5591_s0 }
 0x151   : > { %vm1464_vm10 = vmand %vm4998_vm3, %vm4975_vm4  ;;  %vm6704_vm4 = vcmp.eq.s32.totalorder %v1356_v9, 1  ;;  %v1409_v25 = vrot.slane %v1401_v40, %v3131_v5 }
 0x152   : > { %v1387_v19 = vmax.f32 %v1385_v7, %v1386_v16  ;;  %vm5049_vm0 = vmand %vm1461_vm1, %vm5023_vm12  ;;  %vm5065_vm1 = vcmp.ge.s32.totalorder %v2633_v3, %v1506_v13  ;;  %v1358_v12 = vsel %vm6704_vm4, 0.0, %v1352_v37  ;;  %v6758_v16 = vmov 0 }
 0x153   : > { %vm5060_vm13 = vmand %vm1462_vm6, %vm5023_vm12  ;;  %v1479_v32 = vsel %vm5049_vm0, %v1435_v44, -inf }
 0x154   : > { %v1388_v50 = vrot.slane %v1387_v19, 2  ;;  %vm5083_vm6 = vmand %vm1463_vm2, %vm5023_vm12  ;;  %v1480_v23 = vsel %vm5060_vm13, %v1436_v59, -inf  ;;  %v1483_v33 = vsel %vm6702_vm8, %v1479_v32, -inf  ;;  %vm6711_vm13 = vcmask 1043456  }
 0x155   : > { %vm5095_vm7 = vmand %vm1464_vm10, %vm5023_vm12  ;;  %v1481_v42 = vsel %vm5083_vm6, %v1437_v24, -inf  ;;  %vm5119_vm10 = vcmp.lt.s32.totalorder %v2633_v3, %v1512_v26  ;;  %vm1571_vm12 = vcmp.lt.s32.totalorder %v1561_v8, %v1568_v36  ;;  %v1707_v32 = vstv %s5224_s23 }
 0x156   : > { %v1389_v39 = vmax.f32 %v1387_v19, %v1388_v50  ;;  %v1482_v43 = vsel %vm5095_vm7, %v1438_v0, -inf  ;;  %vm6703_vm2 = vmmov %vm6702_vm8  ;;  %vm6709_vm7 = vcmp.eq.s32.totalorder %v1394_v20, 1  ;;  %v5217_v19 = vld [vmem:[%s1554_s9] sm:$0xf]  ;;  %v5227_v20 = vstv %s5198_s22 }
 0x157   : > { %v1484_v38 = vsel %vm6703_vm2, %v1480_v23, -inf  ;;  %vm1511_vm9 = vmand %vm4998_vm3, %vm5065_vm1  ;;  %v5280_v50 = vadd.s32 2, %v5227_v20 }
 0x158   : > { %v1390_v46 = vrot.slane %v1389_v39, 1  ;;  %vm6705_vm0 = vmmov %vm6703_vm2  ;;  %v1487_v48 = vmax.f32 %v1483_v33, %v1484_v38 }
 0x159   : > { %v1485_v21 = vsel %vm6705_vm0, %v1481_v42, -inf  ;;  %vm6706_vm6 = vmmov %vm6705_vm0  ;;  %v1716_v42 = vstv %s5241_s18  ;;  %s1802_s18 = scalar_select %p5818_p13, 1, 0 }
 0x15a   : > { %v1391_v27 = vmax.f32 %v1389_v39, %v1390_v46  ;;  %v1486_v41 = vsel %vm6706_vm6, %v1482_v43, -inf  ;;  %vm6707_vm8 = vmand %vm4961_vm11, %vm5065_vm1  ;;  %vm1570_vm6 = vcmp.lt.s32.totalorder %v1560_v28, %v1568_v36 }
 0x15b   : > { %vm1514_vm2 = vmand %vm6707_vm8, %vm5119_vm10  ;;  %v1488_v57 = vmax.f32 %v1485_v21, %v1486_v41 }
 0x15c   : > { %vm6708_vm4 = vmand %vm4970_vm15, %vm5065_vm1  ;;  %v1526_v18 = vsel %vm1514_vm2, %v1435_v44, -inf  ;;  %v1396_v47 = vsel %vm6709_vm7, 0.0, %v1391_v27  ;;  %vm6714_vm2 = vcmp.ge.s32.totalorder %v5033_v11, %v1563_v35 }
 0x15d   : > { %vm1515_vm0 = vmand %vm6708_vm4, %vm5119_vm10  ;;  %v1530_v53 = vsel %vm6711_vm13, %v1526_v18, -inf  ;;  %v1402_v55 = vcombine.low %v1358_v12, %v1396_v47  ;;  %v1489_v15 = vmax.f32 %v1487_v48, %v1488_v57  ;;  %v1825_v12 = vstv %s5489_s8 }
 0x15e   : > { %vm6710_vm11 = vmand %vm4986_vm14, %vm5065_vm1  ;;  %v1527_v51 = vsel %vm1515_vm0, %v1436_v59, -inf }
 0x15f   : > { %vm1516_vm8 = vmand %vm6710_vm11, %vm5119_vm10  ;;  %v1416_v4 = vrot.slane %v1402_v55, %v3131_v5  ;;  %vm6721_vm11 = vcmp.ge.s32.totalorder %v1561_v8, %v1563_v35  ;;  %v1490_v44 = vrot.slane %v1489_v15, 4 }
 0x160   : > { %vm1517_vm15 = vmand %vm1511_vm9, %vm5119_vm10  ;;  %v1528_v58 = vsel %vm1516_vm8, %v1437_v24, -inf  ;;  %vm6718_vm9 = vcmp.ge.s32.totalorder %v1560_v28, %v1563_v35  ;;  %v5243_v24 = vld [vmem:[%s1554_s9 + $0x8] sm:$0xf]  ;;  %v5268_v28 = vadd.s32 1, %v5227_v20  ;;  %s1612_s9 = scalar_select %p5353_p2, 1, 0 }
 0x161   : > { %vm6712_vm7 = vmmov %vm6711_vm13  ;;  %v1529_v60 = vsel %vm1517_vm15, %v1438_v0, -inf  ;;  %vm1572_vm13 = vcmp.lt.s32.totalorder %v1562_v52, %v1568_v36  ;;  %v1417_v14 = vcombine.low %v1409_v25, %v1416_v4  ;;  %v5283_v0 = vadd.s32 3, %v5227_v20  ;;  %p5939_p2 = por %p1867_p10, %p1800_p8 }
 0x162   : > { %v1531_v56 = vsel %vm6712_vm7, %v1527_v51, -inf  ;;  %vm6713_vm14 = vmmov %vm6712_vm7  ;;  %v1491_v31 = vmax.f32 %v1489_v15, %v1490_v44  ;;  %v1500_v4 = vstv %s1499_s25  ;;  %v1613_v15 = vstv %s1612_s9  ;;  %s2333_s25 = sshll.u32 %s5478_s2, 2  ;;  %s5721_s9 = sadd.s32 15, %s2604_s21 }
 0x163   : > { %v1532_v1 = vsel %vm6713_vm14, %v1528_v58, -inf  ;;  %v1534_v2 = vmax.f32 %v1530_v53, %v1531_v56  ;;  %vm5177_vm4 = vmand %vm6714_vm2, %vm1569_vm5  ;;  %vm6724_vm5 = vcmp.ge.s32.totalorder %v1562_v52, %v1563_v35  ;;  %v1424_v17 = vrot.slane %v1417_v14, %v3131_v5  ;;  %s1811_s28 = scalar_lea.vmem %s2643_s7, %s2333_s25  ;;  %s5750_s21 = sld [smem:[#allocation5 + %s5548_s26]] }
 0x164   : > { %vm6717_vm3 = vmmov %vm6712_vm7  ;;  %v1492_v23 = vrot.slane %v1491_v31, 2  ;;  %v5512_v44 = vstv %s5478_s2  ;;  %s5765_s22 = sld [smem:[#allocation3 + %s5721_s9]] }
 0x165   : > { %v1533_v6 = vsel %vm6717_vm3, %v1529_v60, -inf  ;;  %vm5185_vm0 = vmand %vm6718_vm9, %vm1570_vm6  ;;  %vm6729_vm3 = vnez %v6689_v10  ;;  %s5867_s23 = sld [smem:[#allocation5 + %s5721_s9]] }
 0x166   : > { %v1535_v9 = vmax.f32 %v1532_v1, %v1533_v6  ;;  %vm5191_vm8 = vmand %vm6721_vm11, %vm1571_vm12  ;;  %vm6727_vm12 = vnez %v6682_v54  ;;  %v1702_v54 = vstv %s5072_s27  ;;  %v1493_v41 = vmax.f32 %v1491_v31, %v1492_v23  ;;  %s5903_s25 = sld [smem:[#allocation6 + %s5721_s9]] }
 0x167   : > { %vm5202_vm6 = vmand %vm6724_vm5, %vm1572_vm13  ;;  %vm6728_vm13 = vnez %v6453_v63  ;;  %v1769_v31 = vstv %s5453_s6  ;;  %v1819_v23 = vadd.s32 3, %v5512_v44  ;;  %s5951_s27 = sld [smem:[#allocation4 + %s5721_s9]] }
 0x168   : > { %v1536_v11 = vmax.f32 %v1534_v2, %v1535_v9  ;;  %vm1577_vm15 = vmand %vm5177_vm4, %vm6727_vm12  ;;  %2328 = vst.msk [vmem:[%s3330_s30 + $0x10] sm:$0xf] %vm6728_vm13, %v1424_v17  ;;  %v1722_v2 = vstv %s5336_s29  ;;  %v1494_v61 = vrot.slane %v1493_v41, 1  ;;  %v1546_v9 = vstv %s1545_s14  ;;  %s5695_s14 = scalar_select %p1945_p5, %s5591_s0, 0 }
 0x169   : > { %vm1578_vm7 = vmand %vm5185_vm0, %vm6727_vm12  ;;  %v1763_v17 = vstv %s5401_s24  ;;  %s1907_s24 = scalar_select %p5939_p2, 1, 0 }
 0x16a   : > { %vm1579_vm14 = vmand %vm5191_vm8, %vm6727_vm12  ;;  %v1537_v59 = vrot.slane %v1536_v11, 4  ;;  %p2065_p1 = scmp.lt.s32.totalorder %s5765_s22, 0  ;;  %s2335_s29 = sshll.u32 %s5695_s14, 2 }
 0x16b   : > { %vm1580_vm2 = vmand %vm5202_vm6, %vm6727_vm12 }
 0x16c   : > { %vm1581_vm9 = vmand %vm1577_vm15, %vm6729_vm3  ;;  %vm6730_vm15 = vcmask 1043456   ;;  %v1538_v8 = vmax.f32 %v1536_v11, %v1537_v59  ;;  %p2057_p5 = scmp.le.s32.totalorder %s5903_s25, %s5867_s23 }
 0x16d   : > { %vm1582_vm11 = vmand %vm1578_vm7, %vm6729_vm3  ;;  %v1593_v26 = vsel %vm1581_vm9, %v5217_v19, -inf  ;;  %p2124_p8 = scmp.le.s32.totalorder %s5951_s27, %s5765_s22 }
 0x16e   : > { %vm1583_vm5 = vmand %vm1579_vm14, %vm6729_vm3  ;;  %v1594_v29 = vsel %vm1582_vm11, %v5234_v22, -inf  ;;  %v1597_v30 = vsel %vm6730_vm15, %v1593_v26, -inf  ;;  %v1539_v40 = vrot.slane %v1538_v8, 2  ;;  %v1694_v26 = vld [vmem:[%s1691_s16 + $0x8] sm:$0xf]  ;;  %p6211_p7 = por %p2057_p5, %p2010_p3 }
 0x16f   : > { %vm1584_vm7 = vmand %vm1580_vm2, %vm6729_vm3  ;;  %v1595_v34 = vsel %vm1583_vm5, %v5243_v24, -inf  ;;  %p6247_p10 = por %p2124_p8, %p2057_p5 }
 0x170   : > { %vm6732_vm14 = vmmov %vm6730_vm15  ;;  %v1596_v35 = vsel %vm1584_vm7, %v5257_v49, -inf  ;;  %v1540_v25 = vmax.f32 %v1538_v8, %v1539_v40  ;;  %v5545_v8 = vstv %s5305_s17  ;;  %s1948_s17 = scalar_lea.vmem %s2643_s7, %s2335_s29 }
 0x171   : > { %v1598_v52 = vsel %vm6732_vm14, %v1594_v29, -inf  ;;  %vm6733_vm9 = vmmov %vm6732_vm14  ;;  %vm1704_vm14 = vcmp.ge.s32.totalorder %v5268_v28, %v1702_v54  ;;  %v1651_v29 = vstv %s1650_s4  ;;  %s2510_s4 = smov [#allocation7]  }
 0x172   : > { %v1599_v36 = vsel %vm6733_vm9, %v1595_v34, -inf  ;;  %v1601_v10 = vmax.f32 %v1597_v30, %v1598_v52  ;;  %vm1616_vm12 = vmand %vm5177_vm4, %vm5065_vm1  ;;  %vm1708_vm4 = vcmp.lt.s32.totalorder %v5227_v20, %v1707_v32  ;;  %v1541_v7 = vrot.slane %v1540_v25, 1  ;;  %v5525_v30 = vld [vmem:[%s1691_s16 + $0xc] sm:$0xf] }
 0x173   : > { %vm6735_vm2 = vmmov %vm6733_vm9  ;;  %vm1705_vm9 = vcmp.ge.s32.totalorder %v5280_v50, %v1702_v54 }
 0x174   : > { %v1600_v37 = vsel %vm6735_vm2, %v1596_v35, -inf  ;;  %vm1617_vm3 = vmand %vm5185_vm0, %vm5065_vm1  ;;  %vm1710_vm2 = vcmp.lt.s32.totalorder %v5280_v50, %v1707_v32  ;;  %v1542_v59 = vmax.f32 %v1540_v25, %v1541_v7  ;;  %v5739_v50 = vld [vmem:[%s1811_s28 + $0xc] sm:$0xf] }
 0x175   : > { %v1602_v39 = vmax.f32 %v1599_v36, %v1600_v37  ;;  %vm1618_vm11 = vmand %vm5191_vm8, %vm5065_vm1  ;;  %v1817_v36 = vadd.s32 1, %v5512_v44 }
 0x176   : > { %vm1619_vm5 = vmand %vm5202_vm6, %vm5065_vm1  ;;  %vm6744_vm1 = vcmp.ge.s32.totalorder %v5227_v20, %v1702_v54  ;;  %v1692_v20 = vld [vmem:[%s1691_s16] sm:$0xf] }
 0x177   : > { %v1603_v43 = vmax.f32 %v1601_v10, %v1602_v39  ;;  %vm1620_vm7 = vmand %vm1616_vm12, %vm5119_vm10  ;;  %vm1709_vm12 = vcmp.lt.s32.totalorder %v5268_v28, %v1707_v32  ;;  %v1818_v10 = vadd.s32 2, %v5512_v44  ;;  %v5727_v28 = vld [vmem:[%s1811_s28 + $0x8] sm:$0xf] }
 0x178   : > { %vm5376_vm15 = vmand %vm1617_vm3, %vm5119_vm10  ;;  %v1632_v33 = vsel %vm1620_vm7, %v5217_v19, -inf  ;;  %vm6741_vm3 = vcmask 1043456   ;;  %vm1711_vm7 = vcmp.lt.s32.totalorder %v5283_v0, %v1707_v32  ;;  %v1495_v19 = vmax.f32 %v1493_v41, %v1494_v61 }
 0x179   : > { %v1604_v38 = vrot.slane %v1603_v43, 4  ;;  %vm5391_vm0 = vmand %vm1618_vm11, %vm5119_vm10  ;;  %v1633_v27 = vsel %vm5376_vm15, %v5234_v22, -inf  ;;  %v1636_v21 = vsel %vm6741_vm3, %v1632_v33, -inf }
 0x17a   : > { %vm1623_vm8 = vmand %vm1619_vm5, %vm5119_vm10  ;;  %v1634_v18 = vsel %vm5391_vm0, %v5243_v24, -inf }
 0x17b   : > { %vm6742_vm11 = vmmov %vm6741_vm3  ;;  %v1605_v48 = vmax.f32 %v1603_v43, %v1604_v38  ;;  %v1635_v45 = vsel %vm1623_vm8, %v5257_v49, -inf  ;;  %vm1501_vm8 = vcmp.eq.s32.totalorder %v1500_v4, 1  ;;  %v1693_v49 = vld [vmem:[%s1691_s16 + $0x4] sm:$0xf]  ;;  %s5805_s16 = sld [smem:[#allocation6 + %s5548_s26]] }
 0x17c   : > { %v1637_v47 = vsel %vm6742_vm11, %v1633_v27, -inf  ;;  %vm6743_vm15 = vmmov %vm6741_vm3  ;;  %vm1547_vm11 = vcmp.eq.s32.totalorder %v1546_v9, 1  ;;  %s1756_s26 = scalar_select %p5786_p9, 1, 0 }
 0x17d   : > { %v1638_v62 = vsel %vm6743_vm15, %v1634_v18, -inf  ;;  %v1640_v51 = vmax.f32 %v1636_v21, %v1637_v47  ;;  %vm5424_vm10 = vmand %vm6744_vm1, %vm1708_vm4  ;;  %vm5448_vm4 = vcmp.ge.s32.totalorder %v2633_v3, %v1716_v42  ;;  %v1606_v56 = vrot.slane %v1605_v48, 2 }
 0x17e   : > { %vm6747_vm6 = vmmov %vm6741_vm3  ;;  %vm5498_vm3 = vcmp.lt.s32.totalorder %v2633_v3, %v1722_v2  ;;  %vm5539_vm1 = vcmp.ge.s32.totalorder %v2633_v3, %v1763_v17  ;;  %v1548_v40 = vsel %vm1547_vm11, 0.0, %v1542_v59  ;;  %vm6779_vm11 = vcmp.eq.s32.totalorder %v1651_v29, 1 }
 0x17f   : > { %v1639_v55 = vsel %vm6747_vm6, %v1635_v45, -inf  ;;  %vm5443_vm5 = vmand %vm1704_vm14, %vm1709_vm12  ;;  %vm6755_vm14 = vcmp.ge.s32.totalorder %v5283_v0, %v1702_v54  ;;  %v1607_v13 = vmax.f32 %v1605_v48, %v1606_v56  ;;  %v6759_v16 = vsel %vm5498_vm3, 4294967295, %v6758_v16 }
 0x180   : > { %v1641_v60 = vmax.f32 %v1638_v62, %v1639_v55  ;;  %vm5459_vm0 = vmand %vm1705_vm9, %vm1710_vm2  ;;  %v1502_v54 = vsel %vm1501_vm8, 0.0, %v1495_v19  ;;  %vm6781_vm8 = vcmask 1043456   ;;  %v5737_v29 = vstv %s5695_s14  ;;  %s5931_s14 = scalar_select %p2065_p1, %s5765_s22, 0 }
 0x181   : > { %vm5471_vm12 = vmand %vm6755_vm14, %vm1711_vm7  ;;  %v1608_v22 = vrot.slane %v1607_v13, 1  ;;  %v1658_v18 = vcombine.low %v1502_v54, %v1548_v40  ;;  %v1954_v54 = vadd.s32 1, %v5737_v29  ;;  %v1955_v37 = vadd.s32 2, %v5737_v29  ;;  %p2011_p4 = scmp.le.s32.totalorder %s5805_s16, %s5750_s21 }
 0x182   : > { %v1642_v14 = vmax.f32 %v1640_v51, %v1641_v60  ;;  %vm1718_vm9 = vmand %vm5424_vm10, %vm5448_vm4  ;;  %s2336_s6 = sshll.u32 %s5931_s14, 2 }
 0x183   : > { %vm1719_vm2 = vmand %vm5443_vm5, %vm5448_vm4  ;;  %v1609_v42 = vmax.f32 %v1607_v13, %v1608_v22  ;;  %v1666_v60 = vrot.slane %v1658_v18, %v3131_v5  ;;  %s2068_s8 = scalar_lea.vmem %s2643_s7, %s2336_s6  ;;  %p6199_p6 = por %p2011_p4, %p2010_p3 }
 0x184   : > { %v1643_v11 = vrot.slane %v1642_v14, 4  ;;  %vm1720_vm7 = vmand %vm5459_vm0, %vm5448_vm4  ;;  %p6237_p9 = por %p2124_p8, %p2011_p4 }
 0x185   : > { %vm1721_vm15 = vmand %vm5471_vm12, %vm5448_vm4 }
 0x186   : > { %v1644_v24 = vmax.f32 %v1642_v14, %v1643_v11  ;;  %vm5521_vm6 = vmand %vm1718_vm9, %vm5498_vm3 }
 0x187   : > { %vm5534_vm14 = vmand %vm1719_vm2, %vm5498_vm3  ;;  %v1736_v35 = vsel %vm5521_vm6, %v1692_v20, -inf  ;;  %vm5599_vm6 = vcmp.lt.s32.totalorder %v2633_v3, %v1769_v31 }
 0x188   : > { %v1645_v34 = vrot.slane %v1644_v24, 2  ;;  %vm5557_vm9 = vmand %vm1720_vm7, %vm5498_vm3  ;;  %v1737_v39 = vsel %vm5534_vm14, %v1693_v49, -inf  ;;  %vm6776_vm7 = vcmp.eq.s32.totalorder %v1613_v15, 1 }
 0x189   : > { %vm5573_vm2 = vmand %vm1721_vm15, %vm5498_vm3  ;;  %v1738_v32 = vsel %vm5557_vm9, %v1694_v26, -inf  ;;  %vm6770_vm15 = vcmask 1043456   ;;  %v1615_v47 = vsel %vm6776_vm7, 0.0, %v1609_v42  ;;  %vm1828_vm3 = vcmp.lt.s32.totalorder %v1818_v10, %v1825_v12 }
 0x18a   : > { %v1646_v43 = vmax.f32 %v1644_v24, %v1645_v34  ;;  %v1739_v46 = vsel %vm5573_vm2, %v5525_v30, -inf  ;;  %v1740_v33 = vsel %vm6770_vm15, %v1736_v35, -inf  ;;  %vm6773_vm14 = vmmov %vm6770_vm15  ;;  %v5762_v35 = vstv %s5591_s0  ;;  %s2013_s0 = scalar_select %p6199_p6, 1, 0 }
 0x18b   : > { %v1741_v21 = vsel %vm6773_vm14, %v1737_v39, -inf  ;;  %vm6774_vm9 = vmmov %vm6773_vm14  ;;  %vm1827_vm14 = vcmp.lt.s32.totalorder %v1817_v36, %v1825_v12  ;;  %v1964_v42 = vstv %s5703_s1  ;;  %s2059_s1 = scalar_select %p6211_p7, 1, 0 }
 0x18c   : > { %v1647_v27 = vrot.slane %v1646_v43, 1  ;;  %v1742_v41 = vsel %vm6774_vm9, %v1738_v32, -inf  ;;  %vm6775_vm2 = vmmov %vm6774_vm9  ;;  %v1744_v45 = vmax.f32 %v1740_v33, %v1741_v21  ;;  %v1956_v32 = vadd.s32 3, %v5737_v29 }
 0x18d   : > { %v1743_v25 = vsel %vm6775_vm2, %v1739_v46, -inf  ;;  %vm6777_vm2 = vmand %vm5424_vm10, %vm5539_vm1 }
 0x18e   : > { %v1648_v48 = vmax.f32 %v1646_v43, %v1647_v27  ;;  %vm1771_vm15 = vmand %vm6777_vm2, %vm5599_vm6  ;;  %v1745_v62 = vmax.f32 %v1742_v41, %v1743_v25  ;;  %v1973_v41 = vstv %s5750_s21  ;;  %s2126_s21 = scalar_select %p6237_p9, 1, 0 }
 0x18f   : > { %vm6778_vm7 = vmand %vm5443_vm5, %vm5539_vm1  ;;  %v1783_v51 = vsel %vm1771_vm15, %v1692_v20, -inf  ;;  %v2020_v20 = vstv %s5867_s23  ;;  %s2213_s23 = sshll.u32 %s3330_s30, 4  ;;  %s6264_s23 = int_to_ptr.vmem [resolvable:$true] %s2213_s23 }
 0x190   : > { %vm1772_vm9 = vmand %vm6778_vm7, %vm5599_vm6  ;;  %v1653_v53 = vsel %vm6779_vm11, 0.0, %v1648_v48  ;;  %v1787_v57 = vsel %vm6781_vm8, %v1783_v51, -inf  ;;  %vm6786_vm7 = vcmp.ge.s32.totalorder %v5512_v44, %v5545_v8  ;;  %v1746_v13 = vmax.f32 %v1744_v45, %v1745_v62 }
 0x191   : > { %vm6780_vm10 = vmand %vm5459_vm0, %vm5539_vm1  ;;  %v1784_v55 = vsel %vm1772_vm9, %v1693_v49, -inf  ;;  %v1659_v56 = vcombine.low %v1615_v47, %v1653_v53  ;;  %vm6785_vm9 = vcmp.lt.s32.totalorder %v5512_v44, %v1825_v12  ;;  %v5705_v49 = vld [vmem:[%s1811_s28] sm:$0xf] }
 0x192   : > { %vm1773_vm2 = vmand %vm6780_vm10, %vm5599_vm6  ;;  %v1747_v22 = vrot.slane %v1746_v13, 4 }
 0x193   : > { %vm6782_vm5 = vmand %vm5471_vm12, %vm5539_vm1  ;;  %v1785_v1 = vsel %vm1773_vm2, %v1694_v26, -inf  ;;  %v1673_v9 = vrot.slane %v1659_v56, %v3131_v5  ;;  %vm6790_vm2 = vcmp.ge.s32.totalorder %v1817_v36, %v5545_v8  ;;  %v5714_v26 = vld [vmem:[%s1811_s28 + $0x4] sm:$0xf]  ;;  %s1869_s28 = scalar_select %p5851_p0, 1, 0 }
 0x194   : > { %vm1774_vm11 = vmand %vm6782_vm5, %vm5599_vm6 }
 0x195   : > { %vm6783_vm15 = vmmov %vm6781_vm8  ;;  %v1786_v61 = vsel %vm1774_vm11, %v5525_v30, -inf  ;;  %vm6793_vm11 = vcmp.ge.s32.totalorder %v1818_v10, %v5545_v8  ;;  %v1674_v19 = vcombine.low %v1666_v60, %v1673_v9  ;;  %v1748_v30 = vmax.f32 %v1746_v13, %v1747_v22 }
 0x196   : > { %v1788_v2 = vsel %vm6783_vm15, %v1784_v55, -inf  ;;  %vm6784_vm0 = vmmov %vm6781_vm8  ;;  %vm1829_vm8 = vcmp.lt.s32.totalorder %v1819_v23, %v1825_v12  ;;  %v6817_v60 = vmov 0  ;;  %v1757_v13 = vstv %s1756_s26 }
 0x197   : > { %v1789_v4 = vsel %vm6784_vm0, %v1785_v1, -inf  ;;  %v1791_v7 = vmax.f32 %v1787_v57, %v1788_v2  ;;  %vm5662_vm10 = vmand %vm6786_vm7, %vm6785_vm9  ;;  %v1681_v59 = vrot.slane %v1674_v19, %v3131_v5  ;;  %v1979_v1 = vstv %s5805_s16  ;;  %s2164_s16 = scalar_select %p6247_p10, 1, 0 }
 0x198   : > { %vm6789_vm12 = vmmov %vm6784_vm0  ;;  %vm6796_vm0 = vcmp.ge.s32.totalorder %v1819_v23, %v5545_v8  ;;  %v1749_v23 = vrot.slane %v1748_v30, 2  ;;  %v1870_v17 = vstv %s1869_s28  ;;  %v6824_v19 = vmov 0  ;;  %s6877_s28 = sand.u32 1, %s2495_s10  }
 0x199   : > { %v1790_v14 = vsel %vm6789_vm12, %v1786_v61, -inf  ;;  %vm5672_vm5 = vmand %vm6790_vm2, %vm1827_vm14  ;;  %2331 = vst.msk [vmem:[%s3330_s30 + $0x14] sm:$0xf] %vm6728_vm13, %v1681_v59  ;;  %vm6799_vm12 = vnez %v6759_v16 }
 0x19a   : > { %v1792_v11 = vmax.f32 %v1789_v4, %v1790_v14  ;;  %vm5679_vm15 = vmand %vm6793_vm11, %vm1828_vm3  ;;  %v1750_v27 = vmax.f32 %v1748_v30, %v1749_v23  ;;  %v1803_v14 = vstv %s1802_s18  ;;  %v2071_v30 = vld [vmem:[%s2068_s8 + $0x8] sm:$0xf] }
 0x19b   : > { %vm5686_vm14 = vmand %vm6796_vm0, %vm1829_vm8 }
 0x19c   : > { %v1793_v44 = vmax.f32 %v1791_v7, %v1792_v11  ;;  %vm1834_vm3 = vmand %vm5662_vm10, %vm5448_vm4  ;;  %v1751_v2 = vrot.slane %v1750_v27, 1 }
 0x19d   : > { %vm1835_vm8 = vmand %vm5672_vm5, %vm5448_vm4 }
 0x19e   : > { %v1794_v24 = vrot.slane %v1793_v44, 4  ;;  %vm1836_vm9 = vmand %vm5679_vm15, %vm5448_vm4 }
 0x19f   : > { %vm1837_vm7 = vmand %vm5686_vm14, %vm5448_vm4 }
 0x1a0   : > { %vm1838_vm2 = vmand %vm1834_vm3, %vm6799_vm12  ;;  %v1795_v8 = vmax.f32 %v1793_v44, %v1794_v24  ;;  %vm6800_vm3 = vcmask 1043456   ;;  %v1752_v44 = vmax.f32 %v1750_v27, %v1751_v2  ;;  %v5976_v24 = vstv %s5931_s14  ;;  %s6272_s14 = scalar_lea.sflag [#allocation8], %s6877_s28 }
 0x1a1   : > { %vm1839_vm11 = vmand %vm1835_vm8, %vm6799_vm12  ;;  %v1850_v31 = vsel %vm1838_vm2, %v5705_v49, -inf }
 0x1a2   : > { %vm1840_vm0 = vmand %vm1836_vm9, %vm6799_vm12  ;;  %v1851_v34 = vsel %vm1839_vm11, %v5714_v26, -inf  ;;  %v1854_v52 = vsel %vm6800_vm3, %v1850_v31, -inf  ;;  %v1796_v43 = vrot.slane %v1795_v8, 2  ;;  %v1951_v31 = vld [vmem:[%s1948_s17 + $0x8] sm:$0xf] }
 0x1a3   : > { %vm1841_vm8 = vmand %vm1837_vm7, %vm6799_vm12  ;;  %v1852_v36 = vsel %vm1840_vm0, %v5727_v28, -inf }
 0x1a4   : > { %vm6801_vm9 = vmmov %vm6800_vm3  ;;  %v1853_v58 = vsel %vm1841_vm8, %v5739_v50, -inf  ;;  %vm1965_vm8 = vcmp.lt.s32.totalorder %v5737_v29, %v1964_v42  ;;  %v1797_v25 = vmax.f32 %v1795_v8, %v1796_v43 }
 0x1a5   : > { %v1855_v10 = vsel %vm6801_vm9, %v1851_v34, -inf  ;;  %vm6803_vm4 = vmmov %vm6800_vm3 }
 0x1a6   : > { %v1856_v16 = vsel %vm6803_vm4, %v1852_v36, -inf  ;;  %v1858_v39 = vmax.f32 %v1854_v52, %v1855_v10  ;;  %vm1873_vm7 = vmand %vm5662_vm10, %vm5539_vm1  ;;  %vm1962_vm4 = vcmp.ge.s32.totalorder %v1955_v37, %v5762_v35  ;;  %v1798_v61 = vrot.slane %v1797_v25, 1 }
 0x1a7   : > { %vm6804_vm12 = vmmov %vm6800_vm3  ;;  %vm1960_vm3 = vcmp.ge.s32.totalorder %v5737_v29, %v5762_v35  ;;  %v1950_v29 = vld [vmem:[%s1948_s17 + $0x4] sm:$0xf]  ;;  %v2074_v52 = vadd.s32 1, %v5976_v24 }
 0x1a8   : > { %v1857_v40 = vsel %vm6804_vm12, %v1853_v58, -inf  ;;  %vm1874_vm2 = vmand %vm5672_vm5, %vm5539_vm1  ;;  %vm1963_vm12 = vcmp.ge.s32.totalorder %v1956_v32, %v5762_v35  ;;  %v1799_v59 = vmax.f32 %v1797_v25, %v1798_v61 }
 0x1a9   : > { %v1859_v46 = vmax.f32 %v1856_v16, %v1857_v40  ;;  %vm1875_vm11 = vmand %vm5679_vm15, %vm5539_vm1  ;;  %v2077_v16 = vstv %s5765_s22  ;;  %v2076_v40 = vadd.s32 3, %v5976_v24  ;;  %s2344_s22 = sshll.u32 %s2576_s13, 9  ;;  %s2439_s13 = scalar_lea.vmem %s6264_s23, 512 }
 0x1aa   : > { %vm1876_vm0 = vmand %vm5686_vm14, %vm5539_vm1  ;;  %vm6814_vm14 = vcmp.ge.s32.totalorder %v1954_v54, %v5762_v35  ;;  %v2075_v35 = vadd.s32 2, %v5976_v24  ;;  %p2440_p13 = scmp.ne.s32.totalorder %s6264_s23, %s2439_s13 }
 0x1ab   : > { %v1860_v33 = vmax.f32 %v1858_v39, %v1859_v46  ;;  %vm5838_vm9 = vmand %vm1873_vm7, %vm5599_vm6  ;;  %vm1966_vm7 = vcmp.lt.s32.totalorder %v1954_v54, %v1964_v42  ;;  %v1908_v39 = vstv %s1907_s24 }
 0x1ac   : > { %vm1878_vm10 = vmand %vm1874_vm2, %vm5599_vm6  ;;  %v1889_v21 = vsel %vm5838_vm9, %v5705_v49, -inf  ;;  %vm6809_vm2 = vcmask 1043456   ;;  %p2441_p0 = pnand %p2440_p13, %p2593_p11 }
 0x1ad   : > { %v1861_v18 = vrot.slane %v1860_v33, 4  ;;  %vm1879_vm5 = vmand %vm1875_vm11, %vm5599_vm6  ;;  %v1890_v47 = vsel %vm1878_vm10, %v5714_v26, -inf  ;;  %v1893_v48 = vsel %vm6809_vm2, %v1889_v21, -inf  ;;  %vm1967_vm11 = vcmp.lt.s32.totalorder %v1955_v37, %v1964_v42  ;;  %v1952_v37 = vld [vmem:[%s1948_s17 + $0xc] sm:$0xf] }
 0x1ae   : > { %vm1880_vm9 = vmand %vm1876_vm0, %vm5599_vm6  ;;  %v1891_v45 = vsel %vm1879_vm5, %v5727_v28, -inf  ;;  %vm1968_vm10 = vcmp.lt.s32.totalorder %v1956_v32, %v1964_v42  ;;  %vm5916_vm5 = vcmp.ge.s32.totalorder %v2633_v3, %v1973_v41  ;;  %v1949_v28 = vld [vmem:[%s1948_s17] sm:$0xf]  ;;  %v2082_v42 = vstv %s5951_s27  ;;  %p2442_p1 = pneg %p2441_p0  ;;  %s2443_s27 = sshll.u32 %s2510_s4, 4  ;;  %s2444_s27 = int_to_ptr.vmem [resolvable:$false] %s2443_s27 }
 0x1af   : > { %vm6810_vm15 = vmmov %vm6809_vm2  ;;  %v1862_v51 = vmax.f32 %v1860_v33, %v1861_v18  ;;  %v1892_v53 = vsel %vm1880_vm9, %v5739_v50, -inf  ;;  %v1895_v38 = vsel %vm6809_vm2, %v1891_v45, -inf  ;;  %v6818_v60 = vsel %vm5916_vm5, 4294967295, %v6817_v60  ;;  %s2445_s17 = scalar_lea.vmem %s2444_s27, 1024  ;;  %p2446_p2 = scmp.lt.s32.totalorder %s6264_s23, %s2444_s27 }
 0x1b0   : > { %v1894_v62 = vsel %vm6810_vm15, %v1890_v47, -inf  ;;  %vm5898_vm1 = vmand %vm1960_vm3, %vm1965_vm8  ;;  %vm1758_vm15 = vcmp.eq.s32.totalorder %v1757_v13, 1  ;;  %v2026_v50 = vstv %s5903_s25  ;;  %s6262_s25 = scalar_lea.hbm %s6315_s5, %s2344_s22  ;;  %p2447_p3 = scmp.lt.s32.totalorder %s2445_s17, %s2439_s13 }
 0x1b1   : > { %v1897_v0 = vmax.f32 %v1893_v48, %v1894_v62  ;;  %vm6813_vm6 = vmmov %vm6809_vm2  ;;  %v1863_v4 = vrot.slane %v1862_v51, 2  ;;  %v1759_v36 = vsel %vm1758_vm15, 0.0, %v1752_v44 }
 0x1b2   : > { %v1896_v57 = vsel %vm6813_vm6, %v1892_v53, -inf  ;;  %vm5911_vm0 = vmand %vm6814_vm14, %vm1966_vm7  ;;  %vm5966_vm7 = vcmp.lt.s32.totalorder %v2633_v3, %v1979_v1  ;;  %p2448_p4 = por %p2447_p3, %p2446_p2 }
 0x1b3   : > { %v1898_v7 = vmax.f32 %v1895_v38, %v1896_v57  ;;  %vm5924_vm3 = vmand %vm1962_vm4, %vm1967_vm11  ;;  %v1864_v15 = vmax.f32 %v1862_v51, %v1863_v4  ;;  %v6825_v19 = vsel %vm5966_vm7, 4294967295, %v6824_v19  ;;  %vm1804_vm11 = vcmp.eq.s32.totalorder %v1803_v14, 1 }
 0x1b4   : > { %vm5946_vm8 = vmand %vm1963_vm12, %vm1968_vm10  ;;  %v1805_v10 = vsel %vm1804_vm11, 0.0, %v1799_v59  ;;  %vm6040_vm11 = vcmp.lt.s32.totalorder %v2633_v3, %v2026_v50  ;;  %v2072_v50 = vld [vmem:[%s2068_s8 + $0xc] sm:$0xf]  ;;  %p2449_p5 = pnand %p2448_p4, %p2442_p1 }
 0x1b5   : > { %v1899_v11 = vmax.f32 %v1897_v0, %v1898_v7  ;;  %vm1975_vm4 = vmand %vm5898_vm1, %vm5916_vm5  ;;  %v1865_v49 = vrot.slane %v1864_v15, 1 }
 0x1b6   : > { %vm1976_vm12 = vmand %vm5911_vm0, %vm5916_vm5 }
 0x1b7   : > { %v1900_v22 = vrot.slane %v1899_v11, 4  ;;  %vm1977_vm9 = vmand %vm5924_vm3, %vm5916_vm5  ;;  %v1866_v43 = vmax.f32 %v1864_v15, %v1865_v49  ;;  %v2069_v49 = vld [vmem:[%s2068_s8] sm:$0xf] }
 0x1b8   : > { %vm1978_vm10 = vmand %vm5946_vm8, %vm5916_vm5 }
 0x1b9   : > { %v1901_v26 = vmax.f32 %v1899_v11, %v1900_v22  ;;  %vm5991_vm2 = vmand %vm1975_vm4, %vm5966_vm7  ;;  %vm6008_vm4 = vcmp.ge.s32.totalorder %v2633_v3, %v2020_v20  ;;  %v1915_v3 = vcombine.low %v1759_v36, %v1805_v10 }
 0x1ba   : > { %vm6003_vm14 = vmand %vm1976_vm12, %vm5966_vm7  ;;  %v1993_v33 = vsel %vm5991_vm2, %v1949_v28, -inf  ;;  %vm2083_vm2 = vcmp.lt.s32.totalorder %v5976_v24, %v2082_v42 }
 0x1bb   : > { %v1902_v54 = vrot.slane %v1901_v26, 2  ;;  %vm6023_vm12 = vmand %vm1977_vm9, %vm5966_vm7  ;;  %v1994_v12 = vsel %vm6003_vm14, %v1950_v29, -inf  ;;  %vm6840_vm14 = vcmp.eq.s32.totalorder %v1870_v17, 1  ;;  %v1923_v51 = vrot.slane %v1915_v3, %v3131_v5 }
 0x1bc   : > { %vm6035_vm15 = vmand %vm1978_vm10, %vm5966_vm7  ;;  %v1995_v27 = vsel %vm6023_vm12, %v1951_v31, -inf  ;;  %v1872_v47 = vsel %vm6840_vm14, 0.0, %v1866_v43  ;;  %vm2085_vm10 = vcmp.lt.s32.totalorder %v2075_v35, %v2082_v42  ;;  %vm6845_vm7 = vcmp.eq.s32.totalorder %v1908_v39, 1 }
 0x1bd   : > { %v1903_v46 = vmax.f32 %v1901_v26, %v1902_v54  ;;  %v1996_v21 = vsel %vm6035_vm15, %v1952_v37, -inf  ;;  %vm6838_vm12 = vmmov %vm6813_vm6 }
 0x1be   : > { %v1997_v25 = vsel %vm6838_vm12, %v1993_v33, -inf  ;;  %vm6839_vm13 = vmmov %vm6813_vm6 }
 0x1bf   : > { %v1904_v41 = vrot.slane %v1903_v46, 1  ;;  %v1998_v18 = vsel %vm6839_vm13, %v1994_v12, -inf  ;;  %vm2025_vm15 = vmand %vm5946_vm8, %vm6008_vm4 }
 0x1c0   : > { %vm6841_vm5 = vmmov %vm6813_vm6  ;;  %v2001_v0 = vmax.f32 %v1997_v25, %v1998_v18 }
 0x1c1   : > { %v1905_v48 = vmax.f32 %v1903_v46, %v1904_v41  ;;  %v1999_v45 = vsel %vm6841_vm5, %v1995_v27, -inf  ;;  %vm6842_vm9 = vmmov %vm6841_vm5 }
 0x1c2   : > { %v2000_v62 = vsel %vm6842_vm9, %v1996_v21, -inf  ;;  %vm6843_vm13 = vmand %vm5898_vm1, %vm6008_vm4  ;;  %vm2084_vm9 = vcmp.lt.s32.totalorder %v2074_v52, %v2082_v42 }
 0x1c3   : > { %vm2028_vm12 = vmand %vm6843_vm13, %vm6040_vm11  ;;  %v1910_v38 = vsel %vm6845_vm7, 0.0, %v1905_v48  ;;  %v2002_v1 = vmax.f32 %v1999_v45, %v2000_v62 }
 0x1c4   : > { %vm6844_vm14 = vmand %vm5911_vm0, %vm6008_vm4  ;;  %v2040_v53 = vsel %vm2028_vm12, %v1949_v28, -inf  ;;  %v1916_v56 = vcombine.low %v1872_v47, %v1910_v38  ;;  %vm6849_vm12 = vcmp.ge.s32.totalorder %v5976_v24, %v2077_v16  ;;  %v2014_v38 = vstv %s2013_s0 }
 0x1c5   : > { %vm2029_vm5 = vmand %vm6844_vm14, %vm6040_vm11  ;;  %v2044_v57 = vsel %vm6813_vm6, %v2040_v53, -inf  ;;  %v2003_v44 = vmax.f32 %v2001_v0, %v2002_v1  ;;  %v2060_v0 = vstv %s2059_s1 }
 0x1c6   : > { %vm6846_vm1 = vmand %vm5924_vm3, %vm6008_vm4  ;;  %v2041_v55 = vsel %vm2029_vm5, %v1950_v29, -inf  ;;  %v1930_v13 = vrot.slane %v1916_v56, %v3131_v5  ;;  %v2070_v29 = vld [vmem:[%s2068_s8 + $0x4] sm:$0xf] }
 0x1c7   : > { %vm2030_vm13 = vmand %vm6846_vm1, %vm6040_vm11  ;;  %vm6856_vm1 = vcmp.ge.s32.totalorder %v2075_v35, %v2077_v16  ;;  %v2004_v26 = vrot.slane %v2003_v44, 4 }
 0x1c8   : > { %vm2031_vm0 = vmand %vm2025_vm15, %vm6040_vm11  ;;  %v2042_v2 = vsel %vm2030_vm13, %v1951_v31, -inf  ;;  %vm6853_vm15 = vcmp.ge.s32.totalorder %v2074_v52, %v2077_v16  ;;  %v1931_v20 = vcombine.low %v1923_v51, %v1930_v13 }
 0x1c9   : > { %vm6847_vm7 = vmmov %vm6813_vm6  ;;  %v2043_v4 = vsel %vm2031_vm0, %v1952_v37, -inf  ;;  %v2005_v52 = vmax.f32 %v2003_v44, %v2004_v26 }
 0x1ca   : > { %v2045_v61 = vsel %vm6847_vm7, %v2041_v55, -inf  ;;  %vm6848_vm3 = vmmov %vm6813_vm6  ;;  %vm2086_vm6 = vcmp.lt.s32.totalorder %v2076_v40, %v2082_v42  ;;  %v1938_v24 = vrot.slane %v1931_v20, %v3131_v5 }
 0x1cb   : > { %v2046_v7 = vsel %vm6848_vm3, %v2042_v2, -inf  ;;  %v2048_v6 = vmax.f32 %v2044_v57, %v2045_v61  ;;  %vm6115_vm14 = vmand %vm6849_vm12, %vm2083_vm2  ;;  %vm6859_vm2 = vcmp.ge.s32.totalorder %v2076_v40, %v2077_v16  ;;  %v2006_v39 = vrot.slane %v2005_v52, 2 }
 0x1cc   : > { %vm6852_vm8 = vmmov %vm6848_vm3  ;;  %v2127_v61 = vstv %s2126_s21 }
 0x1cd   : > { %v2047_v14 = vsel %vm6852_vm8, %v2043_v4, -inf  ;;  %vm6123_vm5 = vmand %vm6853_vm15, %vm2084_vm9  ;;  %vm6862_vm9 = vnez %v6818_v60  ;;  %vm6864_vm8 = vnez %v6825_v19  ;;  %v2007_v33 = vmax.f32 %v2005_v52, %v2006_v39 }
 0x1ce   : > { %v2049_v11 = vmax.f32 %v2046_v7, %v2047_v14  ;;  %vm6129_vm13 = vmand %vm6856_vm1, %vm2085_vm10  ;;  %v2165_v7 = vstv %s2164_s16 }
 0x1cf   : > { %vm6135_vm0 = vmand %vm6859_vm2, %vm2086_vm6  ;;  %vm6863_vm6 = vnez %v6453_v63  ;;  %v2008_v45 = vrot.slane %v2007_v33, 1 }
 0x1d0   : > { %v2050_v22 = vmax.f32 %v2048_v6, %v2049_v11  ;;  %vm2091_vm7 = vmand %vm6115_vm14, %vm6862_vm9  ;;  %2334 = vst.msk [vmem:[%s3330_s30 + $0x18] sm:$0xf] %vm6863_vm6, %v1938_v24  ;;  %vm6865_vm6 = vcmask 1043456  }
 0x1d1   : > { %vm2092_vm10 = vmand %vm6123_vm5, %vm6862_vm9  ;;  %v2009_v57 = vmax.f32 %v2007_v33, %v2008_v45 }
 0x1d2   : > { %vm2093_vm3 = vmand %vm6129_vm13, %vm6862_vm9  ;;  %v2051_v28 = vrot.slane %v2050_v22, 4 }
 0x1d3   : > { %vm2094_vm12 = vmand %vm6135_vm0, %vm6862_vm9 }
 0x1d4   : > { %vm2095_vm15 = vmand %vm2091_vm7, %vm6864_vm8  ;;  %v2052_v35 = vmax.f32 %v2050_v22, %v2051_v28 }
 0x1d5   : > { %vm2096_vm1 = vmand %vm2092_vm10, %vm6864_vm8  ;;  %v2107_v31 = vsel %vm2095_vm15, %v2069_v49, -inf }
 0x1d6   : > { %vm2097_vm2 = vmand %vm2093_vm3, %vm6864_vm8  ;;  %v2108_v60 = vsel %vm2096_vm1, %v2070_v29, -inf  ;;  %v2111_v8 = vsel %vm6865_vm6, %v2107_v31, -inf  ;;  %v2053_v32 = vrot.slane %v2052_v35, 2 }
 0x1d7   : > { %vm2098_vm9 = vmand %vm2094_vm12, %vm6864_vm8  ;;  %v2109_v36 = vsel %vm2097_vm2, %v2071_v30, -inf }
 0x1d8   : > { %vm6866_vm7 = vmmov %vm6865_vm6  ;;  %v2110_v54 = vsel %vm2098_vm9, %v2072_v50, -inf  ;;  %v2054_v12 = vmax.f32 %v2052_v35, %v2053_v32 }
 0x1d9   : > { %v2112_v10 = vsel %vm6866_vm7, %v2108_v60, -inf  ;;  %vm6867_vm10 = vmmov %vm6865_vm6  ;;  %v2114_v19 = vsel %vm6865_vm6, %v2110_v54, -inf  ;;  %vm2061_vm7 = vcmp.eq.s32.totalorder %v2060_v0, 1 }
 0x1da   : > { %v2113_v37 = vsel %vm6867_vm10, %v2109_v36, -inf  ;;  %v2115_v58 = vmax.f32 %v2111_v8, %v2112_v10  ;;  %vm2130_vm3 = vmand %vm6115_vm14, %vm6008_vm4  ;;  %v2055_v62 = vrot.slane %v2054_v12, 1  ;;  %vm2128_vm10 = vcmp.eq.s32.totalorder %v2127_v61, 1 }
 0x1db   : > { %vm2131_vm12 = vmand %vm6123_vm5, %vm6008_vm4  ;;  %v2116_v16 = vmax.f32 %v2113_v37, %v2114_v19 }
 0x1dc   : > { %vm2132_vm8 = vmand %vm6129_vm13, %vm6008_vm4  ;;  %v2056_v56 = vmax.f32 %v2054_v12, %v2055_v62 }
 0x1dd   : > { %vm2133_vm14 = vmand %vm6135_vm0, %vm6008_vm4  ;;  %v2117_v40 = vmax.f32 %v2115_v58, %v2116_v16 }
 0x1de   : > { %vm2134_vm5 = vmand %vm2130_vm3, %vm6040_vm11  ;;  %v2062_v9 = vsel %vm2061_vm7, 0.0, %v2056_v56  ;;  %vm2166_vm3 = vcmp.eq.s32.totalorder %v2165_v7, 1 }
 0x1df   : > { %vm2135_vm4 = vmand %vm2131_vm12, %vm6040_vm11  ;;  %v2146_v34 = vsel %vm2134_vm5, %v2069_v49, -inf  ;;  %v2118_v42 = vrot.slane %v2117_v40, 4 }
 0x1e0   : > { %vm2136_vm13 = vmand %vm2132_vm8, %vm6040_vm11  ;;  %v2147_v43 = vsel %vm2135_vm4, %v2070_v29, -inf }
 0x1e1   : > { %vm6870_vm0 = vmmov %vm6865_vm6  ;;  %v2148_v3 = vsel %vm2136_vm13, %v2071_v30, -inf  ;;  %v2119_v21 = vmax.f32 %v2117_v40, %v2118_v42  ;;  %vm6876_vm6 = vnez %v6453_v63 }
 0x1e2   : > { %v2150_v46 = vsel %vm6870_vm0, %v2146_v34, -inf  ;;  %vm2137_vm15 = vmand %vm2133_vm14, %vm6040_vm11  ;;  %vm2015_vm11 = vcmp.eq.s32.totalorder %v2014_v38, 1 }
 0x1e3   : > { %vm6871_vm1 = vmmov %vm6870_vm0  ;;  %v2149_v41 = vsel %vm2137_vm15, %v2072_v50, -inf  ;;  %v2120_v48 = vrot.slane %v2119_v21, 2  ;;  %v2016_v6 = vsel %vm2015_vm11, 0.0, %v2009_v57 }
 0x1e4   : > { %v2151_v27 = vsel %vm6871_vm1, %v2147_v43, -inf  ;;  %vm6872_vm2 = vmmov %vm6870_vm0  ;;  %v2172_v11 = vcombine.low %v2016_v6, %v2062_v9 }
 0x1e5   : > { %v2152_v25 = vsel %vm6872_vm2, %v2148_v3, -inf  ;;  %v2154_v18 = vmax.f32 %v2150_v46, %v2151_v27  ;;  %vm6873_vm9 = vmmov %vm6870_vm0  ;;  %v2121_v51 = vmax.f32 %v2119_v21, %v2120_v48 }
 0x1e6   : > { %v2153_v47 = vsel %vm6873_vm9, %v2149_v41, -inf  ;;  %v2180_v22 = vrot.slane %v2172_v11, %v3131_v5 }
 0x1e7   : > { %v2155_v23 = vmax.f32 %v2152_v25, %v2153_v47  ;;  %v2122_v1 = vrot.slane %v2121_v51, 1 }
 0x1e9   : > { %v2156_v53 = vmax.f32 %v2154_v18, %v2155_v23  ;;  %v2123_v13 = vmax.f32 %v2121_v51, %v2122_v1 }
 0x1eb   : > { %v2157_v55 = vrot.slane %v2156_v53, 4  ;;  %v2129_v17 = vsel %vm2128_vm10, 0.0, %v2123_v13 }
 0x1ed   : > { %v2158_v2 = vmax.f32 %v2156_v53, %v2157_v55 }
 0x1ef   : > { %v2159_v4 = vrot.slane %v2158_v2, 2 }
 0x1f1   : > { %v2160_v14 = vmax.f32 %v2158_v2, %v2159_v4 }
 0x1f3   : > { %v2161_v15 = vrot.slane %v2160_v14, 1 }
 0x1f5   : > { %v2162_v20 = vmax.f32 %v2160_v14, %v2161_v15 }
 0x1f7   : > { %v2167_v44 = vsel %vm2166_vm3, 0.0, %v2162_v20 }
 0x1f8   : > { %v2173_v59 = vcombine.low %v2129_v17, %v2167_v44 }
 0x1fa   : > { %v2187_v24 = vrot.slane %v2173_v59, %v3131_v5 }
 0x1fc   : > { %v2188_v49 = vcombine.low %v2180_v22, %v2187_v24 }
 0x1fe   : > { %v2195_v26 = vrot.slane %v2188_v49, %v3131_v5 }
 0x200   : > { %2337 = vst.msk [vmem:[%s3330_s30 + $0x1c] sm:$0xf] %vm6876_vm6, %v2195_v26 }
 0x201   : > { %2452 = shalt.err (!%p2449_p5)
}
 0x202   : > { %s2453_s30 = scalar_lea.hbm %s6262_s25, 512  ;;  %s2457_s8 = scalar_lea.hbm %s6315_s5, 1024 }
 0x203   : > { %p2454_p6 = scmp.ne.s32.totalorder %s6262_s25, %s2453_s30  ;;  %p2458_p9 = scmp.lt.u32.totalorder %s6262_s25, %s6315_s5 }
 0x204   : > { %p2459_p10 = scmp.lt.u32.totalorder %s2457_s8, %s2453_s30  ;;  %p2461_p0 = scmp.lt.u32.totalorder %s2453_s30, %s6262_s25 }
 0x205   : > { %p2455_p7 = pnand %p2454_p6, %p2593_p11 }
 0x206   : > { %p2460_p13 = por %p2459_p10, %p2458_p9 }
 0x207   : > { %p2456_p8 = pneg %p2455_p7 }
 0x208   : > { %p2462_p1 = por %p2461_p0, %p2460_p13 }
 0x20a   : > { %p2463_p2 = pnand %p2462_p1, %p2456_p8 }
 0x20c   : > { %2466 = shalt.err (!%p2463_p2)
}
 0x20d   : > { %s2511_s0 = smov 64   ;;  %s2512_s1 = smov 4  }
 0x20e   : > { %2345 = dma.vmem_to_hbm [thread:$0]  (%p2593_p11), %s6264_s23, 512, %s6262_s25, %s6272_s14, %s2511_s0, %s2511_s0, %s2512_s1  }
 0x20f PF: > { %p2351_p3 = scmp.ge.s32.totalorder %s2503_s12, 2  ;;  %s2228_s2 = sand.u32 1, %s2491_s3  }
 0x210   : > { %s2229_s26 = scalar_lea.sflag [#allocation8], %s2228_s2 }
 0x211   : > { %p2348_p4 = pnand %p2351_p3, %p2597_p12 }
 0x213   : > { %2486 = dma.done.wait (!%p2348_p4), %s2229_s26, 512  }
 0x214   : > { %2488 = vsyncadd (!%p2348_p4), %s2229_s26, 4294966784  ;;  %s6878_s21 = sld [smem:[#allocation11_spill]]  ;;  %p33_p5 = scmp.ge.s32.totalorder %s2580_s15, 4  }
 0x215   : > { %s6879_s3 = smov %s2495_s10  ;;  %s6880_s10 = smov %s2499_s11 }
 0x216   : > { %s6882_s12 = smov %s2580_s15  ;;  %35 = sbr.rel (!%p33_p5) target bundleno = 50 (0x32), region = 82 }
 0x21a   : > { %s6881_s11 = smov %s6878_s21 }
 0x21d   :  { %2234 = vsyncpa [#allocation8], 1 }
 0x21e   :  { %2236 = vsyncpa [#allocation8 + $0x1], 1 }

</bundles_post_ra>
